<compile_context>
chip_gen: v7x
topology: tpu7x:2x2x1
jax: 0.10.0
libtpu: 0.0.40
codegen_flags: <defaults>
</compile_context>

<pallas_src>
import jax
import jax.numpy as jnp
from jax.experimental import pallas as pl
from jax.experimental.pallas import tpu as pltpu

N_EMBD = 128
N_HEAD = 4
BLOCK_SIZE = 64  # max T (tril buffer size in the PyTorch module)
LN_EPS = 1e-5


def _block_kernel(x_ref,
                  ln1w_ref, ln1b_ref,
                  wqkv_ref,                # (C, 3C) bf16, scale folded into Q
                  woh_ref, bo_ref,         # (H, hs, C) bf16, (1, C) f32
                  ln2w_ref, ln2b_ref,
                  w1_ref, b1_ref,          # (C, 4C) bf16, (1, 4C) f32
                  w2_ref, b2_ref,          # (4C, C) bf16, (1, C) f32
                  o_ref):
    x = x_ref[...]                         # (BB, T, C) float32
    BB, T, C = x.shape
    hs = C // N_HEAD
    N = BB * T
    x2d = x.reshape(N, C)

    # ---- LayerNorm 1 (f32) ----
    mu = jnp.mean(x2d, axis=-1, keepdims=True)
    var = jnp.mean(jnp.square(x2d - mu), axis=-1, keepdims=True)
    xn = (x2d - mu) * jax.lax.rsqrt(var + LN_EPS)
    xn = xn * ln1w_ref[0] + ln1b_ref[0]

    # ---- fused QKV projection: one (N,C)x(C,3C) bf16 MXU pass ----
    qkv = jnp.dot(xn.astype(jnp.bfloat16), wqkv_ref[...],
                  preferred_element_type=jnp.float32)        # (N, 3C) f32

    # Additive causal mask, computed once and shared across heads/batch.
    row = jax.lax.broadcasted_iota(jnp.int32, (T, T), 0)
    col = jax.lax.broadcasted_iota(jnp.int32, (T, T), 1)
    mask_add = jnp.where(row >= col, 0.0, -1e30).astype(jnp.float32)  # (T, T)

    sa = jnp.zeros((N, C), jnp.float32)
    for h in range(N_HEAD):                # static unroll over 4 heads
        q_h = qkv[:,         h * hs:        (h + 1) * hs].reshape(BB, T, hs)
        k_h = qkv[:,     C + h * hs:    C + (h + 1) * hs].reshape(BB, T, hs)
        v_h = qkv[:, 2 * C + h * hs: 2 * C + (h + 1) * hs].reshape(BB, T, hs)

        # batched over BB (leading batch), scale already folded into q_h
        s = jnp.einsum('btd,bsd->bts', q_h, k_h,
                       preferred_element_type=jnp.float32) + mask_add[None]
        m = jnp.max(s, axis=-1, keepdims=True)
        p = jnp.exp(s - m)                                   # unnormalized
        denom = jnp.sum(p, axis=-1, keepdims=True)           # (BB, T, 1)
        o_h = jnp.einsum('bts,bsd->btd', p, v_h,
                         preferred_element_type=jnp.float32)  # (BB, T, hs)
        # fold 1/sum in after the matmul: (BB,T,1) scale, EUP reciprocal
        o_h = o_h * pl.reciprocal(denom, approx=True)

        # per-head output projection accumulate (replaces concatenate + proj)
        sa = sa + jnp.dot(o_h.reshape(N, hs).astype(jnp.bfloat16),
                          woh_ref[h], preferred_element_type=jnp.float32)
    sa = sa + bo_ref[0]

    x1 = x2d + sa                          # residual 1

    # ---- LayerNorm 2 (f32) ----
    mu2 = jnp.mean(x1, axis=-1, keepdims=True)
    var2 = jnp.mean(jnp.square(x1 - mu2), axis=-1, keepdims=True)
    xn2 = (x1 - mu2) * jax.lax.rsqrt(var2 + LN_EPS)
    xn2 = xn2 * ln2w_ref[0] + ln2b_ref[0]

    # ---- FeedForward: Linear(C,4C) -> ReLU -> Linear(4C,C) ----
    h1 = jnp.dot(xn2.astype(jnp.bfloat16), w1_ref[...],
                 preferred_element_type=jnp.float32) + b1_ref[0]
    h1 = jnp.maximum(h1, 0.0)
    ff = jnp.dot(h1.astype(jnp.bfloat16), w2_ref[...],
                 preferred_element_type=jnp.float32) + b2_ref[0]

    o_ref[...] = (x1 + ff).reshape(BB, T, C)   # residual 2


def block_forward(x, params, *, batch_block=4):
    """x: (B, T, C) float32.  params: dict of f32 weights (see init_params)."""
    B, T, C = x.shape
    assert C == N_EMBD and T <= BLOCK_SIZE and T % 8 == 0
    BB = min(batch_block, B)
    assert B % BB == 0, "batch must be divisible by the per-step batch block"
    grid = (B // BB,)
    hs = C // N_HEAD

    # Host-side weight packing: fused QKV (scale folded into Q), per-head W_o,
    # bf16 weights for the MXU; biases / LN params stay f32.
    scale = jnp.float32(C ** (-0.5))       # PyTorch code uses C (=n_embd).
    wqkv = jnp.concatenate(
        [params["wq"] * scale, params["wk"], params["wv"]],
        axis=1).astype(jnp.bfloat16)                       # (C, 3C)
    wo_h = params["wo"].reshape(N_HEAD, hs, C).astype(jnp.bfloat16)
    w1 = params["w1"].astype(jnp.bfloat16)
    w2 = params["w2"].astype(jnp.bfloat16)

    def full(shape):
        return pl.BlockSpec(shape, lambda b, _s=len(shape): (0,) * _s)

    in_specs = [
        pl.BlockSpec((BB, T, C), lambda b: (b, 0, 0)),      # x
        full((1, C)), full((1, C)),                         # ln1 w, b
        full((C, 3 * C)),                                   # fused wqkv
        full((N_HEAD, hs, C)), full((1, C)),                # wo (per head), bo
        full((1, C)), full((1, C)),                         # ln2 w, b
        full((C, 4 * C)), full((1, 4 * C)),                 # w1, b1
        full((4 * C, C)), full((1, C)),                     # w2, b2
    ]

    return pl.pallas_call(
        _block_kernel,
        out_shape=jax.ShapeDtypeStruct((B, T, C), jnp.float32),
        grid_spec=pltpu.PrefetchScalarGridSpec(
            num_scalar_prefetch=0,
            grid=grid,
            in_specs=in_specs,
            out_specs=pl.BlockSpec((BB, T, C), lambda b: (b, 0, 0)),
        ),
        compiler_params=pltpu.CompilerParams(
            dimension_semantics=("parallel",)),
    )(x,
      params["ln1_w"], params["ln1_b"],
      wqkv,
      wo_h, params["bo"],
      params["ln2_w"], params["ln2_b"],
      w1, params["b1"],
      w2, params["b2"])


def init_params(key):
    C = N_EMBD
    ks = jax.random.split(key, 8)
    s = 0.05
    return {
        "ln1_w": jnp.ones((1, C), jnp.float32),
        "ln1_b": jnp.zeros((1, C), jnp.float32),
        "ln2_w": jnp.ones((1, C), jnp.float32),
        "ln2_b": jnp.zeros((1, C), jnp.float32),
        # Per-head K/Q/V (bias=False) concatenated column-wise into (C, C):
        "wq": s * jax.random.normal(ks[0], (C, C), jnp.float32),
        "wk": s * jax.random.normal(ks[1], (C, C), jnp.float32),
        "wv": s * jax.random.normal(ks[2], (C, C), jnp.float32),
        "wo": s * jax.random.normal(ks[3], (C, C), jnp.float32),
        "bo": s * jax.random.normal(ks[4], (1, C), jnp.float32),
        "w1": s * jax.random.normal(ks[5], (C, 4 * C), jnp.float32),
        "b1": s * jax.random.normal(ks[6], (1, 4 * C), jnp.float32),
        "w2": s * jax.random.normal(ks[7], (4 * C, C), jnp.float32),
        "b2": jnp.zeros((1, C), jnp.float32),
    }


def _reference(x, p):
    """Pure-JAX f32 reference mirroring the PyTorch module (eval mode)."""
    def ln(y, w, b):
        mu = jnp.mean(y, axis=-1, keepdims=True)
        var = jnp.mean(jnp.square(y - mu), axis=-1, keepdims=True)
        return (y - mu) / jnp.sqrt(var + LN_EPS) * w[0] + b[0]

    B, T, C = x.shape
    hs = C // N_HEAD
    xn = ln(x, p["ln1_w"], p["ln1_b"])
    q = xn @ p["wq"]; k = xn @ p["wk"]; v = xn @ p["wv"]
    mask = jnp.tril(jnp.ones((T, T), bool))
    outs = []
    for h in range(N_HEAD):
        qh, kh, vh = (a[..., h * hs:(h + 1) * hs] for a in (q, k, v))
        wei = jnp.einsum("btd,bsd->bts", qh, kh) * C ** (-0.5)
        wei = jnp.where(mask, wei, -jnp.inf)
        wei = jax.nn.softmax(wei, axis=-1)
        outs.append(jnp.einsum("bts,bsd->btd", wei, vh))
    sa = jnp.concatenate(outs, axis=-1) @ p["wo"] + p["bo"][0]
    x1 = x + sa
    xn2 = ln(x1, p["ln2_w"], p["ln2_b"])
    ff = jnp.maximum(xn2 @ p["w1"] + p["b1"][0], 0.0) @ p["w2"] + p["b2"][0]
    return x1 + ff


if __name__ == "__main__":
    key = jax.random.PRNGKey(0)
    kx, kp = jax.random.split(key)
    B, T = 8, BLOCK_SIZE                   # B=8, BB=4 -> grid=(2,): even, >=2
    x = jax.random.normal(kx, (B, T, N_EMBD), jnp.float32)
    params = init_params(kp)

    out = block_forward(x, params)
    out = jax.block_until_ready(out)

    ref = _reference(x, params)
    assert out.shape == (B, T, N_EMBD)
    # bf16 weights / matmul operands in the kernel vs f32 reference -> looser tol.
    assert jnp.allclose(out, ref, atol=3e-2, rtol=3e-2)
    print("KERNEL_OK")
</pallas_src>

<mosaic_0001>
module attributes {stable_mosaic.version = 11 : i64} {
  func.func @_block_kernel(%arg0: i32, %arg1: memref<4x64x128xf32, #tpu.memory_space<vmem>>, %arg2: memref<1x128xf32, #tpu.memory_space<vmem>>, %arg3: memref<1x128xf32, #tpu.memory_space<vmem>>, %arg4: memref<128x384xbf16, #tpu.memory_space<vmem>>, %arg5: memref<4x32x128xbf16, #tpu.memory_space<vmem>>, %arg6: memref<1x128xf32, #tpu.memory_space<vmem>>, %arg7: memref<1x128xf32, #tpu.memory_space<vmem>>, %arg8: memref<1x128xf32, #tpu.memory_space<vmem>>, %arg9: memref<128x512xbf16, #tpu.memory_space<vmem>>, %arg10: memref<1x512xf32, #tpu.memory_space<vmem>>, %arg11: memref<512x128xbf16, #tpu.memory_space<vmem>>, %arg12: memref<1x128xf32, #tpu.memory_space<vmem>>, %arg13: memref<4x64x128xf32, #tpu.memory_space<vmem>>) attributes {dimension_semantics = [#tpu.dimension_semantics<parallel>], iteration_bounds = array<i64: 2>, scalar_prefetch = 0 : i64, scratch_operands = 0 : i64, tpu.core_type = #tpu.core_type<tc>, window_params = [{transform_indices = @transform_0, window_bounds = array<i64: 4, 64, 128>}, {pipeline_mode = #tpu.pipeline_mode<synchronous>, transform_indices = @transform_1, window_bounds = array<i64: 1, 128>}, {pipeline_mode = #tpu.pipeline_mode<synchronous>, transform_indices = @transform_2, window_bounds = array<i64: 1, 128>}, {pipeline_mode = #tpu.pipeline_mode<synchronous>, transform_indices = @transform_3, window_bounds = array<i64: 128, 384>}, {pipeline_mode = #tpu.pipeline_mode<synchronous>, transform_indices = @transform_4, window_bounds = array<i64: 4, 32, 128>}, {pipeline_mode = #tpu.pipeline_mode<synchronous>, transform_indices = @transform_5, window_bounds = array<i64: 1, 128>}, {pipeline_mode = #tpu.pipeline_mode<synchronous>, transform_indices = @transform_6, window_bounds = array<i64: 1, 128>}, {pipeline_mode = #tpu.pipeline_mode<synchronous>, transform_indices = @transform_7, window_bounds = array<i64: 1, 128>}, {pipeline_mode = #tpu.pipeline_mode<synchronous>, transform_indices = @transform_8, window_bounds = array<i64: 128, 512>}, {pipeline_mode = #tpu.pipeline_mode<synchronous>, transform_indices = @transform_9, window_bounds = array<i64: 1, 512>}, {pipeline_mode = #tpu.pipeline_mode<synchronous>, transform_indices = @transform_10, window_bounds = array<i64: 512, 128>}, {pipeline_mode = #tpu.pipeline_mode<synchronous>, transform_indices = @transform_11, window_bounds = array<i64: 1, 128>}, {transform_indices = @transform_12, window_bounds = array<i64: 4, 64, 128>}]} {
    %c0 = arith.constant 0 : index
    %c0_0 = arith.constant 0 : index
    %c0_1 = arith.constant 0 : index
    %0 = vector.load %arg1[%c0, %c0_0, %c0_1] : memref<4x64x128xf32, #tpu.memory_space<vmem>>, vector<4x64x128xf32>
    %1 = vector.shape_cast %0 : vector<4x64x128xf32> to vector<256x128xf32>
    %cst = arith.constant dense<0.000000e+00> : vector<256xf32>
    %2 = vector.multi_reduction <add>, %1, %cst [1] : vector<256x128xf32> to vector<256xf32>
    %3 = vector.shape_cast %2 : vector<256xf32> to vector<256x1xf32>
    %cst_2 = arith.constant 1.280000e+02 : f32
    %4 = vector.broadcast %cst_2 : f32 to vector<256x1xf32>
    %5 = arith.divf %3, %4 : vector<256x1xf32>
    %6 = vector.broadcast %5 : vector<256x1xf32> to vector<256x128xf32>
    %7 = arith.subf %1, %6 : vector<256x128xf32>
    %8 = arith.mulf %7, %7 : vector<256x128xf32>
    %cst_3 = arith.constant dense<0.000000e+00> : vector<256xf32>
    %9 = vector.multi_reduction <add>, %8, %cst_3 [1] : vector<256x128xf32> to vector<256xf32>
    %10 = vector.shape_cast %9 : vector<256xf32> to vector<256x1xf32>
    %cst_4 = arith.constant 1.280000e+02 : f32
    %11 = vector.broadcast %cst_4 : f32 to vector<256x1xf32>
    %12 = arith.divf %10, %11 : vector<256x1xf32>
    %13 = vector.broadcast %5 : vector<256x1xf32> to vector<256x128xf32>
    %14 = arith.subf %1, %13 : vector<256x128xf32>
    %cst_5 = arith.constant 9.99999974E-6 : f32
    %15 = vector.broadcast %cst_5 : f32 to vector<256x1xf32>
    %16 = arith.addf %12, %15 : vector<256x1xf32>
    %17 = math.rsqrt %16 : vector<256x1xf32>
    %18 = vector.broadcast %17 : vector<256x1xf32> to vector<256x128xf32>
    %19 = arith.mulf %14, %18 : vector<256x128xf32>
    %c0_6 = arith.constant 0 : index
    %c0_7 = arith.constant 0 : index
    %20 = vector.load %arg2[%c0_6, %c0_7] : memref<1x128xf32, #tpu.memory_space<vmem>>, vector<1x128xf32>
    %21 = vector.shape_cast %20 : vector<1x128xf32> to vector<128xf32>
    %22 = vector.shape_cast %21 : vector<128xf32> to vector<1x128xf32>
    %23 = vector.broadcast %22 : vector<1x128xf32> to vector<256x128xf32>
    %24 = arith.mulf %19, %23 : vector<256x128xf32>
    %c0_8 = arith.constant 0 : index
    %c0_9 = arith.constant 0 : index
    %25 = vector.load %arg3[%c0_8, %c0_9] : memref<1x128xf32, #tpu.memory_space<vmem>>, vector<1x128xf32>
    %26 = vector.shape_cast %25 : vector<1x128xf32> to vector<128xf32>
    %27 = vector.shape_cast %26 : vector<128xf32> to vector<1x128xf32>
    %28 = vector.broadcast %27 : vector<1x128xf32> to vector<256x128xf32>
    %29 = arith.addf %24, %28 : vector<256x128xf32>
    %30 = arith.truncf %29 : vector<256x128xf32> to vector<256x128xbf16>
    %c0_10 = arith.constant 0 : index
    %c0_11 = arith.constant 0 : index
    %31 = vector.load %arg4[%c0_10, %c0_11] : memref<128x384xbf16, #tpu.memory_space<vmem>>, vector<128x384xbf16>
    %cst_12 = arith.constant dense<0.000000e+00> : vector<256x384xf32>
    %32 = tpu.matmul %30, %31, %cst_12 {dimension_numbers = #tpu.dot_dimension_numbers<[1], [0], [0], [1], [0, 0, 1, 1], [], []>} : vector<256x128xbf16>, vector<128x384xbf16>, vector<256x384xf32> -> vector<256x384xf32>
    %33 = tpu.iota {dimensions = array<i32: 0>} : vector<64x64xi32>
    %34 = tpu.iota {dimensions = array<i32: 1>} : vector<64x64xi32>
    %35 = arith.cmpi sge, %33, %34 : vector<64x64xi32>
    %cst_13 = arith.constant 0.000000e+00 : f32
    %cst_14 = arith.constant -1.000000e+30 : f32
    %36 = vector.broadcast %cst_13 : f32 to vector<64x64xf32>
    %37 = vector.broadcast %cst_14 : f32 to vector<64x64xf32>
    %38 = arith.select %35, %36, %37 : vector<64x64xi1>, vector<64x64xf32>
    %cst_15 = arith.constant 0.000000e+00 : f32
    %39 = vector.broadcast %cst_15 : f32 to vector<256x128xf32>
    %40 = vector.extract_strided_slice %32 {offsets = [0, 0], sizes = [256, 32], strides = [1, 1]} : vector<256x384xf32> to vector<256x32xf32>
    %41 = vector.shape_cast %40 : vector<256x32xf32> to vector<4x64x32xf32>
    %42 = vector.extract_strided_slice %32 {offsets = [0, 128], sizes = [256, 32], strides = [1, 1]} : vector<256x384xf32> to vector<256x32xf32>
    %43 = vector.shape_cast %42 : vector<256x32xf32> to vector<4x64x32xf32>
    %44 = vector.extract_strided_slice %32 {offsets = [0, 256], sizes = [256, 32], strides = [1, 1]} : vector<256x384xf32> to vector<256x32xf32>
    %45 = vector.shape_cast %44 : vector<256x32xf32> to vector<4x64x32xf32>
    "tpu.trace_start"() <{level = 10 : i32, message = "btd,bsd->bts"}> : () -> ()
    %cst_16 = arith.constant dense<0.000000e+00> : vector<4x64x64xf32>
    %46 = tpu.matmul %41, %43, %cst_16 {dimension_numbers = #tpu.dot_dimension_numbers<[2], [2], [1], [1], [0, 0, 0, 1, 1, 1], [0], [0]>} : vector<4x64x32xf32>, vector<4x64x32xf32>, vector<4x64x64xf32> -> vector<4x64x64xf32>
    "tpu.trace_stop"() : () -> ()
    %47 = vector.shape_cast %38 : vector<64x64xf32> to vector<1x64x64xf32>
    %48 = vector.broadcast %47 : vector<1x64x64xf32> to vector<4x64x64xf32>
    %49 = arith.addf %46, %48 : vector<4x64x64xf32>
    %cst_17 = arith.constant dense<0xFF800000> : vector<4x64xf32>
    %50 = vector.multi_reduction <maximumf>, %49, %cst_17 [2] : vector<4x64x64xf32> to vector<4x64xf32>
    %51 = vector.shape_cast %50 : vector<4x64xf32> to vector<4x64x1xf32>
    %52 = vector.broadcast %51 : vector<4x64x1xf32> to vector<4x64x64xf32>
    %53 = arith.subf %49, %52 : vector<4x64x64xf32>
    %54 = math.exp %53 : vector<4x64x64xf32>
    %cst_18 = arith.constant dense<0.000000e+00> : vector<4x64xf32>
    %55 = vector.multi_reduction <add>, %54, %cst_18 [2] : vector<4x64x64xf32> to vector<4x64xf32>
    %56 = vector.shape_cast %55 : vector<4x64xf32> to vector<4x64x1xf32>
    "tpu.trace_start"() <{level = 10 : i32, message = "bts,bsd->btd"}> : () -> ()
    %cst_19 = arith.constant dense<0.000000e+00> : vector<4x64x32xf32>
    %57 = tpu.matmul %54, %45, %cst_19 {dimension_numbers = #tpu.dot_dimension_numbers<[2], [1], [1], [2], [0, 0, 0, 1, 1, 2], [0], [0]>} : vector<4x64x64xf32>, vector<4x64x32xf32>, vector<4x64x32xf32> -> vector<4x64x32xf32>
    "tpu.trace_stop"() : () -> ()
    %58 = tpu.reciprocal %56 {approx = true} : vector<4x64x1xf32> -> vector<4x64x1xf32>
    %59 = vector.broadcast %58 : vector<4x64x1xf32> to vector<4x64x32xf32>
    %60 = arith.mulf %57, %59 : vector<4x64x32xf32>
    %61 = vector.shape_cast %60 : vector<4x64x32xf32> to vector<256x32xf32>
    %62 = arith.truncf %61 : vector<256x32xf32> to vector<256x32xbf16>
    %c0_20 = arith.constant 0 : index
    %c0_21 = arith.constant 0 : index
    %c0_22 = arith.constant 0 : index
    %63 = vector.load %arg5[%c0_20, %c0_21, %c0_22] : memref<4x32x128xbf16, #tpu.memory_space<vmem>>, vector<1x32x128xbf16>
    %64 = vector.shape_cast %63 : vector<1x32x128xbf16> to vector<32x128xbf16>
    %cst_23 = arith.constant dense<0.000000e+00> : vector<256x128xf32>
    %65 = tpu.matmul %62, %64, %cst_23 {dimension_numbers = #tpu.dot_dimension_numbers<[1], [0], [0], [1], [0, 0, 1, 1], [], []>} : vector<256x32xbf16>, vector<32x128xbf16>, vector<256x128xf32> -> vector<256x128xf32>
    %66 = arith.addf %39, %65 : vector<256x128xf32>
    %67 = vector.extract_strided_slice %32 {offsets = [0, 32], sizes = [256, 32], strides = [1, 1]} : vector<256x384xf32> to vector<256x32xf32>
    %68 = vector.shape_cast %67 : vector<256x32xf32> to vector<4x64x32xf32>
    %69 = vector.extract_strided_slice %32 {offsets = [0, 160], sizes = [256, 32], strides = [1, 1]} : vector<256x384xf32> to vector<256x32xf32>
    %70 = vector.shape_cast %69 : vector<256x32xf32> to vector<4x64x32xf32>
    %71 = vector.extract_strided_slice %32 {offsets = [0, 288], sizes = [256, 32], strides = [1, 1]} : vector<256x384xf32> to vector<256x32xf32>
    %72 = vector.shape_cast %71 : vector<256x32xf32> to vector<4x64x32xf32>
    "tpu.trace_start"() <{level = 10 : i32, message = "btd,bsd->bts"}> : () -> ()
    %cst_24 = arith.constant dense<0.000000e+00> : vector<4x64x64xf32>
    %73 = tpu.matmul %68, %70, %cst_24 {dimension_numbers = #tpu.dot_dimension_numbers<[2], [2], [1], [1], [0, 0, 0, 1, 1, 1], [0], [0]>} : vector<4x64x32xf32>, vector<4x64x32xf32>, vector<4x64x64xf32> -> vector<4x64x64xf32>
    "tpu.trace_stop"() : () -> ()
    %74 = vector.shape_cast %38 : vector<64x64xf32> to vector<1x64x64xf32>
    %75 = vector.broadcast %74 : vector<1x64x64xf32> to vector<4x64x64xf32>
    %76 = arith.addf %73, %75 : vector<4x64x64xf32>
    %cst_25 = arith.constant dense<0xFF800000> : vector<4x64xf32>
    %77 = vector.multi_reduction <maximumf>, %76, %cst_25 [2] : vector<4x64x64xf32> to vector<4x64xf32>
    %78 = vector.shape_cast %77 : vector<4x64xf32> to vector<4x64x1xf32>
    %79 = vector.broadcast %78 : vector<4x64x1xf32> to vector<4x64x64xf32>
    %80 = arith.subf %76, %79 : vector<4x64x64xf32>
    %81 = math.exp %80 : vector<4x64x64xf32>
    %cst_26 = arith.constant dense<0.000000e+00> : vector<4x64xf32>
    %82 = vector.multi_reduction <add>, %81, %cst_26 [2] : vector<4x64x64xf32> to vector<4x64xf32>
    %83 = vector.shape_cast %82 : vector<4x64xf32> to vector<4x64x1xf32>
    "tpu.trace_start"() <{level = 10 : i32, message = "bts,bsd->btd"}> : () -> ()
    %cst_27 = arith.constant dense<0.000000e+00> : vector<4x64x32xf32>
    %84 = tpu.matmul %81, %72, %cst_27 {dimension_numbers = #tpu.dot_dimension_numbers<[2], [1], [1], [2], [0, 0, 0, 1, 1, 2], [0], [0]>} : vector<4x64x64xf32>, vector<4x64x32xf32>, vector<4x64x32xf32> -> vector<4x64x32xf32>
    "tpu.trace_stop"() : () -> ()
    %85 = tpu.reciprocal %83 {approx = true} : vector<4x64x1xf32> -> vector<4x64x1xf32>
    %86 = vector.broadcast %85 : vector<4x64x1xf32> to vector<4x64x32xf32>
    %87 = arith.mulf %84, %86 : vector<4x64x32xf32>
    %88 = vector.shape_cast %87 : vector<4x64x32xf32> to vector<256x32xf32>
    %89 = arith.truncf %88 : vector<256x32xf32> to vector<256x32xbf16>
    %c1 = arith.constant 1 : index
    %c0_28 = arith.constant 0 : index
    %c0_29 = arith.constant 0 : index
    %90 = vector.load %arg5[%c1, %c0_28, %c0_29] : memref<4x32x128xbf16, #tpu.memory_space<vmem>>, vector<1x32x128xbf16>
    %91 = vector.shape_cast %90 : vector<1x32x128xbf16> to vector<32x128xbf16>
    %cst_30 = arith.constant dense<0.000000e+00> : vector<256x128xf32>
    %92 = tpu.matmul %89, %91, %cst_30 {dimension_numbers = #tpu.dot_dimension_numbers<[1], [0], [0], [1], [0, 0, 1, 1], [], []>} : vector<256x32xbf16>, vector<32x128xbf16>, vector<256x128xf32> -> vector<256x128xf32>
    %93 = arith.addf %66, %92 : vector<256x128xf32>
    %94 = vector.extract_strided_slice %32 {offsets = [0, 64], sizes = [256, 32], strides = [1, 1]} : vector<256x384xf32> to vector<256x32xf32>
    %95 = vector.shape_cast %94 : vector<256x32xf32> to vector<4x64x32xf32>
    %96 = vector.extract_strided_slice %32 {offsets = [0, 192], sizes = [256, 32], strides = [1, 1]} : vector<256x384xf32> to vector<256x32xf32>
    %97 = vector.shape_cast %96 : vector<256x32xf32> to vector<4x64x32xf32>
    %98 = vector.extract_strided_slice %32 {offsets = [0, 320], sizes = [256, 32], strides = [1, 1]} : vector<256x384xf32> to vector<256x32xf32>
    %99 = vector.shape_cast %98 : vector<256x32xf32> to vector<4x64x32xf32>
    "tpu.trace_start"() <{level = 10 : i32, message = "btd,bsd->bts"}> : () -> ()
    %cst_31 = arith.constant dense<0.000000e+00> : vector<4x64x64xf32>
    %100 = tpu.matmul %95, %97, %cst_31 {dimension_numbers = #tpu.dot_dimension_numbers<[2], [2], [1], [1], [0, 0, 0, 1, 1, 1], [0], [0]>} : vector<4x64x32xf32>, vector<4x64x32xf32>, vector<4x64x64xf32> -> vector<4x64x64xf32>
    "tpu.trace_stop"() : () -> ()
    %101 = vector.shape_cast %38 : vector<64x64xf32> to vector<1x64x64xf32>
    %102 = vector.broadcast %101 : vector<1x64x64xf32> to vector<4x64x64xf32>
    %103 = arith.addf %100, %102 : vector<4x64x64xf32>
    %cst_32 = arith.constant dense<0xFF800000> : vector<4x64xf32>
    %104 = vector.multi_reduction <maximumf>, %103, %cst_32 [2] : vector<4x64x64xf32> to vector<4x64xf32>
    %105 = vector.shape_cast %104 : vector<4x64xf32> to vector<4x64x1xf32>
    %106 = vector.broadcast %105 : vector<4x64x1xf32> to vector<4x64x64xf32>
    %107 = arith.subf %103, %106 : vector<4x64x64xf32>
    %108 = math.exp %107 : vector<4x64x64xf32>
    %cst_33 = arith.constant dense<0.000000e+00> : vector<4x64xf32>
    %109 = vector.multi_reduction <add>, %108, %cst_33 [2] : vector<4x64x64xf32> to vector<4x64xf32>
    %110 = vector.shape_cast %109 : vector<4x64xf32> to vector<4x64x1xf32>
    "tpu.trace_start"() <{level = 10 : i32, message = "bts,bsd->btd"}> : () -> ()
    %cst_34 = arith.constant dense<0.000000e+00> : vector<4x64x32xf32>
    %111 = tpu.matmul %108, %99, %cst_34 {dimension_numbers = #tpu.dot_dimension_numbers<[2], [1], [1], [2], [0, 0, 0, 1, 1, 2], [0], [0]>} : vector<4x64x64xf32>, vector<4x64x32xf32>, vector<4x64x32xf32> -> vector<4x64x32xf32>
    "tpu.trace_stop"() : () -> ()
    %112 = tpu.reciprocal %110 {approx = true} : vector<4x64x1xf32> -> vector<4x64x1xf32>
    %113 = vector.broadcast %112 : vector<4x64x1xf32> to vector<4x64x32xf32>
    %114 = arith.mulf %111, %113 : vector<4x64x32xf32>
    %115 = vector.shape_cast %114 : vector<4x64x32xf32> to vector<256x32xf32>
    %116 = arith.truncf %115 : vector<256x32xf32> to vector<256x32xbf16>
    %c2 = arith.constant 2 : index
    %c0_35 = arith.constant 0 : index
    %c0_36 = arith.constant 0 : index
    %117 = vector.load %arg5[%c2, %c0_35, %c0_36] : memref<4x32x128xbf16, #tpu.memory_space<vmem>>, vector<1x32x128xbf16>
    %118 = vector.shape_cast %117 : vector<1x32x128xbf16> to vector<32x128xbf16>
    %cst_37 = arith.constant dense<0.000000e+00> : vector<256x128xf32>
    %119 = tpu.matmul %116, %118, %cst_37 {dimension_numbers = #tpu.dot_dimension_numbers<[1], [0], [0], [1], [0, 0, 1, 1], [], []>} : vector<256x32xbf16>, vector<32x128xbf16>, vector<256x128xf32> -> vector<256x128xf32>
    %120 = arith.addf %93, %119 : vector<256x128xf32>
    %121 = vector.extract_strided_slice %32 {offsets = [0, 96], sizes = [256, 32], strides = [1, 1]} : vector<256x384xf32> to vector<256x32xf32>
    %122 = vector.shape_cast %121 : vector<256x32xf32> to vector<4x64x32xf32>
    %123 = vector.extract_strided_slice %32 {offsets = [0, 224], sizes = [256, 32], strides = [1, 1]} : vector<256x384xf32> to vector<256x32xf32>
    %124 = vector.shape_cast %123 : vector<256x32xf32> to vector<4x64x32xf32>
    %125 = vector.extract_strided_slice %32 {offsets = [0, 352], sizes = [256, 32], strides = [1, 1]} : vector<256x384xf32> to vector<256x32xf32>
    %126 = vector.shape_cast %125 : vector<256x32xf32> to vector<4x64x32xf32>
    "tpu.trace_start"() <{level = 10 : i32, message = "btd,bsd->bts"}> : () -> ()
    %cst_38 = arith.constant dense<0.000000e+00> : vector<4x64x64xf32>
    %127 = tpu.matmul %122, %124, %cst_38 {dimension_numbers = #tpu.dot_dimension_numbers<[2], [2], [1], [1], [0, 0, 0, 1, 1, 1], [0], [0]>} : vector<4x64x32xf32>, vector<4x64x32xf32>, vector<4x64x64xf32> -> vector<4x64x64xf32>
    "tpu.trace_stop"() : () -> ()
    %128 = vector.shape_cast %38 : vector<64x64xf32> to vector<1x64x64xf32>
    %129 = vector.broadcast %128 : vector<1x64x64xf32> to vector<4x64x64xf32>
    %130 = arith.addf %127, %129 : vector<4x64x64xf32>
    %cst_39 = arith.constant dense<0xFF800000> : vector<4x64xf32>
    %131 = vector.multi_reduction <maximumf>, %130, %cst_39 [2] : vector<4x64x64xf32> to vector<4x64xf32>
    %132 = vector.shape_cast %131 : vector<4x64xf32> to vector<4x64x1xf32>
    %133 = vector.broadcast %132 : vector<4x64x1xf32> to vector<4x64x64xf32>
    %134 = arith.subf %130, %133 : vector<4x64x64xf32>
    %135 = math.exp %134 : vector<4x64x64xf32>
    %cst_40 = arith.constant dense<0.000000e+00> : vector<4x64xf32>
    %136 = vector.multi_reduction <add>, %135, %cst_40 [2] : vector<4x64x64xf32> to vector<4x64xf32>
    %137 = vector.shape_cast %136 : vector<4x64xf32> to vector<4x64x1xf32>
    "tpu.trace_start"() <{level = 10 : i32, message = "bts,bsd->btd"}> : () -> ()
    %cst_41 = arith.constant dense<0.000000e+00> : vector<4x64x32xf32>
    %138 = tpu.matmul %135, %126, %cst_41 {dimension_numbers = #tpu.dot_dimension_numbers<[2], [1], [1], [2], [0, 0, 0, 1, 1, 2], [0], [0]>} : vector<4x64x64xf32>, vector<4x64x32xf32>, vector<4x64x32xf32> -> vector<4x64x32xf32>
    "tpu.trace_stop"() : () -> ()
    %139 = tpu.reciprocal %137 {approx = true} : vector<4x64x1xf32> -> vector<4x64x1xf32>
    %140 = vector.broadcast %139 : vector<4x64x1xf32> to vector<4x64x32xf32>
    %141 = arith.mulf %138, %140 : vector<4x64x32xf32>
    %142 = vector.shape_cast %141 : vector<4x64x32xf32> to vector<256x32xf32>
    %143 = arith.truncf %142 : vector<256x32xf32> to vector<256x32xbf16>
    %c3 = arith.constant 3 : index
    %c0_42 = arith.constant 0 : index
    %c0_43 = arith.constant 0 : index
    %144 = vector.load %arg5[%c3, %c0_42, %c0_43] : memref<4x32x128xbf16, #tpu.memory_space<vmem>>, vector<1x32x128xbf16>
    %145 = vector.shape_cast %144 : vector<1x32x128xbf16> to vector<32x128xbf16>
    %cst_44 = arith.constant dense<0.000000e+00> : vector<256x128xf32>
    %146 = tpu.matmul %143, %145, %cst_44 {dimension_numbers = #tpu.dot_dimension_numbers<[1], [0], [0], [1], [0, 0, 1, 1], [], []>} : vector<256x32xbf16>, vector<32x128xbf16>, vector<256x128xf32> -> vector<256x128xf32>
    %147 = arith.addf %120, %146 : vector<256x128xf32>
    %c0_45 = arith.constant 0 : index
    %c0_46 = arith.constant 0 : index
    %148 = vector.load %arg6[%c0_45, %c0_46] : memref<1x128xf32, #tpu.memory_space<vmem>>, vector<1x128xf32>
    %149 = vector.shape_cast %148 : vector<1x128xf32> to vector<128xf32>
    %150 = vector.shape_cast %149 : vector<128xf32> to vector<1x128xf32>
    %151 = vector.broadcast %150 : vector<1x128xf32> to vector<256x128xf32>
    %152 = arith.addf %147, %151 : vector<256x128xf32>
    %153 = arith.addf %1, %152 : vector<256x128xf32>
    %cst_47 = arith.constant dense<0.000000e+00> : vector<256xf32>
    %154 = vector.multi_reduction <add>, %153, %cst_47 [1] : vector<256x128xf32> to vector<256xf32>
    %155 = vector.shape_cast %154 : vector<256xf32> to vector<256x1xf32>
    %cst_48 = arith.constant 1.280000e+02 : f32
    %156 = vector.broadcast %cst_48 : f32 to vector<256x1xf32>
    %157 = arith.divf %155, %156 : vector<256x1xf32>
    %158 = vector.broadcast %157 : vector<256x1xf32> to vector<256x128xf32>
    %159 = arith.subf %153, %158 : vector<256x128xf32>
    %160 = arith.mulf %159, %159 : vector<256x128xf32>
    %cst_49 = arith.constant dense<0.000000e+00> : vector<256xf32>
    %161 = vector.multi_reduction <add>, %160, %cst_49 [1] : vector<256x128xf32> to vector<256xf32>
    %162 = vector.shape_cast %161 : vector<256xf32> to vector<256x1xf32>
    %cst_50 = arith.constant 1.280000e+02 : f32
    %163 = vector.broadcast %cst_50 : f32 to vector<256x1xf32>
    %164 = arith.divf %162, %163 : vector<256x1xf32>
    %165 = vector.broadcast %157 : vector<256x1xf32> to vector<256x128xf32>
    %166 = arith.subf %153, %165 : vector<256x128xf32>
    %cst_51 = arith.constant 9.99999974E-6 : f32
    %167 = vector.broadcast %cst_51 : f32 to vector<256x1xf32>
    %168 = arith.addf %164, %167 : vector<256x1xf32>
    %169 = math.rsqrt %168 : vector<256x1xf32>
    %170 = vector.broadcast %169 : vector<256x1xf32> to vector<256x128xf32>
    %171 = arith.mulf %166, %170 : vector<256x128xf32>
    %c0_52 = arith.constant 0 : index
    %c0_53 = arith.constant 0 : index
    %172 = vector.load %arg7[%c0_52, %c0_53] : memref<1x128xf32, #tpu.memory_space<vmem>>, vector<1x128xf32>
    %173 = vector.shape_cast %172 : vector<1x128xf32> to vector<128xf32>
    %174 = vector.shape_cast %173 : vector<128xf32> to vector<1x128xf32>
    %175 = vector.broadcast %174 : vector<1x128xf32> to vector<256x128xf32>
    %176 = arith.mulf %171, %175 : vector<256x128xf32>
    %c0_54 = arith.constant 0 : index
    %c0_55 = arith.constant 0 : index
    %177 = vector.load %arg8[%c0_54, %c0_55] : memref<1x128xf32, #tpu.memory_space<vmem>>, vector<1x128xf32>
    %178 = vector.shape_cast %177 : vector<1x128xf32> to vector<128xf32>
    %179 = vector.shape_cast %178 : vector<128xf32> to vector<1x128xf32>
    %180 = vector.broadcast %179 : vector<1x128xf32> to vector<256x128xf32>
    %181 = arith.addf %176, %180 : vector<256x128xf32>
    %182 = arith.truncf %181 : vector<256x128xf32> to vector<256x128xbf16>
    %c0_56 = arith.constant 0 : index
    %c0_57 = arith.constant 0 : index
    %183 = vector.load %arg9[%c0_56, %c0_57] : memref<128x512xbf16, #tpu.memory_space<vmem>>, vector<128x512xbf16>
    %cst_58 = arith.constant dense<0.000000e+00> : vector<256x512xf32>
    %184 = tpu.matmul %182, %183, %cst_58 {dimension_numbers = #tpu.dot_dimension_numbers<[1], [0], [0], [1], [0, 0, 1, 1], [], []>} : vector<256x128xbf16>, vector<128x512xbf16>, vector<256x512xf32> -> vector<256x512xf32>
    %c0_59 = arith.constant 0 : index
    %c0_60 = arith.constant 0 : index
    %185 = vector.load %arg10[%c0_59, %c0_60] : memref<1x512xf32, #tpu.memory_space<vmem>>, vector<1x512xf32>
    %186 = vector.shape_cast %185 : vector<1x512xf32> to vector<512xf32>
    %187 = vector.shape_cast %186 : vector<512xf32> to vector<1x512xf32>
    %188 = vector.broadcast %187 : vector<1x512xf32> to vector<256x512xf32>
    %189 = arith.addf %184, %188 : vector<256x512xf32>
    %cst_61 = arith.constant 0.000000e+00 : f32
    %190 = vector.broadcast %cst_61 : f32 to vector<256x512xf32>
    %191 = arith.maximumf %189, %190 : vector<256x512xf32>
    %192 = arith.truncf %191 : vector<256x512xf32> to vector<256x512xbf16>
    %c0_62 = arith.constant 0 : index
    %c0_63 = arith.constant 0 : index
    %193 = vector.load %arg11[%c0_62, %c0_63] : memref<512x128xbf16, #tpu.memory_space<vmem>>, vector<512x128xbf16>
    %cst_64 = arith.constant dense<0.000000e+00> : vector<256x128xf32>
    %194 = tpu.matmul %192, %193, %cst_64 {dimension_numbers = #tpu.dot_dimension_numbers<[1], [0], [0], [1], [0, 0, 1, 1], [], []>} : vector<256x512xbf16>, vector<512x128xbf16>, vector<256x128xf32> -> vector<256x128xf32>
    %c0_65 = arith.constant 0 : index
    %c0_66 = arith.constant 0 : index
    %195 = vector.load %arg12[%c0_65, %c0_66] : memref<1x128xf32, #tpu.memory_space<vmem>>, vector<1x128xf32>
    %196 = vector.shape_cast %195 : vector<1x128xf32> to vector<128xf32>
    %197 = vector.shape_cast %196 : vector<128xf32> to vector<1x128xf32>
    %198 = vector.broadcast %197 : vector<1x128xf32> to vector<256x128xf32>
    %199 = arith.addf %194, %198 : vector<256x128xf32>
    %200 = arith.addf %153, %199 : vector<256x128xf32>
    %201 = vector.shape_cast %200 : vector<256x128xf32> to vector<4x64x128xf32>
    %c0_67 = arith.constant 0 : index
    %c0_68 = arith.constant 0 : index
    %c0_69 = arith.constant 0 : index
    %202 = vector.load %arg13[%c0_67, %c0_68, %c0_69] : memref<4x64x128xf32, #tpu.memory_space<vmem>>, vector<4x64x128xf32>
    tpu.vector_store %arg13[%c0_67, %c0_68, %c0_69], %201 {strides = array<i32>} : memref<4x64x128xf32, #tpu.memory_space<vmem>>, vector<4x64x128xf32>,
    return
  }
  func.func @transform_0(%arg0: i32) -> (i32, i32, i32) {
    %c0_i32 = arith.constant 0 : i32
    %c0_i32_0 = arith.constant 0 : i32
    %c0_i32_1 = arith.constant 0 : i32
    return %arg0, %c0_i32, %c0_i32_0 : i32, i32, i32
  }
  func.func @transform_1(%arg0: i32) -> (i32, i32) {
    %c0_i32 = arith.constant 0 : i32
    %c0_i32_0 = arith.constant 0 : i32
    %c0_i32_1 = arith.constant 0 : i32
    return %c0_i32, %c0_i32_0 : i32, i32
  }
  func.func @transform_2(%arg0: i32) -> (i32, i32) {
    %c0_i32 = arith.constant 0 : i32
    %c0_i32_0 = arith.constant 0 : i32
    %c0_i32_1 = arith.constant 0 : i32
    return %c0_i32, %c0_i32_0 : i32, i32
  }
  func.func @transform_3(%arg0: i32) -> (i32, i32) {
    %c0_i32 = arith.constant 0 : i32
    %c0_i32_0 = arith.constant 0 : i32
    %c0_i32_1 = arith.constant 0 : i32
    return %c0_i32, %c0_i32_0 : i32, i32
  }
  func.func @transform_4(%arg0: i32) -> (i32, i32, i32) {
    %c0_i32 = arith.constant 0 : i32
    %c0_i32_0 = arith.constant 0 : i32
    %c0_i32_1 = arith.constant 0 : i32
    %c0_i32_2 = arith.constant 0 : i32
    return %c0_i32, %c0_i32_0, %c0_i32_1 : i32, i32, i32
  }
  func.func @transform_5(%arg0: i32) -> (i32, i32) {
    %c0_i32 = arith.constant 0 : i32
    %c0_i32_0 = arith.constant 0 : i32
    %c0_i32_1 = arith.constant 0 : i32
    return %c0_i32, %c0_i32_0 : i32, i32
  }
  func.func @transform_6(%arg0: i32) -> (i32, i32) {
    %c0_i32 = arith.constant 0 : i32
    %c0_i32_0 = arith.constant 0 : i32
    %c0_i32_1 = arith.constant 0 : i32
    return %c0_i32, %c0_i32_0 : i32, i32
  }
  func.func @transform_7(%arg0: i32) -> (i32, i32) {
    %c0_i32 = arith.constant 0 : i32
    %c0_i32_0 = arith.constant 0 : i32
    %c0_i32_1 = arith.constant 0 : i32
    return %c0_i32, %c0_i32_0 : i32, i32
  }
  func.func @transform_8(%arg0: i32) -> (i32, i32) {
    %c0_i32 = arith.constant 0 : i32
    %c0_i32_0 = arith.constant 0 : i32
    %c0_i32_1 = arith.constant 0 : i32
    return %c0_i32, %c0_i32_0 : i32, i32
  }
  func.func @transform_9(%arg0: i32) -> (i32, i32) {
    %c0_i32 = arith.constant 0 : i32
    %c0_i32_0 = arith.constant 0 : i32
    %c0_i32_1 = arith.constant 0 : i32
    return %c0_i32, %c0_i32_0 : i32, i32
  }
  func.func @transform_10(%arg0: i32) -> (i32, i32) {
    %c0_i32 = arith.constant 0 : i32
    %c0_i32_0 = arith.constant 0 : i32
    %c0_i32_1 = arith.constant 0 : i32
    return %c0_i32, %c0_i32_0 : i32, i32
  }
  func.func @transform_11(%arg0: i32) -> (i32, i32) {
    %c0_i32 = arith.constant 0 : i32
    %c0_i32_0 = arith.constant 0 : i32
    %c0_i32_1 = arith.constant 0 : i32
    return %c0_i32, %c0_i32_0 : i32, i32
  }
  func.func @transform_12(%arg0: i32) -> (i32, i32, i32) {
    %c0_i32 = arith.constant 0 : i32
    %c0_i32_0 = arith.constant 0 : i32
    %c0_i32_1 = arith.constant 0 : i32
    return %arg0, %c0_i32, %c0_i32_0 : i32, i32, i32
  }
}

</mosaic_0001>

<bundles_post_ra>
// kernel: tpu_custom_call.1
= control target key start
LH: loop header
LB: loop body
LE: loop exit
PB: predicated region body
PF: predicated region fallthrough
CT: control target
= control target key end

     0   :  { %s20507_s0 = inlined_call_operand.hbm [shape: f32[8,64,128], index: 0, kind: input, shape index: {}]   ;;  %s20508_s1 = inlined_call_operand.vmem [shape: f32[1,128], index: 1, kind: input, shape index: {}]   ;;  %s20509_s2 = inlined_call_operand.vmem [shape: f32[1,128], index: 2, kind: input, shape index: {}]   ;;  %s20510_s3 = inlined_call_operand.hbm [shape: bf16[128,384], index: 3, kind: input, shape index: {}]   ;;  %s20511_s4 = inlined_call_operand.hbm [shape: bf16[4,32,128], index: 4, kind: input, shape index: {}]   ;;  %s20512_s5 = inlined_call_operand.vmem [shape: f32[1,128], index: 5, kind: input, shape index: {}]   ;;  %s20513_s6 = inlined_call_operand.vmem [shape: f32[1,128], index: 6, kind: input, shape index: {}]   ;;  %s20514_s7 = inlined_call_operand.vmem [shape: f32[1,128], index: 7, kind: input, shape index: {}]   ;;  %s20515_s8 = inlined_call_operand.hbm [shape: bf16[128,512], index: 8, kind: input, shape index: {}]   ;;  %s20516_s9 = inlined_call_operand.vmem [shape: f32[1,512], index: 9, kind: input, shape index: {}]   ;;  %s20517_s10 = inlined_call_operand.hbm [shape: bf16[512,128], index: 10, kind: input, shape index: {}]   ;;  %s20518_s11 = inlined_call_operand.vmem [shape: f32[1,128], index: 11, kind: input, shape index: {}]   ;;  %s20519_s12 = inlined_call_operand.hbm [shape: f32[8,64,128], index: 12, kind: output, shape index: {}]  }
   0x1   :  { %20721 = sst [smem:[#allocation155_spill]] %s20510_s3 }
   0x2   :  { %20722 = sst [smem:[#allocation156_spill]] %s20516_s9 }
   0x3   :  { %20723 = sst [smem:[#allocation157_spill]] %s20518_s11 }
   0x4   :  { %20724 = sst [smem:[#allocation158_spill]] %s20519_s12 }
   0x5   :  { %17 = vsyncpa [#allocation3], 0 }
   0x6   :  { %19 = vsyncpa [#allocation3 + $0x1], 0 }
   0x7   :  { %20 = vsyncpa [#allocation6], 0 }
   0x8   :  { %21 = vsyncpa [#allocation9], 0 }
   0x9   :  { %22 = vsyncpa [#allocation4], 0 }
   0xa   :  { %24 = vsyncpa [#allocation4 + $0x1], 0  ;;  %s15979_s21 = smov 0   ;;  %s15981_s22 = smov 0  }
   0xb   :  { %s15983_s23 = smov 0   ;;  %s15985_s24 = smov 0  }
   0xc LB: > { %20725 = sst [smem:[#allocation16_spill]] %s15879_s21  ;;  %s16000_s25 = sadd.s32 4294967295, %s15891_s24   ;;  %s15891_s24 = sphi %s15985_s24, %s21213_s24   ;;  %s15887_s23 = sphi %s15983_s23, %s21212_s23   ;;  %s15883_s22 = sphi %s15981_s22, %s21211_s22   ;;  %s15879_s21 = sphi %s15979_s21, %s21210_s21  }
   0xd   : > { %s11063_s26 = sadd.s32 4294967294, %s15891_s24   ;;  %p50_p0 = scmp.ne.s32.totalorder %s15883_s22, %s15879_s21 }
   0xe   : > { %p20521_p1 = scmp.eq.s32.totalorder %s16000_s25, 0  ;;  %p311_p3 = scmp.eq.s32.totalorder %s11063_s26, 1 }
   0xf   : > { %p11064_p5 = scmp.ge.s32.totalorder %s15891_s24, 1  ;;  %p318_p7 = scmp.lt.s32.totalorder %s15891_s24, 3 }
  0x10   : > { %p16009_p4 = por %p20521_p1, %p50_p0  ;;  %p16014_p6 = por %p311_p3, %p50_p0 }
  0x11   : > { %p16019_p8 = pnand %p11064_p5, %p318_p7  ;;  %s15893_s30 = smov [#allocation5]  }
  0x12   : > { %s20726_s27 = scalar_select %p16009_p4, 1, 0 }
  0x13   : > { %s20727_s28 = scalar_select %p16014_p6, 1, 0 }
  0x14   : > { %s20729_s29 = scalar_select %p16019_p8, 1, 0 }
  0x15   : > { %20728 = sst [smem:[#allocation17_spill]] %s20727_s28  ;;  %s336_s13 = sshll.u32 %s15893_s30, 4  ;;  %s16023_s13 = int_to_ptr.vmem [resolvable:$true] %s336_s13 }
  0x16   : > { %p14321_p9 = pneg %p16019_p8  ;;  %s15894_s15 = smov [#allocation8]  }
  0x17   : > { %s371_s16 = sshll.u32 %s15894_s15, 4  ;;  %s20731_s3 = sld [smem:[#allocation155_spill]]  ;;  %s16034_s16 = int_to_ptr.vmem [resolvable:$true] %s371_s16 }
  0x18   : > { %p16030_p11 = pnand %p14321_p9, %p20521_p1 }
  0x1a   : > { %p16044_p13 = pneg %p16030_p11 }
  0x1d   : > { %s15675_s19 = scalar_lea.hbm %s20731_s3, 3072 }
  0x1e   : > { %p15676_p12 = scmp.ne.s32.totalorder %s20731_s3, %s15675_s19  ;;  %p15682_p5 = scmp.lt.u32.totalorder %s15675_s19, %s20731_s3 }
  0x20   : > { %p15678_p0 = pnand %p16044_p13, %p15676_p12 }
  0x22   : > { %p15679_p3 = pneg %p15678_p0 }
  0x24   : > { %p15684_p7 = pnand %p15682_p5, %p15679_p3 }
  0x26   : > { %15687 = shalt.err (!%p15684_p7)
}
  0x27   : > { %s15688_s17 = scalar_lea.vmem %s16023_s13, 3072  ;;  %p15696_p2 = scmp.lt.s32.totalorder %s16023_s13, %s16023_s13 }
  0x28   : > { %p15689_p9 = scmp.ne.s32.totalorder %s16023_s13, %s15688_s17  ;;  %p15697_p6 = scmp.lt.s32.totalorder %s15688_s17, %s15688_s17 }
  0x2a   : > { %p15691_p10 = pnand %p15689_p9, %p16044_p13  ;;  %p15698_p12 = por %p15697_p6, %p15696_p2 }
  0x2c   : > { %p15692_p1 = pneg %p15691_p10 }
  0x2e   : > { %p15699_p0 = pnand %p15698_p12, %p15692_p1 }
  0x30   : > { %15702 = shalt.err (!%p15699_p0)
}
  0x31   : > { %s15895_s18 = smov 192   ;;  %s15896_s28 = smov 12  }
  0x32   : > { %14324 = dma.hbm_to_vmem [thread:$0]  (!%p16030_p11), %s20731_s3, 3072, %s16023_s13, [#allocation6], %s15895_s18, %s15895_s18, %s15896_s28  }
  0x33   : > { %s15703_s21 = scalar_lea.hbm %s20515_s8, 4096 }
  0x34   : > { %p15704_p2 = scmp.ne.s32.totalorder %s20515_s8, %s15703_s21  ;;  %p15710_p10 = scmp.lt.u32.totalorder %s15703_s21, %s20515_s8 }
  0x36   : > { %p15706_p1 = pnand %p15704_p2, %p16044_p13 }
  0x38   : > { %p15707_p6 = pneg %p15706_p1 }
  0x3a   : > { %p15712_p3 = pnand %p15710_p10, %p15707_p6 }
  0x3c   : > { %15715 = shalt.err (!%p15712_p3)
}
  0x3d   : > { %s15716_s13 = scalar_lea.vmem %s16034_s16, 4096  ;;  %p15724_p12 = scmp.lt.s32.totalorder %s16034_s16, %s16034_s16 }
  0x3e   : > { %p15717_p5 = scmp.ne.s32.totalorder %s16034_s16, %s15716_s13  ;;  %p15725_p0 = scmp.lt.s32.totalorder %s15716_s13, %s15716_s13 }
  0x40   : > { %p15719_p7 = pnand %p15717_p5, %p16044_p13  ;;  %p15726_p2 = por %p15725_p0, %p15724_p12 }
  0x42   : > { %p15720_p9 = pneg %p15719_p7 }
  0x44   : > { %p15727_p1 = pnand %p15726_p2, %p15720_p9 }
  0x46   : > { %15730 = shalt.err (!%p15727_p1)
}
  0x47   : > { %s15897_s11 = smov 256   ;;  %s15898_s9 = smov 16  }
  0x48   : > { %14330 = dma.hbm_to_vmem [thread:$0]  (!%p16030_p11), %s20515_s8, 4096, %s16034_s16, [#allocation9], %s15897_s11, %s15897_s11, %s15898_s9  }
  0x49   : > { %s15899_s18 = smov [#allocation7]   ;;  %s15731_s26 = scalar_lea.hbm %s20511_s4, 1024 }
  0x4a   : > { %s349_s28 = sshll.u32 %s15899_s18, 4  ;;  %p15732_p6 = scmp.ne.s32.totalorder %s20511_s4, %s15731_s26  ;;  %s350_s28 = int_to_ptr.vmem [resolvable:$true] %s349_s28 }
  0x4b   : > { %p15738_p5 = scmp.lt.u32.totalorder %s15731_s26, %s20511_s4 }
  0x4c   : > { %p15734_p10 = pnand %p15732_p6, %p16044_p13 }
  0x4e   : > { %p15735_p3 = pneg %p15734_p10 }
  0x50   : > { %p15740_p7 = pnand %p15738_p5, %p15735_p3 }
  0x52   : > { %15743 = shalt.err (!%p15740_p7)
}
  0x53   : > { %s15744_s16 = scalar_lea.vmem %s350_s28, 1024  ;;  %p15752_p2 = scmp.lt.s32.totalorder %s350_s28, %s350_s28 }
  0x54   : > { %p15745_p9 = scmp.ne.s32.totalorder %s350_s28, %s15744_s16  ;;  %p15753_p1 = scmp.lt.s32.totalorder %s15744_s16, %s15744_s16 }
  0x56   : > { %p15747_p12 = pnand %p15745_p9, %p16044_p13  ;;  %p15754_p4 = por %p15753_p1, %p15752_p2 }
  0x58   : > { %p15748_p0 = pneg %p15747_p12 }
  0x5a   : > { %p15755_p8 = pnand %p15754_p4, %p15748_p0 }
  0x5c   : > { %15758 = shalt.err (!%p15755_p8)
}
  0x5d   : > { %s15900_s11 = smov 64   ;;  %s15901_s9 = smov 4  }
  0x5e   : > { %14327 = dma.hbm_to_vmem [thread:$0]  (!%p16030_p11), %s20511_s4, 1024, %s350_s28, [#allocation6], %s15900_s11, %s15900_s11, %s15901_s9  }
  0x5f   : > { %s15902_s21 = smov [#allocation10]   ;;  %s15759_s26 = scalar_lea.hbm %s20517_s10, 4096 }
  0x60   : > { %s387_s18 = sshll.u32 %s15902_s21, 4  ;;  %p15760_p4 = scmp.ne.s32.totalorder %s20517_s10, %s15759_s26  ;;  %s388_s18 = int_to_ptr.vmem [resolvable:$true] %s387_s18 }
  0x61   : > { %p15766_p10 = scmp.lt.u32.totalorder %s15759_s26, %s20517_s10 }
  0x62   : > { %p15762_p8 = pnand %p15760_p4, %p16044_p13 }
  0x64   : > { %p15763_p6 = pneg %p15762_p8 }
  0x66   : > { %p15768_p3 = pnand %p15766_p10, %p15763_p6 }
  0x68   : > { %15771 = shalt.err (!%p15768_p3)
}
  0x69   : > { %s15772_s28 = scalar_lea.vmem %s388_s18, 4096  ;;  %p15780_p12 = scmp.lt.s32.totalorder %s388_s18, %s388_s18 }
  0x6a   : > { %p15773_p5 = scmp.ne.s32.totalorder %s388_s18, %s15772_s28  ;;  %p15781_p0 = scmp.lt.s32.totalorder %s15772_s28, %s15772_s28 }
  0x6c   : > { %p15775_p7 = pnand %p15773_p5, %p16044_p13  ;;  %p15782_p2 = por %p15781_p0, %p15780_p12 }
  0x6e   : > { %p15776_p9 = pneg %p15775_p7 }
  0x70   : > { %p15783_p1 = pnand %p15782_p2, %p15776_p9 }
  0x72   : > { %15786 = shalt.err (!%p15783_p1)
}
  0x73   : > { %14333 = dma.hbm_to_vmem [thread:$0]  (!%p16030_p11), %s20517_s10, 4096, %s388_s18, [#allocation9], %s15900_s11, %s15900_s11, %s15901_s9  }
  0x74   : > { %s16125_s30 = sadd.s32 1, %s15891_s24   ;;  %s37_s21 = sadd.s32 1, %s15887_s23 }
  0x75   : > { %s34_s14 = ssub.s32 %s15891_s24, %s16125_s30  ;;  %p44_p13 = scmp.ne.s32.totalorder %s15887_s23, %s15883_s22 }
  0x76   : > { %p35_p4 = scmp.eq.s32.totalorder %s34_s14, 0  ;;  %p45_p8 = scmp.eq.s32.totalorder %s15891_s24, 0 }
  0x77   : > { %p20733_p6 = scmp.eq.s32.totalorder %s16000_s25, 1  ;;  %p14346_p3 = scmp.lt.s32.totalorder %s15891_s24, 2 }
  0x78   : > { %s16141_s20 = scalar_select %p35_p4, %s15887_s23, %s37_s21  }
  0x79   : > { %p16135_p10 = por %p20733_p6, %p44_p13  ;;  %p46_p5 = por %p45_p8, %p44_p13 }
  0x7a   : > { %s404_s26 = sand.u32 1, %s15887_s23   ;;  %s11638_s11 = sshll.u32 %s15891_s24, 12 }
  0x7b   : > { %s11070_s15 = sshll.u32 %s404_s26, 8  ;;  %s16148_s17 = scalar_lea.hbm %s20507_s0, %s11638_s11 }
  0x7c   : > { %s408_s13 = scalar_lea.vmem [#allocation2], %s11070_s15  ;;  %p16152_p11 = pnand %p14346_p3, %p46_p5 }
  0x7d   : > { %s416_s16 = sshll.u32 %s408_s13, 4  ;;  %s16156_s3 = scalar_lea.sflag [#allocation3], %s404_s26  ;;  %s16150_s16 = int_to_ptr.vmem [resolvable:$true] %s416_s16 }
  0x7e   : > { %s15787_s12 = scalar_lea.hbm %s16148_s17, 4096  ;;  %p15789_p9 = pneg %p16152_p11 }
  0x7f   : > { %p15788_p7 = scmp.ne.s32.totalorder %s16148_s17, %s15787_s12  ;;  %s15792_s15 = scalar_lea.hbm %s20507_s0, 8192 }
  0x80   : > { %p15793_p2 = scmp.lt.u32.totalorder %s16148_s17, %s20507_s0  ;;  %p15794_p1 = scmp.lt.u32.totalorder %s15792_s15, %s15787_s12 }
  0x81   : > { %p15790_p12 = pnand %p15789_p9, %p15788_p7  ;;  %p15796_p4 = scmp.lt.u32.totalorder %s15787_s12, %s16148_s17 }
  0x82   : > { %p15795_p13 = por %p15794_p1, %p15793_p2 }
  0x83   : > { %p15791_p0 = pneg %p15790_p12 }
  0x84   : > { %p15797_p8 = por %p15796_p4, %p15795_p13 }
  0x86   : > { %p15798_p6 = pnand %p15797_p8, %p15791_p0 }
  0x88   : > { %15801 = shalt.err (!%p15798_p6)
}
  0x89   : > { %s15802_s26 = scalar_lea.vmem %s16150_s16, 4096  ;;  %s15903_s18 = smov [#allocation2]  }
  0x8a   : > { %p15803_p3 = scmp.ne.s32.totalorder %s16150_s16, %s15802_s26  ;;  %s15807_s13 = sshll.u32 %s15903_s18, 4  ;;  %s15808_s13 = int_to_ptr.vmem [resolvable:$false] %s15807_s13 }
  0x8b   : > { %s15809_s21 = scalar_lea.vmem %s15808_s13, 8192  ;;  %p15810_p12 = scmp.lt.s32.totalorder %s16150_s16, %s15808_s13 }
  0x8c   : > { %p15805_p5 = pnand %p15803_p3, %p15789_p9  ;;  %p15811_p2 = scmp.lt.s32.totalorder %s15809_s21, %s15802_s26 }
  0x8e   : > { %p15806_p7 = pneg %p15805_p5  ;;  %p15812_p1 = por %p15811_p2, %p15810_p12 }
  0x90   : > { %p15813_p13 = pnand %p15812_p1, %p15806_p7 }
  0x92   : > { %15816 = shalt.err (!%p15813_p13)
}
  0x93   : > { %s15904_s12 = smov 128   ;;  %s15905_s14 = smov 8  }
  0x94   : > { %14337 = dma.hbm_to_vmem [thread:$0]  (!%p16152_p11), %s16148_s17, 4096, %s16150_s16, %s16156_s3, %s15904_s12, %s15904_s12, %s15905_s14  }
  0x95   : > { %p20736_p9 = scmp.ne.s32.totalorder %s20729_s29, 0 }
  0x97   : > { %428 = sbr.rel (%p20736_p9) target bundleno = 4428 (0x114c), region = 68 }
  0x9e   : > { %s16187_s15 = sand.u32 1, %s15883_s22   ;;  %p20737_p0 = scmp.ne.s32.totalorder %s20726_s27, 0 }
  0x9f   : > { %s11075_s11 = sshll.u32 %s16187_s15, 8  ;;  %s431_s9 = scalar_lea.sflag [#allocation3], %s16187_s15 }
  0xa0   : > { %s16193_s26 = scalar_lea.vmem [#allocation2], %s11075_s11 }
  0xa1   : > { %15862 = dma.done.wait (%p20737_p0), %s431_s9, 4096  }
  0xa2   : > { %15864 = vsyncadd (%p20737_p0), %s431_s9, 4294963200  ;;  %p20738_p11 = scmp.eq.s32.totalorder %s16000_s25, 0 }
  0xa4   : > { %15866 = dma.done.wait (%p20738_p11), [#allocation6], 4096   ;;  %p20739_p4 = pmov %p20738_p11 }
  0xa6   : > { %15868 = vsyncadd (%p20739_p4), [#allocation6], 4294963200  ;;  %p20740_p8 = pmov %p20739_p4 }
  0xa7   : > { %p20741_p6 = pmov %p20739_p4 }
  0xa8   : > { %15870 = dma.done.wait (%p20740_p8), [#allocation9], 8192  }
  0xa9   : > { %15872 = vsyncadd (%p20741_p6), [#allocation9], 4294959104  ;;  %v494_v0 = vld [vmem:[%s16193_s26] sm:$0xff]  ;;  %v496_v1 = vld [vmem:[%s16193_s26 + $0x10] sm:$0xff]  ;;  %vm1514_vm0 = vcmask 261120   ;;  %s15907_s28 = smov 96  }
  0xaa   : > { %526 = vadd.xlane.f32.xlu0 %v494_v0  ;;  %530 = vadd.xlane.f32.xlu1 %v496_v1  ;;  %v495_v2 = vld [vmem:[%s16193_s26 + $0x8] sm:$0xff]  ;;  %v497_v3 = vld [vmem:[%s16193_s26 + $0x18] sm:$0xff]  ;;  %v16212_v4 = vld [vmem:[%s16193_s26 + $0x20] sm:$0xff]  ;;  %vm2127_vm5 = vcmask 523264   ;;  %s15909_s3 = smov 64   ;;  %s15910_s18 = smov 32  }
  0xab   : > { %v16215_v5 = vld [vmem:[%s16193_s26 + $0x28] sm:$0xff]  ;;  %v16218_v6 = vld [vmem:[%s16193_s26 + $0x30] sm:$0xff]  ;;  %v16221_v7 = vld [vmem:[%s16193_s26 + $0x38] sm:$0xff]  ;;  %s21191_s17 = sld [smem:[#allocation156_spill]]  ;;  %s21204_s14 = sld [smem:[#allocation158_spill]] }
  0xac   : > { %v16226_v8 = vld [vmem:[%s16193_s26 + $0x40] sm:$0xff]  ;;  %v16229_v9 = vld [vmem:[%s16193_s26 + $0x48] sm:$0xff]  ;;  %v16234_v10 = vld [vmem:[%s16193_s26 + $0x50] sm:$0xff]  ;;  %s15911_s27 = smov [#allocation11]  }
  0xad   : > { %v16237_v11 = vld [vmem:[%s16193_s26 + $0x58] sm:$0xff]  ;;  %v16242_v12 = vld [vmem:[%s16193_s26 + $0x60] sm:$0xff]  ;;  %v16247_v13 = vld [vmem:[%s16193_s26 + $0x68] sm:$0xff]  ;;  %s15821_s29 = sshll.u32 %s15911_s27, 4  ;;  %s15822_s29 = int_to_ptr.vmem [resolvable:$false] %s15821_s29 }
  0xae   : > { %528 = vadd.xlane.f32.xlu0 %v495_v2  ;;  %532 = vadd.xlane.f32.xlu1 %v497_v3  ;;  %v16250_v14 = vld [vmem:[%s16193_s26 + $0x70] sm:$0xff]  ;;  %v16253_v15 = vld [vmem:[%s16193_s26 + $0x78] sm:$0xff]  ;;  %v16258_v16 = vld [vmem:[%s16193_s26 + $0x80] sm:$0xff] }
  0xaf   : > { %v16263_v17 = vld [vmem:[%s16193_s26 + $0x88] sm:$0xff]  ;;  %v16266_v18 = vld [vmem:[%s16193_s26 + $0x90] sm:$0xff]  ;;  %v16271_v19 = vld [vmem:[%s16193_s26 + $0x98] sm:$0xff] }
  0xb0   : > { %v14883_v20 = vld [vmem:[#allocation5 + $0x4] ss:$12 sps:$4 sm:$0xff]   ;;  %v14885_v21 = vld [vmem:[#allocation5] ss:$12 sps:$4 sm:$0xff]   ;;  %v14886_v22 = vld [vmem:[#allocation5 + $0x1c] ss:$12 sps:$4 sm:$0xff]  }
  0xb1   : > { %1133 = vmatprep.subr.bf16.mxu0 %v14883_v20  ;;  %v16284_v35 = vld [vmem:[%s16193_s26 + $0xa0] sm:$0xff]  ;;  %v16294_v41 = vld [vmem:[%s16193_s26 + $0xa8] sm:$0xff]  ;;  %v16303_v46 = vld [vmem:[%s16193_s26 + $0xb0] sm:$0xff] }
  0xb2   : > { %534 = vadd.xlane.f32.xlu0 %v16212_v4  ;;  %536 = vadd.xlane.f32.xlu1 %v16215_v5  ;;  %v14888_v51 = vld [vmem:[#allocation5 + $0x18] ss:$12 sps:$4 sm:$0xff]   ;;  %v14889_v54 = vld [vmem:[#allocation5 + $0x34] ss:$12 sps:$4 sm:$0xff]   ;;  %v14892_v59 = vld [vmem:[#allocation5 + $0x30] ss:$12 sps:$4 sm:$0xff]  }
  0xb3   : > { %1134 = vmatpush1.bf16.msra.mxu0 %v14885_v21  ;;  %v16312_v52 = vld [vmem:[%s16193_s26 + $0xb8] sm:$0xff]  ;;  %v14891_v55 = vld [vmem:[#allocation5 + $0x8] ss:$12 sps:$4 sm:$0xff]   ;;  %v16321_v60 = vld [vmem:[%s16193_s26 + $0xc0] sm:$0xff] }
  0xb4   : > { %1135 = vmatprep.subr.bf16.mxu0 %v14886_v22  ;;  %12473 = vmatprep.subr.bf16.mxu1 %v14891_v55  ;;  %v14893_v62 = vld [vmem:[#allocation5 + $0x4c] ss:$12 sps:$4 sm:$0xff]   ;;  %v14897_v20 = vld [vmem:[#allocation5 + $0x64] ss:$12 sps:$4 sm:$0xff]   ;;  %vm16611_vm1 = vmpackc.low %vm1514_vm0, %vm1514_vm0 }
  0xb5   : > { %12474 = vmatpush3.bf16.msra.mxu1 %v14891_v55  ;;  %v14895_v63 = vld [vmem:[#allocation5 + $0x20] ss:$12 sps:$4 sm:$0xff]   ;;  %v14899_v21 = vld [vmem:[#allocation5 + $0x38] ss:$12 sps:$4 sm:$0xff]  }
  0xb6   : > { %538 = vadd.xlane.f32.xlu0 %v16218_v6  ;;  %540 = vadd.xlane.f32.xlu1 %v16221_v7 }
  0xb7   : > { %1136 = vmatpush1.bf16.msra.mxu0 %v14888_v51  ;;  %12475 = vmatprep.subr.bf16.mxu1 %v14895_v63  ;;  %v14909_v51 = vld [vmem:[#allocation5 + $0xac] ss:$12 sps:$4 sm:$0xff]  }
  0xb8   : > { %1137 = vmatprep.subr.bf16.mxu0 %v14889_v54 }
  0xb9   : > { %12476 = vmatpush3.bf16.msra.mxu1 %v14895_v63  ;;  %v14913_v63 = vld [vmem:[#allocation5 + $0x98] ss:$12 sps:$4 sm:$0xff]  }
  0xba   : > { %542 = vadd.xlane.f32.xlu0 %v16226_v8  ;;  %544 = vadd.xlane.f32.xlu1 %v16229_v9 }
  0xbb   : > { %1138 = vmatpush1.bf16.msra.mxu0 %v14892_v59  ;;  %12477 = vmatprep.subr.bf16.mxu1 %v14899_v21 }
  0xbc   : > { %1139 = vmatprep.subr.bf16.mxu0 %v14893_v62 }
  0xbd   : > { %12478 = vmatpush3.bf16.msra.mxu1 %v14899_v21 }
  0xbe   : > { %546 = vadd.xlane.f32.xlu0 %v16234_v10  ;;  %548 = vadd.xlane.f32.xlu1 %v16237_v11 }
  0xc2   : > { %550 = vadd.xlane.f32.xlu0 %v16242_v12  ;;  %552 = vadd.xlane.f32.xlu1 %v16247_v13 }
  0xc6   : > { %554 = vadd.xlane.f32.xlu0 %v16250_v14  ;;  %556 = vadd.xlane.f32.xlu1 %v16253_v15 }
  0xca   : > { %558 = vadd.xlane.f32.xlu0 %v16258_v16  ;;  %560 = vadd.xlane.f32.xlu1 %v16263_v17 }
  0xce   : > { %562 = vadd.xlane.f32.xlu0 %v16266_v18  ;;  %564 = vadd.xlane.f32.xlu1 %v16271_v19 }
 0x137   : > { %v527_v23 = vpop.xlane.xlu0 %526  ;;  %v531_v24 = vpop.xlane.xlu1 %530 }
 0x138   : > { %v591_v25 = vmul.f32 0.0078125, %v527_v23  ;;  %v593_v27 = vmul.f32 0.0078125, %v531_v24  ;;  %v14900_v24 = vld [vmem:[#allocation5 + $0x60] ss:$12 sps:$4 sm:$0xff]  }
 0x13a   : > { %v16275_v26 = vsub.f32 %v494_v0, %v591_v25  ;;  %v16281_v34 = vsub.f32 %v496_v1, %v593_v27  ;;  %v16339_v25 = vld [vmem:[%s16193_s26 + $0xd0] sm:$0xff] }
 0x13b   : > { %v529_v28 = vpop.xlane.xlu0 %528  ;;  %v533_v29 = vpop.xlane.xlu1 %532 }
 0x13c   : > { %v592_v30 = vmul.f32 0.0078125, %v529_v28  ;;  %v655_v31 = vmul.f32 %v16275_v26, %v16275_v26  ;;  %v594_v33 = vmul.f32 0.0078125, %v533_v29  ;;  %v657_v38 = vmul.f32 %v16281_v34, %v16281_v34  ;;  %v14901_v29 = vld [vmem:[#allocation5 + $0x7c] ss:$12 sps:$4 sm:$0xff]  }
 0x13e   : > { %687 = vadd.xlane.f32.xlu0 %v655_v31  ;;  %v16279_v32 = vsub.f32 %v495_v2, %v592_v30  ;;  %v16291_v40 = vsub.f32 %v497_v3, %v594_v33  ;;  %v14896_v3 = vld [vmem:[#allocation5 + $0x48] ss:$12 sps:$4 sm:$0xff]   ;;  %v14903_v30 = vld [vmem:[#allocation5 + $0x50] ss:$12 sps:$4 sm:$0xff]  }
 0x13f   : > { %v535_v36 = vpop.xlane.xlu0 %534  ;;  %v537_v42 = vpop.xlane.xlu1 %536  ;;  %1140 = vmatpush1.bf16.msra.mxu0 %v14896_v3  ;;  %12479 = vmatprep.subr.bf16.mxu1 %v14903_v30  ;;  %v16375_v3 = vld [vmem:[%s16193_s26 + $0xf0] sm:$0xff] }
 0x140   : > { %v656_v37 = vmul.f32 %v16279_v32, %v16279_v32  ;;  %v595_v39 = vmul.f32 0.0078125, %v535_v36  ;;  %v658_v43 = vmul.f32 %v16291_v40, %v16291_v40  ;;  %v596_v44 = vmul.f32 0.0078125, %v537_v42  ;;  %1141 = vmatprep.subr.bf16.mxu0 %v14897_v20  ;;  %v14904_v36 = vld [vmem:[#allocation5 + $0x78] ss:$12 sps:$4 sm:$0xff]   ;;  %12480 = vmatpush3.bf16.msra.mxu1 %v14903_v30  ;;  %v14907_v42 = vld [vmem:[#allocation5 + $0x68] ss:$12 sps:$4 sm:$0xff]  }
 0x141   : > { %12481 = vmatprep.subr.bf16.mxu1 %v14907_v42 }
 0x142   : > { %566 = vadd.xlane.f32.xlu0 %v16284_v35  ;;  %689 = vadd.xlane.f32.xlu1 %v656_v37  ;;  %v16300_v45 = vsub.f32 %v16212_v4, %v595_v39  ;;  %v16309_v50 = vsub.f32 %v16215_v5, %v596_v44  ;;  %v16330_v4 = vld [vmem:[%s16193_s26 + $0xc8] sm:$0xff]  ;;  %v16348_v37 = vld [vmem:[%s16193_s26 + $0xd8] sm:$0xff]  ;;  %v14905_v39 = vld [vmem:[#allocation5 + $0x94] ss:$12 sps:$4 sm:$0xff]  }
 0x143   : > { %v539_v47 = vpop.xlane.xlu0 %538  ;;  %v541_v53 = vpop.xlane.xlu1 %540  ;;  %1142 = vmatpush1.bf16.msra.mxu0 %v14900_v24 }
 0x144   : > { %v659_v48 = vmul.f32 %v16300_v45, %v16300_v45  ;;  %v597_v49 = vmul.f32 0.0078125, %v539_v47  ;;  %v660_v56 = vmul.f32 %v16309_v50, %v16309_v50  ;;  %v598_v57 = vmul.f32 0.0078125, %v541_v53  ;;  %1143 = vmatprep.subr.bf16.mxu0 %v14901_v29  ;;  %v14908_v47 = vld [vmem:[#allocation5 + $0x90] ss:$12 sps:$4 sm:$0xff]   ;;  %12482 = vmatpush3.bf16.msra.mxu1 %v14907_v42  ;;  %v14911_v53 = vld [vmem:[#allocation5 + $0x80] ss:$12 sps:$4 sm:$0xff]  }
 0x145   : > { %12483 = vmatprep.subr.bf16.mxu1 %v14911_v53 }
 0x146   : > { %691 = vadd.xlane.f32.xlu0 %v657_v38  ;;  %568 = vadd.xlane.f32.xlu1 %v16294_v41  ;;  %v16318_v58 = vsub.f32 %v16218_v6, %v597_v49  ;;  %v16327_v2 = vsub.f32 %v16221_v7, %v598_v57  ;;  %v16366_v57 = vld [vmem:[%s16193_s26 + $0xe8] sm:$0xff] }
 0x147   : > { %v543_v61 = vpop.xlane.xlu0 %542  ;;  %v545_v5 = vpop.xlane.xlu1 %544  ;;  %1144 = vmatpush1.bf16.msra.mxu0 %v14904_v36 }
 0x148   : > { %v661_v0 = vmul.f32 %v16318_v58, %v16318_v58  ;;  %v599_v1 = vmul.f32 0.0078125, %v543_v61  ;;  %v662_v22 = vmul.f32 %v16327_v2, %v16327_v2  ;;  %v600_v7 = vmul.f32 0.0078125, %v545_v5  ;;  %1145 = vmatprep.subr.bf16.mxu0 %v14905_v39  ;;  %12484 = vmatpush3.bf16.msra.mxu1 %v14911_v53 }
 0x149   : > { %v20526_v5 = vmov 0   ;;  %12485 = vmatprep.subr.bf16.mxu1 %v14913_v63 }
 0x14a   : > { %570 = vadd.xlane.f32.xlu0 %v16303_v46  ;;  %693 = vadd.xlane.f32.xlu1 %v658_v43  ;;  %v16336_v23 = vsub.f32 %v16226_v8, %v599_v1  ;;  %v16345_v33 = vsub.f32 %v16229_v9, %v600_v7 }
 0x14b   : > { %v547_v6 = vpop.xlane.xlu0 %546  ;;  %v549_v27 = vpop.xlane.xlu1 %548  ;;  %1146 = vmatpush1.bf16.msra.mxu0 %v14908_v47  ;;  %1165 = vmatprep.mubr.bf16.mxu0 %v20526_v5 }
 0x14c   : > { %v663_v31 = vmul.f32 %v16336_v23, %v16336_v23  ;;  %v601_v8 = vmul.f32 0.0078125, %v547_v6  ;;  %v664_v43 = vmul.f32 %v16345_v33, %v16345_v33  ;;  %v602_v44 = vmul.f32 0.0078125, %v549_v27  ;;  %1147 = vmatprep.subr.bf16.mxu0 %v14909_v51  ;;  %12486 = vmatpush3.bf16.msra.mxu1 %v14913_v63  ;;  %v16388_v27 = vld [vmem:[%s16193_s26 + $0xf8] sm:$0xff] }
 0x14e   : > { %572 = vadd.xlane.f32.xlu1 %v16312_v52  ;;  %695 = vadd.xlane.f32.xlu0 %v659_v48  ;;  %v16354_v9 = vsub.f32 %v16234_v10, %v601_v8  ;;  %v16357_v48 = vld [vmem:[%s16193_s26 + $0xe0] sm:$0xff]  ;;  %v16363_v10 = vsub.f32 %v16237_v11, %v602_v44 }
 0x14f   : > { %v551_v28 = vpop.xlane.xlu0 %550  ;;  %v553_v38 = vpop.xlane.xlu1 %552 }
 0x150   : > { %v665_v54 = vmul.f32 %v16354_v9, %v16354_v9  ;;  %v603_v55 = vmul.f32 0.0078125, %v551_v28  ;;  %v604_v61 = vmul.f32 0.0078125, %v553_v38 }
 0x152   : > { %697 = vadd.xlane.f32.xlu1 %v660_v56  ;;  %574 = vadd.xlane.f32.xlu0 %v16321_v60  ;;  %v14912_v56 = vld [vmem:[#allocation5 + $0xa8] ss:$12 sps:$4 sm:$0xff]   ;;  %v16372_v1 = vsub.f32 %v16242_v12, %v603_v55  ;;  %v16379_v20 = vsub.f32 %v16247_v13, %v604_v61 }
 0x153   : > { %v555_v49 = vpop.xlane.xlu0 %554  ;;  %v557_v59 = vpop.xlane.xlu1 %556  ;;  %1148 = vmatpush1.bf16.msra.mxu0 %v14912_v56 }
 0x154   : > { %v605_v11 = vmul.f32 0.0078125, %v555_v49  ;;  %v606_v6 = vmul.f32 0.0078125, %v557_v59  ;;  %v667_v12 = vmul.f32 %v16372_v1, %v16372_v1  ;;  %v668_v13 = vmul.f32 %v16379_v20, %v16379_v20 }
 0x156   : > { %576 = vadd.xlane.f32.xlu1 %v16330_v4  ;;  %699 = vadd.xlane.f32.xlu0 %v661_v0  ;;  %v666_v0 = vmul.f32 %v16363_v10, %v16363_v10  ;;  %v16385_v24 = vsub.f32 %v16250_v14, %v605_v11  ;;  %v16393_v29 = vsub.f32 %v16253_v15, %v606_v6 }
 0x157   : > { %v559_v62 = vpop.xlane.xlu0 %558  ;;  %v561_v21 = vpop.xlane.xlu1 %560 }
 0x158   : > { %v607_v7 = vmul.f32 0.0078125, %v559_v62  ;;  %v669_v30 = vmul.f32 %v16385_v24, %v16385_v24  ;;  %v670_v38 = vmul.f32 %v16393_v29, %v16393_v29 }
 0x15a   : > { %701 = vadd.xlane.f32.xlu1 %v662_v22  ;;  %578 = vadd.xlane.f32.xlu0 %v16339_v25  ;;  %v14914_v22 = vld [vmem:[#allocation5 + $0xb0] ss:$12 sps:$4 sm:$0xff]   ;;  %v16399_v8 = vsub.f32 %v16258_v16, %v607_v7 }
 0x15b   : > { %v563_v28 = vpop.xlane.xlu0 %562  ;;  %12487 = vmatprep.subr.bf16.mxu1 %v14914_v22  ;;  %v565_v36 = vpop.xlane.xlu1 %564 }
 0x15c   : > { %12488 = vmatpush3.bf16.msra.mxu1 %v14914_v22  ;;  %v609_v14 = vmul.f32 0.0078125, %v563_v28  ;;  %v671_v15 = vmul.f32 %v16399_v8, %v16399_v8  ;;  %v610_v39 = vmul.f32 0.0078125, %v565_v36 }
 0x15e   : > { %580 = vadd.xlane.f32.xlu1 %v16348_v37  ;;  %703 = vadd.xlane.f32.xlu0 %v663_v31  ;;  %v608_v31 = vmul.f32 0.0078125, %v561_v21  ;;  %v16416_v47 = vsub.f32 %v16271_v19, %v610_v39 }
 0x160   : > { %v16406_v42 = vsub.f32 %v16263_v17, %v608_v31  ;;  %v674_v17 = vmul.f32 %v16416_v47, %v16416_v47 }
 0x162   : > { %705 = vadd.xlane.f32.xlu1 %v664_v43  ;;  %582 = vadd.xlane.f32.xlu0 %v16357_v48  ;;  %v16409_v43 = vsub.f32 %v16266_v18, %v609_v14  ;;  %v672_v16 = vmul.f32 %v16406_v42, %v16406_v42 }
 0x164   : > { %v673_v44 = vmul.f32 %v16409_v43, %v16409_v43 }
 0x166   : > { %584 = vadd.xlane.f32.xlu1 %v16366_v57  ;;  %707 = vadd.xlane.f32.xlu0 %v665_v54 }
 0x16a   : > { %709 = vadd.xlane.f32.xlu1 %v666_v0  ;;  %586 = vadd.xlane.f32.xlu0 %v16375_v3 }
 0x16e   : > { %588 = vadd.xlane.f32.xlu1 %v16388_v27  ;;  %711 = vadd.xlane.f32.xlu0 %v667_v12 }
 0x172   : > { %713 = vadd.xlane.f32.xlu1 %v668_v13  ;;  %715 = vadd.xlane.f32.xlu0 %v669_v30 }
 0x176   : > { %717 = vadd.xlane.f32.xlu1 %v670_v38  ;;  %719 = vadd.xlane.f32.xlu0 %v671_v15 }
 0x17a   : > { %721 = vadd.xlane.f32.xlu1 %v672_v16  ;;  %723 = vadd.xlane.f32.xlu0 %v673_v44  ;;  %v16439_v16 = vld [vmem:[%s20508_s1] ss:$0 sm:$0xff] }
 0x17e   : > { %725 = vadd.xlane.f32.xlu1 %v674_v17 }
 0x1cb   : > { %v688_v49 = vpop.xlane.xlu0 %687 }
 0x1cc   : > { %v751_v18 = vmul.f32 0.0078125, %v688_v49 }
 0x1ce   : > { %v783_v51 = vadd.f32 1e-05, %v751_v18 }
 0x1cf   : > { %v690_v53 = vpop.xlane.xlu1 %689  ;;  %v567_v54 = vpop.xlane.xlu0 %566 }
 0x1d0   : > { %15003 = vrsqrt.f32 %v783_v51  ;;  %v752_v55 = vmul.f32 0.0078125, %v690_v53  ;;  %v611_v56 = vmul.f32 0.0078125, %v567_v54 }
 0x1d2   : > { %v784_v59 = vadd.f32 1e-05, %v752_v55  ;;  %v16421_v61 = vsub.f32 %v16284_v35, %v611_v56  ;;  %v16451_v56 = vld [vmem:[%s20509_s2] ss:$0 sm:$0xff] }
 0x1d3   : > { %v569_v19 = vpop.xlane.xlu1 %568  ;;  %v692_v62 = vpop.xlane.xlu0 %691 }
 0x1d4   : > { %15005 = vrsqrt.f32 %v784_v59  ;;  %v612_v63 = vmul.f32 0.0078125, %v569_v19  ;;  %v753_v0 = vmul.f32 0.0078125, %v692_v62  ;;  %v675_v11 = vmul.f32 %v16421_v61, %v16421_v61 }
 0x1d6   : > { %v785_v6 = vadd.f32 1e-05, %v753_v0  ;;  %727 = vadd.xlane.f32.xlu0 %v675_v11  ;;  %v16426_v21 = vsub.f32 %v16294_v41, %v612_v63 }
 0x1d7   : > { %v694_v22 = vpop.xlane.xlu1 %693  ;;  %v571_v12 = vpop.xlane.xlu0 %570 }
 0x1d8   : > { %15007 = vrsqrt.f32 %v785_v6  ;;  %v754_v7 = vmul.f32 0.0078125, %v694_v22  ;;  %v613_v28 = vmul.f32 0.0078125, %v571_v12  ;;  %v676_v35 = vmul.f32 %v16426_v21, %v16426_v21 }
 0x1da   : > { %v15004_v13 = vpop.eup %15003  ;;  %v786_v30 = vadd.f32 1e-05, %v754_v7  ;;  %729 = vadd.xlane.f32.xlu1 %v676_v35  ;;  %v16431_v31 = vsub.f32 %v16303_v46, %v613_v28 }
 0x1db   : > { %v573_v14 = vpop.xlane.xlu1 %572  ;;  %v696_v36 = vpop.xlane.xlu0 %695  ;;  %v847_v38 = vmul.f32 %v15004_v13, %v16275_v26 }
 0x1dc   : > { %15009 = vrsqrt.f32 %v786_v30  ;;  %v614_v41 = vmul.f32 0.0078125, %v573_v14  ;;  %v755_v15 = vmul.f32 0.0078125, %v696_v36  ;;  %v677_v39 = vmul.f32 %v16431_v31, %v16431_v31 }
 0x1dd   : > { %v886_v51 = vmul.f32 %v16439_v16, %v847_v38 }
 0x1de   : > { %v15006_v44 = vpop.eup %15005  ;;  %v787_v17 = vadd.f32 1e-05, %v755_v15  ;;  %731 = vadd.xlane.f32.xlu0 %v677_v39  ;;  %v16442_v46 = vsub.f32 %v16312_v52, %v614_v41 }
 0x1df   : > { %v698_v49 = vpop.xlane.xlu1 %697  ;;  %v575_v18 = vpop.xlane.xlu0 %574  ;;  %v848_v26 = vmul.f32 %v15006_v44, %v16279_v32  ;;  %v925_v0 = vadd.f32 %v16451_v56, %v886_v51 }
 0x1e0   : > { %15011 = vrsqrt.f32 %v787_v17  ;;  %v756_v53 = vmul.f32 0.0078125, %v698_v49  ;;  %v615_v54 = vmul.f32 0.0078125, %v575_v18  ;;  %v678_v55 = vmul.f32 %v16442_v46, %v16442_v46 }
 0x1e1   : > { %v887_v52 = vmul.f32 %v16439_v16, %v848_v26 }
 0x1e2   : > { %v15008_v59 = vpop.eup %15007  ;;  %v788_v19 = vadd.f32 1e-05, %v756_v53  ;;  %733 = vadd.xlane.f32.xlu1 %v678_v55  ;;  %v16455_v32 = vsub.f32 %v16321_v60, %v615_v54 }
 0x1e3   : > { %v577_v62 = vpop.xlane.xlu1 %576  ;;  %v700_v63 = vpop.xlane.xlu0 %699  ;;  %v926_v11 = vadd.f32 %v16451_v56, %v887_v52  ;;  %v849_v6 = vmul.f32 %v15008_v59, %v16281_v34 }
 0x1e4   : > { %15013 = vrsqrt.f32 %v788_v19  ;;  %v616_v22 = vmul.f32 0.0078125, %v577_v62  ;;  %v757_v12 = vmul.f32 0.0078125, %v700_v63  ;;  %v679_v7 = vmul.f32 %v16455_v32, %v16455_v32 }
 0x1e5   : > { %v957_v28 = vpack.c.bf16 %v926_v11, %v925_v0  ;;  %v888_v34 = vmul.f32 %v16439_v16, %v849_v6 }
 0x1e6   : > { %v15010_v35 = vpop.eup %15009  ;;  %v789_v13 = vadd.f32 1e-05, %v757_v12  ;;  %735 = vadd.xlane.f32.xlu0 %v679_v7  ;;  %v16463_v60 = vsub.f32 %v16330_v4, %v616_v22 }
 0x1e7   : > { %v702_v30 = vpop.xlane.xlu1 %701  ;;  %1166 = vmatmul.mubr.bf16.vlgmr.msra.gmra.mrb[0].mxu0 %v957_v28  ;;  %12489 = vmatprep.mubr.bf16.mxu1 %v957_v28  ;;  %v579_v14 = vpop.xlane.xlu0 %578  ;;  %v850_v36 = vmul.f32 %v15010_v35, %v16291_v40  ;;  %v927_v18 = vadd.f32 %v16451_v56, %v888_v34 }
 0x1e8   : > { %15015 = vrsqrt.f32 %v789_v13  ;;  %v758_v38 = vmul.f32 0.0078125, %v702_v30  ;;  %v617_v41 = vmul.f32 0.0078125, %v579_v14  ;;  %v680_v15 = vmul.f32 %v16463_v60, %v16463_v60  ;;  %1175 = vmatprep.mubr.bf16.mxu0 %v20526_v5 }
 0x1e9   : > { %v889_v39 = vmul.f32 %v16439_v16, %v850_v36 }
 0x1ea   : > { %v15012_v4 = vpop.eup %15011  ;;  %v790_v44 = vadd.f32 1e-05, %v758_v38  ;;  %737 = vadd.xlane.f32.xlu1 %v680_v15  ;;  %v16472_v17 = vsub.f32 %v16339_v25, %v617_v41 }
 0x1eb   : > { %v581_v49 = vpop.xlane.xlu1 %580  ;;  %v704_v40 = vpop.xlane.xlu0 %703  ;;  %v928_v26 = vadd.f32 %v16451_v56, %v889_v39  ;;  %v851_v51 = vmul.f32 %v15012_v4, %v16300_v45 }
 0x1ec   : > { %15017 = vrsqrt.f32 %v790_v44  ;;  %v618_v53 = vmul.f32 0.0078125, %v581_v49  ;;  %v759_v54 = vmul.f32 0.0078125, %v704_v40  ;;  %v681_v55 = vmul.f32 %v16472_v17, %v16472_v17 }
 0x1ed   : > { %v958_v52 = vpack.c.bf16 %v928_v26, %v927_v18  ;;  %v890_v45 = vmul.f32 %v16439_v16, %v851_v51 }
 0x1ee   : > { %v15014_v59 = vpop.eup %15013  ;;  %v791_v19 = vadd.f32 1e-05, %v759_v54  ;;  %739 = vadd.xlane.f32.xlu0 %v681_v55  ;;  %v16480_v25 = vsub.f32 %v16348_v37, %v618_v53 }
 0x1ef   : > { %v706_v62 = vpop.xlane.xlu1 %705  ;;  %1176 = vmatmul.mubr.bf16.gmra.mrb[4].mxu0 %v958_v52  ;;  %12490 = vmatmul.mubr.bf16.vlgmr.msra.gmra.mrb[0].mxu1 %v958_v52  ;;  %v583_v63 = vpop.xlane.xlu0 %582  ;;  %v852_v0 = vmul.f32 %v15014_v59, %v16309_v50  ;;  %v929_v13 = vadd.f32 %v16451_v56, %v890_v45 }
 0x1f0   : > { %15019 = vrsqrt.f32 %v791_v19  ;;  %v760_v11 = vmul.f32 0.0078125, %v706_v62  ;;  %v619_v6 = vmul.f32 0.0078125, %v583_v63  ;;  %v682_v22 = vmul.f32 %v16480_v25, %v16480_v25  ;;  %1185 = vmatprep.mubr.bf16.mxu0 %v20526_v5 }
 0x1f1   : > { %v891_v12 = vmul.f32 %v16439_v16, %v852_v0 }
 0x1f2   : > { %v15016_v37 = vpop.eup %15015  ;;  %v792_v7 = vadd.f32 1e-05, %v760_v11  ;;  %741 = vadd.xlane.f32.xlu1 %v682_v22  ;;  %v16489_v28 = vsub.f32 %v16357_v48, %v619_v6 }
 0x1f3   : > { %v585_v35 = vpop.xlane.xlu1 %584  ;;  %v708_v50 = vpop.xlane.xlu0 %707  ;;  %v930_v30 = vadd.f32 %v16451_v56, %v891_v12  ;;  %v853_v14 = vmul.f32 %v15016_v37, %v16318_v58 }
 0x1f4   : > { %15021 = vrsqrt.f32 %v792_v7  ;;  %v620_v36 = vmul.f32 0.0078125, %v585_v35  ;;  %v761_v34 = vmul.f32 0.0078125, %v708_v50  ;;  %v683_v38 = vmul.f32 %v16489_v28, %v16489_v28 }
 0x1f5   : > { %v959_v41 = vpack.c.bf16 %v930_v30, %v929_v13  ;;  %v892_v58 = vmul.f32 %v16439_v16, %v853_v14 }
 0x1f6   : > { %v15018_v15 = vpop.eup %15017  ;;  %v793_v39 = vadd.f32 1e-05, %v761_v34  ;;  %743 = vadd.xlane.f32.xlu0 %v683_v38  ;;  %v16497_v48 = vsub.f32 %v16366_v57, %v620_v36 }
 0x1f7   : > { %v710_v4 = vpop.xlane.xlu1 %709  ;;  %1186 = vmatmul.mubr.bf16.gmra.mrb[8].mxu0 %v959_v41  ;;  %12493 = vmatprep.mubr.bf16.mxu1 %v959_v41  ;;  %v587_v44 = vpop.xlane.xlu0 %586  ;;  %v854_v49 = vmul.f32 %v15018_v15, %v16327_v2  ;;  %v931_v52 = vadd.f32 %v16451_v56, %v892_v58 }
 0x1f8   : > { %15023 = vrsqrt.f32 %v793_v39  ;;  %v762_v40 = vmul.f32 0.0078125, %v710_v4  ;;  %v621_v18 = vmul.f32 0.0078125, %v587_v44  ;;  %v684_v26 = vmul.f32 %v16497_v48, %v16497_v48  ;;  %1195 = vmatprep.mubr.bf16.mxu0 %v20526_v5 }
 0x1f9   : > { %v893_v51 = vmul.f32 %v16439_v16, %v854_v49 }
 0x1fa   : > { %v15020_v57 = vpop.eup %15019  ;;  %v794_v53 = vadd.f32 1e-05, %v762_v40  ;;  %745 = vadd.xlane.f32.xlu1 %v684_v26  ;;  %v16506_v54 = vsub.f32 %v16375_v3, %v621_v18 }
 0x1fb   : > { %v589_v55 = vpop.xlane.xlu1 %588  ;;  %v712_v2 = vpop.xlane.xlu0 %711  ;;  %v932_v59 = vadd.f32 %v16451_v56, %v893_v51  ;;  %v855_v19 = vmul.f32 %v15020_v57, %v16336_v23 }
 0x1fc   : > { %15025 = vrsqrt.f32 %v794_v53  ;;  %v622_v62 = vmul.f32 0.0078125, %v589_v55  ;;  %v763_v63 = vmul.f32 0.0078125, %v712_v2  ;;  %v685_v0 = vmul.f32 %v16506_v54, %v16506_v54 }
 0x1fd   : > { %v960_v45 = vpack.c.bf16 %v932_v59, %v931_v52  ;;  %v894_v23 = vmul.f32 %v16439_v16, %v855_v19 }
 0x1fe   : > { %v15022_v11 = vpop.eup %15021  ;;  %v795_v6 = vadd.f32 1e-05, %v763_v63  ;;  %747 = vadd.xlane.f32.xlu0 %v685_v0  ;;  %v16514_v3 = vsub.f32 %v16388_v27, %v622_v62 }
 0x1ff   : > { %v714_v22 = vpop.xlane.xlu1 %713  ;;  %1196 = vmatmul.mubr.bf16.gmra.mrb[12].mxu0 %v960_v45  ;;  %12494 = vmatmul.mubr.bf16.gmra.mrb[4].mxu1 %v960_v45  ;;  %v716_v12 = vpop.xlane.xlu0 %715  ;;  %v856_v37 = vmul.f32 %v15022_v11, %v16345_v33  ;;  %v933_v33 = vadd.f32 %v16451_v56, %v894_v23 }
 0x200   : > { %15027 = vrsqrt.f32 %v795_v6  ;;  %v764_v7 = vmul.f32 0.0078125, %v714_v22  ;;  %v765_v35 = vmul.f32 0.0078125, %v716_v12  ;;  %v686_v50 = vmul.f32 %v16514_v3, %v16514_v3  ;;  %1205 = vmatprep.mubr.bf16.mxu0 %v20526_v5 }
 0x201   : > { %v895_v13 = vmul.f32 %v16439_v16, %v856_v37 }
 0x202   : > { %v15024_v27 = vpop.eup %15023  ;;  %v796_v30 = vadd.f32 1e-05, %v764_v7  ;;  %v797_v14 = vadd.f32 1e-05, %v765_v35  ;;  %749 = vadd.xlane.f32.xlu1 %v686_v50 }
 0x203   : > { %v718_v36 = vpop.xlane.xlu1 %717  ;;  %v720_v34 = vpop.xlane.xlu0 %719  ;;  %v934_v38 = vadd.f32 %v16451_v56, %v895_v13  ;;  %v857_v41 = vmul.f32 %v15024_v27, %v16354_v9 }
 0x204   : > { %15029 = vrsqrt.f32 %v796_v30  ;;  %v766_v15 = vmul.f32 0.0078125, %v718_v36  ;;  %v767_v39 = vmul.f32 0.0078125, %v720_v34 }
 0x205   : > { %15031 = vrsqrt.f32 %v797_v14  ;;  %v961_v4 = vpack.c.bf16 %v934_v38, %v933_v33  ;;  %v896_v51 = vmul.f32 %v16439_v16, %v857_v41 }
 0x206   : > { %v15026_v44 = vpop.eup %15025  ;;  %v798_v49 = vadd.f32 1e-05, %v766_v15  ;;  %v799_v58 = vadd.f32 1e-05, %v767_v39 }
 0x207   : > { %v722_v40 = vpop.xlane.xlu1 %721  ;;  %1206 = vmatmul.mubr.bf16.gmra.mrb[16].mxu0 %v961_v4  ;;  %12497 = vmatprep.mubr.bf16.mxu1 %v961_v4  ;;  %v724_v18 = vpop.xlane.xlu0 %723  ;;  %v858_v26 = vmul.f32 %v15026_v44, %v16363_v10  ;;  %v935_v19 = vadd.f32 %v16451_v56, %v896_v51 }
 0x208   : > { %15033 = vrsqrt.f32 %v798_v49  ;;  %v768_v57 = vmul.f32 0.0078125, %v722_v40  ;;  %v769_v53 = vmul.f32 0.0078125, %v724_v18  ;;  %1215 = vmatprep.mubr.bf16.mxu0 %v20526_v5 }
 0x209   : > { %15035 = vrsqrt.f32 %v799_v58  ;;  %v897_v9 = vmul.f32 %v16439_v16, %v858_v26 }
 0x20a   : > { %v15028_v55 = vpop.eup %15027  ;;  %v800_v2 = vadd.f32 1e-05, %v768_v57  ;;  %v801_v52 = vadd.f32 1e-05, %v769_v53 }
 0x20b   : > { %v726_v59 = vpop.xlane.xlu1 %725  ;;  %v936_v62 = vadd.f32 %v16451_v56, %v897_v9  ;;  %v859_v10 = vmul.f32 %v15028_v55, %v16372_v1 }
 0x20c   : > { %15037 = vrsqrt.f32 %v800_v2  ;;  %v770_v63 = vmul.f32 0.0078125, %v726_v59 }
 0x20d   : > { %15039 = vrsqrt.f32 %v801_v52  ;;  %v962_v0 = vpack.c.bf16 %v936_v62, %v935_v19  ;;  %v898_v12 = vmul.f32 %v16439_v16, %v859_v10 }
 0x20e   : > { %v15030_v45 = vpop.eup %15029  ;;  %v802_v11 = vadd.f32 1e-05, %v770_v63 }
 0x20f   : > { %v15032_v6 = vpop.eup %15031  ;;  %1216 = vmatmul.mubr.bf16.gmra.mrb[20].mxu0 %v962_v0  ;;  %12498 = vmatmul.mubr.bf16.gmra.mrb[8].mxu1 %v962_v0  ;;  %v860_v22 = vmul.f32 %v15030_v45, %v16379_v20  ;;  %v937_v50 = vadd.f32 %v16451_v56, %v898_v12 }
 0x210   : > { %15041 = vrsqrt.f32 %v802_v11  ;;  %1225 = vmatprep.mubr.bf16.mxu0 %v20526_v5  ;;  %v861_v37 = vmul.f32 %v15032_v6, %v16385_v24 }
 0x211   : > { %v899_v1 = vmul.f32 %v16439_v16, %v860_v22 }
 0x212   : > { %v15034_v23 = vpop.eup %15033  ;;  %v900_v7 = vmul.f32 %v16439_v16, %v861_v37 }
 0x213   : > { %v15036_v35 = vpop.eup %15035  ;;  %v938_v13 = vadd.f32 %v16451_v56, %v899_v1  ;;  %v862_v27 = vmul.f32 %v15034_v23, %v16393_v29 }
 0x214   : > { %v863_v20 = vmul.f32 %v15036_v35, %v16399_v8  ;;  %v939_v24 = vadd.f32 %v16451_v56, %v900_v7 }
 0x215   : > { %v963_v30 = vpack.c.bf16 %v938_v13, %v937_v50  ;;  %v901_v14 = vmul.f32 %v16439_v16, %v862_v27 }
 0x216   : > { %v15038_v36 = vpop.eup %15037  ;;  %v902_v41 = vmul.f32 %v16439_v16, %v863_v20 }
 0x217   : > { %v15040_v34 = vpop.eup %15039  ;;  %1226 = vmatmul.mubr.bf16.gmra.mrb[24].mxu0 %v963_v30  ;;  %12501 = vmatprep.mubr.bf16.mxu1 %v963_v30  ;;  %v940_v33 = vadd.f32 %v16451_v56, %v901_v14  ;;  %v864_v38 = vmul.f32 %v15038_v36, %v16406_v42 }
 0x218   : > { %1235 = vmatprep.mubr.bf16.mxu0 %v20526_v5  ;;  %v865_v29 = vmul.f32 %v15040_v34, %v16409_v43  ;;  %v941_v4 = vadd.f32 %v16451_v56, %v902_v41 }
 0x219   : > { %v964_v8 = vpack.c.bf16 %v940_v33, %v939_v24  ;;  %v903_v15 = vmul.f32 %v16439_v16, %v864_v38 }
 0x21a   : > { %v15042_v39 = vpop.eup %15041  ;;  %v904_v58 = vmul.f32 %v16439_v16, %v865_v29 }
 0x21b   : > { %12502 = vmatmul.mubr.bf16.gmra.mrb[12].mxu1 %v964_v8  ;;  %v942_v44 = vadd.f32 %v16451_v56, %v903_v15  ;;  %v866_v49 = vmul.f32 %v15042_v39, %v16416_v47 }
 0x21c   : > { %v943_v43 = vadd.f32 %v16451_v56, %v904_v58 }
 0x21d   : > { %v965_v42 = vpack.c.bf16 %v942_v44, %v941_v4  ;;  %v905_v40 = vmul.f32 %v16439_v16, %v866_v49 }
 0x21f   : > { %1236 = vmatmul.mubr.bf16.gmra.mrb[28].mxu0 %v964_v8  ;;  %12505 = vmatprep.mubr.bf16.mxu1 %v965_v42  ;;  %v944_v18 = vadd.f32 %v16451_v56, %v905_v40 }
 0x220   : > { %1245 = vmatprep.mubr.bf16.mxu0 %v20526_v5 }
 0x221   : > { %v966_v26 = vpack.c.bf16 %v944_v18, %v943_v43 }
 0x223   : > { %12506 = vmatmul.mubr.bf16.gmra.mrb[16].mxu1 %v966_v26 }
 0x227   : > { %1246 = vmatmul.mubr.bf16.gmra.mrb[32].mxu0 %v965_v42 }
 0x228   : > { %1255 = vmatprep.mubr.bf16.mxu0 %v20526_v5 }
 0x22f   : > { %1256 = vmatmul.mubr.bf16.gmra.mrb[36].mxu0 %v966_v26 }
 0x230   : > { %1265 = vmatprep.mubr.bf16.mxu0 %v20526_v5 }
 0x263   : > { %v728_v47 = vpop.xlane.xlu0 %727 }
 0x264   : > { %v771_v51 = vmul.f32 0.0078125, %v728_v47 }
 0x266   : > { %v803_v57 = vadd.f32 1e-05, %v771_v51 }
 0x267   : > { %v730_v53 = vpop.xlane.xlu1 %729 }
 0x268   : > { %15043 = vrsqrt.f32 %v803_v57  ;;  %v772_v9 = vmul.f32 0.0078125, %v730_v53 }
 0x26a   : > { %v804_v55 = vadd.f32 1e-05, %v772_v9 }
 0x26b   : > { %v732_v2 = vpop.xlane.xlu0 %731 }
 0x26c   : > { %15045 = vrsqrt.f32 %v804_v55  ;;  %v773_v52 = vmul.f32 0.0078125, %v732_v2 }
 0x26e   : > { %v805_v59 = vadd.f32 1e-05, %v773_v52 }
 0x26f   : > { %v734_v19 = vpop.xlane.xlu1 %733 }
 0x270   : > { %15047 = vrsqrt.f32 %v805_v59  ;;  %v774_v62 = vmul.f32 0.0078125, %v734_v19 }
 0x272   : > { %v15044_v10 = vpop.eup %15043  ;;  %v806_v63 = vadd.f32 1e-05, %v774_v62 }
 0x273   : > { %v736_v0 = vpop.xlane.xlu0 %735  ;;  %v867_v45 = vmul.f32 %v15044_v10, %v16421_v61 }
 0x274   : > { %15049 = vrsqrt.f32 %v806_v63  ;;  %v775_v11 = vmul.f32 0.0078125, %v736_v0 }
 0x275   : > { %v906_v1 = vmul.f32 %v16439_v16, %v867_v45 }
 0x276   : > { %v15046_v6 = vpop.eup %15045  ;;  %v807_v22 = vadd.f32 1e-05, %v775_v11 }
 0x277   : > { %v738_v12 = vpop.xlane.xlu1 %737  ;;  %v868_v37 = vmul.f32 %v15046_v6, %v16426_v21  ;;  %v945_v27 = vadd.f32 %v16451_v56, %v906_v1 }
 0x278   : > { %15051 = vrsqrt.f32 %v807_v22  ;;  %v776_v23 = vmul.f32 0.0078125, %v738_v12 }
 0x279   : > { %v907_v7 = vmul.f32 %v16439_v16, %v868_v37 }
 0x27a   : > { %v15048_v35 = vpop.eup %15047  ;;  %v808_v50 = vadd.f32 1e-05, %v776_v23 }
 0x27b   : > { %v740_v13 = vpop.xlane.xlu0 %739  ;;  %v946_v61 = vadd.f32 %v16451_v56, %v907_v7  ;;  %v869_v20 = vmul.f32 %v15048_v35, %v16431_v31 }
 0x27c   : > { %15053 = vrsqrt.f32 %v808_v50  ;;  %v777_v30 = vmul.f32 0.0078125, %v740_v13 }
 0x27d   : > { %v967_v14 = vpack.c.bf16 %v946_v61, %v945_v27  ;;  %v908_v33 = vmul.f32 %v16439_v16, %v869_v20 }
 0x27e   : > { %v15050_v36 = vpop.eup %15049  ;;  %v809_v21 = vadd.f32 1e-05, %v777_v30 }
 0x27f   : > { %v742_v24 = vpop.xlane.xlu1 %741  ;;  %1266 = vmatmul.mubr.bf16.gmra.mrb[40].mxu0 %v967_v14  ;;  %12509 = vmatprep.mubr.bf16.mxu1 %v967_v14  ;;  %v870_v34 = vmul.f32 %v15050_v36, %v16442_v46  ;;  %v947_v15 = vadd.f32 %v16451_v56, %v908_v33 }
 0x280   : > { %15055 = vrsqrt.f32 %v809_v21  ;;  %v778_v38 = vmul.f32 0.0078125, %v742_v24  ;;  %1275 = vmatprep.mubr.bf16.mxu0 %v20526_v5 }
 0x281   : > { %v909_v41 = vmul.f32 %v16439_v16, %v870_v34 }
 0x282   : > { %v15052_v29 = vpop.eup %15051  ;;  %v810_v31 = vadd.f32 1e-05, %v778_v38 }
 0x283   : > { %v744_v8 = vpop.xlane.xlu0 %743  ;;  %v948_v39 = vadd.f32 %v16451_v56, %v909_v41  ;;  %v871_v4 = vmul.f32 %v15052_v29, %v16455_v32 }
 0x284   : > { %15057 = vrsqrt.f32 %v810_v31  ;;  %v779_v44 = vmul.f32 0.0078125, %v744_v8 }
 0x285   : > { %v968_v46 = vpack.c.bf16 %v948_v39, %v947_v15  ;;  %v910_v43 = vmul.f32 %v16439_v16, %v871_v4 }
 0x286   : > { %v15054_v49 = vpop.eup %15053  ;;  %v811_v58 = vadd.f32 1e-05, %v779_v44 }
 0x287   : > { %v746_v42 = vpop.xlane.xlu1 %745  ;;  %1276 = vmatmul.mubr.bf16.gmra.mrb[44].mxu0 %v968_v46  ;;  %12510 = vmatmul.mubr.bf16.gmra.mrb[20].mxu1 %v968_v46  ;;  %v872_v40 = vmul.f32 %v15054_v49, %v16463_v60  ;;  %v949_v57 = vadd.f32 %v16451_v56, %v910_v43 }
 0x288   : > { %15059 = vrsqrt.f32 %v811_v58  ;;  %v780_v18 = vmul.f32 0.0078125, %v746_v42  ;;  %1285 = vmatprep.mubr.bf16.mxu0 %v20526_v5 }
 0x289   : > { %v911_v26 = vmul.f32 %v16439_v16, %v872_v40 }
 0x28a   : > { %v15056_v47 = vpop.eup %15055  ;;  %v812_v32 = vadd.f32 1e-05, %v780_v18 }
 0x28b   : > { %v748_v51 = vpop.xlane.xlu0 %747  ;;  %v950_v53 = vadd.f32 %v16451_v56, %v911_v26  ;;  %v873_v9 = vmul.f32 %v15056_v47, %v16472_v17 }
 0x28c   : > { %15061 = vrsqrt.f32 %v812_v32  ;;  %v781_v55 = vmul.f32 0.0078125, %v748_v51 }
 0x28d   : > { %v969_v60 = vpack.c.bf16 %v950_v53, %v949_v57  ;;  %v912_v62 = vmul.f32 %v16439_v16, %v873_v9 }
 0x28e   : > { %v15058_v2 = vpop.eup %15057  ;;  %v813_v52 = vadd.f32 1e-05, %v781_v55 }
 0x28f   : > { %v750_v59 = vpop.xlane.xlu1 %749  ;;  %1286 = vmatmul.mubr.bf16.gmra.mrb[48].mxu0 %v969_v60  ;;  %12513 = vmatprep.mubr.bf16.mxu1 %v969_v60  ;;  %v874_v19 = vmul.f32 %v15058_v2, %v16480_v25  ;;  %v951_v45 = vadd.f32 %v16451_v56, %v912_v62 }
 0x290   : > { %15063 = vrsqrt.f32 %v813_v52  ;;  %v782_v10 = vmul.f32 0.0078125, %v750_v59  ;;  %1295 = vmatprep.mubr.bf16.mxu0 %v20526_v5 }
 0x291   : > { %v913_v63 = vmul.f32 %v16439_v16, %v874_v19 }
 0x292   : > { %v15060_v0 = vpop.eup %15059  ;;  %v814_v17 = vadd.f32 1e-05, %v782_v10 }
 0x293   : > { %v952_v11 = vadd.f32 %v16451_v56, %v913_v63  ;;  %v875_v6 = vmul.f32 %v15060_v0, %v16489_v28 }
 0x294   : > { %15065 = vrsqrt.f32 %v814_v17 }
 0x295   : > { %v970_v22 = vpack.c.bf16 %v952_v11, %v951_v45  ;;  %v914_v37 = vmul.f32 %v16439_v16, %v875_v6 }
 0x296   : > { %v15062_v12 = vpop.eup %15061 }
 0x297   : > { %1296 = vmatmul.mubr.bf16.gmra.mrb[52].mxu0 %v970_v22  ;;  %12514 = vmatmul.mubr.bf16.gmra.mrb[24].mxu1 %v970_v22  ;;  %v876_v25 = vmul.f32 %v15062_v12, %v16497_v48  ;;  %v953_v7 = vadd.f32 %v16451_v56, %v914_v37 }
 0x298   : > { %1305 = vmatprep.mubr.bf16.mxu0 %v20526_v5 }
 0x299   : > { %v915_v1 = vmul.f32 %v16439_v16, %v876_v25 }
 0x29a   : > { %v15064_v23 = vpop.eup %15063 }
 0x29b   : > { %v954_v35 = vadd.f32 %v16451_v56, %v915_v1  ;;  %v877_v28 = vmul.f32 %v15064_v23, %v16506_v54 }
 0x29d   : > { %v971_v50 = vpack.c.bf16 %v954_v35, %v953_v7  ;;  %v916_v48 = vmul.f32 %v16439_v16, %v877_v28 }
 0x29e   : > { %v15066_v13 = vpop.eup %15065 }
 0x29f   : > { %1306 = vmatmul.mubr.bf16.gmra.mrb[56].mxu0 %v971_v50  ;;  %12517 = vmatprep.mubr.bf16.mxu1 %v971_v50  ;;  %v878_v27 = vmul.f32 %v15066_v13, %v16514_v3  ;;  %v955_v20 = vadd.f32 %v16451_v56, %v916_v48 }
 0x2a0   : > { %1315 = vmatprep.mubr.bf16.mxu0 %v20526_v5 }
 0x2a1   : > { %v917_v61 = vmul.f32 %v16439_v16, %v878_v27 }
 0x2a3   : > { %v956_v30 = vadd.f32 %v16451_v56, %v917_v61 }
 0x2a5   : > { %v972_v14 = vpack.c.bf16 %v956_v30, %v955_v20 }
 0x2a7   : > { %1316 = vmatmul.mubr.bf16.gmra.mrb[60].mxu0 %v972_v14  ;;  %12518 = vmatmul.mubr.bf16.gmra.mrb[28].mxu1 %v972_v14 }
 0x2ba   : > { %v16601_v54 = vpop.f32.mrb[0].mxu0 }
 0x2bb   : > { %20742 = vst [vmem:[#allocation18_spill] sm:$0xff] %v16601_v54  ;;  %v1169_v36 = vpop.f32.mrb[1].mxu0  ;;  %3016 = vrot.lane.b32.xlu0 %v16601_v54, %s15907_s28  ;;  %12537 = vmatprep.mubr.msk.f32.mxu1 %vm1514_vm0, %v16601_v54 }
 0x2bc   : > { %v16607_v3 = vpop.f32.mrb[2].mxu0 }
 0x2bd   : > { %20743 = vst [vmem:[#allocation19_spill] sm:$0xff] %v16607_v3  ;;  %v1173_v16 = vpop.f32.mrb[3].mxu0 }
 0x2be   : > { %v13561_v21 = vpack.c.bf16 %v1173_v16, %v1169_v36  ;;  %v16615_v24 = vpack.i.bf16 %v1173_v16, %v1169_v36 }
 0x2bf   : > { %3018 = vrot.lane.b32.xlu0 %v16607_v3, %s15907_s28 }
 0x2c0   : > { %20746 = vst [vmem:[#allocation20_spill] sm:$0xff] %v16615_v24  ;;  %13563 = vmatprep.subr.msk.bf16.mxu1 %vm16611_vm1, %v13561_v21 }
 0x2c1   : > { %13566 = vmatpush3.bf16.xpose.msk.msra.mxu1 %vm16611_vm1, %v13561_v21 }
 0x2c2   : > { %v16623_v34 = vpop.f32.mrb[4].mxu0  ;;  %v12491_v33 = vpop.f32.mrb[0].mxu1 }
 0x2c3   : > { %20747 = vst [vmem:[#allocation21_spill] sm:$0xff] %v16623_v34  ;;  %v1179_v38 = vpop.f32.mrb[5].mxu0  ;;  %v1360_v41 = vpop.f32.mrb[1].mxu1  ;;  %14404 = vrot.lane.b32.xlu0 %v16615_v24, %s15907_s28 }
 0x2c4   : > { %v16627_v29 = vpop.f32.mrb[6].mxu0  ;;  %v12492_v31 = vpop.f32.mrb[2].mxu1 }
 0x2c5   : > { %20748 = vst [vmem:[#allocation22_spill] sm:$0xff] %v16627_v29  ;;  %v1183_v8 = vpop.f32.mrb[7].mxu0  ;;  %v1363_v15 = vpop.f32.mrb[3].mxu1  ;;  %v16629_v39 = vpack.c.bf16 %v12492_v31, %v12491_v33  ;;  %v16631_v4 = vpack.i.bf16 %v12492_v31, %v12491_v33 }
 0x2c6   : > { %v16633_v44 = vpack.i.bf16 %v1183_v8, %v1179_v38  ;;  %v13567_v46 = vpack.c.bf16 %v1183_v8, %v1179_v38  ;;  %v16635_v49 = vpack.c.bf16 %v1363_v15, %v1360_v41  ;;  %v16637_v58 = vpack.i.bf16 %v1363_v15, %v1360_v41 }
 0x2c7   : > { %20749 = vst [vmem:[#allocation23_spill] sm:$0xff] %v16631_v4  ;;  %3020 = vrot.lane.b32.xlu0 %v16623_v34, %s15907_s28 }
 0x2c8   : > { %20750 = vst [vmem:[#allocation24_spill] sm:$0xff] %v16633_v44  ;;  %20751 = vst [vmem:[#allocation25_spill] sm:$0xff] %v16637_v58  ;;  %14409 = vrot.lane.b32.xlu1 %v16633_v44, %s15907_s28  ;;  %13569 = vmatprep.subr.msk.bf16.mxu1 %vm16611_vm1, %v13567_v46 }
 0x2c9   : > { %13572 = vmatpush3.bf16.xpose.msk.msra.mxu1 %vm16611_vm1, %v13567_v46 }
 0x2ca   : > { %v16647_v42 = vpop.f32.mrb[8].mxu0 }
 0x2cb   : > { %20752 = vst [vmem:[#allocation26_spill] sm:$0xff] %v16647_v42  ;;  %v1189_v40 = vpop.f32.mrb[9].mxu0  ;;  %3022 = vrot.lane.b32.xlu0 %v16627_v29, %s15907_s28 }
 0x2cc   : > { %v16651_v43 = vpop.f32.mrb[10].mxu0 }
 0x2cd   : > { %20753 = vst [vmem:[#allocation27_spill] sm:$0xff] %v16651_v43  ;;  %v1193_v18 = vpop.f32.mrb[11].mxu0 }
 0x2ce   : > { %v13573_v26 = vpack.c.bf16 %v1193_v18, %v1189_v40  ;;  %v16653_v47 = vpack.i.bf16 %v1193_v18, %v1189_v40 }
 0x2d0   : > { %20754 = vst [vmem:[#allocation28_spill] sm:$0xff] %v16653_v47  ;;  %13575 = vmatprep.subr.msk.bf16.mxu1 %vm16611_vm1, %v13573_v26  ;;  %14414 = vrot.lane.b32.xlu0 %v16653_v47, %s15907_s28 }
 0x2d1   : > { %13578 = vmatpush3.bf16.xpose.msk.msra.mxu1 %vm16611_vm1, %v13573_v26 }
 0x2d2   : > { %v16661_v32 = vpop.f32.mrb[12].mxu0  ;;  %v12495_v51 = vpop.f32.mrb[4].mxu1 }
 0x2d3   : > { %20755 = vst [vmem:[#allocation29_spill] sm:$0xff] %v16661_v32  ;;  %v1199_v57 = vpop.f32.mrb[13].mxu0  ;;  %v1376_v53 = vpop.f32.mrb[5].mxu1 }
 0x2d4   : > { %v16663_v9 = vpop.f32.mrb[14].mxu0  ;;  %v12496_v55 = vpop.f32.mrb[6].mxu1 }
 0x2d5   : > { %20756 = vst [vmem:[#allocation30_spill] sm:$0xff] %v16663_v9  ;;  %v1203_v60 = vpop.f32.mrb[15].mxu0  ;;  %v1379_v2 = vpop.f32.mrb[7].mxu1  ;;  %v16665_v52 = vpack.c.bf16 %v12496_v55, %v12495_v51  ;;  %v16667_v59 = vpack.i.bf16 %v12496_v55, %v12495_v51 }
 0x2d6   : > { %v13579_v19 = vpack.c.bf16 %v1203_v60, %v1199_v57  ;;  %v16669_v62 = vpack.i.bf16 %v1203_v60, %v1199_v57  ;;  %v16671_v10 = vpack.c.bf16 %v1379_v2, %v1376_v53  ;;  %v16673_v63 = vpack.i.bf16 %v1379_v2, %v1376_v53 }
 0x2d7   : > { %20757 = vst [vmem:[#allocation31_spill] sm:$0xff] %v16667_v59 }
 0x2d8   : > { %20758 = vst [vmem:[#allocation32_spill] sm:$0xff] %v16669_v62  ;;  %20759 = vst [vmem:[#allocation33_spill] sm:$0xff] %v16673_v63  ;;  %13581 = vmatprep.subr.msk.bf16.mxu1 %vm16611_vm1, %v13579_v19  ;;  %14419 = vrot.lane.b32.xlu0 %v16669_v62, %s15907_s28 }
 0x2d9   : > { %13584 = vmatpush3.bf16.xpose.msk.msra.mxu1 %vm16611_vm1, %v13579_v19 }
 0x2da   : > { %v16681_v0 = vpop.f32.mrb[16].mxu0 }
 0x2db   : > { %20760 = vst [vmem:[#allocation34_spill] sm:$0xff] %v16681_v0  ;;  %v1209_v17 = vpop.f32.mrb[17].mxu0 }
 0x2dc   : > { %v16683_v45 = vpop.f32.mrb[18].mxu0  ;;  %3185 = vrot.lane.b32.xlu0 %v16681_v0, %s15907_s28 }
 0x2dd   : > { %20761 = vst [vmem:[#allocation35_spill] sm:$0xff] %v16683_v45  ;;  %v1213_v11 = vpop.f32.mrb[19].mxu0 }
 0x2de   : > { %v16687_v6 = vpack.i.bf16 %v1213_v11, %v1209_v17  ;;  %v13585_v22 = vpack.c.bf16 %v1213_v11, %v1209_v17 }
 0x2e0   : > { %20762 = vst [vmem:[#allocation36_spill] sm:$0xff] %v16687_v6  ;;  %14424 = vrot.lane.b32.xlu1 %v16687_v6, %s15907_s28  ;;  %13587 = vmatprep.subr.msk.bf16.mxu1 %vm16611_vm1, %v13585_v22 }
 0x2e1   : > { %3187 = vrot.lane.b32.xlu0 %v16683_v45, %s15907_s28  ;;  %12538 = vmatmul.mubr.msk.f32.vlgmr.msra.gmra.mrb[32].mxu1 %vm1514_vm0, %v16607_v3 }
 0x2e2   : > { %12540 = vmatprep.mubr.msk.f32.mxu1 %vm1514_vm0, %v16623_v34  ;;  %13590 = vmatpush3.bf16.xpose.msk.msra.mxu1 %vm16611_vm1, %v13585_v22  ;;  %v16701_v12 = vpop.f32.mrb[20].mxu0  ;;  %v12499_v25 = vpop.f32.mrb[8].mxu1 }
 0x2e3   : > { %20763 = vst [vmem:[#allocation37_spill] sm:$0xff] %v16701_v12  ;;  %v1219_v37 = vpop.f32.mrb[21].mxu0  ;;  %v1392_v1 = vpop.f32.mrb[9].mxu1 }
 0x2e4   : > { %v16703_v23 = vpop.f32.mrb[22].mxu0  ;;  %v12500_v7 = vpop.f32.mrb[10].mxu1 }
 0x2e5   : > { %20764 = vst [vmem:[#allocation38_spill] sm:$0xff] %v16703_v23  ;;  %3189 = vrot.lane.b32.xlu0 %v16701_v12, %s15907_s28  ;;  %12541 = vmatmul.mubr.msk.f32.gmra.mrb[34].mxu1 %vm1514_vm0, %v16627_v29  ;;  %v1395_v35 = vpop.f32.mrb[11].mxu1  ;;  %v1223_v28 = vpop.f32.mrb[23].mxu0  ;;  %v16709_v50 = vpack.c.bf16 %v12500_v7, %v12499_v25  ;;  %v16711_v13 = vpack.i.bf16 %v12500_v7, %v12499_v25 }
 0x2e6   : > { %3191 = vrot.lane.b32.xlu1 %v16703_v23, %s15907_s28  ;;  %12543 = vmatprep.mubr.msk.f32.mxu1 %vm1514_vm0, %v16647_v42  ;;  %v16717_v27 = vpack.i.bf16 %v1223_v28, %v1219_v37  ;;  %v13591_v48 = vpack.c.bf16 %v1223_v28, %v1219_v37  ;;  %v16719_v61 = vpack.c.bf16 %v1395_v35, %v1392_v1 }
 0x2e7   : > { %20765 = vst [vmem:[#allocation39_spill] sm:$0xff] %v16711_v13  ;;  %v16721_v20 = vpack.i.bf16 %v1395_v35, %v1392_v1 }
 0x2e8   : > { %20766 = vst [vmem:[#allocation40_spill] sm:$0xff] %v16717_v27  ;;  %13593 = vmatprep.subr.msk.bf16.mxu1 %vm16611_vm1, %v13591_v48 }
 0x2e9   : > { %20767 = vst [vmem:[#allocation41_spill] sm:$0xff] %v16721_v20  ;;  %14429 = vrot.lane.b32.xlu0 %v16717_v27, %s15907_s28  ;;  %12544 = vmatmul.mubr.msk.f32.gmra.mrb[36].mxu1 %vm1514_vm0, %v16651_v43 }
 0x2ea   : > { %12546 = vmatprep.mubr.msk.f32.mxu1 %vm1514_vm0, %v16661_v32  ;;  %13596 = vmatpush3.bf16.xpose.msk.msra.mxu1 %vm16611_vm1, %v13591_v48  ;;  %v16733_v30 = vpop.f32.mrb[24].mxu0 }
 0x2eb   : > { %20768 = vst [vmem:[#allocation42_spill] sm:$0xff] %v16733_v30  ;;  %v1229_v14 = vpop.f32.mrb[25].mxu0 }
 0x2ec   : > { %v16735_v36 = vpop.f32.mrb[26].mxu0 }
 0x2ed   : > { %20769 = vst [vmem:[#allocation43_spill] sm:$0xff] %v16735_v36  ;;  %12547 = vmatmul.mubr.msk.f32.gmra.mrb[38].mxu1 %vm1514_vm0, %v16663_v9  ;;  %v1233_v16 = vpop.f32.mrb[27].mxu0 }
 0x2ee   : > { %12565 = vmatprep.mubr.msk.f32.mxu1 %vm1514_vm0, %v16681_v0  ;;  %v12503_v21 = vpop.f32.mrb[12].mxu1  ;;  %v16741_v33 = vpack.i.bf16 %v1233_v16, %v1229_v14  ;;  %v13597_v38 = vpack.c.bf16 %v1233_v16, %v1229_v14 }
 0x2ef   : > { %v1408_v41 = vpop.f32.mrb[13].mxu1 }
 0x2f0   : > { %20770 = vst [vmem:[#allocation44_spill] sm:$0xff] %v16741_v33  ;;  %14434 = vrot.lane.b32.xlu0 %v16741_v33, %s15907_s28  ;;  %v12504_v31 = vpop.f32.mrb[14].mxu1  ;;  %13599 = vmatprep.subr.msk.bf16.mxu1 %vm16611_vm1, %v13597_v38 }
 0x2f1   : > { %v1411_v8 = vpop.f32.mrb[15].mxu1  ;;  %v16747_v15 = vpack.c.bf16 %v12504_v31, %v12503_v21  ;;  %v16749_v46 = vpack.i.bf16 %v12504_v31, %v12503_v21 }
 0x2f2   : > { %13602 = vmatpush3.bf16.xpose.msk.msra.mxu1 %vm16611_vm1, %v13597_v38  ;;  %v16753_v40 = vpop.f32.mrb[28].mxu0  ;;  %v16755_v18 = vpack.c.bf16 %v1411_v8, %v1408_v41  ;;  %v16757_v26 = vpack.i.bf16 %v1411_v8, %v1408_v41 }
 0x2f3   : > { %20771 = vst [vmem:[#allocation45_spill] sm:$0xff] %v16749_v46  ;;  %20772 = vst [vmem:[#allocation46_spill] sm:$0xff] %v16753_v40  ;;  %v1239_v51 = vpop.f32.mrb[29].mxu0 }
 0x2f4   : > { %20773 = vst [vmem:[#allocation47_spill] sm:$0xff] %v16757_v26  ;;  %v16759_v57 = vpop.f32.mrb[30].mxu0 }
 0x2f5   : > { %20774 = vst [vmem:[#allocation48_spill] sm:$0xff] %v16759_v57  ;;  %v1243_v53 = vpop.f32.mrb[31].mxu0 }
 0x2f6   : > { %v12507_v55 = vpop.f32.mrb[16].mxu1  ;;  %v16761_v60 = vpack.i.bf16 %v1243_v53, %v1239_v51  ;;  %v13603_v2 = vpack.c.bf16 %v1243_v53, %v1239_v51 }
 0x2f7   : > { %v1424_v19 = vpop.f32.mrb[17].mxu1 }
 0x2f8   : > { %20775 = vst [vmem:[#allocation49_spill] sm:$0xff] %v16761_v60  ;;  %14439 = vrot.lane.b32.xlu0 %v16761_v60, %s15907_s28  ;;  %v12508_v17 = vpop.f32.mrb[18].mxu1  ;;  %13605 = vmatprep.subr.msk.bf16.mxu1 %vm16611_vm1, %v13603_v2 }
 0x2f9   : > { %v1427_v11 = vpop.f32.mrb[19].mxu1  ;;  %v16767_v22 = vpack.c.bf16 %v12508_v17, %v12507_v55  ;;  %v16769_v25 = vpack.i.bf16 %v12508_v17, %v12507_v55 }
 0x2fa   : > { %13608 = vmatpush3.bf16.xpose.msk.msra.mxu1 %vm16611_vm1, %v13603_v2  ;;  %v16773_v37 = vpop.f32.mrb[32].mxu0  ;;  %v16775_v1 = vpack.c.bf16 %v1427_v11, %v1424_v19  ;;  %v16777_v7 = vpack.i.bf16 %v1427_v11, %v1424_v19 }
 0x2fb   : > { %20776 = vst [vmem:[#allocation50_spill] sm:$0xff] %v16769_v25  ;;  %20777 = vst [vmem:[#allocation51_spill] sm:$0xff] %v16773_v37  ;;  %v1249_v35 = vpop.f32.mrb[33].mxu0  ;;  %12593 = vmatprep.mubr.msk.f32.mxu0 %vm1514_vm0, %v16773_v37 }
 0x2fc   : > { %20778 = vst [vmem:[#allocation52_spill] sm:$0xff] %v16777_v7  ;;  %v16781_v28 = vpop.f32.mrb[34].mxu0 }
 0x2fd   : > { %20779 = vst [vmem:[#allocation53_spill] sm:$0xff] %v16781_v28  ;;  %v1253_v48 = vpop.f32.mrb[35].mxu0 }
 0x2fe   : > { %v16783_v14 = vpack.i.bf16 %v1253_v48, %v1249_v35  ;;  %v13609_v16 = vpack.c.bf16 %v1253_v48, %v1249_v35 }
 0x300   : > { %20780 = vst [vmem:[#allocation54_spill] sm:$0xff] %v16783_v14  ;;  %14444 = vrot.lane.b32.xlu0 %v16783_v14, %s15907_s28  ;;  %13611 = vmatprep.subr.msk.bf16.mxu0 %vm16611_vm1, %v13609_v16 }
 0x301   : > { %12566 = vmatmul.mubr.msk.f32.vlgmr.msra.gmra.mrb[40].mxu1 %vm1514_vm0, %v16683_v45  ;;  %13614 = vmatpush3.bf16.xpose.msk.msra.mxu0 %vm16611_vm1, %v13609_v16 }
 0x302   : > { %12568 = vmatprep.mubr.msk.f32.mxu1 %vm1514_vm0, %v16701_v12  ;;  %v16795_v21 = vpop.f32.mrb[36].mxu0 }
 0x303   : > { %20781 = vst [vmem:[#allocation55_spill] sm:$0xff] %v16795_v21  ;;  %v1259_v38 = vpop.f32.mrb[37].mxu0 }
 0x304   : > { %v16797_v41 = vpop.f32.mrb[38].mxu0 }
 0x305   : > { %20782 = vst [vmem:[#allocation56_spill] sm:$0xff] %v16797_v41  ;;  %12569 = vmatmul.mubr.msk.f32.gmra.mrb[42].mxu1 %vm1514_vm0, %v16703_v23  ;;  %v1263_v31 = vpop.f32.mrb[39].mxu0 }
 0x306   : > { %12571 = vmatprep.mubr.msk.f32.mxu1 %vm1514_vm0, %v16733_v30  ;;  %v16803_v8 = vpack.i.bf16 %v1263_v31, %v1259_v38  ;;  %v13615_v51 = vpack.c.bf16 %v1263_v31, %v1259_v38 }
 0x308   : > { %20783 = vst [vmem:[#allocation57_spill] sm:$0xff] %v16803_v8  ;;  %14449 = vrot.lane.b32.xlu0 %v16803_v8, %s15907_s28  ;;  %13617 = vmatprep.subr.msk.bf16.mxu0 %vm16611_vm1, %v13615_v51 }
 0x309   : > { %12572 = vmatmul.mubr.msk.f32.gmra.mrb[44].mxu1 %vm1514_vm0, %v16735_v36  ;;  %13620 = vmatpush3.bf16.xpose.msk.msra.mxu0 %vm16611_vm1, %v13615_v51 }
 0x30a   : > { %12574 = vmatprep.mubr.msk.f32.mxu1 %vm1514_vm0, %v16753_v40 }
 0x30d   : > { %12575 = vmatmul.mubr.msk.f32.gmra.mrb[46].mxu1 %vm1514_vm0, %v16759_v57 }
 0x352   : > { %v16817_v53 = vpop.f32.mrb[40].mxu0 }
 0x353   : > { %20784 = vst [vmem:[#allocation58_spill] sm:$0xff] %v16817_v53  ;;  %v1269_v55 = vpop.f32.mrb[41].mxu0 }
 0x354   : > { %v16819_v2 = vpop.f32.mrb[42].mxu0 }
 0x355   : > { %20785 = vst [vmem:[#allocation59_spill] sm:$0xff] %v16819_v2  ;;  %v1273_v19 = vpop.f32.mrb[43].mxu0 }
 0x356   : > { %v16821_v17 = vpack.i.bf16 %v1273_v19, %v1269_v55  ;;  %v13621_v11 = vpack.c.bf16 %v1273_v19, %v1269_v55 }
 0x358   : > { %20786 = vst [vmem:[#allocation60_spill] sm:$0xff] %v16821_v17  ;;  %14454 = vrot.lane.b32.xlu0 %v16821_v17, %s15907_s28  ;;  %13623 = vmatprep.subr.msk.bf16.mxu0 %vm16611_vm1, %v13621_v11 }
 0x359   : > { %13626 = vmatpush3.bf16.xpose.msk.msra.mxu0 %vm16611_vm1, %v13621_v11 }
 0x35a   : > { %v16829_v35 = vpop.f32.mrb[44].mxu0  ;;  %v12511_v48 = vpop.f32.mrb[20].mxu1 }
 0x35b   : > { %20787 = vst [vmem:[#allocation61_spill] sm:$0xff] %v16829_v35  ;;  %v1279_v16 = vpop.f32.mrb[45].mxu0  ;;  %v1440_v38 = vpop.f32.mrb[21].mxu1 }
 0x35c   : > { %v16831_v31 = vpop.f32.mrb[46].mxu0  ;;  %v12512_v51 = vpop.f32.mrb[22].mxu1 }
 0x35d   : > { %20788 = vst [vmem:[#allocation62_spill] sm:$0xff] %v16831_v31  ;;  %v1283_v5 = vpop.f32.mrb[47].mxu0  ;;  %v1443_v12 = vpop.f32.mrb[23].mxu1  ;;  %v16833_v19 = vpack.c.bf16 %v12512_v51, %v12511_v48  ;;  %v16839_v60 = vpack.i.bf16 %v12512_v51, %v12511_v48 }
 0x35e   : > { %v13627_v55 = vpack.c.bf16 %v1283_v5, %v1279_v16  ;;  %v16835_v8 = vpack.i.bf16 %v1283_v5, %v1279_v16  ;;  %v16837_v0 = vpack.c.bf16 %v1443_v12, %v1440_v38  ;;  %v16841_v11 = vpack.i.bf16 %v1443_v12, %v1440_v38 }
 0x35f   : > { %20790 = vst [vmem:[#allocation64_spill] sm:$0xff] %v16839_v60 }
 0x360   : > { %20789 = vst [vmem:[#allocation63_spill] sm:$0xff] %v16835_v8  ;;  %20791 = vst [vmem:[#allocation65_spill] sm:$0xff] %v16841_v11  ;;  %13629 = vmatprep.subr.msk.bf16.mxu0 %vm16611_vm1, %v13627_v55 }
 0x361   : > { %13632 = vmatpush3.bf16.xpose.msk.msra.mxu0 %vm16611_vm1, %v13627_v55 }
 0x362   : > { %v16847_v34 = vpop.f32.mrb[48].mxu0  ;;  %13658 = vmatprep.subr.bf16.mxu0 %v16635_v49 }
 0x363   : > { %20792 = vst [vmem:[#allocation66_spill] sm:$0xff] %v16847_v34  ;;  %v1289_v27 = vpop.f32.mrb[49].mxu0  ;;  %12621 = vmatprep.mubr.msk.f32.mxu1 %vm1514_vm0, %v16847_v34 }
 0x364   : > { %v16852_v5 = vpop.f32.mrb[50].mxu0 }
 0x365   : > { %20793 = vst [vmem:[#allocation67_spill] sm:$0xff] %v16852_v5  ;;  %v1293_v48 = vpop.f32.mrb[51].mxu0 }
 0x366   : > { %v16854_v16 = vpack.i.bf16 %v1293_v48, %v1289_v27  ;;  %v13633_v12 = vpack.c.bf16 %v1293_v48, %v1289_v27 }
 0x368   : > { %20794 = vst [vmem:[#allocation68_spill] sm:$0xff] %v16854_v16  ;;  %14459 = vrot.lane.b32.xlu1 %v16854_v16, %s15907_s28  ;;  %12594 = vmatmul.mubr.msk.f32.vlgmr.msra.gmra.mrb[64].mxu0 %vm1514_vm0, %v16781_v28 }
 0x369   : > { %13635 = vmatprep.subr.msk.bf16.mxu1 %vm16611_vm1, %v13633_v12  ;;  %12596 = vmatprep.mubr.msk.f32.mxu0 %vm1514_vm0, %v16795_v21 }
 0x36a   : > { %13638 = vmatpush3.bf16.xpose.msk.msra.mxu1 %vm16611_vm1, %v13633_v12  ;;  %13660 = vmatpush3.bf16.msra.mxu0 %v16635_v49  ;;  %v16867_v38 = vpop.f32.mrb[52].mxu0  ;;  %v12515_v27 = vpop.f32.mrb[24].mxu1 }
 0x36b   : > { %20795 = vst [vmem:[#allocation69_spill] sm:$0xff] %v16867_v38  ;;  %13662 = vmatprep.subr.bf16.mxu0 %v16629_v39  ;;  %v1299_v51 = vpop.f32.mrb[53].mxu0  ;;  %v1456_v55 = vpop.f32.mrb[25].mxu1 }
 0x36c   : > { %v16870_v48 = vpop.f32.mrb[54].mxu0  ;;  %12597 = vmatmul.mubr.msk.f32.gmra.mrb[66].mxu0 %vm1514_vm0, %v16797_v41  ;;  %v12516_v16 = vpop.f32.mrb[26].mxu1 }
 0x36d   : > { %20796 = vst [vmem:[#allocation70_spill] sm:$0xff] %v16870_v48  ;;  %v1303_v54 = vpop.f32.mrb[55].mxu0  ;;  %12599 = vmatprep.mubr.msk.f32.mxu0 %vm1514_vm0, %v16817_v53  ;;  %v1459_v12 = vpop.f32.mrb[27].mxu1  ;;  %v16879_v17 = vpack.c.bf16 %v12516_v16, %v12515_v27  ;;  %v16886_v29 = vpack.i.bf16 %v12516_v16, %v12515_v27 }
 0x36e   : > { %13664 = vmatpush3.bf16.msra.mxu0 %v16629_v39  ;;  %v13639_v49 = vpack.c.bf16 %v1303_v54, %v1299_v51  ;;  %v16877_v23 = vpack.i.bf16 %v1303_v54, %v1299_v51  ;;  %v16882_v45 = vpack.c.bf16 %v1459_v12, %v1456_v55  ;;  %v16884_v14 = vpack.i.bf16 %v1459_v12, %v1456_v55 }
 0x36f   : > { %13666 = vmatprep.subr.bf16.mxu0 %v16671_v10  ;;  %20799 = vst [vmem:[#allocation73_spill] sm:$0xff] %v16886_v29 }
 0x370   : > { %20797 = vst [vmem:[#allocation71_spill] sm:$0xff] %v16877_v23  ;;  %20798 = vst [vmem:[#allocation72_spill] sm:$0xff] %v16884_v14  ;;  %12600 = vmatmul.mubr.msk.f32.gmra.mrb[68].mxu0 %vm1514_vm0, %v16819_v2  ;;  %13641 = vmatprep.subr.msk.bf16.mxu1 %vm16611_vm1, %v13639_v49 }
 0x371   : > { %12602 = vmatprep.mubr.msk.f32.mxu0 %vm1514_vm0, %v16829_v35 }
 0x372   : > { %13644 = vmatpush3.bf16.xpose.msk.msra.mxu1 %vm16611_vm1, %v13639_v49  ;;  %13668 = vmatpush3.bf16.msra.mxu0 %v16671_v10  ;;  %v16897_v54 = vpop.f32.mrb[56].mxu0 }
 0x373   : > { %20800 = vst [vmem:[#allocation74_spill] sm:$0xff] %v16897_v54  ;;  %13670 = vmatprep.subr.bf16.mxu0 %v16665_v52  ;;  %v1309_v39 = vpop.f32.mrb[57].mxu0 }
 0x374   : > { %v16900_v16 = vpop.f32.mrb[58].mxu0  ;;  %12603 = vmatmul.mubr.msk.f32.gmra.mrb[70].mxu0 %vm1514_vm0, %v16831_v31 }
 0x375   : > { %20801 = vst [vmem:[#allocation75_spill] sm:$0xff] %v16900_v16  ;;  %v1313_v27 = vpop.f32.mrb[59].mxu0 }
 0x376   : > { %13672 = vmatpush3.bf16.msra.mxu0 %v16665_v52  ;;  %v13645_v51 = vpack.c.bf16 %v1313_v27, %v1309_v39  ;;  %v16905_v55 = vpack.i.bf16 %v1313_v27, %v1309_v39 }
 0x377   : > { %13690 = vmatprep.subr.bf16.mxu0 %v16775_v1 }
 0x378   : > { %20802 = vst [vmem:[#allocation76_spill] sm:$0xff] %v16905_v55  ;;  %13647 = vmatprep.subr.msk.bf16.mxu1 %vm16611_vm1, %v13645_v51 }
 0x37a   : > { %13650 = vmatpush3.bf16.xpose.msk.msra.mxu1 %vm16611_vm1, %v13645_v51  ;;  %v16912_v10 = vpop.f32.mrb[60].mxu0  ;;  %v12519_v12 = vpop.f32.mrb[28].mxu1 }
 0x37b   : > { %20803 = vst [vmem:[#allocation77_spill] sm:$0xff] %v16912_v10  ;;  %v1319_v49 = vpop.f32.mrb[61].mxu0  ;;  %v1472_v33 = vpop.f32.mrb[29].mxu1 }
 0x37c   : > { %v16914_v3 = vpop.f32.mrb[62].mxu0  ;;  %v12520_v6 = vpop.f32.mrb[30].mxu1 }
 0x37d   : > { %20804 = vst [vmem:[#allocation78_spill] sm:$0xff] %v16914_v3  ;;  %v1323_v52 = vpop.f32.mrb[63].mxu0  ;;  %v1475_v44 = vpop.f32.mrb[31].mxu1  ;;  %v16916_v27 = vpack.c.bf16 %v12520_v6, %v12519_v12  ;;  %v16924_v51 = vpack.i.bf16 %v12520_v6, %v12519_v12  ;;  %v15908_v12 = vmov -1e+30  }
 0x37e   : > { %v13651_v39 = vpack.c.bf16 %v1323_v52, %v1319_v49  ;;  %v16918_v62 = vpack.i.bf16 %v1323_v52, %v1319_v49  ;;  %v16920_v47 = vpack.c.bf16 %v1475_v44, %v1472_v33  ;;  %v16922_v24 = vpack.i.bf16 %v1475_v44, %v1472_v33 }
 0x37f   : > { %20807 = vst [vmem:[#allocation81_spill] sm:$0xff] %v16924_v51  ;;  %v1487_v44 = vlaneseq }
 0x380   : > { %20805 = vst [vmem:[#allocation79_spill] sm:$0xff] %v16918_v62  ;;  %20806 = vst [vmem:[#allocation80_spill] sm:$0xff] %v16922_v24  ;;  %13653 = vmatprep.subr.msk.bf16.mxu1 %vm16611_vm1, %v13651_v39 }
 0x381   : > { %v16953_v6 = vshrl.u32 %v1487_v44, 7 }
 0x382   : > { %13656 = vmatpush3.bf16.xpose.msk.msra.mxu1 %vm16611_vm1, %v13651_v39 }
 0x383   : > { %13674 = vmatprep.subr.bf16.mxu1 %v16719_v61  ;;  %20808 = vst [vmem:[#allocation82_spill] sm:$0xff] %v16953_v6  ;;  %v1491_v33 = vadd.s32 24, %v16953_v6  ;;  %v1495_v11 = vadd.s32 56, %v16953_v6  ;;  %v1494_v60 = vadd.s32 48, %v16953_v6 }
 0x389   : > { %12622 = vmatmul.mubr.msk.f32.vlgmr.msra.gmra.mrb[48].mxu1 %vm1514_vm0, %v16852_v5 }
 0x38a   : > { %12624 = vmatprep.mubr.msk.f32.mxu1 %vm1514_vm0, %v16867_v38  ;;  %13676 = vmatpush3.bf16.msra.mxu1 %v16719_v61  ;;  %v1497_v61 = vand.u32 127, %v1487_v44  ;;  %v1492_v44 = vadd.s32 32, %v16953_v6 }
 0x38b   : > { %13678 = vmatprep.subr.bf16.mxu1 %v16709_v50 }
 0x38c   : > { %vm1498_vm3 = vcmp.ge.s32.totalorder %v16953_v6, %v1497_v61  ;;  %vm1501_vm4 = vcmp.ge.s32.totalorder %v1491_v33, %v1497_v61  ;;  %vm1502_vm8 = vcmp.ge.s32.totalorder %v1492_v44, %v1497_v61  ;;  %vm1505_vm9 = vcmp.ge.s32.totalorder %v1495_v11, %v1497_v61 }
 0x38d   : > { %12625 = vmatmul.mubr.msk.f32.gmra.mrb[50].mxu1 %vm1514_vm0, %v16870_v48  ;;  %v16961_v52 = vsel %vm1498_vm3, 0.0, %v15908_v12  ;;  %v16971_v24 = vsel %vm1501_vm4, 0.0, %v15908_v12  ;;  %vm1504_vm10 = vcmp.ge.s32.totalorder %v1494_v60, %v1497_v61  ;;  %v17001_v63 = vsel %vm1505_vm9, 0.0, %v15908_v12 }
 0x38e   : > { %12627 = vmatprep.mubr.msk.f32.mxu1 %vm1514_vm0, %v16897_v54  ;;  %13680 = vmatpush3.bf16.msra.mxu1 %v16709_v50  ;;  %v1489_v50 = vadd.s32 8, %v16953_v6  ;;  %20810 = vst [vmem:[#allocation84_spill] sm:$0xff] %v16961_v52  ;;  %20811 = vst [vmem:[#allocation85_spill] sm:$0xff] %v16971_v24  ;;  %v17007_v4 = vsel %vm1504_vm10, 0.0, %v15908_v12 }
 0x38f   : > { %13682 = vmatprep.subr.bf16.mxu1 %v16755_v18  ;;  %20815 = vst [vmem:[#allocation89_spill] sm:$0xff] %v17001_v63  ;;  %20816 = vst [vmem:[#allocation90_spill] sm:$0xff] %v17007_v4 }
 0x390   : > { %vm1499_vm2 = vcmp.ge.s32.totalorder %v1489_v50, %v1497_v61 }
 0x391   : > { %12628 = vmatmul.mubr.msk.f32.gmra.mrb[52].mxu1 %vm1514_vm0, %v16900_v16  ;;  %v16959_v49 = vsel %vm1499_vm2, 0.0, %v15908_v12 }
 0x392   : > { %12630 = vmatprep.mubr.msk.f32.mxu1 %vm1514_vm0, %v16912_v10  ;;  %13684 = vmatpush3.bf16.msra.mxu1 %v16755_v18  ;;  %v1490_v18 = vadd.s32 16, %v16953_v6  ;;  %20809 = vst [vmem:[#allocation83_spill] sm:$0xff] %v16959_v49 }
 0x393   : > { %13686 = vmatprep.subr.bf16.mxu1 %v16747_v15 }
 0x394   : > { %vm1500_vm6 = vcmp.ge.s32.totalorder %v1490_v18, %v1497_v61 }
 0x395   : > { %12631 = vmatmul.mubr.msk.f32.gmra.mrb[54].mxu1 %vm1514_vm0, %v16914_v3  ;;  %v16975_v33 = vsel %vm1500_vm6, 0.0, %v15908_v12 }
 0x396   : > { %13688 = vmatpush3.bf16.msra.mxu1 %v16747_v15  ;;  %v1493_v15 = vadd.s32 40, %v16953_v6  ;;  %20812 = vst [vmem:[#allocation86_spill] sm:$0xff] %v16975_v33 }
 0x397   : > { %13706 = vmatprep.subr.bf16.mxu1 %v16882_v45 }
 0x398   : > { %vm1503_vm7 = vcmp.ge.s32.totalorder %v1493_v15, %v1497_v61  ;;  %v16991_v15 = vsel %vm1502_vm8, 0.0, %v15908_v12 }
 0x399   : > { %v16987_v25 = vsel %vm1503_vm7, 0.0, %v15908_v12  ;;  %20814 = vst [vmem:[#allocation88_spill] sm:$0xff] %v16991_v15 }
 0x39a   : > { %20813 = vst [vmem:[#allocation87_spill] sm:$0xff] %v16987_v25 }
 0x3b4   : > { %v12539_v39 = vpop.f32.mrb[32].mxu1 }
 0x3b5   : > { %v1629_v50 = vpop.f32.mrb[33].mxu1  ;;  %v16966_v51 = vadd.f32 %v12539_v39, %v16959_v49 }
 0x3b6   : > { %v16969_v29 = vadd.f32 %v1629_v50, %v16961_v52 }
 0x3b7   : > { %v2131_v14 = vsel %vm2127_vm5, %v16966_v51, -inf }
 0x3b8   : > { %2132 = vmax.xlane.f32.xlu1 %v2131_v14  ;;  %v12542_v18 = vpop.f32.mrb[34].mxu1  ;;  %v2128_v7 = vsel %vm2127_vm5, %v16969_v29, -inf }
 0x3b9   : > { %v1639_v39 = vpop.f32.mrb[35].mxu1  ;;  %2129 = vmax.xlane.f32.xlu0 %v2128_v7  ;;  %v16981_v50 = vadd.f32 %v12542_v18, %v16971_v24 }
 0x3ba   : > { %v16985_v59 = vadd.f32 %v1639_v39, %v16975_v33 }
 0x3bb   : > { %v2137_v14 = vsel %vm2127_vm5, %v16981_v50, -inf }
 0x3bc   : > { %2138 = vmax.xlane.f32.xlu1 %v2137_v14  ;;  %v12545_v44 = vpop.f32.mrb[36].mxu1  ;;  %v2134_v7 = vsel %vm2127_vm5, %v16985_v59, -inf }
 0x3bd   : > { %v1649_v18 = vpop.f32.mrb[37].mxu1  ;;  %2135 = vmax.xlane.f32.xlu0 %v2134_v7  ;;  %v16996_v6 = vadd.f32 %v12545_v44, %v16987_v25 }
 0x3be   : > { %v16999_v39 = vadd.f32 %v1649_v18, %v16991_v15 }
 0x3bf   : > { %v2143_v46 = vsel %vm2127_vm5, %v16996_v6, -inf }
 0x3c0   : > { %2144 = vmax.xlane.f32.xlu1 %v2143_v46  ;;  %v12548_v11 = vpop.f32.mrb[38].mxu1  ;;  %v2140_v14 = vsel %vm2127_vm5, %v16999_v39, -inf }
 0x3c1   : > { %v1659_v7 = vpop.f32.mrb[39].mxu1  ;;  %2141 = vmax.xlane.f32.xlu0 %v2140_v14  ;;  %v17010_v44 = vadd.f32 %v12548_v11, %v17001_v63 }
 0x3c2   : > { %v17015_v61 = vadd.f32 %v1659_v7, %v17007_v4 }
 0x3c3   : > { %v2149_v60 = vsel %vm2127_vm5, %v17010_v44, -inf }
 0x3c4   : > { %2150 = vmax.xlane.f32.xlu1 %v2149_v60  ;;  %v2146_v46 = vsel %vm2127_vm5, %v17015_v61, -inf }
 0x3c8   : > { %2147 = vmax.xlane.f32.xlu1 %v2146_v46 }
 0x3d4   : > { %v12567_v18 = vpop.f32.mrb[40].mxu1 }
 0x3d5   : > { %v17020_v12 = vadd.f32 %v12567_v18, %v16959_v49  ;;  %v1782_v26 = vpop.f32.mrb[41].mxu1 }
 0x3d6   : > { %v17023_v14 = vadd.f32 %v1782_v26, %v16961_v52 }
 0x3d7   : > { %v2155_v11 = vsel %vm2127_vm5, %v17020_v12, -inf }
 0x3d8   : > { %v12570_v20 = vpop.f32.mrb[42].mxu1  ;;  %2156 = vmax.xlane.f32.xlu0 %v2155_v11  ;;  %v2152_v18 = vsel %vm2127_vm5, %v17023_v14, -inf }
 0x3d9   : > { %v1792_v7 = vpop.f32.mrb[43].mxu1  ;;  %v17028_v60 = vadd.f32 %v12570_v20, %v16971_v24 }
 0x3da   : > { %v17031_v13 = vadd.f32 %v1792_v7, %v16975_v33 }
 0x3db   : > { %v2161_v46 = vsel %vm2127_vm5, %v17028_v60, -inf }
 0x3dc   : > { %v12573_v26 = vpop.f32.mrb[44].mxu1  ;;  %2162 = vmax.xlane.f32.xlu1 %v2161_v46  ;;  %2153 = vmax.xlane.f32.xlu0 %v2152_v18  ;;  %v2158_v7 = vsel %vm2127_vm5, %v17031_v13, -inf }
 0x3dd   : > { %v1802_v10 = vpop.f32.mrb[45].mxu1  ;;  %v17038_v58 = vadd.f32 %v12573_v26, %v16987_v25 }
 0x3de   : > { %v17041_v11 = vadd.f32 %v1802_v10, %v16991_v15 }
 0x3df   : > { %v2167_v20 = vsel %vm2127_vm5, %v17038_v58, -inf }
 0x3e0   : > { %v12576_v54 = vpop.f32.mrb[46].mxu1  ;;  %2168 = vmax.xlane.f32.xlu1 %v2167_v20  ;;  %2159 = vmax.xlane.f32.xlu0 %v2158_v7  ;;  %v2164_v26 = vsel %vm2127_vm5, %v17041_v11, -inf  ;;  %v17059_v20 = vpop.permute.xlu0 %3016 }
 0x3e1   : > { %v1812_v3 = vpop.f32.mrb[47].mxu1  ;;  %v17048_v46 = vadd.f32 %v12576_v54, %v17001_v63  ;;  %20817 = vst [vmem:[#allocation91_spill] sm:$0xff] %v17059_v20 }
 0x3e2   : > { %v17051_v18 = vadd.f32 %v1812_v3, %v17007_v4 }
 0x3e3   : > { %v2173_v10 = vsel %vm2127_vm5, %v17048_v46, -inf }
 0x3e4   : > { %2174 = vmax.xlane.f32.xlu1 %v2173_v10  ;;  %2165 = vmax.xlane.f32.xlu0 %v2164_v26  ;;  %v2170_v38 = vsel %vm2127_vm5, %v17051_v18, -inf  ;;  %v17061_v7 = vpop.permute.xlu0 %3018 }
 0x3e5   : > { %20818 = vst [vmem:[#allocation92_spill] sm:$0xff] %v17061_v7  ;;  %v17083_v7 = vpop.permute.xlu1 %14409 }
 0x3e6   : > { %20828 = vst [vmem:[#allocation102_spill] sm:$0xff] %v17083_v7 }
 0x3e8   : > { %2171 = vmax.xlane.f32.xlu0 %v2170_v38  ;;  %v17063_v54 = vpop.permute.xlu0 %14404 }
 0x3ec   : > { %v17065_v3 = vpop.permute.xlu0 %3020 }
 0x3ed   : > { %20819 = vst [vmem:[#allocation93_spill] sm:$0xff] %v17065_v3  ;;  %v17087_v3 = vpop.permute.xlu1 %14424 }
 0x3f0   : > { %v17067_v16 = vpop.permute.xlu0 %3022 }
 0x3f1   : > { %20820 = vst [vmem:[#allocation94_spill] sm:$0xff] %v17067_v16 }
 0x3f4   : > { %v17069_v34 = vpop.permute.xlu0 %14414 }
 0x3f5   : > { %20821 = vst [vmem:[#allocation95_spill] sm:$0xff] %v17069_v34 }
 0x3f8   : > { %v17071_v48 = vpop.permute.xlu0 %14419 }
 0x3f9   : > { %20822 = vst [vmem:[#allocation96_spill] sm:$0xff] %v17071_v48 }
 0x3fc   : > { %v17073_v10 = vpop.permute.xlu0 %3185 }
 0x3fd   : > { %20823 = vst [vmem:[#allocation97_spill] sm:$0xff] %v17073_v10 }
 0x400   : > { %v17075_v26 = vpop.permute.xlu0 %3187 }
 0x401   : > { %20824 = vst [vmem:[#allocation98_spill] sm:$0xff] %v17075_v26  ;;  %v17094_v26 = vpop.permute.xlu1 %3191 }
 0x402   : > { %20832 = vst [vmem:[#allocation106_spill] sm:$0xff] %v17094_v26 }
 0x404   : > { %v17077_v35 = vpop.permute.xlu0 %3189 }
 0x405   : > { %20825 = vst [vmem:[#allocation99_spill] sm:$0xff] %v17077_v35  ;;  %v17108_v53 = vpop.permute.xlu1 %14459 }
 0x406   : > { %20836 = vst [vmem:[#allocation110_spill] sm:$0xff] %v17108_v53 }
 0x408   : > { %v17079_v38 = vpop.permute.xlu0 %14429 }
 0x409   : > { %20826 = vst [vmem:[#allocation100_spill] sm:$0xff] %v17079_v38 }
 0x40c   : > { %v17081_v20 = vpop.permute.xlu0 %14434 }
 0x40d   : > { %20827 = vst [vmem:[#allocation101_spill] sm:$0xff] %v17081_v20 }
 0x410   : > { %v17085_v5 = vpop.permute.xlu0 %14439 }
 0x411   : > { %20829 = vst [vmem:[#allocation103_spill] sm:$0xff] %v17085_v5 }
 0x414   : > { %v17089_v16 = vpop.permute.xlu0 %14444 }
 0x415   : > { %20830 = vst [vmem:[#allocation104_spill] sm:$0xff] %v17089_v16 }
 0x418   : > { %v17099_v38 = vpop.permute.xlu0 %14449 }
 0x419   : > { %20834 = vst [vmem:[#allocation108_spill] sm:$0xff] %v17099_v38 }
 0x41c   : > { %v17113_v26 = vpop.permute.xlu0 %14454 }
 0x41d   : > { %20838 = vst [vmem:[#allocation112_spill] sm:$0xff] %v17113_v26 }
 0x43b   : > { %v12595_v34 = vpop.f32.mrb[64].mxu0 }
 0x43c   : > { %v1935_v48 = vpop.f32.mrb[65].mxu0  ;;  %v17092_v10 = vadd.f32 %v12595_v34, %v16959_v49 }
 0x43d   : > { %v17097_v35 = vadd.f32 %v1935_v48, %v16961_v52 }
 0x43e   : > { %20831 = vst [vmem:[#allocation105_spill] sm:$0xff] %v17092_v10  ;;  %v2179_v20 = vsel %vm2127_vm5, %v17092_v10, -inf }
 0x43f   : > { %20833 = vst [vmem:[#allocation107_spill] sm:$0xff] %v17097_v35  ;;  %2180 = vmax.xlane.f32.xlu1 %v2179_v20  ;;  %v12598_v5 = vpop.f32.mrb[66].mxu0  ;;  %v2176_v16 = vsel %vm2127_vm5, %v17097_v35, -inf }
 0x440   : > { %v1945_v7 = vpop.f32.mrb[67].mxu0  ;;  %2177 = vmax.xlane.f32.xlu0 %v2176_v16  ;;  %v17106_v34 = vadd.f32 %v12598_v5, %v16971_v24 }
 0x441   : > { %v17111_v48 = vadd.f32 %v1945_v7, %v16975_v33 }
 0x442   : > { %20835 = vst [vmem:[#allocation109_spill] sm:$0xff] %v17106_v34  ;;  %v2185_v38 = vsel %vm2127_vm5, %v17106_v34, -inf }
 0x443   : > { %20837 = vst [vmem:[#allocation111_spill] sm:$0xff] %v17111_v48  ;;  %2186 = vmax.xlane.f32.xlu1 %v2185_v38  ;;  %v12601_v20 = vpop.f32.mrb[68].mxu0  ;;  %v2182_v35 = vsel %vm2127_vm5, %v17111_v48, -inf }
 0x444   : > { %v1955_v31 = vpop.f32.mrb[69].mxu0  ;;  %2183 = vmax.xlane.f32.xlu0 %v2182_v35  ;;  %v17120_v5 = vadd.f32 %v12601_v20, %v16987_v25 }
 0x445   : > { %v2133_v16 = vpop.xlane.xlu1 %2132  ;;  %v17123_v53 = vadd.f32 %v1955_v31, %v16991_v15 }
 0x446   : > { %20839 = vst [vmem:[#allocation113_spill] sm:$0xff] %v17120_v5  ;;  %v2225_v7 = vsub.f32 %v16966_v51, %v2133_v16  ;;  %v2130_v26 = vpop.xlane.xlu0 %2129  ;;  %v2191_v34 = vsel %vm2127_vm5, %v17120_v5, -inf }
 0x447   : > { %v2224_v38 = vsub.f32 %v16969_v29, %v2130_v26  ;;  %2192 = vmax.xlane.f32.xlu1 %v2191_v34  ;;  %v12604_v10 = vpop.f32.mrb[70].mxu0  ;;  %v2188_v35 = vsel %vm2127_vm5, %v17123_v53, -inf }
 0x448   : > { %v2258_v48 = vmul.f32 1.442695, %v2225_v7  ;;  %v1965_v20 = vpop.f32.mrb[71].mxu0  ;;  %2189 = vmax.xlane.f32.xlu0 %v2188_v35  ;;  %v17132_v41 = vadd.f32 %v12604_v10, %v17001_v63 }
 0x449   : > { %v2256_v31 = vmul.f32 1.442695, %v2224_v38  ;;  %v2139_v2 = vpop.xlane.xlu1 %2138  ;;  %v17138_v29 = vadd.f32 %v1965_v20, %v17007_v4 }
 0x44a   : > { %20840 = vst [vmem:[#allocation114_spill] sm:$0xff] %v17132_v41  ;;  %v2227_v51 = vsub.f32 %v16981_v50, %v2139_v2  ;;  %v2136_v16 = vpop.xlane.xlu0 %2135  ;;  %v2197_v5 = vsel %vm2127_vm5, %v17132_v41, -inf }
 0x44b   : > { %15067 = vpow2.f32 %v2256_v31  ;;  %v2226_v26 = vsub.f32 %v16985_v59, %v2136_v16  ;;  %2198 = vmax.xlane.f32.xlu1 %v2197_v5  ;;  %v2194_v2 = vsel %vm2127_vm5, %v17138_v29, -inf }
 0x44c   : > { %15069 = vpow2.f32 %v2258_v48  ;;  %v2262_v34 = vmul.f32 1.442695, %v2227_v51 }
 0x44d   : > { %v2260_v7 = vmul.f32 1.442695, %v2226_v26  ;;  %v2145_v10 = vpop.xlane.xlu1 %2144 }
 0x44e   : > { %v2229_v38 = vsub.f32 %v16996_v6, %v2145_v10  ;;  %v2142_v35 = vpop.xlane.xlu0 %2141 }
 0x44f   : > { %15071 = vpow2.f32 %v2260_v7  ;;  %v2228_v50 = vsub.f32 %v16999_v39, %v2142_v35  ;;  %2195 = vmax.xlane.f32.xlu1 %v2194_v2 }
 0x450   : > { %15073 = vpow2.f32 %v2262_v34  ;;  %v2266_v20 = vmul.f32 1.442695, %v2229_v38  ;;  %v14407_v38 = vunpack.i.h.bf16 %v17063_v54 }
 0x451   : > { %v2264_v31 = vmul.f32 1.442695, %v2228_v50  ;;  %v2151_v41 = vpop.xlane.xlu1 %2150 }
 0x452   : > { %v2231_v59 = vsub.f32 %v17010_v44, %v2151_v41 }
 0x453   : > { %15075 = vpow2.f32 %v2264_v31 }
 0x454   : > { %15077 = vpow2.f32 %v2266_v20  ;;  %v2270_v39 = vmul.f32 1.442695, %v2231_v59 }
 0x455   : > { %v17146_v48 = vpop.eup %15067  ;;  %v2148_v5 = vpop.xlane.xlu1 %2147 }
 0x456   : > { %20841 = vst [vmem:[#allocation115_spill] sm:$0xff] %v17146_v48  ;;  %v17148_v6 = vpop.eup %15069  ;;  %v2230_v51 = vsub.f32 %v17015_v61, %v2148_v5  ;;  %12649 = vmatprep.mubr.msk.f32.mxu0 %vm2127_vm5, %v17146_v48 }
 0x457   : > { %20842 = vst [vmem:[#allocation116_spill] sm:$0xff] %v17148_v6  ;;  %12650 = vmatmul.mubr.msk.f32.vlgmr.msra.gmra.mrb[72].mxu0 %vm2127_vm5, %v17148_v6 }
 0x458   : > { %v2268_v16 = vmul.f32 1.442695, %v2230_v51  ;;  %13692 = vmatpush3.bf16.msra.mxu0 %v16775_v1 }
 0x459   : > { %v17156_v26 = vpop.eup %15071  ;;  %13694 = vmatprep.subr.bf16.mxu0 %v16767_v22 }
 0x45a   : > { %20843 = vst [vmem:[#allocation117_spill] sm:$0xff] %v17156_v26  ;;  %v17159_v41 = vpop.eup %15073  ;;  %15079 = vpow2.f32 %v2268_v16  ;;  %12652 = vmatprep.mubr.msk.f32.mxu0 %vm2127_vm5, %v17156_v26 }
 0x45b   : > { %20844 = vst [vmem:[#allocation118_spill] sm:$0xff] %v17159_v41  ;;  %15081 = vpow2.f32 %v2270_v39  ;;  %12653 = vmatmul.mubr.msk.f32.gmra.mrb[74].mxu0 %vm2127_vm5, %v17159_v41 }
 0x45c   : > { %13696 = vmatpush3.bf16.msra.mxu0 %v16767_v22  ;;  %v12623_v44 = vpop.f32.mrb[48].mxu1  ;;  %v14406_v22 = vunpack.i.l.bf16 %v17063_v54 }
 0x45d   : > { %v17166_v61 = vpop.eup %15075  ;;  %v17169_v1 = vadd.f32 %v12623_v44, %v16959_v49  ;;  %13698 = vmatprep.subr.bf16.mxu0 %v16837_v0  ;;  %v2088_v34 = vpop.f32.mrb[49].mxu1 }
 0x45e   : > { %20845 = vst [vmem:[#allocation119_spill] sm:$0xff] %v17166_v61  ;;  %v17172_v7 = vpop.eup %15077  ;;  %v17175_v10 = vadd.f32 %v2088_v34, %v16961_v52  ;;  %12655 = vmatprep.mubr.msk.f32.mxu0 %vm2127_vm5, %v17166_v61  ;;  %v17193_v54 = vpack.c.bf16 %v14407_v38, %v14406_v22 }
 0x45f   : > { %20846 = vst [vmem:[#allocation120_spill] sm:$0xff] %v17172_v7  ;;  %12656 = vmatmul.mubr.msk.f32.gmra.mrb[76].mxu0 %vm2127_vm5, %v17172_v7  ;;  %v2203_v35 = vsel %vm2127_vm5, %v17169_v1, -inf }
 0x460   : > { %13700 = vmatpush3.bf16.msra.mxu0 %v16837_v0  ;;  %v17186_v2 = vpop.f32.mrb[50].mxu1  ;;  %2204 = vmax.xlane.f32.xlu1 %v2203_v35  ;;  %v2200_v50 = vsel %vm2127_vm5, %v17175_v10, -inf }
 0x461   : > { %13702 = vmatprep.subr.bf16.mxu0 %v16833_v19  ;;  %v17191_v20 = vpop.f32.mrb[51].mxu1  ;;  %2201 = vmax.xlane.f32.xlu0 %v2200_v50 }
 0x464   : > { %v17195_v31 = vpop.eup %15079  ;;  %13704 = vmatpush3.bf16.msra.mxu0 %v16833_v19  ;;  %v17198_v59 = vpop.f32.mrb[52].mxu1 }
 0x465   : > { %20847 = vst [vmem:[#allocation121_spill] sm:$0xff] %v17195_v31  ;;  %v17200_v0 = vpop.eup %15081  ;;  %13723 = vmatprep.subr.msk.bf16.mxu0 %vm16611_vm1, %v17193_v54  ;;  %v17205_v5 = vpop.f32.mrb[53].mxu1  ;;  %12658 = vmatprep.mubr.msk.f32.mxu0 %vm2127_vm5, %v17195_v31 }
 0x466   : > { %20848 = vst [vmem:[#allocation122_spill] sm:$0xff] %v17200_v0  ;;  %v2157_v51 = vpop.xlane.xlu0 %2156  ;;  %12659 = vmatmul.mubr.msk.f32.gmra.mrb[78].mxu0 %vm2127_vm5, %v17200_v0 }
 0x467   : > { %v2233_v39 = vsub.f32 %v17020_v12, %v2157_v51 }
 0x468   : > { %v17212_v19 = vpop.f32.mrb[54].mxu1 }
 0x469   : > { %v2163_v16 = vpop.xlane.xlu1 %2162  ;;  %v17214_v44 = vpop.f32.mrb[55].mxu1  ;;  %v2274_v22 = vmul.f32 1.442695, %v2233_v39 }
 0x46a   : > { %v2154_v34 = vpop.xlane.xlu0 %2153  ;;  %v2235_v35 = vsub.f32 %v17028_v60, %v2163_v16 }
 0x46b   : > { %v2232_v38 = vsub.f32 %v17023_v14, %v2154_v34 }
 0x46c   : > { %v2278_v48 = vmul.f32 1.442695, %v2235_v35 }
 0x46d   : > { %v2272_v50 = vmul.f32 1.442695, %v2232_v38  ;;  %v2169_v61 = vpop.xlane.xlu1 %2168 }
 0x46e   : > { %v2160_v31 = vpop.xlane.xlu0 %2159  ;;  %v2237_v12 = vsub.f32 %v17038_v58, %v2169_v61 }
 0x46f   : > { %15083 = vpow2.f32 %v2272_v50  ;;  %v2234_v26 = vsub.f32 %v17031_v13, %v2160_v31  ;;  %v17301_v50 = vadd.f32 %v17214_v44, %v17007_v4  ;;  %v20857_v44 = vld [vmem:[#allocation59_spill] sm:$0xff] }
 0x470   : > { %15085 = vpow2.f32 %v2274_v22  ;;  %v2282_v60 = vmul.f32 1.442695, %v2237_v12  ;;  %v17283_v22 = vadd.f32 %v17205_v5, %v16991_v15 }
 0x471   : > { %v2276_v51 = vmul.f32 1.442695, %v2234_v26  ;;  %v2175_v0 = vpop.xlane.xlu1 %2174  ;;  %14469 = vrot.lane.b32.xlu1 %v16877_v23, %s15907_s28 }
 0x472   : > { %v2166_v7 = vpop.xlane.xlu0 %2165  ;;  %v2239_v39 = vsub.f32 %v17048_v46, %v2175_v0  ;;  %v2212_v5 = vsel %vm2127_vm5, %v17283_v22, -inf }
 0x473   : > { %15087 = vpow2.f32 %v2276_v51  ;;  %v2236_v14 = vsub.f32 %v17041_v11, %v2166_v7  ;;  %v14426_v7 = vunpack.i.l.bf16 %v17087_v3  ;;  %v20858_v51 = vld [vmem:[#allocation56_spill] sm:$0xff] }
 0x474   : > { %15089 = vpow2.f32 %v2278_v48  ;;  %v2286_v58 = vmul.f32 1.442695, %v2239_v39 }
 0x475   : > { %v2280_v16 = vmul.f32 1.442695, %v2236_v14 }
 0x476   : > { %v2172_v34 = vpop.xlane.xlu0 %2171 }
 0x477   : > { %15091 = vpow2.f32 %v2280_v16  ;;  %v2238_v13 = vsub.f32 %v17051_v18, %v2172_v34  ;;  %14464 = vrot.lane.b32.xlu0 %v16835_v8, %s15907_s28  ;;  %v20860_v34 = vld [vmem:[#allocation62_spill] sm:$0xff] }
 0x478   : > { %15093 = vpow2.f32 %v2282_v60  ;;  %v20859_v60 = vld [vmem:[#allocation105_spill] sm:$0xff] }
 0x479   : > { %v17227_v26 = vpop.eup %15083  ;;  %v2284_v61 = vmul.f32 1.442695, %v2238_v13  ;;  %v20861_v13 = vld [vmem:[#allocation107_spill] sm:$0xff] }
 0x47a   : > { %20849 = vst [vmem:[#allocation123_spill] sm:$0xff] %v17227_v26  ;;  %v17229_v31 = vpop.eup %15085  ;;  %12677 = vmatprep.mubr.msk.f32.mxu1 %vm2127_vm5, %v17227_v26 }
 0x47b   : > { %20850 = vst [vmem:[#allocation124_spill] sm:$0xff] %v17229_v31  ;;  %15095 = vpow2.f32 %v2284_v61  ;;  %12678 = vmatmul.mubr.msk.f32.vlgmr.msra.gmra.mrb[56].mxu1 %vm2127_vm5, %v17229_v31 }
 0x47c   : > { %15097 = vpow2.f32 %v2286_v58  ;;  %13708 = vmatpush3.bf16.msra.mxu1 %v16882_v45  ;;  %v14427_v45 = vunpack.i.h.bf16 %v17087_v3  ;;  %v17279_v3 = vadd.f32 %v17186_v2, %v16971_v24  ;;  %v17295_v2 = vadd.f32 %v17212_v19, %v17001_v63 }
 0x47d   : > { %v17236_v11 = vpop.eup %15087  ;;  %13710 = vmatprep.subr.bf16.mxu1 %v16879_v17  ;;  %v2218_v19 = vsel %vm2127_vm5, %v17301_v50, -inf }
 0x47e   : > { %20851 = vst [vmem:[#allocation125_spill] sm:$0xff] %v17236_v11  ;;  %v17239_v46 = vpop.eup %15089  ;;  %12680 = vmatprep.mubr.msk.f32.mxu1 %vm2127_vm5, %v17236_v11  ;;  %v17265_v38 = vpack.c.bf16 %v14427_v45, %v14426_v7  ;;  %v2221_v12 = vsel %vm2127_vm5, %v17295_v2, -inf  ;;  %v20862_v7 = vld [vmem:[#allocation58_spill] sm:$0xff] }
 0x47f   : > { %20852 = vst [vmem:[#allocation126_spill] sm:$0xff] %v17239_v46  ;;  %12681 = vmatmul.mubr.msk.f32.gmra.mrb[58].mxu1 %vm2127_vm5, %v17239_v46 }
 0x480   : > { %13712 = vmatpush3.bf16.msra.mxu1 %v16879_v17 }
 0x481   : > { %v17246_v18 = vpop.eup %15091  ;;  %13714 = vmatprep.subr.bf16.mxu1 %v16920_v47 }
 0x482   : > { %20853 = vst [vmem:[#allocation127_spill] sm:$0xff] %v17246_v18  ;;  %v17249_v48 = vpop.eup %15093  ;;  %12683 = vmatprep.mubr.msk.f32.mxu1 %vm2127_vm5, %v17246_v18 }
 0x483   : > { %20854 = vst [vmem:[#allocation128_spill] sm:$0xff] %v17249_v48  ;;  %12684 = vmatmul.mubr.msk.f32.gmra.mrb[60].mxu1 %vm2127_vm5, %v17249_v48 }
 0x484   : > { %13716 = vmatpush3.bf16.msra.mxu1 %v16920_v47  ;;  %v17275_v47 = vadd.f32 %v17191_v20, %v16975_v33  ;;  %v2209_v20 = vsel %vm2127_vm5, %v17279_v3, -inf }
 0x485   : > { %v17258_v0 = vpop.eup %15095  ;;  %13718 = vmatprep.subr.bf16.mxu1 %v16916_v27 }
 0x486   : > { %20855 = vst [vmem:[#allocation129_spill] sm:$0xff] %v17258_v0  ;;  %v17261_v17 = vpop.eup %15097  ;;  %12686 = vmatprep.mubr.msk.f32.mxu1 %vm2127_vm5, %v17258_v0  ;;  %v2206_v35 = vsel %vm2127_vm5, %v17275_v47, -inf }
 0x487   : > { %20856 = vst [vmem:[#allocation130_spill] sm:$0xff] %v17261_v17  ;;  %12687 = vmatmul.mubr.msk.f32.gmra.mrb[62].mxu1 %vm2127_vm5, %v17261_v17 }
 0x488   : > { %13720 = vmatpush3.bf16.msra.mxu1 %v16916_v27  ;;  %v17289_v27 = vadd.f32 %v17198_v59, %v16987_v25 }
 0x489   : > { %13747 = vmatprep.subr.msk.bf16.mxu1 %vm16611_vm1, %v17265_v38 }
 0x48a   : > { %v2215_v59 = vsel %vm2127_vm5, %v17289_v27, -inf }
 0x495   : > { %2207 = vmax.xlane.f32.xlu1 %v2206_v35 }
 0x496   : > { %2210 = vmax.xlane.f32.xlu0 %v2209_v20  ;;  %v20863_v20 = vld [vmem:[#allocation109_spill] sm:$0xff] }
 0x499   : > { %2213 = vmax.xlane.f32.xlu1 %v2212_v5 }
 0x49a   : > { %2216 = vmax.xlane.f32.xlu0 %v2215_v59 }
 0x49d   : > { %2222 = vmax.xlane.f32.xlu1 %v2221_v12  ;;  %v20864_v12 = vld [vmem:[#allocation67_spill] sm:$0xff] }
 0x49e   : > { %2219 = vmax.xlane.f32.xlu0 %v2218_v19  ;;  %v20865_v19 = vld [vmem:[#allocation111_spill] sm:$0xff] }
 0x4ae   : > { %3193 = vrot.lane.b32.xlu1 %v16733_v30, %s15907_s28 }
 0x4b2   : > { %3195 = vrot.lane.b32.xlu1 %v16735_v36, %s15907_s28 }
 0x4b4   : > { %3024 = vrot.lane.b32.xlu0 %v16647_v42, %s15907_s28 }
 0x4b6   : > { %3197 = vrot.lane.b32.xlu1 %v16753_v40, %s15907_s28 }
 0x4b8   : > { %3026 = vrot.lane.b32.xlu0 %v16651_v43, %s15907_s28 }
 0x4ba   : > { %3199 = vrot.lane.b32.xlu1 %v16759_v57, %s15907_s28 }
 0x4bc   : > { %3028 = vrot.lane.b32.xlu0 %v16661_v32, %s15907_s28 }
 0x4be   : > { %3354 = vrot.lane.b32.xlu1 %v16773_v37, %s15907_s28 }
 0x4c0   : > { %3030 = vrot.lane.b32.xlu0 %v16663_v9, %s15907_s28 }
 0x4c2   : > { %3358 = vrot.lane.b32.xlu1 %v16795_v21, %s15907_s28 }
 0x4c4   : > { %14474 = vrot.lane.b32.xlu0 %v16905_v55, %s15907_s28 }
 0x4c6   : > { %14479 = vrot.lane.b32.xlu1 %v16918_v62, %s15907_s28 }
 0x4c8   : > { %3356 = vrot.lane.b32.xlu0 %v16781_v28, %s15907_s28 }
 0x4ca   : > { %3364 = vrot.lane.b32.xlu1 %v20857_v44, %s15907_s28 }
 0x4cc   : > { %3360 = vrot.lane.b32.xlu0 %v20858_v51, %s15907_s28  ;;  %v2181_v14 = vpop.xlane.xlu1 %2180 }
 0x4cd   : > { %v2241_v39 = vsub.f32 %v20859_v60, %v2181_v14  ;;  %v2178_v16 = vpop.xlane.xlu0 %2177 }
 0x4ce   : > { %3368 = vrot.lane.b32.xlu1 %v20860_v34, %s15907_s28  ;;  %v2240_v58 = vsub.f32 %v20861_v13, %v2178_v16  ;;  %v20866_v16 = vld [vmem:[#allocation61_spill] sm:$0xff] }
 0x4cf   : > { %v2290_v61 = vmul.f32 1.442695, %v2241_v39  ;;  %v20867_v13 = vld [vmem:[#allocation113_spill] sm:$0xff] }
 0x4d0   : > { %v2288_v45 = vmul.f32 1.442695, %v2240_v58  ;;  %3362 = vrot.lane.b32.xlu0 %v20862_v7, %s15907_s28  ;;  %v2187_v35 = vpop.xlane.xlu1 %2186 }
 0x4d1   : > { %v2243_v5 = vsub.f32 %v20863_v20, %v2187_v35  ;;  %v2184_v59 = vpop.xlane.xlu0 %2183  ;;  %v20868_v35 = vld [vmem:[#allocation70_spill] sm:$0xff] }
 0x4d2   : > { %15099 = vpow2.f32 %v2288_v45  ;;  %3525 = vrot.lane.b32.xlu1 %v20864_v12, %s15907_s28  ;;  %v2242_v14 = vsub.f32 %v20865_v19, %v2184_v59  ;;  %v20870_v59 = vld [vmem:[#allocation102_spill] sm:$0xff] }
 0x4d3   : > { %15101 = vpow2.f32 %v2290_v61  ;;  %v2294_v60 = vmul.f32 1.442695, %v2243_v5  ;;  %v20869_v61 = vld [vmem:[#allocation66_spill] sm:$0xff]  ;;  %v14412_v19 = vunpack.i.h.bf16 %v20870_v59 }
 0x4d4   : > { %v2292_v0 = vmul.f32 1.442695, %v2242_v14  ;;  %3366 = vrot.lane.b32.xlu0 %v20866_v16, %s15907_s28  ;;  %v2193_v39 = vpop.xlane.xlu1 %2192  ;;  %v14411_v14 = vunpack.i.l.bf16 %v20870_v59 }
 0x4d5   : > { %v2245_v58 = vsub.f32 %v20867_v13, %v2193_v39  ;;  %v2190_v18 = vpop.xlane.xlu0 %2189  ;;  %v20871_v39 = vld [vmem:[#allocation114_spill] sm:$0xff] }
 0x4d6   : > { %15103 = vpow2.f32 %v2292_v0  ;;  %3529 = vrot.lane.b32.xlu1 %v20868_v35, %s15907_s28  ;;  %v2244_v45 = vsub.f32 %v17123_v53, %v2190_v18  ;;  %v20872_v0 = vld [vmem:[#allocation75_spill] sm:$0xff]  ;;  %v20874_v53 = vld [vmem:[#allocation69_spill] sm:$0xff] }
 0x4d7   : > { %15105 = vpow2.f32 %v2294_v60  ;;  %v2298_v20 = vmul.f32 1.442695, %v2245_v58 }
 0x4d8   : > { %v2296_v11 = vmul.f32 1.442695, %v2244_v45  ;;  %3523 = vrot.lane.b32.xlu0 %v20869_v61, %s15907_s28  ;;  %v2199_v5 = vpop.xlane.xlu1 %2198 }
 0x4d9   : > { %v2247_v13 = vsub.f32 %v20871_v39, %v2199_v5  ;;  %v20876_v5 = vld [vmem:[#allocation78_spill] sm:$0xff] }
 0x4da   : > { %15107 = vpow2.f32 %v2296_v11  ;;  %3533 = vrot.lane.b32.xlu1 %v20872_v0, %s15907_s28  ;;  %v13727_v11 = vpack.c.bf16 %v14412_v19, %v14411_v14  ;;  %v20880_v14 = vld [vmem:[#allocation95_spill] sm:$0xff] }
 0x4db   : > { %15109 = vpow2.f32 %v2298_v20  ;;  %v2302_v45 = vmul.f32 1.442695, %v2247_v13  ;;  %v14417_v39 = vunpack.i.h.bf16 %v20880_v14  ;;  %v14416_v13 = vunpack.i.l.bf16 %v20880_v14  ;;  %v20885_v14 = vld [vmem:[#allocation39_spill] sm:$0xff] }
 0x4dc   : > { %v17362_v26 = vpop.eup %15099  ;;  %3527 = vrot.lane.b32.xlu0 %v20874_v53, %s15907_s28  ;;  %v2196_v18 = vpop.xlane.xlu1 %2195 }
 0x4dd   : > { %20873 = vst [vmem:[#allocation105_spill] sm:$0xff] %v17362_v26  ;;  %v17366_v60 = vpop.eup %15101  ;;  %v2246_v58 = vsub.f32 %v17138_v29, %v2196_v18  ;;  %12705 = vmatprep.mubr.msk.f32.mxu0 %vm2127_vm5, %v17362_v26  ;;  %v20878_v29 = vld [vmem:[#allocation74_spill] sm:$0xff] }
 0x4de   : > { %20875 = vst [vmem:[#allocation107_spill] sm:$0xff] %v17366_v60  ;;  %3537 = vrot.lane.b32.xlu1 %v20876_v5, %s15907_s28  ;;  %12706 = vmatmul.mubr.msk.f32.vlgmr.msra.gmra.mrb[80].mxu0 %vm2127_vm5, %v17366_v60  ;;  %v20893_v60 = vld [vmem:[#allocation91_spill] sm:$0xff] }
 0x4df   : > { %v2300_v20 = vmul.f32 1.442695, %v2246_v58  ;;  %13726 = vmatpush3.bf16.xpose.msk.msra.mxu0 %vm16611_vm1, %v17193_v54  ;;  %v20881_v54 = vld [vmem:[#allocation25_spill] sm:$0xff] }
 0x4e0   : > { %v17378_v59 = vpop.eup %15103  ;;  %3531 = vrot.lane.b32.xlu0 %v20878_v29, %s15907_s28  ;;  %13729 = vmatprep.subr.msk.bf16.mxu0 %vm16611_vm1, %v13727_v11  ;;  %v20883_v58 = vld [vmem:[#allocation77_spill] sm:$0xff] }
 0x4e1   : > { %20877 = vst [vmem:[#allocation109_spill] sm:$0xff] %v17378_v59  ;;  %v17384_v19 = vpop.eup %15105  ;;  %15111 = vpow2.f32 %v2300_v20  ;;  %12708 = vmatprep.mubr.msk.f32.mxu0 %vm2127_vm5, %v17378_v59  ;;  %v13733_v59 = vpack.c.bf16 %v14417_v39, %v14416_v13  ;;  %v20888_v39 = vld [vmem:[#allocation47_spill] sm:$0xff] }
 0x4e2   : > { %20879 = vst [vmem:[#allocation111_spill] sm:$0xff] %v17384_v19  ;;  %15113 = vpow2.f32 %v2302_v45  ;;  %14484 = vrot.lane.b32.xlu1 %v20881_v54, %s15907_s28  ;;  %12709 = vmatmul.mubr.msk.f32.gmra.mrb[82].mxu0 %vm2127_vm5, %v17384_v19  ;;  %v20886_v45 = vld [vmem:[#allocation41_spill] sm:$0xff]  ;;  %v20887_v54 = vld [vmem:[#allocation96_spill] sm:$0xff] }
 0x4e3   : > { %v14422_v26 = vunpack.i.h.bf16 %v20887_v54  ;;  %v20892_v19 = vld [vmem:[#allocation45_spill] sm:$0xff] }
 0x4e4   : > { %v17394_v18 = vpop.eup %15107  ;;  %3535 = vrot.lane.b32.xlu0 %v20883_v58, %s15907_s28 }
 0x4e5   : > { %20882 = vst [vmem:[#allocation113_spill] sm:$0xff] %v17394_v18  ;;  %v17398_v20 = vpop.eup %15109  ;;  %12711 = vmatprep.mubr.msk.f32.mxu0 %vm2127_vm5, %v17394_v18  ;;  %v14421_v18 = vunpack.i.l.bf16 %v20887_v54 }
 0x4e6   : > { %20884 = vst [vmem:[#allocation102_spill] sm:$0xff] %v17398_v20  ;;  %14499 = vrot.lane.b32.xlu1 %v20885_v14, %s15907_s28  ;;  %12712 = vmatmul.mubr.msk.f32.gmra.mrb[84].mxu0 %vm2127_vm5, %v17398_v20  ;;  %v20891_v20 = vld [vmem:[#allocation23_spill] sm:$0xff] }
 0x4e7   : > { %13732 = vmatpush3.bf16.xpose.msk.msra.mxu0 %vm16611_vm1, %v13727_v11 }
 0x4e8   : > { %14489 = vrot.lane.b32.xlu0 %v20886_v45, %s15907_s28  ;;  %13735 = vmatprep.subr.msk.bf16.mxu0 %vm16611_vm1, %v13733_v59  ;;  %v13739_v45 = vpack.c.bf16 %v14422_v26, %v14421_v18  ;;  %v20895_v26 = vld [vmem:[#allocation104_spill] sm:$0xff] }
 0x4e9   : > { %v14447_v18 = vunpack.i.h.bf16 %v20895_v26 }
 0x4ea   : > { %14509 = vrot.lane.b32.xlu1 %v20888_v39, %s15907_s28 }
 0x4eb   : > { %v17416_v13 = vpop.eup %15111 }
 0x4ec   : > { %20889 = vst [vmem:[#allocation114_spill] sm:$0xff] %v17416_v13  ;;  %v17418_v14 = vpop.eup %15113  ;;  %14494 = vrot.lane.b32.xlu0 %v20891_v20, %s15907_s28  ;;  %12714 = vmatprep.mubr.msk.f32.mxu0 %vm2127_vm5, %v17416_v13  ;;  %v20894_v13 = vld [vmem:[#allocation33_spill] sm:$0xff] }
 0x4ed   : > { %20890 = vst [vmem:[#allocation95_spill] sm:$0xff] %v17418_v14  ;;  %v2205_v11 = vpop.xlane.xlu1 %2204  ;;  %12715 = vmatmul.mubr.msk.f32.gmra.mrb[86].mxu0 %vm2127_vm5, %v17418_v14 }
 0x4ee   : > { %v2249_v54 = vsub.f32 %v17169_v1, %v2205_v11  ;;  %14519 = vrot.lane.b32.xlu1 %v20892_v19, %s15907_s28  ;;  %v2202_v39 = vpop.xlane.xlu0 %2201  ;;  %12761 = vmatprep.mubr.msk.f32.mxu0 %vm1514_vm0, %v20893_v60  ;;  %v14446_v11 = vunpack.i.l.bf16 %v20895_v26  ;;  %v20896_v19 = vld [vmem:[#allocation50_spill] sm:$0xff] }
 0x4ef   : > { %v2248_v17 = vsub.f32 %v17175_v10, %v2202_v39  ;;  %13738 = vmatpush3.bf16.xpose.msk.msra.mxu0 %vm16611_vm1, %v13733_v59  ;;  %v20897_v10 = vld [vmem:[#allocation31_spill] sm:$0xff]  ;;  %v20898_v59 = vld [vmem:[#allocation64_spill] sm:$0xff] }
 0x4f0   : > { %v2306_v20 = vmul.f32 1.442695, %v2249_v54  ;;  %14504 = vrot.lane.b32.xlu0 %v20894_v13, %s15907_s28  ;;  %13741 = vmatprep.subr.msk.bf16.mxu0 %vm16611_vm1, %v13739_v45  ;;  %v13769_v60 = vpack.c.bf16 %v14447_v18, %v14446_v11  ;;  %v20900_v39 = vld [vmem:[#allocation100_spill] sm:$0xff]  ;;  %v20902_v11 = vld [vmem:[#allocation65_spill] sm:$0xff] }
 0x4f1   : > { %v2304_v1 = vmul.f32 1.442695, %v2248_v17  ;;  %v20899_v17 = vld [vmem:[#allocation52_spill] sm:$0xff]  ;;  %v14432_v54 = vunpack.i.h.bf16 %v20900_v39 }
 0x4f2   : > { %14529 = vrot.lane.b32.xlu1 %v20896_v19, %s15907_s28 }
 0x4f3   : > { %15115 = vpow2.f32 %v2304_v1  ;;  %v20901_v1 = vld [vmem:[#allocation108_spill] sm:$0xff] }
 0x4f4   : > { %15117 = vpow2.f32 %v2306_v20  ;;  %14514 = vrot.lane.b32.xlu0 %v20897_v10, %s15907_s28  ;;  %v14431_v20 = vunpack.i.l.bf16 %v20900_v39  ;;  %v14452_v26 = vunpack.i.h.bf16 %v20901_v1  ;;  %v14451_v18 = vunpack.i.l.bf16 %v20901_v1  ;;  %v20906_v39 = vld [vmem:[#allocation93_spill] sm:$0xff] }
 0x4f6   : > { %14539 = vrot.lane.b32.xlu1 %v20898_v59, %s15907_s28  ;;  %v13751_v59 = vpack.c.bf16 %v14432_v54, %v14431_v20  ;;  %v13775_v1 = vpack.c.bf16 %v14452_v26, %v14451_v18  ;;  %v20909_v54 = vld [vmem:[#allocation101_spill] sm:$0xff] }
 0x4f7   : > { %13744 = vmatpush3.bf16.xpose.msk.msra.mxu0 %vm16611_vm1, %v13739_v45  ;;  %v14437_v20 = vunpack.i.h.bf16 %v20909_v54  ;;  %v14436_v26 = vunpack.i.l.bf16 %v20909_v54 }
 0x4f8   : > { %14524 = vrot.lane.b32.xlu0 %v20899_v17, %s15907_s28  ;;  %13771 = vmatprep.subr.msk.bf16.mxu0 %vm16611_vm1, %v13769_v60  ;;  %v20905_v17 = vld [vmem:[#allocation92_spill] sm:$0xff] }
 0x4fc   : > { %14534 = vrot.lane.b32.xlu0 %v20902_v11, %s15907_s28  ;;  %v20907_v11 = vld [vmem:[#allocation72_spill] sm:$0xff] }
 0x4fd   : > { %v17458_v10 = vpop.eup %15115 }
 0x4fe   : > { %20903 = vst [vmem:[#allocation96_spill] sm:$0xff] %v17458_v10  ;;  %v17460_v45 = vpop.eup %15117  ;;  %12733 = vmatprep.mubr.msk.f32.mxu1 %vm2127_vm5, %v17458_v10  ;;  %12762 = vmatmul.mubr.msk.f32.vlgmr.msra.gmra.mrb[88].mxu0 %vm1514_vm0, %v20905_v17  ;;  %v20908_v17 = vld [vmem:[#allocation94_spill] sm:$0xff] }
 0x4ff   : > { %20904 = vst [vmem:[#allocation91_spill] sm:$0xff] %v17460_v45  ;;  %12734 = vmatmul.mubr.msk.f32.vlgmr.msra.gmra.mrb[64].mxu1 %vm2127_vm5, %v17460_v45  ;;  %12764 = vmatprep.mubr.msk.f32.mxu0 %vm1514_vm0, %v20906_v39  ;;  %v13757_v39 = vpack.c.bf16 %v14437_v20, %v14436_v26 }
 0x500   : > { %13750 = vmatpush3.bf16.xpose.msk.msra.mxu1 %vm16611_vm1, %v17265_v38  ;;  %13774 = vmatpush3.bf16.xpose.msk.msra.mxu0 %vm16611_vm1, %v13769_v60  ;;  %v20910_v38 = vld [vmem:[#allocation112_spill] sm:$0xff] }
 0x501   : > { %14544 = vrot.lane.b32.xlu0 %v20907_v11, %s15907_s28  ;;  %13753 = vmatprep.subr.msk.bf16.mxu1 %vm16611_vm1, %v13751_v59  ;;  %v14457_v18 = vunpack.i.h.bf16 %v20910_v38  ;;  %v14456_v60 = vunpack.i.l.bf16 %v20910_v38  ;;  %v14465_v11 = vpop.permute.xlu0 %14464 }
 0x502   : > { %13777 = vmatprep.subr.msk.bf16.mxu0 %vm16611_vm1, %v13775_v1  ;;  %12765 = vmatmul.mubr.msk.f32.gmra.mrb[90].mxu0 %vm1514_vm0, %v20908_v17  ;;  %v20911_v17 = vld [vmem:[#allocation103_spill] sm:$0xff]  ;;  %v14467_v38 = vunpack.i.h.bf16 %v14465_v11  ;;  %v14466_v20 = vunpack.i.l.bf16 %v14465_v11 }
 0x503   : > { %v13781_v19 = vpack.c.bf16 %v14457_v18, %v14456_v60  ;;  %v14442_v54 = vunpack.i.h.bf16 %v20911_v17  ;;  %v14441_v10 = vunpack.i.l.bf16 %v20911_v17 }
 0x504   : > { %v13787_v18 = vpack.c.bf16 %v14467_v38, %v14466_v20 }
 0x505   : > { %v13763_v26 = vpack.c.bf16 %v14442_v54, %v14441_v10 }
 0x508   : > { %13756 = vmatpush3.bf16.xpose.msk.msra.mxu1 %vm16611_vm1, %v13751_v59  ;;  %13780 = vmatpush3.bf16.xpose.msk.msra.mxu0 %vm16611_vm1, %v13775_v1  ;;  %v20912_v59 = vld [vmem:[#allocation110_spill] sm:$0xff] }
 0x509   : > { %13759 = vmatprep.subr.msk.bf16.mxu1 %vm16611_vm1, %v13757_v39  ;;  %13783 = vmatprep.subr.msk.bf16.mxu0 %vm16611_vm1, %v13781_v19  ;;  %v14462_v1 = vunpack.i.h.bf16 %v20912_v59  ;;  %v14461_v60 = vunpack.i.l.bf16 %v20912_v59 }
 0x50b   : > { %v17507_v17 = vpack.c.bf16 %v14462_v1, %v14461_v60 }
 0x510   : > { %13762 = vmatpush3.bf16.xpose.msk.msra.mxu1 %vm16611_vm1, %v13757_v39  ;;  %13786 = vmatpush3.bf16.xpose.msk.msra.mxu0 %vm16611_vm1, %v13781_v19  ;;  %v17516_v19 = vpop.permute.xlu1 %14469 }
 0x511   : > { %13765 = vmatprep.subr.msk.bf16.mxu1 %vm16611_vm1, %v13763_v26  ;;  %13789 = vmatprep.subr.msk.bf16.mxu0 %vm16611_vm1, %v13787_v18 }
 0x518   : > { %13768 = vmatpush3.bf16.xpose.msk.msra.mxu1 %vm16611_vm1, %v13763_v26  ;;  %13792 = vmatpush3.bf16.xpose.msk.msra.mxu0 %vm16611_vm1, %v13787_v18 }
 0x519   : > { %13795 = vmatprep.subr.msk.bf16.mxu1 %vm16611_vm1, %v17507_v17 }
 0x522   : > { %v2208_v10 = vpop.xlane.xlu1 %2207 }
 0x523   : > { %v2250_v11 = vsub.f32 %v17275_v47, %v2208_v10  ;;  %v2211_v39 = vpop.xlane.xlu0 %2210 }
 0x524   : > { %v2251_v54 = vsub.f32 %v17279_v3, %v2211_v39 }
 0x525   : > { %v2308_v38 = vmul.f32 1.442695, %v2250_v11 }
 0x526   : > { %v2310_v20 = vmul.f32 1.442695, %v2251_v54  ;;  %v2214_v59 = vpop.xlane.xlu1 %2213 }
 0x527   : > { %15119 = vpow2.f32 %v2308_v38  ;;  %v2252_v26 = vsub.f32 %v17283_v22, %v2214_v59  ;;  %v2217_v1 = vpop.xlane.xlu0 %2216 }
 0x528   : > { %15121 = vpow2.f32 %v2310_v20  ;;  %v2253_v18 = vsub.f32 %v17289_v27, %v2217_v1 }
 0x529   : > { %v2312_v60 = vmul.f32 1.442695, %v2252_v26 }
 0x52a   : > { %v2314_v13 = vmul.f32 1.442695, %v2253_v18  ;;  %v2223_v45 = vpop.xlane.xlu1 %2222  ;;  %v17522_v14 = vpop.f32.mrb[72].mxu0 }
 0x52b   : > { %20913 = vst [vmem:[#allocation104_spill] sm:$0xff] %v17522_v14  ;;  %15123 = vpow2.f32 %v2312_v60  ;;  %v2255_v47 = vsub.f32 %v17295_v2, %v2223_v45  ;;  %v17525_v10 = vpop.f32.mrb[73].mxu0  ;;  %v2220_v3 = vpop.xlane.xlu0 %2219 }
 0x52c   : > { %20914 = vst [vmem:[#allocation100_spill] sm:$0xff] %v17525_v10  ;;  %15125 = vpow2.f32 %v2314_v13  ;;  %v2254_v11 = vsub.f32 %v17301_v50, %v2220_v3 }
 0x52d   : > { %v2318_v39 = vmul.f32 1.442695, %v2255_v47 }
 0x52e   : > { %v2316_v22 = vmul.f32 1.442695, %v2254_v11  ;;  %v3194_v54 = vpop.permute.xlu1 %3193  ;;  %v17528_v38 = vpop.f32.mrb[74].mxu0 }
 0x52f   : > { %20915 = vst [vmem:[#allocation108_spill] sm:$0xff] %v17528_v38  ;;  %v17530_v27 = vpop.f32.mrb[75].mxu0  ;;  %v3025_v20 = vpop.permute.xlu0 %3024  ;;  %v20928_v38 = vld [vmem:[#allocation98_spill] sm:$0xff] }
 0x530   : > { %20916 = vst [vmem:[#allocation92_spill] sm:$0xff] %v17530_v27  ;;  %15127 = vpow2.f32 %v2316_v22  ;;  %12767 = vmatprep.mubr.msk.f32.mxu0 %vm1514_vm0, %v3025_v20 }
 0x531   : > { %v17533_v59 = vpop.eup %15119  ;;  %15129 = vpow2.f32 %v2318_v39 }
 0x532   : > { %20917 = vst [vmem:[#allocation93_spill] sm:$0xff] %v17533_v59  ;;  %v17535_v2 = vpop.eup %15121  ;;  %v3196_v45 = vpop.permute.xlu1 %3195  ;;  %12736 = vmatprep.mubr.msk.f32.mxu1 %vm2127_vm5, %v17533_v59 }
 0x533   : > { %20918 = vst [vmem:[#allocation94_spill] sm:$0xff] %v17535_v2  ;;  %v17537_v13 = vpop.f32.mrb[76].mxu0  ;;  %12737 = vmatmul.mubr.msk.f32.gmra.mrb[66].mxu1 %vm2127_vm5, %v17535_v2  ;;  %v3027_v26 = vpop.permute.xlu0 %3026 }
 0x534   : > { %20919 = vst [vmem:[#allocation101_spill] sm:$0xff] %v17537_v13  ;;  %v17541_v50 = vpop.f32.mrb[77].mxu0  ;;  %12768 = vmatmul.mubr.msk.f32.gmra.mrb[92].mxu0 %vm1514_vm0, %v3027_v26  ;;  %v14472_v13 = vunpack.i.h.bf16 %v17516_v19 }
 0x535   : > { %20920 = vst [vmem:[#allocation112_spill] sm:$0xff] %v17541_v50  ;;  %v17546_v1 = vpop.eup %15123  ;;  %v14471_v50 = vunpack.i.l.bf16 %v17516_v19  ;;  %v20929_v19 = vld [vmem:[#allocation99_spill] sm:$0xff] }
 0x536   : > { %20921 = vst [vmem:[#allocation103_spill] sm:$0xff] %v17546_v1  ;;  %v17548_v18 = vpop.eup %15125  ;;  %v3198_v60 = vpop.permute.xlu1 %3197  ;;  %12739 = vmatprep.mubr.msk.f32.mxu1 %vm2127_vm5, %v17546_v1 }
 0x537   : > { %20922 = vst [vmem:[#allocation110_spill] sm:$0xff] %v17548_v18  ;;  %12740 = vmatmul.mubr.msk.f32.gmra.mrb[68].mxu1 %vm2127_vm5, %v17548_v18  ;;  %v3029_v47 = vpop.permute.xlu0 %3028  ;;  %v13799_v27 = vpack.c.bf16 %v14472_v13, %v14471_v50 }
 0x538   : > { %12770 = vmatprep.mubr.msk.f32.mxu0 %vm1514_vm0, %v3029_v47  ;;  %v20927_v47 = vld [vmem:[#allocation97_spill] sm:$0xff] }
 0x539   : > { %v17555_v3 = vpop.f32.mrb[78].mxu0 }
 0x53a   : > { %20923 = vst [vmem:[#allocation131_spill] sm:$0xff] %v17555_v3  ;;  %v17557_v11 = vpop.eup %15127  ;;  %v3200_v39 = vpop.permute.xlu1 %3199 }
 0x53b   : > { %20924 = vst [vmem:[#allocation132_spill] sm:$0xff] %v17557_v11  ;;  %v17559_v22 = vpop.f32.mrb[79].mxu0  ;;  %v17561_v20 = vpop.eup %15129  ;;  %12742 = vmatprep.mubr.msk.f32.mxu1 %vm2127_vm5, %v17557_v11  ;;  %v20930_v11 = vld [vmem:[#allocation106_spill] sm:$0xff] }
 0x53c   : > { %20925 = vst [vmem:[#allocation133_spill] sm:$0xff] %v17559_v22  ;;  %20926 = vst [vmem:[#allocation134_spill] sm:$0xff] %v17561_v20  ;;  %v3031_v26 = vpop.permute.xlu0 %3030  ;;  %12743 = vmatmul.mubr.msk.f32.gmra.mrb[70].mxu1 %vm2127_vm5, %v17561_v20 }
 0x53d   : > { %12771 = vmatmul.mubr.msk.f32.gmra.mrb[94].mxu0 %vm1514_vm0, %v3031_v26  ;;  %12789 = vmatprep.mubr.msk.f32.mxu1 %vm1514_vm0, %v20927_v47 }
 0x53e   : > { %v3355_v3 = vpop.permute.xlu1 %3354 }
 0x53f   : > { %12817 = vmatprep.mubr.msk.f32.mxu0 %vm1514_vm0, %v3355_v3 }
 0x540   : > { %v14475_v22 = vpop.permute.xlu0 %14474  ;;  %12790 = vmatmul.mubr.msk.f32.vlgmr.msra.gmra.mrb[72].mxu1 %vm1514_vm0, %v20928_v38 }
 0x541   : > { %13798 = vmatpush3.bf16.xpose.msk.msra.mxu1 %vm16611_vm1, %v17507_v17  ;;  %12792 = vmatprep.mubr.msk.f32.mxu1 %vm1514_vm0, %v20929_v19  ;;  %v14477_v14 = vunpack.i.h.bf16 %v14475_v22  ;;  %v14476_v10 = vunpack.i.l.bf16 %v14475_v22 }
 0x542   : > { %13801 = vmatprep.subr.msk.bf16.mxu1 %vm16611_vm1, %v13799_v27  ;;  %v3359_v26 = vpop.permute.xlu1 %3358 }
 0x543   : > { %v13805_v13 = vpack.c.bf16 %v14477_v14, %v14476_v10 }
 0x544   : > { %v3357_v47 = vpop.permute.xlu0 %3356  ;;  %12793 = vmatmul.mubr.msk.f32.gmra.mrb[74].mxu1 %vm1514_vm0, %v20930_v11 }
 0x545   : > { %12818 = vmatmul.mubr.msk.f32.vlgmr.msra.gmra.mrb[96].mxu0 %vm1514_vm0, %v3357_v47  ;;  %12795 = vmatprep.mubr.msk.f32.mxu1 %vm1514_vm0, %v3194_v54 }
 0x546   : > { %12820 = vmatprep.mubr.msk.f32.mxu0 %vm1514_vm0, %v3359_v26  ;;  %v14480_v17 = vpop.permute.xlu1 %14479 }
 0x547   : > { %v14482_v54 = vunpack.i.h.bf16 %v14480_v17  ;;  %v14481_v11 = vunpack.i.l.bf16 %v14480_v17 }
 0x548   : > { %v3361_v38 = vpop.permute.xlu0 %3360  ;;  %12796 = vmatmul.mubr.msk.f32.gmra.mrb[76].mxu1 %vm1514_vm0, %v3196_v45 }
 0x549   : > { %12821 = vmatmul.mubr.msk.f32.gmra.mrb[98].mxu0 %vm1514_vm0, %v3361_v38  ;;  %13804 = vmatpush3.bf16.xpose.msk.msra.mxu1 %vm16611_vm1, %v13799_v27 }
 0x54a   : > { %12798 = vmatprep.mubr.msk.f32.mxu1 %vm1514_vm0, %v3198_v60  ;;  %13807 = vmatprep.subr.msk.bf16.mxu1 %vm16611_vm1, %v13805_v13  ;;  %v3365_v50 = vpop.permute.xlu1 %3364  ;;  %v13811_v60 = vpack.c.bf16 %v14482_v54, %v14481_v11 }
 0x54c   : > { %v3363_v3 = vpop.permute.xlu0 %3362  ;;  %12799 = vmatmul.mubr.msk.f32.gmra.mrb[78].mxu1 %vm1514_vm0, %v3200_v39 }
 0x54d   : > { %12823 = vmatprep.mubr.msk.f32.mxu0 %vm1514_vm0, %v3363_v3 }
 0x54e   : > { %12824 = vmatmul.mubr.msk.f32.gmra.mrb[100].mxu0 %vm1514_vm0, %v3365_v50  ;;  %v17597_v14 = vpop.f32.mrb[56].mxu1  ;;  %v3369_v10 = vpop.permute.xlu1 %3368 }
 0x54f   : > { %20931 = vst [vmem:[#allocation97_spill] sm:$0xff] %v17597_v14  ;;  %v17599_v45 = vpop.f32.mrb[57].mxu1 }
 0x550   : > { %20932 = vst [vmem:[#allocation98_spill] sm:$0xff] %v17599_v45  ;;  %v3367_v27 = vpop.permute.xlu0 %3366 }
 0x551   : > { %12826 = vmatprep.mubr.msk.f32.mxu0 %vm1514_vm0, %v3367_v27  ;;  %13810 = vmatpush3.bf16.xpose.msk.msra.mxu1 %vm16611_vm1, %v13805_v13 }
 0x552   : > { %12827 = vmatmul.mubr.msk.f32.gmra.mrb[102].mxu0 %vm1514_vm0, %v3369_v10  ;;  %v17605_v22 = vpop.f32.mrb[58].mxu1  ;;  %13813 = vmatprep.subr.msk.bf16.mxu1 %vm16611_vm1, %v13811_v60  ;;  %v3526_v39 = vpop.permute.xlu1 %3525 }
 0x553   : > { %20933 = vst [vmem:[#allocation99_spill] sm:$0xff] %v17605_v22  ;;  %v17609_v19 = vpop.f32.mrb[59].mxu1 }
 0x554   : > { %20934 = vst [vmem:[#allocation106_spill] sm:$0xff] %v17609_v19  ;;  %v3524_v26 = vpop.permute.xlu0 %3523 }
 0x555   : > { %12845 = vmatprep.mubr.msk.f32.mxu1 %vm1514_vm0, %v3524_v26 }
 0x556   : > { %v17612_v47 = vpop.f32.mrb[60].mxu1  ;;  %v3530_v17 = vpop.permute.xlu1 %3529 }
 0x557   : > { %20935 = vst [vmem:[#allocation135_spill] sm:$0xff] %v17612_v47  ;;  %v17614_v38 = vpop.f32.mrb[61].mxu1 }
 0x558   : > { %20936 = vst [vmem:[#allocation136_spill] sm:$0xff] %v17614_v38  ;;  %v3528_v50 = vpop.permute.xlu0 %3527 }
 0x559   : > { %13816 = vmatpush3.bf16.xpose.msk.msra.mxu1 %vm16611_vm1, %v13811_v60 }
 0x55a   : > { %v17618_v13 = vpop.f32.mrb[62].mxu1  ;;  %v3534_v3 = vpop.permute.xlu1 %3533 }
 0x55b   : > { %20937 = vst [vmem:[#allocation137_spill] sm:$0xff] %v17618_v13  ;;  %v17620_v54 = vpop.f32.mrb[63].mxu1 }
 0x55c   : > { %20938 = vst [vmem:[#allocation138_spill] sm:$0xff] %v17620_v54  ;;  %v3532_v11 = vpop.permute.xlu0 %3531 }
 0x55e   : > { %v3538_v10 = vpop.permute.xlu1 %3537 }
 0x560   : > { %v3536_v27 = vpop.permute.xlu0 %3535  ;;  %12846 = vmatmul.mubr.msk.f32.vlgmr.msra.gmra.mrb[80].mxu1 %vm1514_vm0, %v3526_v39 }
 0x561   : > { %12848 = vmatprep.mubr.msk.f32.mxu1 %vm1514_vm0, %v3528_v50 }
 0x562   : > { %v14485_v26 = vpop.permute.xlu1 %14484 }
 0x563   : > { %v14487_v47 = vunpack.i.h.bf16 %v14485_v26  ;;  %v14486_v22 = vunpack.i.l.bf16 %v14485_v26 }
 0x564   : > { %v14490_v38 = vpop.permute.xlu0 %14489  ;;  %12849 = vmatmul.mubr.msk.f32.gmra.mrb[82].mxu1 %vm1514_vm0, %v3530_v17 }
 0x565   : > { %v14492_v19 = vunpack.i.h.bf16 %v14490_v38  ;;  %v14491_v14 = vunpack.i.l.bf16 %v14490_v38  ;;  %12851 = vmatprep.mubr.msk.f32.mxu1 %vm1514_vm0, %v3532_v11  ;;  %v13817_v60 = vpack.c.bf16 %v14487_v47, %v14486_v22 }
 0x566   : > { %v14500_v13 = vpop.permute.xlu1 %14499 }
 0x567   : > { %v13833_v54 = vpack.c.bf16 %v14492_v19, %v14491_v14  ;;  %v14502_v45 = vunpack.i.h.bf16 %v14500_v13  ;;  %v14501_v1 = vunpack.i.l.bf16 %v14500_v13  ;;  %13818 = vmatprep.subr.bf16.mxu0 %v13817_v60 }
 0x568   : > { %v14495_v59 = vpop.permute.xlu0 %14494  ;;  %12852 = vmatmul.mubr.msk.f32.gmra.mrb[84].mxu1 %vm1514_vm0, %v3534_v3  ;;  %13820 = vmatpush3.bf16.msra.mxu0 %v13817_v60 }
 0x569   : > { %v14497_v39 = vunpack.i.h.bf16 %v14495_v59  ;;  %v14496_v20 = vunpack.i.l.bf16 %v14495_v59  ;;  %12854 = vmatprep.mubr.msk.f32.mxu1 %vm1514_vm0, %v3536_v27  ;;  %13834 = vmatprep.subr.bf16.mxu1 %v13833_v54  ;;  %v13837_v38 = vpack.c.bf16 %v14502_v45, %v14501_v1 }
 0x56a   : > { %13836 = vmatpush3.bf16.msra.mxu1 %v13833_v54  ;;  %v14510_v17 = vpop.permute.xlu1 %14509 }
 0x56b   : > { %v13821_v50 = vpack.c.bf16 %v14497_v39, %v14496_v20  ;;  %v14512_v11 = vunpack.i.h.bf16 %v14510_v17  ;;  %v14511_v22 = vunpack.i.l.bf16 %v14510_v17  ;;  %13838 = vmatprep.subr.bf16.mxu1 %v13837_v38 }
 0x56c   : > { %v14505_v47 = vpop.permute.xlu0 %14504  ;;  %12855 = vmatmul.mubr.msk.f32.gmra.mrb[86].mxu1 %vm1514_vm0, %v3538_v10 }
 0x56d   : > { %v14507_v14 = vunpack.i.h.bf16 %v14505_v47  ;;  %v14506_v19 = vunpack.i.l.bf16 %v14505_v47  ;;  %13822 = vmatprep.subr.bf16.mxu0 %v13821_v50  ;;  %v13841_v59 = vpack.c.bf16 %v14512_v11, %v14511_v22 }
 0x56e   : > { %13824 = vmatpush3.bf16.msra.mxu0 %v13821_v50  ;;  %13840 = vmatpush3.bf16.msra.mxu1 %v13837_v38  ;;  %v14520_v13 = vpop.permute.xlu1 %14519 }
 0x56f   : > { %v13825_v3 = vpack.c.bf16 %v14507_v14, %v14506_v19  ;;  %v14522_v27 = vunpack.i.h.bf16 %v14520_v13  ;;  %v14521_v26 = vunpack.i.l.bf16 %v14520_v13  ;;  %13842 = vmatprep.subr.bf16.mxu1 %v13841_v59 }
 0x570   : > { %v14515_v1 = vpop.permute.xlu0 %14514 }
 0x571   : > { %v14517_v45 = vunpack.i.h.bf16 %v14515_v1  ;;  %v14516_v20 = vunpack.i.l.bf16 %v14515_v1  ;;  %13826 = vmatprep.subr.bf16.mxu0 %v13825_v3  ;;  %v13845_v54 = vpack.c.bf16 %v14522_v27, %v14521_v26 }
 0x572   : > { %13828 = vmatpush3.bf16.msra.mxu0 %v13825_v3  ;;  %13844 = vmatpush3.bf16.msra.mxu1 %v13841_v59 }
 0x573   : > { %v13829_v60 = vpack.c.bf16 %v14517_v45, %v14516_v20  ;;  %13846 = vmatprep.subr.bf16.mxu1 %v13845_v54 }
 0x574   : > { %v14525_v39 = vpop.permute.xlu0 %14524 }
 0x575   : > { %v14527_v10 = vunpack.i.h.bf16 %v14525_v39  ;;  %v14526_v17 = vunpack.i.l.bf16 %v14525_v39  ;;  %13830 = vmatprep.subr.bf16.mxu0 %v13829_v60 }
 0x576   : > { %13832 = vmatpush3.bf16.msra.mxu0 %v13829_v60  ;;  %13848 = vmatpush3.bf16.msra.mxu1 %v13845_v54 }
 0x577   : > { %v17629_v38 = vpack.c.bf16 %v14527_v10, %v14526_v17 }
 0x578   : > { %v17631_v50 = vpop.permute.xlu0 %14534 }
 0x579   : > { %13850 = vmatprep.subr.bf16.mxu0 %v17629_v38 }
 0x57c   : > { %v14545_v11 = vpop.permute.xlu0 %14544 }
 0x57d   : > { %v14547_v22 = vunpack.i.h.bf16 %v14545_v11  ;;  %v14546_v47 = vunpack.i.l.bf16 %v14545_v11 }
 0x57f   : > { %v17634_v14 = vpack.c.bf16 %v14547_v22, %v14546_v47 }
 0x581   : > { %13866 = vmatprep.subr.bf16.mxu1 %v17634_v14 }
 0x5b1   : > { %v17637_v19 = vpop.f32.mrb[80].mxu0 }
 0x5b2   : > { %20939 = vst [vmem:[#allocation139_spill] sm:$0xff] %v17637_v19  ;;  %v17639_v59 = vpop.f32.mrb[81].mxu0 }
 0x5b3   : > { %20940 = vst [vmem:[#allocation140_spill] sm:$0xff] %v17639_v59 }
 0x5b5   : > { %v17641_v13 = vpop.f32.mrb[82].mxu0 }
 0x5b6   : > { %20941 = vst [vmem:[#allocation141_spill] sm:$0xff] %v17641_v13  ;;  %v17643_v3 = vpop.f32.mrb[83].mxu0 }
 0x5b7   : > { %20942 = vst [vmem:[#allocation142_spill] sm:$0xff] %v17643_v3 }
 0x5b9   : > { %v17645_v27 = vpop.f32.mrb[84].mxu0 }
 0x5ba   : > { %20943 = vst [vmem:[#allocation143_spill] sm:$0xff] %v17645_v27  ;;  %v17647_v26 = vpop.f32.mrb[85].mxu0 }
 0x5bb   : > { %20944 = vst [vmem:[#allocation144_spill] sm:$0xff] %v17647_v26 }
 0x5c0   : > { %v17649_v1 = vpop.f32.mrb[86].mxu0 }
 0x5c1   : > { %20945 = vst [vmem:[#allocation145_spill] sm:$0xff] %v17649_v1  ;;  %v17651_v45 = vpop.f32.mrb[87].mxu0 }
 0x5c2   : > { %20946 = vst [vmem:[#allocation146_spill] sm:$0xff] %v17651_v45 }
 0x5d1   : > { %v12763_v20 = vpop.f32.mrb[88].mxu0 }
 0x5d2   : > { %v17654_v54 = vadd.f32 %v12763_v20, %v16959_v49  ;;  %v17656_v60 = vpop.f32.mrb[64].mxu1  ;;  %v3146_v39 = vpop.f32.mrb[89].mxu0 }
 0x5d3   : > { %20947 = vst [vmem:[#allocation147_spill] sm:$0xff] %v17656_v60  ;;  %v17658_v10 = vpop.f32.mrb[65].mxu1  ;;  %v17661_v17 = vadd.f32 %v3146_v39, %v16961_v52 }
 0x5d4   : > { %20948 = vst [vmem:[#allocation148_spill] sm:$0xff] %v17658_v10  ;;  %v3695_v11 = vsel %vm2127_vm5, %v17654_v54, -inf }
 0x5d5   : > { %3696 = vmax.xlane.f32.xlu0 %v3695_v11  ;;  %v12766_v22 = vpop.f32.mrb[90].mxu0  ;;  %v3692_v10 = vsel %vm2127_vm5, %v17661_v17, -inf }
 0x5d6   : > { %v17666_v47 = vadd.f32 %v12766_v22, %v16971_v24  ;;  %v3156_v1 = vpop.f32.mrb[91].mxu0 }
 0x5d7   : > { %v17669_v20 = vadd.f32 %v3156_v1, %v16975_v33 }
 0x5d8   : > { %v3701_v60 = vsel %vm2127_vm5, %v17666_v47, -inf }
 0x5d9   : > { %3702 = vmax.xlane.f32.xlu1 %v3701_v60  ;;  %3693 = vmax.xlane.f32.xlu0 %v3692_v10  ;;  %v3698_v39 = vsel %vm2127_vm5, %v17669_v20, -inf }
 0x5dd   : > { %3699 = vmax.xlane.f32.xlu1 %v3698_v39 }
 0x606   : > { %v17677_v11 = vpop.f32.mrb[66].mxu1 }
 0x607   : > { %20949 = vst [vmem:[#allocation149_spill] sm:$0xff] %v17677_v11  ;;  %v17679_v22 = vpop.f32.mrb[67].mxu1  ;;  %v12769_v45 = vpop.f32.mrb[92].mxu0 }
 0x608   : > { %20950 = vst [vmem:[#allocation150_spill] sm:$0xff] %v17679_v22  ;;  %v17682_v1 = vadd.f32 %v12769_v45, %v16987_v25  ;;  %v3166_v27 = vpop.f32.mrb[93].mxu0 }
 0x609   : > { %v17685_v26 = vadd.f32 %v3166_v27, %v16991_v15 }
 0x60a   : > { %v17687_v13 = vpop.f32.mrb[68].mxu1  ;;  %v3707_v60 = vsel %vm2127_vm5, %v17682_v1, -inf }
 0x60b   : > { %20951 = vst [vmem:[#allocation151_spill] sm:$0xff] %v17687_v13  ;;  %v17691_v10 = vpop.f32.mrb[69].mxu1  ;;  %3708 = vmax.xlane.f32.xlu1 %v3707_v60  ;;  %v3704_v39 = vsel %vm2127_vm5, %v17685_v26, -inf }
 0x60c   : > { %20952 = vst [vmem:[#allocation152_spill] sm:$0xff] %v17691_v10 }
 0x60f   : > { %v17695_v11 = vpop.f32.mrb[70].mxu1  ;;  %3705 = vmax.xlane.f32.xlu1 %v3704_v39 }
 0x610   : > { %20953 = vst [vmem:[#allocation153_spill] sm:$0xff] %v17695_v11  ;;  %v12772_v22 = vpop.f32.mrb[94].mxu0  ;;  %v17700_v27 = vpop.f32.mrb[71].mxu1 }
 0x611   : > { %v17698_v45 = vadd.f32 %v12772_v22, %v17001_v63  ;;  %20954 = vst [vmem:[#allocation154_spill] sm:$0xff] %v17700_v27  ;;  %v3176_v3 = vpop.f32.mrb[95].mxu0 }
 0x612   : > { %v17703_v13 = vadd.f32 %v3176_v3, %v17007_v4 }
 0x613   : > { %v3713_v10 = vsel %vm2127_vm5, %v17698_v45, -inf  ;;  %v12791_v60 = vpop.f32.mrb[72].mxu1 }
 0x614   : > { %3714 = vmax.xlane.f32.xlu1 %v3713_v10  ;;  %v17708_v19 = vadd.f32 %v12791_v60, %v16959_v49  ;;  %v3315_v11 = vpop.f32.mrb[73].mxu1  ;;  %v3710_v39 = vsel %vm2127_vm5, %v17703_v13, -inf }
 0x615   : > { %v17721_v2 = vadd.f32 %v3315_v11, %v16961_v52 }
 0x616   : > { %v3719_v22 = vsel %vm2127_vm5, %v17708_v19, -inf }
 0x617   : > { %v12794_v27 = vpop.f32.mrb[74].mxu1  ;;  %3720 = vmax.xlane.f32.xlu0 %v3719_v22 }
 0x618   : > { %v12819_v59 = vpop.f32.mrb[96].mxu0  ;;  %3711 = vmax.xlane.f32.xlu1 %v3710_v39  ;;  %v17715_v3 = vadd.f32 %v12794_v27, %v16971_v24  ;;  %v3325_v10 = vpop.f32.mrb[75].mxu1 }
 0x619   : > { %v17718_v18 = vadd.f32 %v12819_v59, %v16959_v49  ;;  %v3484_v60 = vpop.f32.mrb[97].mxu0  ;;  %v17724_v48 = vadd.f32 %v3325_v10, %v16975_v33  ;;  %v3716_v10 = vsel %vm2127_vm5, %v17721_v2, -inf }
 0x61a   : > { %v3725_v39 = vsel %vm2127_vm5, %v17715_v3, -inf  ;;  %v17731_v41 = vadd.f32 %v3484_v60, %v16961_v52 }
 0x61b   : > { %v3743_v46 = vsel %vm2127_vm5, %v17718_v18, -inf  ;;  %v12797_v22 = vpop.f32.mrb[76].mxu1  ;;  %3726 = vmax.xlane.f32.xlu0 %v3725_v39  ;;  %v3722_v6 = vsel %vm2127_vm5, %v17724_v48, -inf }
 0x61c   : > { %v12822_v27 = vpop.f32.mrb[98].mxu0  ;;  %3744 = vmax.xlane.f32.xlu1 %v3743_v46  ;;  %v3335_v59 = vpop.f32.mrb[77].mxu1  ;;  %v17741_v35 = vadd.f32 %v12797_v22, %v16987_v25 }
 0x61d   : > { %v3494_v31 = vpop.f32.mrb[99].mxu0  ;;  %v17744_v60 = vadd.f32 %v12822_v27, %v16971_v24 }
 0x61e   : > { %v17734_v11 = vadd.f32 %v3494_v31, %v16975_v33  ;;  %v3740_v31 = vsel %vm2127_vm5, %v17731_v41, -inf  ;;  %v3731_v27 = vsel %vm2127_vm5, %v17741_v35, -inf }
 0x61f   : > { %v12800_v5 = vpop.f32.mrb[78].mxu1  ;;  %3723 = vmax.xlane.f32.xlu0 %v3722_v6  ;;  %v17751_v6 = vadd.f32 %v3335_v59, %v16991_v15  ;;  %v3749_v22 = vsel %vm2127_vm5, %v17744_v60, -inf }
 0x620   : > { %3717 = vmax.xlane.f32.xlu1 %v3716_v10  ;;  %v3345_v0 = vpop.f32.mrb[79].mxu1  ;;  %v3746_v12 = vsel %vm2127_vm5, %v17734_v11, -inf }
 0x621   : > { %v12825_v46 = vpop.f32.mrb[100].mxu0 }
 0x622   : > { %v3504_v39 = vpop.f32.mrb[101].mxu0  ;;  %v17754_v44 = vadd.f32 %v12825_v46, %v16987_v25  ;;  %v3728_v46 = vsel %vm2127_vm5, %v17751_v6, -inf }
 0x623   : > { %3747 = vmax.xlane.f32.xlu0 %v3746_v12  ;;  %v17761_v62 = vadd.f32 %v3504_v39, %v16991_v15 }
 0x624   : > { %3741 = vmax.xlane.f32.xlu1 %v3740_v31  ;;  %v3755_v59 = vsel %vm2127_vm5, %v17754_v44, -inf  ;;  %v17771_v31 = vadd.f32 %v12800_v5, %v17001_v63 }
 0x625   : > { %v12828_v34 = vpop.f32.mrb[102].mxu0  ;;  %v3752_v39 = vsel %vm2127_vm5, %v17761_v62, -inf }
 0x626   : > { %v3514_v10 = vpop.f32.mrb[103].mxu0  ;;  %v17764_v12 = vadd.f32 %v12828_v34, %v17001_v63  ;;  %v17778_v34 = vadd.f32 %v3345_v0, %v17007_v4 }
 0x627   : > { %3732 = vmax.xlane.f32.xlu0 %v3731_v27  ;;  %v3737_v27 = vsel %vm2127_vm5, %v17771_v31, -inf }
 0x628   : > { %3750 = vmax.xlane.f32.xlu1 %v3749_v22  ;;  %v3761_v22 = vsel %vm2127_vm5, %v17764_v12, -inf  ;;  %v3734_v23 = vsel %vm2127_vm5, %v17778_v34, -inf }
 0x62b   : > { %3729 = vmax.xlane.f32.xlu0 %v3728_v46  ;;  %v17786_v46 = vadd.f32 %v3514_v10, %v17007_v4 }
 0x62c   : > { %3756 = vmax.xlane.f32.xlu1 %v3755_v59 }
 0x62f   : > { %3753 = vmax.xlane.f32.xlu0 %v3752_v39 }
 0x630   : > { %3762 = vmax.xlane.f32.xlu1 %v3761_v22 }
 0x633   : > { %v12847_v21 = vpop.f32.mrb[80].mxu1  ;;  %3738 = vmax.xlane.f32.xlu0 %v3737_v27 }
 0x634   : > { %v3653_v59 = vpop.f32.mrb[81].mxu1  ;;  %v17796_v27 = vadd.f32 %v12847_v21, %v16959_v49 }
 0x635   : > { %v17783_v5 = vadd.f32 %v3653_v59, %v16961_v52  ;;  %v3758_v59 = vsel %vm2127_vm5, %v17786_v46, -inf }
 0x636   : > { %v3767_v21 = vsel %vm2127_vm5, %v17796_v27, -inf }
 0x637   : > { %v12850_v22 = vpop.f32.mrb[82].mxu1  ;;  %v3764_v0 = vsel %vm2127_vm5, %v17783_v5, -inf  ;;  %3735 = vmax.xlane.f32.xlu0 %v3734_v23 }
 0x638   : > { %v17793_v39 = vadd.f32 %v12850_v22, %v16971_v24  ;;  %v3663_v37 = vpop.f32.mrb[83].mxu1  ;;  %3765 = vmax.xlane.f32.xlu1 %v3764_v0 }
 0x639   : > { %v17803_v52 = vadd.f32 %v3663_v37, %v16975_v33 }
 0x63a   : > { %v3773_v10 = vsel %vm2127_vm5, %v17793_v39, -inf }
 0x63b   : > { %v12853_v57 = vpop.f32.mrb[84].mxu1  ;;  %3759 = vmax.xlane.f32.xlu0 %v3758_v59  ;;  %v3770_v49 = vsel %vm2127_vm5, %v17803_v52, -inf }
 0x63c   : > { %v3673_v23 = vpop.f32.mrb[85].mxu1  ;;  %3774 = vmax.xlane.f32.xlu1 %v3773_v10  ;;  %v17806_v22 = vadd.f32 %v12853_v57, %v16987_v25 }
 0x63d   : > { %v17811_v0 = vadd.f32 %v3673_v23, %v16991_v15 }
 0x63e   : > { %v3779_v59 = vsel %vm2127_vm5, %v17806_v22, -inf }
 0x63f   : > { %v12856_v24 = vpop.f32.mrb[86].mxu1  ;;  %3768 = vmax.xlane.f32.xlu0 %v3767_v21  ;;  %v3776_v57 = vsel %vm2127_vm5, %v17811_v0, -inf  ;;  %v20955_v21 = vld [vmem:[#allocation80_spill] sm:$0xff] }
 0x640   : > { %v3683_v37 = vpop.f32.mrb[87].mxu1  ;;  %3771 = vmax.xlane.f32.xlu1 %v3770_v49  ;;  %v17818_v10 = vadd.f32 %v12856_v24, %v17001_v63  ;;  %v14530_v24 = vpop.permute.xlu1 %14529  ;;  %v20956_v63 = vld [vmem:[#allocation73_spill] sm:$0xff] }
 0x641   : > { %v17823_v23 = vadd.f32 %v3683_v37, %v17007_v4  ;;  %v20958_v37 = vld [vmem:[#allocation20_spill] sm:$0xff]  ;;  %v14531_v53 = vunpack.i.l.bf16 %v14530_v24 }
 0x642   : > { %v3785_v15 = vsel %vm2127_vm5, %v17818_v10, -inf }
 0x643   : > { %3780 = vmax.xlane.f32.xlu0 %v3779_v59  ;;  %v3782_v49 = vsel %vm2127_vm5, %v17823_v23, -inf  ;;  %v20957_v59 = vld [vmem:[#allocation81_spill] sm:$0xff] }
 0x644   : > { %3777 = vmax.xlane.f32.xlu1 %v3776_v57  ;;  %v14540_v57 = vpop.permute.xlu1 %14539 }
 0x648   : > { %3786 = vmax.xlane.f32.xlu1 %v3785_v15 }
 0x64c   : > { %3783 = vmax.xlane.f32.xlu1 %v3782_v49 }
 0x659   : > { %14554 = vrot.lane.b32.xlu0 %v20955_v21, %s15907_s28 }
 0x65d   : > { %14549 = vrot.lane.b32.xlu1 %v20956_v63, %s15907_s28  ;;  %14559 = vrot.lane.b32.xlu0 %v20957_v59, %s15907_s28 }
 0x661   : > { %14564 = vrot.lane.b32.xlu1 %v20958_v37, %s15909_s3  ;;  %v14532_v37 = vunpack.i.h.bf16 %v14530_v24 }
 0x662   : > { %v3697_v15 = vpop.xlane.xlu0 %3696 }
 0x663   : > { %v3789_v4 = vsub.f32 %v17654_v54, %v3697_v15 }
 0x665   : > { %v3822_v21 = vmul.f32 1.442695, %v3789_v4  ;;  %v14537_v4 = vunpack.i.h.bf16 %v17631_v50 }
 0x666   : > { %v3703_v25 = vpop.xlane.xlu1 %3702  ;;  %v3694_v49 = vpop.xlane.xlu0 %3693 }
 0x667   : > { %v3788_v33 = vsub.f32 %v17661_v17, %v3694_v49  ;;  %v3791_v36 = vsub.f32 %v17666_v47, %v3703_v25  ;;  %v14536_v25 = vunpack.i.l.bf16 %v17631_v50 }
 0x669   : > { %v3820_v58 = vmul.f32 1.442695, %v3788_v33  ;;  %v3826_v59 = vmul.f32 1.442695, %v3791_v36  ;;  %v14542_v33 = vunpack.i.h.bf16 %v14540_v57 }
 0x66a   : > { %v3700_v63 = vpop.xlane.xlu1 %3699 }
 0x66b   : > { %v3790_v8 = vsub.f32 %v17669_v20, %v3700_v63  ;;  %15131 = vpow2.f32 %v3820_v58  ;;  %v13853_v63 = vpack.c.bf16 %v14532_v37, %v14531_v53  ;;  %v13857_v58 = vpack.c.bf16 %v14537_v4, %v14536_v25  ;;  %v17860_v53 = vld [vmem:[#allocation7 + $0x10] sm:$0xff]  }
 0x66c   : > { %15133 = vpow2.f32 %v3822_v21 }
 0x66d   : > { %v3824_v29 = vmul.f32 1.442695, %v3790_v8 }
 0x66f   : > { %15135 = vpow2.f32 %v3824_v29  ;;  %v14541_v29 = vunpack.i.l.bf16 %v14540_v57 }
 0x670   : > { %15137 = vpow2.f32 %v3826_v59 }
 0x671   : > { %v13861_v50 = vpack.c.bf16 %v14542_v33, %v14541_v29 }
 0x675   : > { %v17841_v54 = vpop.eup %15131 }
 0x676   : > { %v17843_v15 = vpop.eup %15133  ;;  %12873 = vmatprep.mubr.msk.f32.mxu0 %vm2127_vm5, %v17841_v54 }
 0x677   : > { %12874 = vmatmul.mubr.msk.f32.vlgmr.msra.gmra.mrb[104].mxu0 %vm2127_vm5, %v17843_v15 }
 0x678   : > { %13852 = vmatpush3.bf16.msra.mxu0 %v17629_v38 }
 0x679   : > { %v17851_v36 = vpop.eup %15135  ;;  %13854 = vmatprep.subr.bf16.mxu0 %v13853_v63 }
 0x67a   : > { %12876 = vmatprep.mubr.msk.f32.mxu0 %vm2127_vm5, %v17851_v36  ;;  %v17856_v8 = vpop.eup %15137 }
 0x67b   : > { %12877 = vmatmul.mubr.msk.f32.gmra.mrb[106].mxu0 %vm2127_vm5, %v17856_v8 }
 0x67c   : > { %13856 = vmatpush3.bf16.msra.mxu0 %v13853_v63 }
 0x67d   : > { %13858 = vmatprep.subr.bf16.mxu0 %v13857_v58 }
 0x680   : > { %13860 = vmatpush3.bf16.msra.mxu0 %v13857_v58 }
 0x681   : > { %13862 = vmatprep.subr.bf16.mxu0 %v13861_v50 }
 0x684   : > { %13864 = vmatpush3.bf16.msra.mxu0 %v13861_v50 }
 0x685   : > { %12969 = vmatprep.subr.bf16.mxu0 %v17860_v53 }
 0x698   : > { %v3709_v38 = vpop.xlane.xlu1 %3708 }
 0x699   : > { %v3793_v17 = vsub.f32 %v17682_v1, %v3709_v38 }
 0x69b   : > { %v3830_v21 = vmul.f32 1.442695, %v3793_v17 }
 0x69c   : > { %v3706_v47 = vpop.xlane.xlu1 %3705 }
 0x69d   : > { %v3792_v20 = vsub.f32 %v17685_v26, %v3706_v47 }
 0x69f   : > { %v3828_v24 = vmul.f32 1.442695, %v3792_v20 }
 0x6a1   : > { %v3715_v59 = vpop.xlane.xlu1 %3714  ;;  %15139 = vpow2.f32 %v3828_v24 }
 0x6a2   : > { %15141 = vpow2.f32 %v3830_v21  ;;  %v3795_v37 = vsub.f32 %v17698_v45, %v3715_v59 }
 0x6a4   : > { %v3721_v49 = vpop.xlane.xlu0 %3720  ;;  %v3834_v25 = vmul.f32 1.442695, %v3795_v37 }
 0x6a5   : > { %v3712_v57 = vpop.xlane.xlu1 %3711  ;;  %v3797_v26 = vsub.f32 %v17708_v19, %v3721_v49 }
 0x6a6   : > { %v3794_v4 = vsub.f32 %v17703_v13, %v3712_v57 }
 0x6a7   : > { %v3838_v19 = vmul.f32 1.442695, %v3797_v26 }
 0x6a8   : > { %v3832_v63 = vmul.f32 1.442695, %v3794_v4  ;;  %v3727_v29 = vpop.xlane.xlu0 %3726 }
 0x6a9   : > { %v3745_v33 = vpop.xlane.xlu1 %3744  ;;  %v3799_v45 = vsub.f32 %v17715_v3, %v3727_v29 }
 0x6aa   : > { %15143 = vpow2.f32 %v3832_v63  ;;  %v3805_v1 = vsub.f32 %v17718_v18, %v3745_v33 }
 0x6ab   : > { %15145 = vpow2.f32 %v3834_v25  ;;  %v17869_v58 = vpop.eup %15139  ;;  %v3842_v24 = vmul.f32 1.442695, %v3799_v45 }
 0x6ac   : > { %v3854_v50 = vmul.f32 1.442695, %v3805_v1  ;;  %v17871_v38 = vpop.eup %15141  ;;  %12879 = vmatprep.mubr.msk.f32.mxu0 %vm2127_vm5, %v17869_v58  ;;  %v3724_v13 = vpop.xlane.xlu0 %3723 }
 0x6ad   : > { %v3718_v17 = vpop.xlane.xlu1 %3717  ;;  %v3798_v18 = vsub.f32 %v17724_v48, %v3724_v13  ;;  %12880 = vmatmul.mubr.msk.f32.gmra.mrb[108].mxu0 %vm2127_vm5, %v17871_v38 }
 0x6ae   : > { %15147 = vpow2.f32 %v3854_v50  ;;  %v3796_v47 = vsub.f32 %v17721_v2, %v3718_v17 }
 0x6af   : > { %v3840_v21 = vmul.f32 1.442695, %v3798_v18 }
 0x6b0   : > { %v3836_v20 = vmul.f32 1.442695, %v3796_v47  ;;  %v3748_v37 = vpop.xlane.xlu0 %3747 }
 0x6b1   : > { %v3742_v59 = vpop.xlane.xlu1 %3741  ;;  %v3806_v57 = vsub.f32 %v17734_v11, %v3748_v37 }
 0x6b2   : > { %15149 = vpow2.f32 %v3836_v20  ;;  %v3804_v3 = vsub.f32 %v17731_v41, %v3742_v59 }
 0x6b3   : > { %15151 = vpow2.f32 %v3838_v19  ;;  %v3856_v48 = vmul.f32 1.442695, %v3806_v57 }
 0x6b4   : > { %v17882_v49 = vpop.eup %15143  ;;  %15153 = vpow2.f32 %v3840_v21  ;;  %v3852_v2 = vmul.f32 1.442695, %v3804_v3  ;;  %v3733_v63 = vpop.xlane.xlu0 %3732 }
 0x6b5   : > { %v17884_v4 = vpop.eup %15145  ;;  %15155 = vpow2.f32 %v3842_v24  ;;  %v3751_v25 = vpop.xlane.xlu1 %3750  ;;  %12882 = vmatprep.mubr.msk.f32.mxu0 %vm2127_vm5, %v17882_v49  ;;  %v3801_v41 = vsub.f32 %v17741_v35, %v3733_v63 }
 0x6b6   : > { %15157 = vpow2.f32 %v3852_v2  ;;  %v3807_v33 = vsub.f32 %v17744_v60, %v3751_v25  ;;  %12883 = vmatmul.mubr.msk.f32.gmra.mrb[110].mxu0 %vm2127_vm5, %v17884_v4 }
 0x6b7   : > { %15159 = vpow2.f32 %v3856_v48  ;;  %v3846_v1 = vmul.f32 1.442695, %v3801_v41 }
 0x6b8   : > { %v15148_v11 = vpop.eup %15147  ;;  %v3858_v29 = vmul.f32 1.442695, %v3807_v33  ;;  %v3730_v50 = vpop.xlane.xlu0 %3729 }
 0x6b9   : > { %v3757_v26 = vpop.xlane.xlu1 %3756  ;;  %v3935_v45 = vsel %vm2127_vm5, %v15148_v11, 0.0  ;;  %v3800_v13 = vsub.f32 %v17751_v6, %v3730_v50 }
 0x6ba   : > { %15161 = vpow2.f32 %v3858_v29  ;;  %v3809_v17 = vsub.f32 %v17754_v44, %v3757_v26  ;;  %3936 = vadd.xlane.f32.xlu0 %v3935_v45 }
 0x6bb   : > { %15163 = vpow2.f32 %v3846_v1  ;;  %v3844_v47 = vmul.f32 1.442695, %v3800_v13 }
 0x6bc   : > { %v17895_v60 = vpop.eup %15149  ;;  %v3862_v35 = vmul.f32 1.442695, %v3809_v17  ;;  %v3754_v20 = vpop.xlane.xlu0 %3753 }
 0x6bd   : > { %v17897_v18 = vpop.eup %15151  ;;  %12901 = vmatprep.mubr.msk.f32.mxu1 %vm2127_vm5, %v17895_v60  ;;  %v3763_v19 = vpop.xlane.xlu1 %3762  ;;  %v3808_v44 = vsub.f32 %v17761_v62, %v3754_v20 }
 0x6be   : > { %v17901_v21 = vpop.eup %15153  ;;  %15165 = vpow2.f32 %v3862_v35  ;;  %12902 = vmatmul.mubr.msk.f32.vlgmr.msra.gmra.mrb[88].mxu1 %vm2127_vm5, %v17897_v18  ;;  %v3811_v59 = vsub.f32 %v17764_v12, %v3763_v19  ;;  %v17919_v12 = vld [vmem:[#allocation7 + $0x18] sm:$0xff]  }
 0x6bf   : > { %v17906_v6 = vpop.eup %15155  ;;  %15167 = vpow2.f32 %v3844_v47  ;;  %13868 = vmatpush3.bf16.msra.mxu1 %v17634_v14  ;;  %12904 = vmatprep.mubr.msk.f32.mxu1 %vm2127_vm5, %v17901_v21  ;;  %v3860_v37 = vmul.f32 1.442695, %v3808_v44 }
 0x6c0   : > { %v15158_v24 = vpop.eup %15157  ;;  %v3739_v57 = vpop.xlane.xlu0 %3738  ;;  %v3866_v25 = vmul.f32 1.442695, %v3811_v59 }
 0x6c1   : > { %v15160_v3 = vpop.eup %15159  ;;  %12929 = vmatprep.mubr.msk.f32.mxu0 %vm2127_vm5, %v15158_v24  ;;  %v3932_v62 = vsel %vm2127_vm5, %v15158_v24, 0.0  ;;  %v3803_v2 = vsub.f32 %v17771_v31, %v3739_v57  ;;  %15169 = vpow2.f32 %v3860_v37 }
 0x6c2   : > { %3933 = vadd.xlane.f32.xlu0 %v3932_v62  ;;  %12905 = vmatmul.mubr.msk.f32.gmra.mrb[90].mxu1 %vm2127_vm5, %v17906_v6  ;;  %v3938_v14 = vsel %vm2127_vm5, %v15160_v3, 0.0 }
 0x6c3   : > { %12930 = vmatmul.mubr.msk.f32.vlgmr.msra.gmra.mrb[112].mxu0 %vm2127_vm5, %v15148_v11  ;;  %3939 = vadd.xlane.f32.xlu1 %v3938_v14  ;;  %v3850_v63 = vmul.f32 1.442695, %v3803_v2 }
 0x6c4   : > { %v15162_v48 = vpop.eup %15161  ;;  %12932 = vmatprep.mubr.msk.f32.mxu0 %vm2127_vm5, %v15160_v3  ;;  %12970 = vmatpush3.bf16.msra.mxu0 %v17860_v53  ;;  %v3736_v33 = vpop.xlane.xlu0 %3735 }
 0x6c5   : > { %v15164_v31 = vpop.eup %15163  ;;  %v3941_v41 = vsel %vm2127_vm5, %v15162_v48, 0.0  ;;  %12971 = vmatprep.subr.bf16.mxu0 %v17919_v12  ;;  %15171 = vpow2.f32 %v3850_v63  ;;  %v3766_v29 = vpop.xlane.xlu1 %3765  ;;  %v3802_v11 = vsub.f32 %v17778_v34, %v3736_v33 }
 0x6c6   : > { %3942 = vadd.xlane.f32.xlu0 %v3941_v41  ;;  %v3923_v1 = vsel %vm2127_vm5, %v15164_v31, 0.0  ;;  %v3812_v26 = vsub.f32 %v17783_v5, %v3766_v29  ;;  %15173 = vpow2.f32 %v3866_v25 }
 0x6c7   : > { %12933 = vmatmul.mubr.msk.f32.gmra.mrb[114].mxu0 %vm2127_vm5, %v15162_v48  ;;  %3924 = vadd.xlane.f32.xlu1 %v3923_v1  ;;  %v3848_v45 = vmul.f32 1.442695, %v3802_v11 }
 0x6c8   : > { %v15166_v50 = vpop.eup %15165  ;;  %12972 = vmatpush3.bf16.msra.mxu0 %v17919_v12  ;;  %v3868_v13 = vmul.f32 1.442695, %v3812_v26  ;;  %v3760_v35 = vpop.xlane.xlu0 %3759 }
 0x6c9   : > { %v15168_v17 = vpop.eup %15167  ;;  %v3947_v47 = vsel %vm2127_vm5, %v15166_v50, 0.0  ;;  %15175 = vpow2.f32 %v3848_v45  ;;  %v3775_v34 = vpop.xlane.xlu1 %3774  ;;  %v3810_v19 = vsub.f32 %v17786_v46, %v3760_v35 }
 0x6ca   : > { %12907 = vmatprep.mubr.msk.f32.mxu1 %vm2127_vm5, %v15168_v17  ;;  %3948 = vadd.xlane.f32.xlu0 %v3947_v47  ;;  %15177 = vpow2.f32 %v3868_v13  ;;  %v3815_v5 = vsub.f32 %v17793_v39, %v3775_v34  ;;  %v3920_v59 = vsel %vm2127_vm5, %v15168_v17, 0.0 }
 0x6cb   : > { %12908 = vmatmul.mubr.msk.f32.gmra.mrb[92].mxu1 %vm2127_vm5, %v15164_v31  ;;  %v3864_v20 = vmul.f32 1.442695, %v3810_v19  ;;  %v15170_v44 = vpop.eup %15169 }
 0x6cc   : > { %v3769_v24 = vpop.xlane.xlu0 %3768  ;;  %12935 = vmatprep.mubr.msk.f32.mxu0 %vm2127_vm5, %v15170_v44  ;;  %v3944_v46 = vsel %vm2127_vm5, %v15170_v44, 0.0  ;;  %v3874_v62 = vmul.f32 1.442695, %v3815_v5 }
 0x6cd   : > { %15179 = vpow2.f32 %v3864_v20  ;;  %v3772_v37 = vpop.xlane.xlu1 %3771  ;;  %v3813_v3 = vsub.f32 %v17796_v27, %v3769_v24  ;;  %12936 = vmatmul.mubr.msk.f32.gmra.mrb[116].mxu0 %vm2127_vm5, %v15166_v50  ;;  %3945 = vadd.xlane.f32.xlu1 %v3944_v46 }
 0x6ce   : > { %3921 = vadd.xlane.f32.xlu0 %v3920_v59  ;;  %v3814_v57 = vsub.f32 %v17803_v52, %v3772_v37 }
 0x6cf   : > { %v15172_v39 = vpop.eup %15171  ;;  %v3870_v2 = vmul.f32 1.442695, %v3813_v3 }
 0x6d0   : > { %v3872_v14 = vmul.f32 1.442695, %v3814_v57  ;;  %v3781_v48 = vpop.xlane.xlu0 %3780  ;;  %v3929_v25 = vsel %vm2127_vm5, %v15172_v39, 0.0  ;;  %v15174_v63 = vpop.eup %15173 }
 0x6d1   : > { %15181 = vpow2.f32 %v3870_v2  ;;  %v3778_v31 = vpop.xlane.xlu1 %3777  ;;  %v3817_v27 = vsub.f32 %v17806_v22, %v3781_v48  ;;  %v3953_v11 = vsel %vm2127_vm5, %v15174_v63, 0.0 }
 0x6d2   : > { %3930 = vadd.xlane.f32.xlu0 %v3929_v25  ;;  %v3816_v33 = vsub.f32 %v17811_v0, %v3778_v31  ;;  %15183 = vpow2.f32 %v3874_v62 }
 0x6d3   : > { %v15176_v41 = vpop.eup %15175  ;;  %v3878_v52 = vmul.f32 1.442695, %v3817_v27  ;;  %15185 = vpow2.f32 %v3872_v14 }
 0x6d4   : > { %v3876_v29 = vmul.f32 1.442695, %v3816_v33  ;;  %12910 = vmatprep.mubr.msk.f32.mxu1 %vm2127_vm5, %v15176_v41  ;;  %v15178_v1 = vpop.eup %15177  ;;  %v3926_v45 = vsel %vm2127_vm5, %v15176_v41, 0.0  ;;  %v14555_v13 = vpop.permute.xlu0 %14554 }
 0x6d5   : > { %v3787_v26 = vpop.xlane.xlu1 %3786  ;;  %12911 = vmatmul.mubr.msk.f32.gmra.mrb[94].mxu1 %vm2127_vm5, %v15172_v39  ;;  %15187 = vpow2.f32 %v3878_v52  ;;  %v3956_v5 = vsel %vm2127_vm5, %v15178_v1, 0.0  ;;  %v14557_v44 = vunpack.i.h.bf16 %v14555_v13  ;;  %v14556_v24 = vunpack.i.l.bf16 %v14555_v13  ;;  %v20965_v13 = vld [vmem:[#allocation22_spill] sm:$0xff] }
 0x6d6   : > { %3954 = vadd.xlane.f32.xlu0 %v3953_v11  ;;  %v3819_v50 = vsub.f32 %v17818_v10, %v3787_v26  ;;  %12957 = vmatprep.mubr.msk.f32.mxu1 %vm2127_vm5, %v15178_v1  ;;  %15189 = vpow2.f32 %v3876_v29 }
 0x6d7   : > { %v15180_v22 = vpop.eup %15179  ;;  %v13873_v25 = vpack.c.bf16 %v14557_v44, %v14556_v24  ;;  %v20972_v44 = vld [vmem:[#allocation40_spill] sm:$0xff]  ;;  %v20973_v24 = vld [vmem:[#allocation21_spill] sm:$0xff] }
 0x6d8   : > { %v3882_v0 = vmul.f32 1.442695, %v3819_v50  ;;  %12938 = vmatprep.mubr.msk.f32.mxu0 %vm2127_vm5, %v15180_v22  ;;  %v3950_v17 = vsel %vm2127_vm5, %v15180_v22, 0.0  ;;  %v14560_v3 = vpop.permute.xlu0 %14559  ;;  %v20959_v22 = vld [vmem:[#allocation28_spill] sm:$0xff] }
 0x6d9   : > { %v3784_v35 = vpop.xlane.xlu1 %3783  ;;  %12939 = vmatmul.mubr.msk.f32.gmra.mrb[118].mxu0 %vm2127_vm5, %v15174_v63  ;;  %3951 = vadd.xlane.f32.xlu1 %v3950_v17  ;;  %v14562_v14 = vunpack.i.h.bf16 %v14560_v3  ;;  %v14561_v48 = vunpack.i.l.bf16 %v14560_v3  ;;  %v20964_v17 = vld [vmem:[#allocation44_spill] sm:$0xff] }
 0x6da   : > { %3927 = vadd.xlane.f32.xlu0 %v3926_v45  ;;  %15191 = vpow2.f32 %v3882_v0  ;;  %v3818_v63 = vsub.f32 %v17823_v23, %v3784_v35  ;;  %v20961_v0 = vld [vmem:[#allocation24_spill] sm:$0xff]  ;;  %v20963_v45 = vld [vmem:[#allocation19_spill] sm:$0xff]  ;;  %v20966_v35 = vld [vmem:[#allocation54_spill] sm:$0xff] }
 0x6db   : > { %v15182_v47 = vpop.eup %15181  ;;  %v13877_v41 = vpack.c.bf16 %v14562_v14, %v14561_v48  ;;  %v20977_v14 = vld [vmem:[#allocation69_spill] sm:$0xff] }
 0x6dc   : > { %v3959_v10 = vsel %vm2127_vm5, %v15182_v47, 0.0  ;;  %v15184_v34 = vpop.eup %15183  ;;  %v3880_v52 = vmul.f32 1.442695, %v3818_v63 }
 0x6dd   : > { %v14550_v19 = vpop.permute.xlu1 %14549  ;;  %v15186_v20 = vpop.eup %15185  ;;  %3957 = vadd.xlane.f32.xlu1 %v3956_v5  ;;  %v3965_v57 = vsel %vm2127_vm5, %v15184_v34, 0.0  ;;  %v20970_v5 = vld [vmem:[#allocation18_spill] sm:$0xff] }
 0x6de   : > { %3960 = vadd.xlane.f32.xlu0 %v3959_v10  ;;  %v14552_v59 = vunpack.i.h.bf16 %v14550_v19  ;;  %v14551_v37 = vunpack.i.l.bf16 %v14550_v19  ;;  %v3962_v62 = vsel %vm2127_vm5, %v15186_v20, 0.0  ;;  %15193 = vpow2.f32 %v3880_v52  ;;  %v20967_v10 = vld [vmem:[#allocation35_spill] sm:$0xff]  ;;  %v20969_v19 = vld [vmem:[#allocation38_spill] sm:$0xff] }
 0x6df   : > { %v15188_v39 = vpop.eup %15187  ;;  %v20982_v52 = vld [vmem:[#allocation43_spill] sm:$0xff] }
 0x6e0   : > { %v13869_v46 = vpack.c.bf16 %v14552_v59, %v14551_v37  ;;  %v15190_v2 = vpop.eup %15189  ;;  %v3971_v31 = vsel %vm2127_vm5, %v15188_v39, 0.0  ;;  %v20974_v59 = vld [vmem:[#allocation49_spill] sm:$0xff]  ;;  %v20975_v37 = vld [vmem:[#allocation34_spill] sm:$0xff] }
 0x6e1   : > { %3963 = vadd.xlane.f32.xlu1 %v3962_v62  ;;  %v3968_v33 = vsel %vm2127_vm5, %v15190_v2, 0.0  ;;  %v14565_v11 = vpop.permute.xlu1 %14564 }
 0x6e2   : > { %3966 = vadd.xlane.f32.xlu0 %v3965_v57  ;;  %13870 = vmatprep.subr.bf16.mxu1 %v13869_v46  ;;  %v14567_v23 = vunpack.i.h.bf16 %v14565_v11  ;;  %v14566_v1 = vunpack.i.l.bf16 %v14565_v11  ;;  %v20983_v11 = vld [vmem:[#allocation48_spill] sm:$0xff] }
 0x6e3   : > { %13872 = vmatpush3.bf16.msra.mxu1 %v13869_v46 }
 0x6e4   : > { %13874 = vmatprep.subr.bf16.mxu1 %v13873_v25  ;;  %v15192_v27 = vpop.eup %15191  ;;  %v17966_v26 = vpack.c.bf16 %v14567_v23, %v14566_v1  ;;  %v20984_v1 = vld [vmem:[#allocation51_spill] sm:$0xff] }
 0x6e5   : > { %3969 = vadd.xlane.f32.xlu1 %v3968_v33  ;;  %v3977_v29 = vsel %vm2127_vm5, %v15192_v27, 0.0 }
 0x6e6   : > { %3972 = vadd.xlane.f32.xlu0 %v3971_v31  ;;  %v20979_v31 = vld [vmem:[#allocation74_spill] sm:$0xff] }
 0x6e7   : > { %13876 = vmatpush3.bf16.msra.mxu1 %v13873_v25  ;;  %v20978_v25 = vld [vmem:[#allocation37_spill] sm:$0xff] }
 0x6e8   : > { %13878 = vmatprep.subr.bf16.mxu1 %v13877_v41  ;;  %v15194_v50 = vpop.eup %15193 }
 0x6ea   : > { %3978 = vadd.xlane.f32.xlu0 %v3977_v29 }
 0x6eb   : > { %13880 = vmatpush3.bf16.msra.mxu1 %v13877_v41  ;;  %v20981_v41 = vld [vmem:[#allocation77_spill] sm:$0xff] }
 0x6ec   : > { %14201 = vmatprep.subr.bf16.mxu1 %v17860_v53 }
 0x6ee   : > { %12958 = vmatmul.mubr.msk.f32.vlgmr.msra.gmra.mrb[96].mxu1 %vm2127_vm5, %v15182_v47  ;;  %v3974_v47 = vsel %vm2127_vm5, %v15194_v50, 0.0 }
 0x6ef   : > { %12960 = vmatprep.mubr.msk.f32.mxu1 %vm2127_vm5, %v15186_v20  ;;  %14203 = vmatpush3.bf16.msra.mxu1 %v17860_v53  ;;  %v20960_v53 = vld [vmem:[#allocation32_spill] sm:$0xff] }
 0x6f0   : > { %14202 = vmatprep.subr.bf16.mxu1 %v17919_v12  ;;  %v20971_v20 = vld [vmem:[#allocation68_spill] sm:$0xff] }
 0x6f2   : > { %12961 = vmatmul.mubr.msk.f32.gmra.mrb[98].mxu1 %vm2127_vm5, %v15184_v34  ;;  %v20968_v34 = vld [vmem:[#allocation60_spill] sm:$0xff] }
 0x6f3   : > { %12963 = vmatprep.mubr.msk.f32.mxu1 %vm2127_vm5, %v15190_v2  ;;  %14204 = vmatpush3.bf16.msra.mxu1 %v17919_v12  ;;  %v20962_v12 = vld [vmem:[#allocation36_spill] sm:$0xff] }
 0x6f4   : > { %13883 = vmatprep.subr.msk.bf16.mxu1 %vm16611_vm1, %v17966_v26 }
 0x6f6   : > { %12964 = vmatmul.mubr.msk.f32.gmra.mrb[100].mxu1 %vm2127_vm5, %v15188_v39  ;;  %14574 = vrot.lane.b32.xlu1 %v20959_v22, %s15909_s3  ;;  %v20976_v39 = vld [vmem:[#allocation57_spill] sm:$0xff] }
 0x6f7   : > { %12966 = vmatprep.mubr.msk.f32.mxu1 %vm2127_vm5, %v15194_v50 }
 0x6fa   : > { %12967 = vmatmul.mubr.msk.f32.gmra.mrb[102].mxu1 %vm2127_vm5, %v15192_v27  ;;  %14579 = vrot.lane.b32.xlu1 %v20960_v53, %s15909_s3  ;;  %v20980_v27 = vld [vmem:[#allocation63_spill] sm:$0xff] }
 0x700   : > { %14569 = vrot.lane.b32.xlu0 %v20961_v0, %s15909_s3 }
 0x704   : > { %14584 = vrot.lane.b32.xlu0 %v20962_v12, %s15909_s3  ;;  %v21001_v12 = vld [vmem:[#allocation130_spill] sm:$0xff] }
 0x708   : > { %5153 = vrot.lane.b32.xlu0 %v20963_v45, %s15909_s3 }
 0x70c   : > { %14594 = vrot.lane.b32.xlu0 %v20964_v17, %s15909_s3 }
 0x710   : > { %5157 = vrot.lane.b32.xlu0 %v20965_v13, %s15909_s3 }
 0x714   : > { %5159 = vrot.lane.b32.xlu0 %v16647_v42, %s15909_s3 }
 0x718   : > { %5163 = vrot.lane.b32.xlu0 %v16661_v32, %s15909_s3  ;;  %v20998_v32 = vld [vmem:[#allocation124_spill] sm:$0xff] }
 0x71c   : > { %14604 = vrot.lane.b32.xlu0 %v20966_v35, %s15909_s3 }
 0x71e   : > { %3975 = vadd.xlane.f32.xlu1 %v3974_v47  ;;  %v20985_v47 = vld [vmem:[#allocation71_spill] sm:$0xff] }
 0x720   : > { %5322 = vrot.lane.b32.xlu0 %v20967_v10, %s15909_s3 }
 0x724   : > { %14614 = vrot.lane.b32.xlu0 %v20968_v34, %s15909_s3 }
 0x728   : > { %5326 = vrot.lane.b32.xlu0 %v20969_v19, %s15909_s3 }
 0x72c   : > { %5328 = vrot.lane.b32.xlu0 %v16733_v30, %s15909_s3 }
 0x72f   : > { %5151 = vrot.lane.b32.xlu1 %v20970_v5, %s15909_s3 }
 0x730   : > { %5332 = vrot.lane.b32.xlu0 %v16753_v40, %s15909_s3 }
 0x733   : > { %14589 = vrot.lane.b32.xlu1 %v20972_v44, %s15909_s3  ;;  %v2365_v44 = vsel %vm2127_vm5, %v21001_v12, 0.0 }
 0x734   : > { %14624 = vrot.lane.b32.xlu0 %v20971_v20, %s15909_s3 }
 0x737   : > { %5155 = vrot.lane.b32.xlu1 %v20973_v24, %s15909_s3 }
 0x738   : > { %5491 = vrot.lane.b32.xlu0 %v16781_v28, %s15909_s3 }
 0x73b   : > { %14599 = vrot.lane.b32.xlu1 %v20974_v59, %s15909_s3 }
 0x73c   : > { %14634 = vrot.lane.b32.xlu0 %v16905_v55, %s15909_s3  ;;  %v20990_v55 = vld [vmem:[#allocation67_spill] sm:$0xff] }
 0x73f   : > { %5161 = vrot.lane.b32.xlu1 %v16651_v43, %s15909_s3  ;;  %v20997_v43 = vld [vmem:[#allocation122_spill] sm:$0xff] }
 0x740   : > { %5495 = vrot.lane.b32.xlu0 %v20858_v51, %s15909_s3  ;;  %v2341_v10 = vsel %vm2127_vm5, %v20997_v43, 0.0 }
 0x743   : > { %5165 = vrot.lane.b32.xlu1 %v16663_v9, %s15909_s3 }
 0x744   : > { %5497 = vrot.lane.b32.xlu0 %v20862_v7, %s15909_s3 }
 0x747   : > { %5320 = vrot.lane.b32.xlu1 %v20975_v37, %s15909_s3  ;;  %v3937_v3 = vpop.xlane.xlu0 %3936 }
 0x748   : > { %5501 = vrot.lane.b32.xlu0 %v20866_v16, %s15909_s3  ;;  %15195 = vrcp.f32 %v3937_v3 }
 0x74a   : > { %v18034_v46 = vpop.f32.mrb[104].mxu0 }
 0x74b   : > { %v18038_v57 = vpop.f32.mrb[105].mxu0  ;;  %14609 = vrot.lane.b32.xlu1 %v20976_v39, %s15909_s3  ;;  %v20994_v39 = vld [vmem:[#allocation116_spill] sm:$0xff] }
 0x74c   : > { %5658 = vrot.lane.b32.xlu0 %v20869_v61, %s15909_s3  ;;  %v20988_v61 = vld [vmem:[#allocation59_spill] sm:$0xff] }
 0x74e   : > { %v18042_v2 = vpop.f32.mrb[106].mxu0 }
 0x74f   : > { %v3934_v62 = vpop.xlane.xlu0 %3933  ;;  %v18046_v48 = vpop.f32.mrb[107].mxu0  ;;  %5324 = vrot.lane.b32.xlu1 %v20978_v25, %s15909_s3 }
 0x750   : > { %5662 = vrot.lane.b32.xlu0 %v20977_v14, %s15909_s3  ;;  %v3940_v28 = vpop.xlane.xlu1 %3939  ;;  %15197 = vrcp.f32 %v3934_v62 }
 0x753   : > { %v3943_v63 = vpop.xlane.xlu0 %3942  ;;  %14619 = vrot.lane.b32.xlu1 %v20980_v27, %s15909_s3  ;;  %v20989_v27 = vld [vmem:[#allocation62_spill] sm:$0xff] }
 0x754   : > { %5666 = vrot.lane.b32.xlu0 %v20979_v31, %s15909_s3  ;;  %v20987_v31 = vld [vmem:[#allocation79_spill] sm:$0xff]  ;;  %15199 = vrcp.f32 %v3943_v63 }
 0x755   : > { %15201 = vrcp.f32 %v3940_v28  ;;  %v20995_v28 = vld [vmem:[#allocation118_spill] sm:$0xff] }
 0x757   : > { %v18054_v33 = vpop.xlane.xlu0 %3948  ;;  %5330 = vrot.lane.b32.xlu1 %v20982_v52, %s15909_s3  ;;  %v3911_v52 = vsel %vm2127_vm5, %v17897_v18, 0.0  ;;  %v2323_v18 = vsel %vm2127_vm5, %v20994_v39, 0.0 }
 0x758   : > { %5670 = vrot.lane.b32.xlu0 %v20981_v41, %s15909_s3  ;;  %v20986_v41 = vld [vmem:[#allocation55_spill] sm:$0xff] }
 0x75b   : > { %v3922_v29 = vpop.xlane.xlu0 %3921  ;;  %5334 = vrot.lane.b32.xlu1 %v20983_v11, %s15909_s3 }
 0x75f   : > { %v18062_v23 = vpop.xlane.xlu0 %3930  ;;  %5489 = vrot.lane.b32.xlu1 %v20984_v1, %s15909_s3 }
 0x763   : > { %v18066_v50 = vpop.xlane.xlu0 %3954  ;;  %14629 = vrot.lane.b32.xlu1 %v20985_v47, %s15909_s3  ;;  %v3884_v47 = vsel %vm2127_vm5, %v17841_v54, 0.0  ;;  %v20992_v54 = vld [vmem:[#allocation75_spill] sm:$0xff] }
 0x767   : > { %v18070_v16 = vpop.xlane.xlu0 %3927  ;;  %5493 = vrot.lane.b32.xlu1 %v20986_v41, %s15909_s3 }
 0x76b   : > { %v18074_v7 = vpop.xlane.xlu0 %3960  ;;  %14639 = vrot.lane.b32.xlu1 %v20987_v31, %s15909_s3  ;;  %v3890_v31 = vsel %vm2127_vm5, %v17851_v36, 0.0  ;;  %v3899_v36 = vsel %vm2127_vm5, %v17871_v38, 0.0 }
 0x76f   : > { %v18078_v14 = vpop.xlane.xlu0 %3966  ;;  %5499 = vrot.lane.b32.xlu1 %v20988_v61, %s15909_s3  ;;  %v20991_v61 = vld [vmem:[#allocation70_spill] sm:$0xff] }
 0x773   : > { %v18082_v1 = vpop.xlane.xlu0 %3972  ;;  %5503 = vrot.lane.b32.xlu1 %v20989_v27, %s15909_s3  ;;  %v3893_v27 = vsel %vm2127_vm5, %v17856_v8, 0.0  ;;  %v3905_v8 = vsel %vm2127_vm5, %v17884_v4, 0.0  ;;  %v3917_v4 = vsel %vm2127_vm5, %v17906_v6, 0.0  ;;  %v15196_v6 = vpop.eup %15195 }
 0x774   : > { %v15198_v19 = vpop.eup %15197 }
 0x777   : > { %3885 = vadd.xlane.f32.xlu0 %v3884_v47  ;;  %v18088_v41 = vpop.xlane.xlu0 %3978  ;;  %5660 = vrot.lane.b32.xlu1 %v20990_v55, %s15909_s3 }
 0x77b   : > { %3891 = vadd.xlane.f32.xlu0 %v3890_v31  ;;  %v18094_v51 = vpop.permute.xlu0 %14569  ;;  %5664 = vrot.lane.b32.xlu1 %v20991_v61, %s15909_s3  ;;  %v3925_v31 = vpop.xlane.xlu1 %3924  ;;  %v20993_v61 = vld [vmem:[#allocation78_spill] sm:$0xff] }
 0x77c   : > { %15203 = vrcp.f32 %v3925_v31 }
 0x77d   : > { %15205 = vrcp.f32 %v3922_v29  ;;  %v15200_v29 = vpop.eup %15199 }
 0x77e   : > { %15207 = vrcp.f32 %v18054_v33 }
 0x77f   : > { %3894 = vadd.xlane.f32.xlu0 %v3893_v27  ;;  %5668 = vrot.lane.b32.xlu1 %v20992_v54, %s15909_s3  ;;  %v18104_v55 = vpop.permute.xlu0 %14584  ;;  %v3946_v27 = vpop.xlane.xlu1 %3945 }
 0x780   : > { %v18102_v47 = vpop.f32.mrb[108].mxu0  ;;  %15209 = vrcp.f32 %v3946_v27  ;;  %v2347_v27 = vsel %vm2127_vm5, %v20998_v32, 0.0  ;;  %v3887_v32 = vsel %vm2127_vm5, %v17843_v15, 0.0  ;;  %v3896_v15 = vsel %vm2127_vm5, %v17869_v58, 0.0 }
 0x781   : > { %v18106_v20 = vpop.f32.mrb[109].mxu0  ;;  %15211 = vrcp.f32 %v18062_v23  ;;  %v20999_v23 = vld [vmem:[#allocation126_spill] sm:$0xff]  ;;  %v3902_v58 = vsel %vm2127_vm5, %v17882_v49, 0.0  ;;  %v3908_v49 = vsel %vm2127_vm5, %v17895_v60, 0.0  ;;  %v3914_v60 = vsel %vm2127_vm5, %v17901_v21, 0.0 }
 0x782   : > { %15213 = vrcp.f32 %v18070_v16 }
 0x783   : > { %3900 = vadd.xlane.f32.xlu0 %v3899_v36  ;;  %5672 = vrot.lane.b32.xlu1 %v20993_v61, %s15909_s3  ;;  %v18114_v54 = vpop.permute.xlu0 %5153  ;;  %v3952_v38 = vpop.xlane.xlu1 %3951  ;;  %15215 = vrcp.f32 %v18066_v50 }
 0x784   : > { %15217 = vrcp.f32 %v3952_v38 }
 0x785   : > { %15219 = vrcp.f32 %v18074_v7 }
 0x787   : > { %3906 = vadd.xlane.f32.xlu0 %v3905_v8  ;;  %v18122_v36 = vpop.permute.xlu0 %14594  ;;  %v18128_v61 = vpop.xlane.xlu1 %3957 }
 0x788   : > { %15221 = vrcp.f32 %v18128_v61 }
 0x789   : > { %v18116_v11 = vpop.f32.mrb[110].mxu0  ;;  %15223 = vrcp.f32 %v18078_v14  ;;  %v21009_v14 = vld [vmem:[#allocation117_spill] sm:$0xff] }
 0x78a   : > { %v18118_v40 = vpop.f32.mrb[111].mxu0 }
 0x78b   : > { %3912 = vadd.xlane.f32.xlu0 %v3911_v52  ;;  %v18134_v3 = vpop.permute.xlu0 %5157  ;;  %v18145_v39 = vpop.xlane.xlu1 %3963 }
 0x78c   : > { %15225 = vrcp.f32 %v18145_v39  ;;  %v2326_v39 = vsel %vm2127_vm5, %v21009_v14, 0.0 }
 0x78d   : > { %15227 = vrcp.f32 %v18082_v1 }
 0x78f   : > { %3918 = vadd.xlane.f32.xlu0 %v3917_v4  ;;  %v2329_v4 = vsel %vm2127_vm5, %v20995_v28, 0.0  ;;  %v20996_v28 = vld [vmem:[#allocation120_spill] sm:$0xff] }
 0x791   : > { %v18126_v8 = vpop.f32.mrb[88].mxu1 }
 0x792   : > { %v18130_v34 = vpop.f32.mrb[89].mxu1 }
 0x793   : > { %2324 = vadd.xlane.f32.xlu0 %v2323_v18  ;;  %v18149_v18 = vpop.permute.xlu0 %5159 }
 0x795   : > { %v18136_v62 = vpop.f32.mrb[90].mxu1 }
 0x796   : > { %v12931_v52 = vpop.f32.mrb[112].mxu0  ;;  %v18138_v63 = vpop.f32.mrb[91].mxu1 }
 0x797   : > { %v18142_v25 = vmul.f32 %v15196_v6, %v12931_v52  ;;  %v4424_v30 = vpop.f32.mrb[113].mxu0  ;;  %2330 = vadd.xlane.f32.xlu0 %v2329_v4  ;;  %v2335_v6 = vsel %vm2127_vm5, %v20996_v28, 0.0  ;;  %v15202_v52 = vpop.eup %15201 }
 0x798   : > { %v18147_v31 = vmul.f32 %v15198_v19, %v4424_v30  ;;  %v15204_v30 = vpop.eup %15203  ;;  %v18159_v19 = vpop.xlane.xlu1 %3969 }
 0x799   : > { %v15206_v9 = vpop.eup %15205  ;;  %15229 = vrcp.f32 %v18159_v19 }
 0x79a   : > { %v12934_v37 = vpop.f32.mrb[114].mxu0  ;;  %15231 = vrcp.f32 %v18088_v41 }
 0x79b   : > { %v18155_v35 = vmul.f32 %v15200_v29, %v12934_v37  ;;  %v4434_v4 = vpop.f32.mrb[115].mxu0  ;;  %2336 = vadd.xlane.f32.xlu0 %v2335_v6  ;;  %v18167_v29 = vpop.permute.xlu0 %5163 }
 0x79c   : > { %v18157_v33 = vmul.f32 %v15202_v52, %v4434_v4  ;;  %v15208_v52 = vpop.eup %15207 }
 0x79d   : > { %v15210_v45 = vpop.eup %15209 }
 0x79e   : > { %v12909_v59 = vpop.f32.mrb[92].mxu1 }
 0x79f   : > { %v4669_v28 = vmul.f32 %v15204_v30, %v12909_v59  ;;  %v4283_v37 = vpop.f32.mrb[93].mxu1  ;;  %2342 = vadd.xlane.f32.xlu0 %v2341_v10  ;;  %v14575_v59 = vpop.permute.xlu1 %14574  ;;  %v2353_v30 = vsel %vm2127_vm5, %v20999_v23, 0.0 }
 0x7a0   : > { %v4668_v6 = vmul.f32 %v15206_v9, %v4283_v37  ;;  %v12937_v17 = vpop.f32.mrb[116].mxu0  ;;  %v18173_v16 = vpop.permute.xlu0 %14604 }
 0x7a1   : > { %v4677_v43 = vmul.f32 %v15208_v52, %v12937_v17  ;;  %v4444_v42 = vpop.f32.mrb[117].mxu0  ;;  %v14571_v52 = vunpack.i.l.bf16 %v18094_v51 }
 0x7a2   : > { %v4694_v4 = vpack.c.bf16 %v4669_v28, %v4668_v6  ;;  %v4676_v10 = vmul.f32 %v15210_v45, %v4444_v42  ;;  %v15212_v28 = vpop.eup %15211  ;;  %v21000_v42 = vld [vmem:[#allocation128_spill] sm:$0xff]  ;;  %v14572_v6 = vunpack.i.h.bf16 %v18094_v51 }
 0x7a3   : > { %2348 = vadd.xlane.f32.xlu0 %v2347_v27  ;;  %v15214_v50 = vpop.eup %15213  ;;  %v14580_v27 = vpop.permute.xlu1 %14579  ;;  %v2359_v45 = vsel %vm2127_vm5, %v21000_v42, 0.0 }
 0x7a4   : > { %12985 = vmatprep.mubr.msk.bf16.mxu1 %vm1514_vm0, %v4694_v4  ;;  %v4698_v9 = vpack.c.bf16 %v4677_v43, %v4676_v10  ;;  %v18183_v43 = vpop.permute.xlu0 %5322  ;;  %v15216_v10 = vpop.eup %15215  ;;  %v13887_v51 = vpack.c.bf16 %v14572_v6, %v14571_v52  ;;  %v14577_v6 = vunpack.i.h.bf16 %v14575_v59 }
 0x7a7   : > { %2354 = vadd.xlane.f32.xlu0 %v2353_v30  ;;  %3888 = vadd.xlane.f32.xlu1 %v3887_v32  ;;  %v15218_v32 = vpop.eup %15217 }
 0x7a8   : > { %v12912_v17 = vpop.f32.mrb[94].mxu1  ;;  %v18203_v12 = vpop.permute.xlu0 %14614 }
 0x7a9   : > { %v4671_v38 = vmul.f32 %v15212_v28, %v12912_v17  ;;  %v4293_v37 = vpop.f32.mrb[95].mxu1 }
 0x7aa   : > { %v4670_v4 = vmul.f32 %v15214_v50, %v4293_v37 }
 0x7ab   : > { %2360 = vadd.xlane.f32.xlu0 %v2359_v45  ;;  %3897 = vadd.xlane.f32.xlu1 %v3896_v15  ;;  %v18187_v28 = vpop.xlane.xlu1 %3975  ;;  %v21005_v15 = vpack.c.bf16 %v18155_v35, %v18157_v33  ;;  %v21006_v33 = vld [vmem:[#allocation102_spill] sm:$0xff] }
 0x7ac   : > { %v4695_v23 = vpack.c.bf16 %v4671_v38, %v4670_v4  ;;  %v12940_v30 = vpop.f32.mrb[118].mxu0  ;;  %v21002_v38 = vpack.c.bf16 %v18142_v25, %v18147_v31  ;;  %v21004_v25 = vld [vmem:[#allocation111_spill] sm:$0xff]  ;;  %v2383_v7 = vsel %vm2127_vm5, %v21006_v33, 0.0  ;;  %15233 = vrcp.f32 %v18187_v28  ;;  %v21013_v28 = vld [vmem:[#allocation121_spill] sm:$0xff] }
 0x7ad   : > { %v4679_v17 = vmul.f32 %v15216_v10, %v12940_v30  ;;  %v4454_v42 = vpop.f32.mrb[119].mxu0  ;;  %v2377_v31 = vsel %vm2127_vm5, %v21004_v25, 0.0  ;;  %v14582_v10 = vunpack.i.h.bf16 %v14580_v27  ;;  %v21007_v30 = vld [vmem:[#allocation115_spill] sm:$0xff] }
 0x7ae   : > { %v4678_v50 = vmul.f32 %v15218_v32, %v4454_v42  ;;  %12986 = vmatmul.mubr.msk.bf16.vlgmr.msra.gmra.mrb[104].mxu1 %vm1514_vm0, %v4695_v23  ;;  %v14581_v23 = vunpack.i.l.bf16 %v14580_v27  ;;  %v2320_v21 = vsel %vm2127_vm5, %v21007_v30, 0.0  ;;  %v15220_v42 = vpop.eup %15219  ;;  %v2338_v30 = vsel %vm2127_vm5, %v21013_v28, 0.0  ;;  %v21018_v28 = vld [vmem:[#allocation127_spill] sm:$0xff] }
 0x7af   : > { %2366 = vadd.xlane.f32.xlu0 %v2365_v44  ;;  %13886 = vmatpush3.bf16.xpose.msk.msra.mxu1 %vm16611_vm1, %v17966_v26  ;;  %v21003_v44 = vld [vmem:[#allocation107_spill] sm:$0xff]  ;;  %v14576_v26 = vunpack.i.l.bf16 %v14575_v59  ;;  %v18207_v52 = vpop.permute.xlu1 %5151  ;;  %v18218_v59 = vpop.permute.xlu0 %5326 }
 0x7b0   : > { %12989 = vmatprep.mubr.msk.bf16.mxu1 %vm1514_vm0, %v21002_v38  ;;  %v4699_v37 = vpack.c.bf16 %v4679_v17, %v4678_v50  ;;  %3903 = vadd.xlane.f32.xlu1 %v3902_v58  ;;  %v2371_v45 = vsel %vm2127_vm5, %v21003_v44, 0.0  ;;  %v13899_v17 = vpack.c.bf16 %v14582_v10, %v14581_v23  ;;  %v21010_v50 = vld [vmem:[#allocation91_spill] sm:$0xff]  ;;  %v15222_v1 = vpop.eup %15221  ;;  %v14587_v38 = vunpack.i.h.bf16 %v18104_v55 }
 0x7b1   : > { %13889 = vmatprep.subr.msk.bf16.mxu1 %vm16611_vm1, %v13887_v51  ;;  %v13893_v4 = vpack.c.bf16 %v14577_v6, %v14576_v26  ;;  %v2395_v58 = vsel %vm2127_vm5, %v21010_v50, 0.0  ;;  %v21011_v26 = vld [vmem:[#allocation119_spill] sm:$0xff]  ;;  %v15224_v25 = vpop.eup %15223 }
 0x7b2   : > { %v15226_v33 = vpop.eup %15225 }
 0x7b3   : > { %2372 = vadd.xlane.f32.xlu0 %v2371_v45  ;;  %v18228_v35 = vpop.permute.xlu1 %14589  ;;  %v18236_v61 = vpop.permute.xlu0 %5328 }
 0x7b4   : > { %3909 = vadd.xlane.f32.xlu1 %v3908_v49  ;;  %v2332_v49 = vsel %vm2127_vm5, %v21011_v26, 0.0  ;;  %v21016_v26 = vld [vmem:[#allocation134_spill] sm:$0xff] }
 0x7b6   : > { %12990 = vmatmul.mubr.msk.bf16.gmra.mrb[108].mxu1 %vm1514_vm0, %v21005_v15 }
 0x7b7   : > { %2378 = vadd.xlane.f32.xlu0 %v2377_v31  ;;  %13892 = vmatpush3.bf16.xpose.msk.msra.mxu1 %vm16611_vm1, %v13887_v51  ;;  %v18242_v27 = vpop.permute.xlu1 %5155  ;;  %v18256_v19 = vpop.permute.xlu0 %5332 }
 0x7b8   : > { %12993 = vmatprep.mubr.msk.bf16.mxu1 %vm1514_vm0, %v4698_v9  ;;  %3915 = vadd.xlane.f32.xlu1 %v3914_v60  ;;  %v21008_v9 = vld [vmem:[#allocation95_spill] sm:$0xff] }
 0x7b9   : > { %13895 = vmatprep.subr.msk.bf16.mxu1 %vm16611_vm1, %v13893_v4  ;;  %v2389_v32 = vsel %vm2127_vm5, %v21008_v9, 0.0 }
 0x7bb   : > { %2384 = vadd.xlane.f32.xlu0 %v2383_v7  ;;  %v18261_v31 = vpop.permute.xlu1 %14599  ;;  %v18272_v9 = vpop.permute.xlu0 %14624 }
 0x7bc   : > { %2321 = vadd.xlane.f32.xlu1 %v2320_v21  ;;  %v15228_v21 = vpop.eup %15227 }
 0x7be   : > { %12994 = vmatmul.mubr.msk.bf16.gmra.mrb[112].mxu1 %vm1514_vm0, %v4699_v37  ;;  %v14586_v37 = vunpack.i.l.bf16 %v18104_v55  ;;  %v21012_v55 = vld [vmem:[#allocation94_spill] sm:$0xff] }
 0x7bf   : > { %2390 = vadd.xlane.f32.xlu0 %v2389_v32  ;;  %13898 = vmatpush3.bf16.xpose.msk.msra.mxu1 %vm16611_vm1, %v13893_v4  ;;  %v2401_v60 = vsel %vm2127_vm5, %v21012_v55, 0.0  ;;  %v18281_v55 = vpop.permute.xlu0 %5491 }
 0x7c0   : > { %2327 = vadd.xlane.f32.xlu1 %v2326_v39  ;;  %13901 = vmatprep.subr.msk.bf16.mxu1 %vm16611_vm1, %v13899_v17  ;;  %v13905_v7 = vpack.c.bf16 %v14587_v38, %v14586_v37  ;;  %v21014_v39 = vld [vmem:[#allocation110_spill] sm:$0xff]  ;;  %v21015_v38 = vld [vmem:[#allocation123_spill] sm:$0xff] }
 0x7c1   : > { %v12959_v51 = vpop.f32.mrb[96].mxu1  ;;  %v2344_v37 = vsel %vm2127_vm5, %v21015_v38, 0.0 }
 0x7c2   : > { %v4681_v44 = vmul.f32 %v15220_v42, %v12959_v51  ;;  %v4585_v45 = vpop.f32.mrb[97].mxu1  ;;  %v2407_v42 = vsel %vm2127_vm5, %v21014_v39, 0.0  ;;  %v15230_v51 = vpop.eup %15229  ;;  %v14591_v39 = vunpack.i.l.bf16 %v18228_v35 }
 0x7c3   : > { %2396 = vadd.xlane.f32.xlu0 %v2395_v58  ;;  %v4680_v6 = vmul.f32 %v15222_v1, %v4585_v45 }
 0x7c4   : > { %2333 = vadd.xlane.f32.xlu1 %v2332_v49  ;;  %v2413_v49 = vsel %vm2127_vm5, %v21016_v26, 0.0  ;;  %v21022_v26 = vld [vmem:[#allocation113_spill] sm:$0xff] }
 0x7c5   : > { %v4700_v4 = vpack.c.bf16 %v4681_v44, %v4680_v6  ;;  %v12962_v15 = vpop.f32.mrb[98].mxu1  ;;  %v15232_v44 = vpop.eup %15231 }
 0x7c6   : > { %v4683_v41 = vmul.f32 %v15224_v25, %v12962_v15  ;;  %v4595_v10 = vpop.f32.mrb[99].mxu1  ;;  %v15234_v25 = vpop.eup %15233 }
 0x7c7   : > { %2402 = vadd.xlane.f32.xlu0 %v2401_v60  ;;  %v4682_v23 = vmul.f32 %v15226_v33, %v4595_v10  ;;  %12997 = vmatprep.mubr.msk.bf16.mxu1 %vm1514_vm0, %v4700_v4  ;;  %v21017_v33 = vld [vmem:[#allocation125_spill] sm:$0xff] }
 0x7c8   : > { %13904 = vmatpush3.bf16.xpose.msk.msra.mxu1 %vm16611_vm1, %v13899_v17  ;;  %2339 = vadd.xlane.f32.xlu1 %v2338_v30  ;;  %v5162_v17 = vpop.permute.xlu1 %5161  ;;  %v2356_v30 = vsel %vm2127_vm5, %v21018_v28, 0.0  ;;  %v14606_v28 = vunpack.i.l.bf16 %v18173_v16 }
 0x7c9   : > { %13907 = vmatprep.subr.msk.bf16.mxu1 %vm16611_vm1, %v13905_v7  ;;  %v4701_v32 = vpack.c.bf16 %v4683_v41, %v4682_v23  ;;  %v12965_v14 = vpop.f32.mrb[100].mxu1  ;;  %v2350_v41 = vsel %vm2127_vm5, %v21017_v33, 0.0  ;;  %v21026_v33 = vld [vmem:[#allocation96_spill] sm:$0xff] }
 0x7ca   : > { %v4685_v50 = vmul.f32 %v15228_v21, %v12965_v14  ;;  %v4605_v58 = vpop.f32.mrb[101].mxu1  ;;  %v18291_v21 = vpop.permute.xlu0 %14634  ;;  %v14592_v14 = vunpack.i.h.bf16 %v18228_v35 }
 0x7cb   : > { %2408 = vadd.xlane.f32.xlu0 %v2407_v42  ;;  %v4684_v1 = vmul.f32 %v15230_v51, %v4605_v58  ;;  %12998 = vmatmul.mubr.msk.bf16.gmra.mrb[116].mxu1 %vm1514_vm0, %v4701_v32  ;;  %v18293_v32 = vld [vmem:[#allocation7] sm:$0xff]   ;;  %v21019_v51 = vld [vmem:[#allocation129_spill] sm:$0xff] }
 0x7cc   : > { %2345 = vadd.xlane.f32.xlu1 %v2344_v37  ;;  %v5166_v10 = vpop.permute.xlu1 %5165  ;;  %13005 = vmatprep.subr.bf16.mxu0 %v18293_v32  ;;  %v13911_v58 = vpack.c.bf16 %v14592_v14, %v14591_v39  ;;  %v14597_v37 = vunpack.i.h.bf16 %v18122_v36  ;;  %v21028_v14 = vld [vmem:[#allocation93_spill] sm:$0xff] }
 0x7cd   : > { %v4702_v45 = vpack.c.bf16 %v4685_v50, %v4684_v1  ;;  %v12968_v6 = vpop.f32.mrb[102].mxu1  ;;  %v2362_v50 = vsel %vm2127_vm5, %v21019_v51, 0.0  ;;  %v2398_v39 = vsel %vm2127_vm5, %v21028_v14, 0.0  ;;  %v14627_v14 = vunpack.i.h.bf16 %v18272_v9 }
 0x7ce   : > { %v4687_v4 = vmul.f32 %v15232_v44, %v12968_v6  ;;  %v4615_v15 = vpop.f32.mrb[103].mxu1  ;;  %v18300_v1 = vpop.permute.xlu0 %5495  ;;  %v14596_v44 = vunpack.i.l.bf16 %v18122_v36  ;;  %v21023_v36 = vld [vmem:[#allocation25_spill] sm:$0xff] }
 0x7cf   : > { %2414 = vadd.xlane.f32.xlu0 %v2413_v49  ;;  %v4686_v60 = vmul.f32 %v15234_v25, %v4615_v15  ;;  %13001 = vmatprep.mubr.msk.bf16.mxu1 %vm1514_vm0, %v4702_v45  ;;  %v2380_v49 = vsel %vm2127_vm5, %v21022_v26, 0.0  ;;  %v21024_v25 = vld [vmem:[#allocation114_spill] sm:$0xff]  ;;  %v21025_v15 = vld [vmem:[#allocation33_spill] sm:$0xff] }
 0x7d0   : > { %2351 = vadd.xlane.f32.xlu1 %v2350_v41  ;;  %v5321_v42 = vpop.permute.xlu1 %5320  ;;  %v2392_v41 = vsel %vm2127_vm5, %v21026_v33, 0.0  ;;  %v21033_v26 = vld [vmem:[#allocation50_spill] sm:$0xff] }
 0x7d1   : > { %v4703_v23 = vpack.c.bf16 %v4687_v4, %v4686_v60  ;;  %v2386_v4 = vsel %vm2127_vm5, %v21024_v25, 0.0  ;;  %v14616_v25 = vunpack.i.l.bf16 %v18203_v12 }
 0x7d3   : > { %13002 = vmatmul.mubr.msk.bf16.gmra.mrb[120].mxu1 %vm1514_vm0, %v4703_v23  ;;  %v14607_v23 = vunpack.i.h.bf16 %v18173_v16  ;;  %v21031_v16 = vld [vmem:[#allocation45_spill] sm:$0xff] }
 0x7d4   : > { %2357 = vadd.xlane.f32.xlu1 %v2356_v30  ;;  %13057 = vmatprep.mubr.msk.f32.mxu1 %vm1514_vm0, %v18207_v52  ;;  %v21020_v52 = vld [vmem:[#allocation105_spill] sm:$0xff]  ;;  %v14610_v35 = vpop.permute.xlu1 %14609 }
 0x7d5   : > { %v2368_v38 = vsel %vm2127_vm5, %v21020_v52, 0.0  ;;  %v13929_v51 = vpack.c.bf16 %v14607_v23, %v14606_v28  ;;  %v21036_v23 = vld [vmem:[#allocation23_spill] sm:$0xff] }
 0x7d8   : > { %2363 = vadd.xlane.f32.xlu1 %v2362_v50  ;;  %v5325_v6 = vpop.permute.xlu1 %5324 }
 0x7db   : > { %13058 = vmatmul.mubr.msk.f32.vlgmr.msra.gmra.mrb[124].mxu1 %vm1514_vm0, %v18114_v54  ;;  %v21021_v54 = vld [vmem:[#allocation109_spill] sm:$0xff] }
 0x7dc   : > { %13910 = vmatpush3.bf16.xpose.msk.msra.mxu1 %vm16611_vm1, %v13905_v7  ;;  %2369 = vadd.xlane.f32.xlu1 %v2368_v38  ;;  %v2374_v45 = vsel %vm2127_vm5, %v21021_v54, 0.0  ;;  %v18320_v7 = vpop.permute.xlu0 %5497  ;;  %v21032_v54 = vld [vmem:[#allocation132_spill] sm:$0xff] }
 0x7dd   : > { %13060 = vmatprep.mubr.msk.f32.mxu1 %vm1514_vm0, %v18242_v27  ;;  %13913 = vmatprep.subr.msk.bf16.mxu1 %vm16611_vm1, %v13911_v58  ;;  %v13917_v27 = vpack.c.bf16 %v14597_v37, %v14596_v44  ;;  %v14612_v37 = vunpack.i.h.bf16 %v14610_v35  ;;  %v14611_v44 = vunpack.i.l.bf16 %v14610_v35  ;;  %v21034_v35 = vld [vmem:[#allocation64_spill] sm:$0xff] }
 0x7df   : > { %13061 = vmatmul.mubr.msk.f32.gmra.mrb[126].mxu1 %vm1514_vm0, %v18134_v3  ;;  %v14602_v3 = vunpack.i.h.bf16 %v18261_v31 }
 0x7e0   : > { %2375 = vadd.xlane.f32.xlu1 %v2374_v45  ;;  %13063 = vmatprep.mubr.msk.f32.mxu1 %vm1514_vm0, %v18149_v18  ;;  %v14601_v18 = vunpack.i.l.bf16 %v18261_v31  ;;  %v2410_v45 = vsel %vm2127_vm5, %v21032_v54, 0.0  ;;  %v21039_v54 = vld [vmem:[#allocation52_spill] sm:$0xff] }
 0x7e2   : > { %v13923_v60 = vpack.c.bf16 %v14602_v3, %v14601_v18  ;;  %v14617_v18 = vunpack.i.h.bf16 %v18203_v12 }
 0x7e3   : > { %13064 = vmatmul.mubr.msk.f32.gmra.mrb[128].mxu1 %vm1514_vm0, %v5162_v17  ;;  %v18335_v17 = vpop.permute.xlu0 %5501 }
 0x7e4   : > { %13916 = vmatpush3.bf16.xpose.msk.msra.mxu1 %vm16611_vm1, %v13911_v58  ;;  %2381 = vadd.xlane.f32.xlu1 %v2380_v49  ;;  %v21030_v58 = vld [vmem:[#allocation103_spill] sm:$0xff]  ;;  %v13935_v49 = vpack.c.bf16 %v14612_v37, %v14611_v44 }
 0x7e5   : > { %13066 = vmatprep.mubr.msk.f32.mxu1 %vm1514_vm0, %v18167_v29  ;;  %13919 = vmatprep.subr.msk.bf16.mxu1 %vm16611_vm1, %v13917_v27  ;;  %v14620_v29 = vpop.permute.xlu1 %14619  ;;  %v2404_v52 = vsel %vm2127_vm5, %v21030_v58, 0.0  ;;  %v21038_v58 = vld [vmem:[#allocation47_spill] sm:$0xff] }
 0x7e6   : > { %14644 = vrot.lane.b32.xlu0 %v21023_v36, %s15909_s3  ;;  %v14622_v12 = vunpack.i.h.bf16 %v14620_v29 }
 0x7e7   : > { %13067 = vmatmul.mubr.msk.f32.gmra.mrb[130].mxu1 %vm1514_vm0, %v5166_v10  ;;  %v18347_v31 = vpop.permute.xlu0 %5658  ;;  %v21027_v10 = vld [vmem:[#allocation41_spill] sm:$0xff] }
 0x7e8   : > { %2387 = vadd.xlane.f32.xlu1 %v2386_v4  ;;  %13085 = vmatprep.mubr.msk.f32.mxu1 %vm1514_vm0, %v5321_v42  ;;  %v21029_v42 = vld [vmem:[#allocation39_spill] sm:$0xff] }
 0x7e9   : > { %v5331_v30 = vpop.permute.xlu1 %5330 }
 0x7ea   : > { %14654 = vrot.lane.b32.xlu0 %v21025_v15, %s15909_s3 }
 0x7eb   : > { %v18359_v50 = vpop.permute.xlu0 %5662 }
 0x7ec   : > { %13922 = vmatpush3.bf16.xpose.msk.msra.mxu1 %vm16611_vm1, %v13917_v27  ;;  %2393 = vadd.xlane.f32.xlu1 %v2392_v41 }
 0x7ed   : > { %13925 = vmatprep.subr.msk.bf16.mxu1 %vm16611_vm1, %v13923_v60  ;;  %v5335_v38 = vpop.permute.xlu1 %5334 }
 0x7ee   : > { %14664 = vrot.lane.b32.xlu0 %v21027_v10, %s15909_s3 }
 0x7ef   : > { %v18371_v27 = vpop.permute.xlu0 %5666 }
 0x7f0   : > { %2399 = vadd.xlane.f32.xlu1 %v2398_v39  ;;  %v14626_v39 = vunpack.i.l.bf16 %v18272_v9 }
 0x7f1   : > { %v5490_v3 = vpop.permute.xlu1 %5489 }
 0x7f2   : > { %14669 = vrot.lane.b32.xlu0 %v21029_v42, %s15909_s3 }
 0x7f3   : > { %v18386_v4 = vpop.permute.xlu0 %5670 }
 0x7f4   : > { %13928 = vmatpush3.bf16.xpose.msk.msra.mxu1 %vm16611_vm1, %v13923_v60  ;;  %2405 = vadd.xlane.f32.xlu1 %v2404_v52  ;;  %v13941_v60 = vpack.c.bf16 %v14617_v18, %v14616_v25  ;;  %v13953_v52 = vpack.c.bf16 %v14627_v14, %v14626_v39 }
 0x7f5   : > { %13931 = vmatprep.subr.msk.bf16.mxu1 %vm16611_vm1, %v13929_v51 }
 0x7f6   : > { %14679 = vrot.lane.b32.xlu0 %v21031_v16, %s15909_s3 }
 0x7f8   : > { %2411 = vadd.xlane.f32.xlu1 %v2410_v45 }
 0x7fa   : > { %14689 = vrot.lane.b32.xlu0 %v21033_v26, %s15909_s3 }
 0x7fb   : > { %13086 = vmatmul.mubr.msk.f32.vlgmr.msra.gmra.mrb[132].mxu1 %vm1514_vm0, %v18183_v43  ;;  %v14630_v43 = vpop.permute.xlu1 %14629 }
 0x7fc   : > { %13088 = vmatprep.mubr.msk.f32.mxu1 %vm1514_vm0, %v5325_v6  ;;  %13934 = vmatpush3.bf16.xpose.msk.msra.mxu1 %vm16611_vm1, %v13929_v51  ;;  %v21035_v6 = vld [vmem:[#allocation73_spill] sm:$0xff]  ;;  %v14631_v9 = vunpack.i.l.bf16 %v14630_v43 }
 0x7fd   : > { %13937 = vmatprep.subr.msk.bf16.mxu1 %vm16611_vm1, %v13935_v49 }
 0x7fe   : > { %14699 = vrot.lane.b32.xlu0 %v21034_v35, %s15909_s3 }
 0x7ff   : > { %13089 = vmatmul.mubr.msk.f32.gmra.mrb[134].mxu1 %vm1514_vm0, %v18218_v59  ;;  %v14621_v59 = vunpack.i.l.bf16 %v14620_v29  ;;  %v21037_v29 = vld [vmem:[#allocation31_spill] sm:$0xff] }
 0x800   : > { %13091 = vmatprep.mubr.msk.f32.mxu1 %vm1514_vm0, %v18236_v61  ;;  %v5494_v61 = vpop.permute.xlu1 %5493 }
 0x801   : > { %v13947_v28 = vpack.c.bf16 %v14622_v12, %v14621_v59  ;;  %v21040_v59 = vld [vmem:[#allocation65_spill] sm:$0xff] }
 0x802   : > { %14709 = vrot.lane.b32.xlu0 %v21035_v6, %s15909_s3 }
 0x803   : > { %13092 = vmatmul.mubr.msk.f32.gmra.mrb[136].mxu1 %vm1514_vm0, %v5331_v30 }
 0x804   : > { %v18395_v33 = vpop.xlane.xlu0 %3885  ;;  %13094 = vmatprep.mubr.msk.f32.mxu1 %vm1514_vm0, %v18256_v19  ;;  %13940 = vmatpush3.bf16.xpose.msk.msra.mxu1 %vm16611_vm1, %v13935_v49  ;;  %v14640_v30 = vpop.permute.xlu1 %14639  ;;  %v14632_v49 = vunpack.i.h.bf16 %v14630_v43  ;;  %v14636_v43 = vunpack.i.l.bf16 %v18291_v21 }
 0x805   : > { %13943 = vmatprep.subr.msk.bf16.mxu1 %vm16611_vm1, %v13941_v60  ;;  %v14641_v39 = vunpack.i.l.bf16 %v14640_v30 }
 0x807   : > { %13095 = vmatmul.mubr.msk.f32.gmra.mrb[138].mxu1 %vm1514_vm0, %v5335_v38 }
 0x808   : > { %v3892_v41 = vpop.xlane.xlu0 %3891  ;;  %13113 = vmatprep.mubr.msk.f32.mxu1 %vm1514_vm0, %v5490_v3  ;;  %v5500_v38 = vpop.permute.xlu1 %5499 }
 0x809   : > { %14649 = vrot.lane.b32.xlu1 %v21036_v23, %s15909_s3  ;;  %15235 = vrcp.f32 %v3892_v41  ;;  %v13959_v41 = vpack.c.bf16 %v14632_v49, %v14631_v9 }
 0x80c   : > { %v3895_v19 = vpop.xlane.xlu0 %3894  ;;  %13946 = vmatpush3.bf16.xpose.msk.msra.mxu1 %vm16611_vm1, %v13941_v60  ;;  %v5504_v60 = vpop.permute.xlu1 %5503 }
 0x80d   : > { %15237 = vrcp.f32 %v3895_v19  ;;  %13949 = vmatprep.subr.msk.bf16.mxu1 %vm16611_vm1, %v13947_v28  ;;  %14659 = vrot.lane.b32.xlu1 %v21037_v29, %s15909_s3 }
 0x80e   : > { %15239 = vrcp.f32 %v18395_v33 }
 0x810   : > { %v3901_v51 = vpop.xlane.xlu0 %3900  ;;  %v5661_v19 = vpop.permute.xlu1 %5660 }
 0x811   : > { %14674 = vrot.lane.b32.xlu1 %v21038_v58, %s15909_s3 }
 0x813   : > { %v15236_v44 = vpop.eup %15235 }
 0x814   : > { %v3907_v37 = vpop.xlane.xlu0 %3906  ;;  %13952 = vmatpush3.bf16.xpose.msk.msra.mxu1 %vm16611_vm1, %v13947_v28  ;;  %v18424_v3 = vmul.f32 %v15236_v44, %v18046_v48  ;;  %v14637_v48 = vunpack.i.h.bf16 %v18291_v21  ;;  %v5665_v21 = vpop.permute.xlu1 %5664 }
 0x815   : > { %13955 = vmatprep.subr.msk.bf16.mxu1 %vm16611_vm1, %v13953_v52  ;;  %14684 = vrot.lane.b32.xlu1 %v21039_v54, %s15909_s3 }
 0x817   : > { %v15238_v45 = vpop.eup %15237 }
 0x818   : > { %v18427_v18 = vmul.f32 %v15238_v45, %v18042_v2  ;;  %v3913_v25 = vpop.xlane.xlu0 %3912  ;;  %v21041_v2 = vld [vmem:[#allocation72_spill] sm:$0xff]  ;;  %v15240_v33 = vpop.eup %15239 }
 0x819   : > { %14694 = vrot.lane.b32.xlu1 %v21040_v59, %s15909_s3 }
 0x81a   : > { %v4689_v12 = vpack.c.bf16 %v18427_v18, %v18424_v3 }
 0x81b   : > { %13114 = vmatmul.mubr.msk.f32.vlgmr.msra.gmra.mrb[140].mxu1 %vm1514_vm0, %v18281_v55 }
 0x81c   : > { %v3919_v28 = vpop.xlane.xlu0 %3918  ;;  %13116 = vmatprep.mubr.msk.f32.mxu1 %vm1514_vm0, %v5494_v61  ;;  %13958 = vmatpush3.bf16.xpose.msk.msra.mxu1 %vm16611_vm1, %v13953_v52  ;;  %v13965_v61 = vpack.c.bf16 %v14637_v48, %v14636_v43 }
 0x81d   : > { %13961 = vmatprep.subr.msk.bf16.mxu1 %vm16611_vm1, %v13959_v41  ;;  %14704 = vrot.lane.b32.xlu1 %v21041_v2, %s15909_s3 }
 0x81f   : > { %13117 = vmatmul.mubr.msk.f32.gmra.mrb[142].mxu1 %vm1514_vm0, %v18300_v1  ;;  %v14642_v1 = vunpack.i.h.bf16 %v14640_v30 }
 0x820   : > { %v18446_v55 = vpop.xlane.xlu0 %2324  ;;  %13119 = vmatprep.mubr.msk.f32.mxu1 %vm1514_vm0, %v18320_v7 }
 0x821   : > { %v13971_v52 = vpack.c.bf16 %v14642_v1, %v14641_v39 }
 0x823   : > { %13120 = vmatmul.mubr.msk.f32.gmra.mrb[144].mxu1 %vm1514_vm0, %v5500_v38  ;;  %v5669_v38 = vpop.permute.xlu1 %5668 }
 0x824   : > { %v18451_v14 = vpop.xlane.xlu0 %2330  ;;  %13122 = vmatprep.mubr.msk.f32.mxu1 %vm1514_vm0, %v18335_v17  ;;  %13964 = vmatpush3.bf16.xpose.msk.msra.mxu1 %vm16611_vm1, %v13959_v41 }
 0x825   : > { %13967 = vmatprep.subr.msk.bf16.mxu1 %vm16611_vm1, %v13965_v61 }
 0x827   : > { %13123 = vmatmul.mubr.msk.f32.gmra.mrb[146].mxu1 %vm1514_vm0, %v5504_v60  ;;  %v5673_v30 = vpop.permute.xlu1 %5672 }
 0x828   : > { %v18460_v7 = vpop.xlane.xlu0 %2336  ;;  %13141 = vmatprep.mubr.msk.f32.mxu1 %vm1514_vm0, %v18347_v31 }
 0x82c   : > { %v18464_v44 = vpop.xlane.xlu0 %2342  ;;  %13970 = vmatpush3.bf16.xpose.msk.msra.mxu1 %vm16611_vm1, %v13965_v61 }
 0x82d   : > { %13973 = vmatprep.subr.msk.bf16.mxu1 %vm16611_vm1, %v13971_v52 }
 0x830   : > { %v18470_v17 = vpop.xlane.xlu0 %2348 }
 0x834   : > { %v18472_v45 = vpop.xlane.xlu0 %2354  ;;  %13976 = vmatpush3.bf16.xpose.msk.msra.mxu1 %vm16611_vm1, %v13971_v52  ;;  %v3889_v31 = vpop.xlane.xlu1 %3888 }
 0x835   : > { %15241 = vrcp.f32 %v3889_v31 }
 0x836   : > { %15243 = vrcp.f32 %v3901_v51 }
 0x838   : > { %v18477_v49 = vpop.xlane.xlu0 %2360  ;;  %v3898_v9 = vpop.xlane.xlu1 %3897 }
 0x839   : > { %15245 = vrcp.f32 %v3898_v9 }
 0x83a   : > { %15247 = vrcp.f32 %v3907_v37 }
 0x83b   : > { %13142 = vmatmul.mubr.msk.f32.vlgmr.msra.gmra.mrb[148].mxu1 %vm1514_vm0, %v5661_v19  ;;  %v4656_v19 = vmul.f32 %v15240_v33, %v18038_v57 }
 0x83c   : > { %v18480_v60 = vpop.xlane.xlu0 %2366  ;;  %13144 = vmatprep.mubr.msk.f32.mxu1 %vm1514_vm0, %v18359_v50 }
 0x83d   : > { %v3904_v41 = vpop.xlane.xlu1 %3903 }
 0x83e   : > { %15249 = vrcp.f32 %v3904_v41 }
 0x83f   : > { %13145 = vmatmul.mubr.msk.f32.gmra.mrb[150].mxu1 %vm1514_vm0, %v5665_v21  ;;  %v15242_v43 = vpop.eup %15241  ;;  %15251 = vrcp.f32 %v3913_v25  ;;  %v14918_v25 = vld [vmem:[#allocation7 + $0x8] sm:$0xff]  }
 0x840   : > { %v18485_v48 = vpop.xlane.xlu0 %2372  ;;  %13147 = vmatprep.mubr.msk.f32.mxu1 %vm1514_vm0, %v18371_v27  ;;  %v4657_v37 = vmul.f32 %v15242_v43, %v18034_v46  ;;  %v15244_v61 = vpop.eup %15243 }
 0x841   : > { %v3910_v51 = vpop.xlane.xlu1 %3909  ;;  %v4661_v46 = vmul.f32 %v15244_v61, %v18102_v47  ;;  %v21042_v61 = vld [vmem:[#allocation100_spill] sm:$0xff] }
 0x842   : > { %15253 = vrcp.f32 %v3910_v51  ;;  %v4688_v1 = vpack.c.bf16 %v4657_v37, %v4656_v19 }
 0x843   : > { %13148 = vmatmul.mubr.msk.f32.gmra.mrb[152].mxu1 %vm1514_vm0, %v5669_v38  ;;  %v15246_v21 = vpop.eup %15245  ;;  %15255 = vrcp.f32 %v3919_v28 }
 0x844   : > { %v18492_v50 = vpop.xlane.xlu0 %2378  ;;  %13150 = vmatprep.mubr.msk.f32.mxu1 %vm1514_vm0, %v18386_v4  ;;  %12973 = vmatprep.mubr.msk.bf16.mxu0 %vm1514_vm0, %v4688_v1  ;;  %v4660_v57 = vmul.f32 %v15246_v21, %v18106_v20  ;;  %v15248_v27 = vpop.eup %15247  ;;  %v21043_v21 = vld [vmem:[#allocation104_spill] sm:$0xff] }
 0x845   : > { %v3916_v39 = vpop.xlane.xlu1 %3915  ;;  %12974 = vmatmul.mubr.msk.bf16.vlgmr.msra.gmra.mrb[120].mxu0 %vm1514_vm0, %v4689_v12  ;;  %v4663_v3 = vmul.f32 %v15248_v27, %v18116_v11  ;;  %v21045_v27 = vld [vmem:[#allocation92_spill] sm:$0xff] }
 0x846   : > { %15257 = vrcp.f32 %v3916_v39  ;;  %v4690_v4 = vpack.c.bf16 %v4661_v46, %v4660_v57  ;;  %13006 = vmatpush3.bf16.msra.mxu0 %v18293_v32  ;;  %v21044_v57 = vld [vmem:[#allocation108_spill] sm:$0xff] }
 0x847   : > { %13151 = vmatmul.mubr.msk.f32.gmra.mrb[154].mxu1 %vm1514_vm0, %v5673_v30  ;;  %15259 = vrcp.f32 %v18446_v55  ;;  %13007 = vmatprep.subr.bf16.mxu0 %v14918_v25 }
 0x848   : > { %v18504_v28 = vpop.xlane.xlu0 %2384  ;;  %v15250_v52 = vpop.eup %15249  ;;  %12977 = vmatprep.mubr.msk.bf16.mxu0 %vm1514_vm0, %v4690_v4 }
 0x849   : > { %v2322_v20 = vpop.xlane.xlu1 %2321  ;;  %v4662_v47 = vmul.f32 %v15250_v52, %v18118_v40  ;;  %v15252_v18 = vpop.eup %15251 }
 0x84a   : > { %15261 = vrcp.f32 %v2322_v20  ;;  %13008 = vmatpush3.bf16.msra.mxu0 %v14918_v25  ;;  %v4665_v31 = vmul.f32 %v15252_v18, %v18126_v8 }
 0x84b   : > { %v4691_v38 = vpack.c.bf16 %v4663_v3, %v4662_v47  ;;  %15263 = vrcp.f32 %v18451_v14 }
 0x84c   : > { %v18511_v12 = vpop.xlane.xlu0 %2390  ;;  %v15254_v30 = vpop.eup %15253 }
 0x84d   : > { %v2328_v32 = vpop.xlane.xlu1 %2327  ;;  %v4664_v55 = vmul.f32 %v15254_v30, %v18130_v34  ;;  %v15256_v9 = vpop.eup %15255  ;;  %12978 = vmatmul.mubr.msk.bf16.gmra.mrb[124].mxu0 %vm1514_vm0, %v4691_v38  ;;  %v21046_v38 = vld [vmem:[#allocation112_spill] sm:$0xff] }
 0x84e   : > { %15265 = vrcp.f32 %v2328_v32  ;;  %v4667_v43 = vmul.f32 %v15256_v9, %v18136_v62  ;;  %v21047_v32 = vld [vmem:[#allocation101_spill] sm:$0xff] }
 0x84f   : > { %v4692_v11 = vpack.c.bf16 %v4665_v31, %v4664_v55  ;;  %15267 = vrcp.f32 %v18460_v7 }
 0x850   : > { %v18517_v40 = vpop.xlane.xlu0 %2396  ;;  %v15258_v41 = vpop.eup %15257 }
 0x851   : > { %v2334_v33 = vpop.xlane.xlu1 %2333  ;;  %12981 = vmatprep.mubr.msk.bf16.mxu0 %vm1514_vm0, %v4692_v11  ;;  %v4666_v14 = vmul.f32 %v15258_v41, %v18138_v63  ;;  %v15260_v34 = vpop.eup %15259 }
 0x852   : > { %15269 = vrcp.f32 %v2334_v33  ;;  %v2965_v7 = vmul.f32 %v15260_v34, %v21043_v21  ;;  %v21049_v34 = vld [vmem:[#allocation131_spill] sm:$0xff] }
 0x853   : > { %v4693_v51 = vpack.c.bf16 %v4667_v43, %v4666_v14  ;;  %15271 = vrcp.f32 %v18464_v44 }
 0x854   : > { %v18523_v8 = vpop.xlane.xlu0 %2402  ;;  %v15262_v19 = vpop.eup %15261 }
 0x855   : > { %v2340_v37 = vpop.xlane.xlu1 %2339  ;;  %v2964_v1 = vmul.f32 %v15262_v19, %v21042_v61  ;;  %v15264_v25 = vpop.eup %15263  ;;  %12982 = vmatmul.mubr.msk.bf16.gmra.mrb[128].mxu0 %vm1514_vm0, %v4693_v51 }
 0x856   : > { %15273 = vrcp.f32 %v2340_v37  ;;  %v2967_v46 = vmul.f32 %v15264_v25, %v21044_v57 }
 0x857   : > { %v2996_v62 = vpack.c.bf16 %v2965_v7, %v2964_v1  ;;  %15275 = vrcp.f32 %v18470_v17  ;;  %v21050_v7 = vld [vmem:[#allocation98_spill] sm:$0xff] }
 0x858   : > { %v18529_v63 = vpop.xlane.xlu0 %2408  ;;  %v15266_v39 = vpop.eup %15265 }
 0x859   : > { %v2966_v4 = vmul.f32 %v15266_v39, %v21045_v27  ;;  %v2346_v44 = vpop.xlane.xlu1 %2345  ;;  %13009 = vmatprep.mubr.msk.bf16.mxu0 %vm1514_vm0, %v2996_v62  ;;  %v15268_v52 = vpop.eup %15267  ;;  %v21051_v62 = vld [vmem:[#allocation97_spill] sm:$0xff] }
 0x85a   : > { %15277 = vrcp.f32 %v2346_v44  ;;  %v2969_v17 = vmul.f32 %v15268_v52, %v21047_v32 }
 0x85b   : > { %v2997_v20 = vpack.c.bf16 %v2967_v46, %v2966_v4  ;;  %15279 = vrcp.f32 %v18472_v45  ;;  %v21048_v45 = vld [vmem:[#allocation133_spill] sm:$0xff] }
 0x85c   : > { %v18535_v47 = vpop.xlane.xlu0 %2414  ;;  %v15270_v3 = vpop.eup %15269 }
 0x85d   : > { %v2352_v18 = vpop.xlane.xlu1 %2351  ;;  %v2968_v30 = vmul.f32 %v15270_v3, %v21046_v38  ;;  %v15272_v55 = vpop.eup %15271  ;;  %13010 = vmatmul.mubr.msk.bf16.vlgmr.msra.gmra.mrb[120].mxu0 %vm1514_vm0, %v2997_v20 }
 0x85e   : > { %15281 = vrcp.f32 %v2352_v18  ;;  %v2971_v51 = vmul.f32 %v15272_v55, %v21049_v34  ;;  %v21053_v18 = vld [vmem:[#allocation99_spill] sm:$0xff] }
 0x85f   : > { %v2998_v9 = vpack.c.bf16 %v2969_v17, %v2968_v30  ;;  %15283 = vrcp.f32 %v18477_v49 }
 0x860   : > { %v14645_v31 = vpop.permute.xlu0 %14644  ;;  %v15274_v11 = vpop.eup %15273 }
 0x861   : > { %v14647_v41 = vunpack.i.h.bf16 %v14645_v31  ;;  %v14646_v33 = vunpack.i.l.bf16 %v14645_v31  ;;  %v2358_v14 = vpop.xlane.xlu1 %2357  ;;  %13013 = vmatprep.mubr.msk.bf16.mxu0 %vm1514_vm0, %v2998_v9  ;;  %v2970_v43 = vmul.f32 %v15274_v11, %v21048_v45  ;;  %v15276_v19 = vpop.eup %15275 }
 0x862   : > { %15285 = vrcp.f32 %v2358_v14  ;;  %v2973_v39 = vmul.f32 %v15276_v19, %v21051_v62  ;;  %v21055_v14 = vld [vmem:[#allocation135_spill] sm:$0xff] }
 0x863   : > { %v13977_v37 = vpack.c.bf16 %v14647_v41, %v14646_v33  ;;  %v2999_v1 = vpack.c.bf16 %v2971_v51, %v2970_v43  ;;  %15287 = vrcp.f32 %v18480_v60  ;;  %v21052_v60 = vld [vmem:[#allocation106_spill] sm:$0xff]  ;;  %v21054_v41 = vld [vmem:[#allocation136_spill] sm:$0xff] }
 0x864   : > { %v18545_v61 = vpop.permute.xlu0 %14654  ;;  %v15278_v21 = vpop.eup %15277 }
 0x865   : > { %13978 = vmatprep.subr.bf16.mxu0 %v13977_v37  ;;  %v2364_v49 = vpop.xlane.xlu1 %2363  ;;  %v2972_v25 = vmul.f32 %v15278_v21, %v21050_v7  ;;  %v15280_v57 = vpop.eup %15279  ;;  %13014 = vmatmul.mubr.msk.bf16.gmra.mrb[124].mxu0 %vm1514_vm0, %v2999_v1  ;;  %v21057_v21 = vld [vmem:[#allocation137_spill] sm:$0xff] }
 0x866   : > { %13980 = vmatpush3.bf16.msra.mxu0 %v13977_v37  ;;  %15289 = vrcp.f32 %v2364_v49  ;;  %v2975_v38 = vmul.f32 %v15280_v57, %v21053_v18  ;;  %v21056_v37 = vld [vmem:[#allocation138_spill] sm:$0xff]  ;;  %v21058_v57 = vld [vmem:[#allocation140_spill] sm:$0xff]  ;;  %v21061_v18 = vld [vmem:[#allocation141_spill] sm:$0xff] }
 0x867   : > { %v3000_v27 = vpack.c.bf16 %v2973_v39, %v2972_v25  ;;  %15291 = vrcp.f32 %v18485_v48 }
 0x868   : > { %v14665_v46 = vpop.permute.xlu0 %14664  ;;  %v15282_v4 = vpop.eup %15281 }
 0x869   : > { %v14667_v44 = vunpack.i.h.bf16 %v14665_v46  ;;  %v14666_v52 = vunpack.i.l.bf16 %v14665_v46  ;;  %v2370_v20 = vpop.xlane.xlu1 %2369  ;;  %13017 = vmatprep.mubr.msk.bf16.mxu0 %vm1514_vm0, %v3000_v27  ;;  %v2974_v3 = vmul.f32 %v15282_v4, %v21052_v60  ;;  %v15284_v30 = vpop.eup %15283  ;;  %v21059_v27 = vld [vmem:[#allocation139_spill] sm:$0xff]  ;;  %v21060_v60 = vld [vmem:[#allocation142_spill] sm:$0xff] }
 0x86a   : > { %15293 = vrcp.f32 %v2370_v20  ;;  %v2977_v45 = vmul.f32 %v15284_v30, %v21055_v14 }
 0x86b   : > { %v13993_v32 = vpack.c.bf16 %v14667_v44, %v14666_v52  ;;  %v3001_v55 = vpack.c.bf16 %v2975_v38, %v2974_v3  ;;  %15295 = vrcp.f32 %v18492_v50 }
 0x86c   : > { %v14670_v17 = vpop.permute.xlu0 %14669  ;;  %v15286_v31 = vpop.eup %15285 }
 0x86d   : > { %v14672_v9 = vunpack.i.h.bf16 %v14670_v17  ;;  %v14671_v11 = vunpack.i.l.bf16 %v14670_v17  ;;  %13994 = vmatprep.subr.bf16.mxu1 %v13993_v32  ;;  %v2376_v48 = vpop.xlane.xlu1 %2375  ;;  %v2976_v33 = vmul.f32 %v15286_v31, %v21054_v41  ;;  %v15288_v43 = vpop.eup %15287  ;;  %13018 = vmatmul.mubr.msk.bf16.gmra.mrb[128].mxu0 %vm1514_vm0, %v3001_v55  ;;  %v21062_v55 = vld [vmem:[#allocation144_spill] sm:$0xff] }
 0x86e   : > { %13996 = vmatpush3.bf16.msra.mxu1 %v13993_v32  ;;  %15297 = vrcp.f32 %v2376_v48  ;;  %v2979_v49 = vmul.f32 %v15288_v43, %v21057_v21  ;;  %v21066_v43 = vld [vmem:[#allocation145_spill] sm:$0xff] }
 0x86f   : > { %v13997_v34 = vpack.c.bf16 %v14672_v9, %v14671_v11  ;;  %v3002_v51 = vpack.c.bf16 %v2977_v45, %v2976_v33  ;;  %15299 = vrcp.f32 %v18504_v28  ;;  %v21063_v9 = vld [vmem:[#allocation143_spill] sm:$0xff]  ;;  %v21065_v45 = vld [vmem:[#allocation146_spill] sm:$0xff] }
 0x870   : > { %v15290_v19 = vpop.eup %15289 }
 0x871   : > { %13998 = vmatprep.subr.bf16.mxu1 %v13997_v34  ;;  %v2382_v50 = vpop.xlane.xlu1 %2381  ;;  %13021 = vmatprep.mubr.msk.bf16.mxu0 %vm1514_vm0, %v3002_v51  ;;  %v2978_v1 = vmul.f32 %v15290_v19, %v21056_v37  ;;  %v15292_v7 = vpop.eup %15291 }
 0x872   : > { %14000 = vmatpush3.bf16.msra.mxu1 %v13997_v34  ;;  %15301 = vrcp.f32 %v2382_v50  ;;  %v2981_v28 = vmul.f32 %v15292_v7, %v21059_v27 }
 0x873   : > { %v3003_v25 = vpack.c.bf16 %v2979_v49, %v2978_v1  ;;  %15303 = vrcp.f32 %v18511_v12  ;;  %v21070_v49 = vld [vmem:[#allocation148_spill] sm:$0xff] }
 0x874   : > { %v15294_v62 = vpop.eup %15293 }
 0x875   : > { %v2388_v39 = vpop.xlane.xlu1 %2387  ;;  %v2980_v46 = vmul.f32 %v15294_v62, %v21058_v57  ;;  %v15296_v4 = vpop.eup %15295  ;;  %13022 = vmatmul.mubr.msk.bf16.gmra.mrb[132].mxu0 %vm1514_vm0, %v3003_v25  ;;  %v21071_v25 = vld [vmem:[#allocation147_spill] sm:$0xff] }
 0x876   : > { %15305 = vrcp.f32 %v2388_v39  ;;  %v2983_v12 = vmul.f32 %v15296_v4, %v21061_v18  ;;  %v21073_v4 = vld [vmem:[#allocation150_spill] sm:$0xff] }
 0x877   : > { %v3004_v44 = vpack.c.bf16 %v2981_v28, %v2980_v46  ;;  %15307 = vrcp.f32 %v18517_v40 }
 0x878   : > { %v15298_v52 = vpop.eup %15297 }
 0x879   : > { %v2394_v20 = vpop.xlane.xlu1 %2393  ;;  %13025 = vmatprep.mubr.msk.bf16.mxu0 %vm1514_vm0, %v3004_v44  ;;  %v2982_v3 = vmul.f32 %v15298_v52, %v21060_v60  ;;  %v15300_v38 = vpop.eup %15299  ;;  %v21074_v44 = vld [vmem:[#allocation149_spill] sm:$0xff]  ;;  %v14657_v60 = vunpack.i.h.bf16 %v18545_v61 }
 0x87a   : > { %15309 = vrcp.f32 %v2394_v20  ;;  %v2985_v11 = vmul.f32 %v15300_v38, %v21063_v9 }
 0x87b   : > { %v3005_v30 = vpack.c.bf16 %v2983_v12, %v2982_v3  ;;  %15311 = vrcp.f32 %v18523_v8  ;;  %v14656_v3 = vunpack.i.l.bf16 %v18545_v61 }
 0x87c   : > { %v15302_v32 = vpop.eup %15301 }
 0x87d   : > { %v2400_v17 = vpop.xlane.xlu1 %2399  ;;  %v2984_v31 = vmul.f32 %v15302_v32, %v21062_v55  ;;  %v15304_v48 = vpop.eup %15303  ;;  %13026 = vmatmul.mubr.msk.bf16.gmra.mrb[136].mxu0 %vm1514_vm0, %v3005_v30 }
 0x87e   : > { %15313 = vrcp.f32 %v2400_v17  ;;  %v2987_v34 = vmul.f32 %v15304_v48, %v21066_v43  ;;  %v13985_v43 = vpack.c.bf16 %v14657_v60, %v14656_v3 }
 0x87f   : > { %v3006_v40 = vpack.c.bf16 %v2985_v11, %v2984_v31  ;;  %15315 = vrcp.f32 %v18529_v63  ;;  %v21078_v11 = vld [vmem:[#allocation152_spill] sm:$0xff] }
 0x880   : > { %v15306_v41 = vpop.eup %15305 }
 0x881   : > { %v2406_v33 = vpop.xlane.xlu1 %2405  ;;  %13029 = vmatprep.mubr.msk.bf16.mxu0 %vm1514_vm0, %v3006_v40  ;;  %v18577_v14 = vpop.f32.mrb[104].mxu1  ;;  %v2986_v8 = vmul.f32 %v15306_v41, %v21065_v45  ;;  %v21079_v40 = vld [vmem:[#allocation151_spill] sm:$0xff] }
 0x882   : > { %21064 = vst [vmem:[#allocation28_spill] sm:$0xff] %v18577_v14  ;;  %v15308_v51 = vpop.eup %15307  ;;  %15317 = vrcp.f32 %v2406_v33  ;;  %v18581_v19 = vpop.f32.mrb[105].mxu1 }
 0x883   : > { %21067 = vst [vmem:[#allocation32_spill] sm:$0xff] %v18581_v19  ;;  %v18583_v50 = vpop.f32.mrb[106].mxu1  ;;  %v3007_v37 = vpack.c.bf16 %v2987_v34, %v2986_v8  ;;  %15319 = vrcp.f32 %v18535_v47  ;;  %v2989_v62 = vmul.f32 %v15308_v51, %v21071_v25  ;;  %v14680_v45 = vpop.permute.xlu0 %14679  ;;  %v21082_v25 = vld [vmem:[#allocation153_spill] sm:$0xff] }
 0x884   : > { %21068 = vst [vmem:[#allocation24_spill] sm:$0xff] %v18583_v50  ;;  %v15310_v1 = vpop.eup %15309  ;;  %v18586_v63 = vpop.f32.mrb[107].mxu1 }
 0x885   : > { %21069 = vst [vmem:[#allocation22_spill] sm:$0xff] %v18586_v63  ;;  %v2412_v21 = vpop.xlane.xlu1 %2411  ;;  %v2988_v7 = vmul.f32 %v15310_v1, %v21070_v49  ;;  %v15312_v39 = vpop.eup %15311  ;;  %13030 = vmatmul.mubr.msk.bf16.gmra.mrb[140].mxu0 %vm1514_vm0, %v3007_v37  ;;  %v14682_v37 = vunpack.i.h.bf16 %v14680_v45  ;;  %v21081_v49 = vld [vmem:[#allocation154_spill] sm:$0xff] }
 0x886   : > { %15321 = vrcp.f32 %v2412_v21  ;;  %v2991_v52 = vmul.f32 %v15312_v39, %v21074_v44  ;;  %v14681_v39 = vunpack.i.l.bf16 %v14680_v45 }
 0x887   : > { %v3008_v57 = vpack.c.bf16 %v2989_v62, %v2988_v7 }
 0x888   : > { %v15314_v46 = vpop.eup %15313 }
 0x889   : > { %v14650_v27 = vpop.permute.xlu1 %14649  ;;  %13033 = vmatprep.mubr.msk.bf16.mxu0 %vm1514_vm0, %v3008_v57  ;;  %v18592_v28 = vpop.f32.mrb[108].mxu1  ;;  %v2990_v47 = vmul.f32 %v15314_v46, %v21073_v4 }
 0x88a   : > { %21072 = vst [vmem:[#allocation18_spill] sm:$0xff] %v18592_v28  ;;  %v15316_v20 = vpop.eup %15315  ;;  %v14652_v18 = vunpack.i.h.bf16 %v14650_v27  ;;  %v14651_v12 = vunpack.i.l.bf16 %v14650_v27  ;;  %v18598_v38 = vpop.f32.mrb[109].mxu1 }
 0x88b   : > { %21075 = vst [vmem:[#allocation21_spill] sm:$0xff] %v18598_v38  ;;  %v18600_v30 = vpop.f32.mrb[110].mxu1  ;;  %v3009_v32 = vpack.c.bf16 %v2991_v52, %v2990_v47  ;;  %v2993_v41 = vmul.f32 %v15316_v20, %v21079_v40 }
 0x88c   : > { %21076 = vst [vmem:[#allocation116_spill] sm:$0xff] %v18600_v30  ;;  %v15318_v17 = vpop.eup %15317  ;;  %v18602_v55 = vpop.f32.mrb[111].mxu1  ;;  %v13981_v31 = vpack.c.bf16 %v14652_v18, %v14651_v12  ;;  %v14005_v12 = vpack.c.bf16 %v14682_v37, %v14681_v39  ;;  %v21094_v37 = vld [vmem:[#allocation83_spill] sm:$0xff] }
 0x88d   : > { %21077 = vst [vmem:[#allocation118_spill] sm:$0xff] %v18602_v55  ;;  %v14660_v9 = vpop.permute.xlu1 %14659  ;;  %v2992_v48 = vmul.f32 %v15318_v17, %v21078_v11  ;;  %v15320_v33 = vpop.eup %15319  ;;  %13034 = vmatmul.mubr.msk.bf16.gmra.mrb[144].mxu0 %vm1514_vm0, %v3009_v32 }
 0x88e   : > { %v14662_v8 = vunpack.i.h.bf16 %v14660_v9  ;;  %v14661_v61 = vunpack.i.l.bf16 %v14660_v9  ;;  %13982 = vmatprep.subr.bf16.mxu0 %v13981_v31  ;;  %v2995_v62 = vmul.f32 %v15320_v33, %v21082_v25 }
 0x88f   : > { %13984 = vmatpush3.bf16.msra.mxu0 %v13981_v31  ;;  %v3010_v34 = vpack.c.bf16 %v2993_v41, %v2992_v48 }
 0x890   : > { %v15322_v51 = vpop.eup %15321  ;;  %13986 = vmatprep.subr.bf16.mxu0 %v13985_v43  ;;  %v13989_v4 = vpack.c.bf16 %v14662_v8, %v14661_v61 }
 0x891   : > { %v14675_v1 = vpop.permute.xlu1 %14674  ;;  %13037 = vmatprep.mubr.msk.bf16.mxu0 %vm1514_vm0, %v3010_v34  ;;  %v18608_v21 = vpop.f32.mrb[112].mxu1  ;;  %v2994_v7 = vmul.f32 %v15322_v51, %v21081_v49 }
 0x892   : > { %21080 = vst [vmem:[#allocation120_spill] sm:$0xff] %v18608_v21  ;;  %v14677_v57 = vunpack.i.h.bf16 %v14675_v1  ;;  %v14676_v46 = vunpack.i.l.bf16 %v14675_v1  ;;  %v18612_v27 = vpop.f32.mrb[113].mxu1 }
 0x893   : > { %21083 = vst [vmem:[#allocation122_spill] sm:$0xff] %v18612_v27  ;;  %13988 = vmatpush3.bf16.msra.mxu0 %v13985_v43  ;;  %v18614_v47 = vpop.f32.mrb[114].mxu1  ;;  %v3011_v44 = vpack.c.bf16 %v2995_v62, %v2994_v7  ;;  %v21095_v7 = vld [vmem:[#allocation84_spill] sm:$0xff] }
 0x894   : > { %21084 = vst [vmem:[#allocation124_spill] sm:$0xff] %v18614_v47  ;;  %13990 = vmatprep.subr.bf16.mxu0 %v13989_v4  ;;  %v18616_v52 = vpop.f32.mrb[115].mxu1  ;;  %v14001_v20 = vpack.c.bf16 %v14677_v57, %v14676_v46  ;;  %v21096_v46 = vld [vmem:[#allocation85_spill] sm:$0xff] }
 0x895   : > { %21085 = vst [vmem:[#allocation126_spill] sm:$0xff] %v18616_v52  ;;  %v14685_v60 = vpop.permute.xlu1 %14684  ;;  %13038 = vmatmul.mubr.msk.bf16.gmra.mrb[148].mxu0 %vm1514_vm0, %v3011_v44 }
 0x896   : > { %v14687_v3 = vunpack.i.h.bf16 %v14685_v60  ;;  %v14686_v18 = vunpack.i.l.bf16 %v14685_v60  ;;  %14002 = vmatprep.subr.bf16.mxu1 %v14001_v20 }
 0x897   : > { %13992 = vmatpush3.bf16.msra.mxu0 %v13989_v4  ;;  %14004 = vmatpush3.bf16.msra.mxu1 %v14001_v20  ;;  %v21097_v20 = vld [vmem:[#allocation86_spill] sm:$0xff] }
 0x898   : > { %14006 = vmatprep.subr.bf16.mxu1 %v14005_v12  ;;  %v18619_v32 = vpack.c.bf16 %v14687_v3, %v14686_v18 }
 0x899   : > { %v18621_v17 = vpop.permute.xlu1 %14694 }
 0x89a   : > { %14010 = vmatprep.subr.bf16.mxu0 %v18619_v32 }
 0x89b   : > { %14008 = vmatpush3.bf16.msra.mxu1 %v14005_v12 }
 0x89d   : > { %v14705_v31 = vpop.permute.xlu1 %14704 }
 0x89e   : > { %v14707_v9 = vunpack.i.h.bf16 %v14705_v31  ;;  %v14706_v11 = vunpack.i.l.bf16 %v14705_v31  ;;  %v18624_v48 = vpop.f32.mrb[116].mxu1  ;;  %v21098_v31 = vld [vmem:[#allocation87_spill] sm:$0xff] }
 0x89f   : > { %21086 = vst [vmem:[#allocation128_spill] sm:$0xff] %v18624_v48  ;;  %v18626_v40 = vpop.f32.mrb[117].mxu1 }
 0x8a0   : > { %21087 = vst [vmem:[#allocation130_spill] sm:$0xff] %v18626_v40  ;;  %v18628_v41 = vpop.f32.mrb[118].mxu1  ;;  %v18630_v33 = vpack.c.bf16 %v14707_v9, %v14706_v11 }
 0x8a1   : > { %21088 = vst [vmem:[#allocation107_spill] sm:$0xff] %v18628_v41  ;;  %v18632_v45 = vpop.f32.mrb[119].mxu1 }
 0x8a2   : > { %21089 = vst [vmem:[#allocation111_spill] sm:$0xff] %v18632_v45  ;;  %14026 = vmatprep.subr.bf16.mxu1 %v18630_v33 }
 0x8a6   : > { %v18635_v8 = vpop.f32.mrb[120].mxu1 }
 0x8a7   : > { %21090 = vst [vmem:[#allocation102_spill] sm:$0xff] %v18635_v8  ;;  %v18637_v61 = vpop.f32.mrb[121].mxu1 }
 0x8a8   : > { %21091 = vst [vmem:[#allocation115_spill] sm:$0xff] %v18637_v61  ;;  %v18639_v43 = vpop.f32.mrb[122].mxu1 }
 0x8a9   : > { %21092 = vst [vmem:[#allocation95_spill] sm:$0xff] %v18639_v43  ;;  %v18641_v34 = vpop.f32.mrb[123].mxu1 }
 0x8aa   : > { %21093 = vst [vmem:[#allocation117_spill] sm:$0xff] %v18641_v34 }
 0x8ae   : > { %v13059_v51 = vpop.f32.mrb[124].mxu1 }
 0x8af   : > { %v18644_v1 = vadd.f32 %v13059_v51, %v21094_v37  ;;  %v5281_v49 = vpop.f32.mrb[125].mxu1  ;;  %v21099_v51 = vld [vmem:[#allocation88_spill] sm:$0xff] }
 0x8b0   : > { %v18647_v25 = vadd.f32 %v5281_v49, %v21095_v7 }
 0x8b1   : > { %v5830_v62 = vsel %vm2127_vm5, %v18644_v1, -inf }
 0x8b2   : > { %5831 = vmax.xlane.f32.xlu0 %v5830_v62  ;;  %v13062_v39 = vpop.f32.mrb[126].mxu1  ;;  %v5827_v57 = vsel %vm2127_vm5, %v18647_v25, -inf }
 0x8b3   : > { %v18654_v4 = vadd.f32 %v13062_v39, %v21096_v46  ;;  %v5291_v44 = vpop.f32.mrb[127].mxu1  ;;  %5828 = vmax.xlane.f32.xlu1 %v5827_v57 }
 0x8b4   : > { %v18657_v60 = vadd.f32 %v5291_v44, %v21097_v20  ;;  %v21100_v44 = vld [vmem:[#allocation89_spill] sm:$0xff] }
 0x8b5   : > { %v5836_v3 = vsel %vm2127_vm5, %v18654_v4, -inf }
 0x8b6   : > { %5837 = vmax.xlane.f32.xlu0 %v5836_v3  ;;  %v13065_v18 = vpop.f32.mrb[128].mxu1  ;;  %v5833_v12 = vsel %vm2127_vm5, %v18657_v60, -inf }
 0x8b7   : > { %v18664_v9 = vadd.f32 %v13065_v18, %v21098_v31  ;;  %v5301_v11 = vpop.f32.mrb[129].mxu1  ;;  %5834 = vmax.xlane.f32.xlu1 %v5833_v12  ;;  %v21101_v12 = vld [vmem:[#allocation90_spill] sm:$0xff] }
 0x8b8   : > { %v18667_v49 = vadd.f32 %v5301_v11, %v21099_v51 }
 0x8b9   : > { %v5842_v62 = vsel %vm2127_vm5, %v18664_v9, -inf }
 0x8ba   : > { %5843 = vmax.xlane.f32.xlu0 %v5842_v62  ;;  %v13068_v39 = vpop.f32.mrb[130].mxu1  ;;  %v5839_v57 = vsel %vm2127_vm5, %v18667_v49, -inf }
 0x8bb   : > { %v18674_v3 = vadd.f32 %v13068_v39, %v21100_v44  ;;  %v5311_v34 = vpop.f32.mrb[131].mxu1  ;;  %5840 = vmax.xlane.f32.xlu1 %v5839_v57 }
 0x8bc   : > { %v18679_v43 = vadd.f32 %v5311_v34, %v21101_v12 }
 0x8bd   : > { %v5848_v18 = vsel %vm2127_vm5, %v18674_v3, -inf }
 0x8be   : > { %v5845_v11 = vsel %vm2127_vm5, %v18679_v43, -inf }
 0x8bf   : > { %5849 = vmax.xlane.f32.xlu1 %v5848_v18 }
 0x8c3   : > { %5846 = vmax.xlane.f32.xlu1 %v5845_v11 }
 0x8ce   : > { %v13087_v62 = vpop.f32.mrb[132].mxu1 }
 0x8cf   : > { %v18684_v61 = vadd.f32 %v13087_v62, %v21094_v37  ;;  %v5450_v8 = vpop.f32.mrb[133].mxu1 }
 0x8d0   : > { %v18687_v39 = vadd.f32 %v5450_v8, %v21095_v7 }
 0x8d1   : > { %v5854_v57 = vsel %vm2127_vm5, %v18684_v61, -inf }
 0x8d2   : > { %5855 = vmax.xlane.f32.xlu0 %v5854_v57  ;;  %v13090_v45 = vpop.f32.mrb[134].mxu1  ;;  %v5851_v34 = vsel %vm2127_vm5, %v18687_v39, -inf }
 0x8d3   : > { %v18694_v18 = vadd.f32 %v13090_v45, %v21096_v46  ;;  %v5460_v11 = vpop.f32.mrb[135].mxu1  ;;  %5852 = vmax.xlane.f32.xlu1 %v5851_v34 }
 0x8d4   : > { %v18699_v41 = vadd.f32 %v5460_v11, %v21097_v20 }
 0x8d5   : > { %v5860_v62 = vsel %vm2127_vm5, %v18694_v18, -inf }
 0x8d6   : > { %v13093_v8 = vpop.f32.mrb[136].mxu1  ;;  %v5857_v52 = vsel %vm2127_vm5, %v18699_v41, -inf }
 0x8d7   : > { %v18702_v40 = vadd.f32 %v13093_v8, %v21098_v31  ;;  %v5470_v57 = vpop.f32.mrb[137].mxu1  ;;  %5861 = vmax.xlane.f32.xlu1 %v5860_v62 }
 0x8d8   : > { %v18707_v45 = vadd.f32 %v5470_v57, %v21099_v51 }
 0x8d9   : > { %v5866_v48 = vsel %vm2127_vm5, %v18702_v40, -inf }
 0x8da   : > { %5867 = vmax.xlane.f32.xlu0 %v5866_v48  ;;  %v13096_v34 = vpop.f32.mrb[138].mxu1  ;;  %v5863_v8 = vsel %vm2127_vm5, %v18707_v45, -inf }
 0x8db   : > { %v5480_v47 = vpop.f32.mrb[139].mxu1  ;;  %5858 = vmax.xlane.f32.xlu1 %v5857_v52  ;;  %v18712_v11 = vadd.f32 %v13096_v34, %v21100_v44 }
 0x8dc   : > { %v18717_v62 = vadd.f32 %v5480_v47, %v21101_v12 }
 0x8dd   : > { %v5872_v57 = vsel %vm2127_vm5, %v18712_v11, -inf }
 0x8de   : > { %v5869_v48 = vsel %vm2127_vm5, %v18717_v62, -inf }
 0x8df   : > { %5864 = vmax.xlane.f32.xlu1 %v5863_v8 }
 0x8e3   : > { %5873 = vmax.xlane.f32.xlu1 %v5872_v57 }
 0x8e7   : > { %5870 = vmax.xlane.f32.xlu1 %v5869_v48 }
 0x8ee   : > { %v13115_v27 = vpop.f32.mrb[140].mxu1 }
 0x8ef   : > { %v18724_v52 = vadd.f32 %v13115_v27, %v21094_v37  ;;  %v5619_v34 = vpop.f32.mrb[141].mxu1 }
 0x8f0   : > { %v18727_v21 = vadd.f32 %v5619_v34, %v21095_v7 }
 0x8f1   : > { %v5878_v47 = vsel %vm2127_vm5, %v18724_v52, -inf }
 0x8f2   : > { %v13118_v8 = vpop.f32.mrb[142].mxu1  ;;  %5879 = vmax.xlane.f32.xlu1 %v5878_v47  ;;  %v5875_v27 = vsel %vm2127_vm5, %v18727_v21, -inf }
 0x8f3   : > { %v5629_v55 = vpop.f32.mrb[143].mxu1  ;;  %v18735_v30 = vadd.f32 %v13118_v8, %v21096_v46 }
 0x8f4   : > { %v18732_v57 = vadd.f32 %v5629_v55, %v21097_v20 }
 0x8f5   : > { %v5884_v55 = vsel %vm2127_vm5, %v18735_v30, -inf }
 0x8f6   : > { %v13121_v48 = vpop.f32.mrb[144].mxu1  ;;  %5876 = vmax.xlane.f32.xlu1 %v5875_v27  ;;  %v5881_v34 = vsel %vm2127_vm5, %v18732_v57, -inf }
 0x8f7   : > { %v5639_v38 = vpop.f32.mrb[145].mxu1  ;;  %5882 = vmax.xlane.f32.xlu0 %v5881_v34  ;;  %v18745_v47 = vadd.f32 %v13121_v48, %v21098_v31 }
 0x8f8   : > { %v18742_v28 = vadd.f32 %v5639_v38, %v21099_v51 }
 0x8f9   : > { %v5890_v38 = vsel %vm2127_vm5, %v18745_v47, -inf }
 0x8fa   : > { %v13124_v8 = vpop.f32.mrb[146].mxu1  ;;  %5885 = vmax.xlane.f32.xlu1 %v5884_v55  ;;  %v5887_v63 = vsel %vm2127_vm5, %v18742_v28, -inf }
 0x8fb   : > { %v5649_v27 = vpop.f32.mrb[147].mxu1  ;;  %5888 = vmax.xlane.f32.xlu0 %v5887_v63  ;;  %v18755_v34 = vadd.f32 %v13124_v8, %v21100_v44 }
 0x8fc   : > { %v18752_v50 = vadd.f32 %v5649_v27, %v21101_v12 }
 0x8fd   : > { %v5896_v55 = vsel %vm2127_vm5, %v18755_v34, -inf }
 0x8fe   : > { %5891 = vmax.xlane.f32.xlu1 %v5890_v38  ;;  %v5893_v48 = vsel %vm2127_vm5, %v18752_v50, -inf }
 0x8ff   : > { %5894 = vmax.xlane.f32.xlu0 %v5893_v48 }
 0x902   : > { %5897 = vmax.xlane.f32.xlu1 %v5896_v55 }
 0x90e   : > { %v13143_v19 = vpop.f32.mrb[148].mxu1 }
 0x90f   : > { %v18764_v63 = vadd.f32 %v13143_v19, %v21094_v37  ;;  %v5788_v27 = vpop.f32.mrb[149].mxu1 }
 0x910   : > { %v18767_v8 = vadd.f32 %v5788_v27, %v21095_v7 }
 0x911   : > { %v5902_v14 = vsel %vm2127_vm5, %v18764_v63, -inf }
 0x912   : > { %v13146_v38 = vpop.f32.mrb[150].mxu1  ;;  %5903 = vmax.xlane.f32.xlu1 %v5902_v14  ;;  %v5899_v48 = vsel %vm2127_vm5, %v18767_v8, -inf }
 0x913   : > { %v18774_v2 = vadd.f32 %v13146_v38, %v21096_v46  ;;  %v5798_v55 = vpop.f32.mrb[151].mxu1  ;;  %5900 = vmax.xlane.f32.xlu0 %v5899_v48 }
 0x914   : > { %v18777_v19 = vadd.f32 %v5798_v55, %v21097_v20 }
 0x915   : > { %v5908_v27 = vsel %vm2127_vm5, %v18774_v2, -inf }
 0x916   : > { %v13149_v6 = vpop.f32.mrb[152].mxu1  ;;  %5909 = vmax.xlane.f32.xlu1 %v5908_v27  ;;  %v5905_v7 = vsel %vm2127_vm5, %v18777_v19, -inf }
 0x917   : > { %v18784_v14 = vadd.f32 %v13149_v6, %v21098_v31  ;;  %v5808_v37 = vpop.f32.mrb[153].mxu1  ;;  %5906 = vmax.xlane.f32.xlu0 %v5905_v7 }
 0x918   : > { %v18787_v38 = vadd.f32 %v5808_v37, %v21099_v51  ;;  %v21102_v51 = vld [vmem:[#allocation81_spill] sm:$0xff] }
 0x919   : > { %v5914_v48 = vsel %vm2127_vm5, %v18784_v14, -inf }
 0x91a   : > { %v13152_v55 = vpop.f32.mrb[154].mxu1  ;;  %5915 = vmax.xlane.f32.xlu1 %v5914_v48  ;;  %v5911_v20 = vsel %vm2127_vm5, %v18787_v38, -inf  ;;  %v14690_v48 = vpop.permute.xlu0 %14689 }
 0x91b   : > { %v18794_v27 = vadd.f32 %v13152_v55, %v21100_v44  ;;  %v5818_v46 = vpop.f32.mrb[155].mxu1  ;;  %5912 = vmax.xlane.f32.xlu0 %v5911_v20  ;;  %v21104_v55 = vld [vmem:[#allocation20_spill] sm:$0xff] }
 0x91c   : > { %v18797_v6 = vadd.f32 %v5818_v46, %v21101_v12  ;;  %v21103_v46 = vld [vmem:[#allocation80_spill] sm:$0xff] }
 0x91d   : > { %v5920_v37 = vsel %vm2127_vm5, %v18794_v27, -inf  ;;  %v21105_v12 = vld [vmem:[#allocation40_spill] sm:$0xff] }
 0x91e   : > { %5921 = vmax.xlane.f32.xlu1 %v5920_v37  ;;  %v5917_v7 = vsel %vm2127_vm5, %v18797_v6, -inf  ;;  %v18807_v20 = vpop.permute.xlu0 %14699 }
 0x91f   : > { %5918 = vmax.xlane.f32.xlu0 %v5917_v7 }
 0x922   : > { %v18815_v37 = vpop.permute.xlu0 %14709 }
 0x92f   : > { %14719 = vrot.lane.b32.xlu1 %v21102_v51, %s15909_s3 }
 0x933   : > { %14739 = vrot.lane.b32.xlu1 %v20960_v53, %s15910_s18 }
 0x935   : > { %14714 = vrot.lane.b32.xlu0 %v21103_v46, %s15909_s3  ;;  %s21192_s3 = sld [smem:[#allocation157_spill]] }
 0x937   : > { %7065 = vrot.lane.b32.xlu1 %v20970_v5, %s15910_s18 }
 0x939   : > { %14724 = vrot.lane.b32.xlu0 %v21104_v55, %s15910_s18 }
 0x93b   : > { %7069 = vrot.lane.b32.xlu1 %v20973_v24, %s15910_s18 }
 0x93d   : > { %14729 = vrot.lane.b32.xlu0 %v20961_v0, %s15910_s18 }
 0x93f   : > { %7071 = vrot.lane.b32.xlu1 %v20965_v13, %s15910_s18  ;;  %v5832_v53 = vpop.xlane.xlu0 %5831  ;;  %v21106_v13 = vld [vmem:[#allocation36_spill] sm:$0xff] }
 0x940   : > { %v5924_v7 = vsub.f32 %v18644_v1, %v5832_v53  ;;  %v5829_v51 = vpop.xlane.xlu1 %5828 }
 0x941   : > { %14734 = vrot.lane.b32.xlu0 %v20959_v22, %s15910_s18  ;;  %v5923_v5 = vsub.f32 %v18647_v25, %v5829_v51  ;;  %v21107_v25 = vld [vmem:[#allocation26_spill] sm:$0xff] }
 0x942   : > { %v5957_v55 = vmul.f32 1.442695, %v5924_v7 }
 0x943   : > { %v5955_v46 = vmul.f32 1.442695, %v5923_v5  ;;  %14749 = vrot.lane.b32.xlu1 %v21105_v12, %s15910_s18  ;;  %v5838_v24 = vpop.xlane.xlu0 %5837 }
 0x944   : > { %v5926_v0 = vsub.f32 %v18654_v4, %v5838_v24  ;;  %v5835_v44 = vpop.xlane.xlu1 %5834  ;;  %v21108_v4 = vld [vmem:[#allocation19_spill] sm:$0xff] }
 0x945   : > { %15323 = vpow2.f32 %v5955_v46  ;;  %14744 = vrot.lane.b32.xlu0 %v21106_v13, %s15910_s18  ;;  %v5925_v1 = vsub.f32 %v18657_v60, %v5835_v44  ;;  %v21109_v60 = vld [vmem:[#allocation29_spill] sm:$0xff]  ;;  %v21110_v13 = vld [vmem:[#allocation44_spill] sm:$0xff] }
 0x946   : > { %15325 = vpow2.f32 %v5957_v55  ;;  %v5961_v53 = vmul.f32 1.442695, %v5926_v0  ;;  %v14692_v55 = vunpack.i.h.bf16 %v14690_v48  ;;  %v14691_v0 = vunpack.i.l.bf16 %v14690_v48 }
 0x947   : > { %v5959_v22 = vmul.f32 1.442695, %v5925_v1  ;;  %7073 = vrot.lane.b32.xlu1 %v21107_v25, %s15910_s18  ;;  %v5844_v51 = vpop.xlane.xlu0 %5843  ;;  %v14697_v48 = vunpack.i.h.bf16 %v18621_v17  ;;  %v14696_v25 = vunpack.i.l.bf16 %v18621_v17 }
 0x948   : > { %v5928_v7 = vsub.f32 %v18664_v9, %v5844_v51  ;;  %v5841_v12 = vpop.xlane.xlu1 %5840  ;;  %v21112_v51 = vld [vmem:[#allocation27_spill] sm:$0xff] }
 0x949   : > { %15327 = vpow2.f32 %v5959_v22  ;;  %7067 = vrot.lane.b32.xlu0 %v21108_v4, %s15910_s18  ;;  %v5927_v46 = vsub.f32 %v18667_v49, %v5841_v12  ;;  %v21111_v49 = vld [vmem:[#allocation30_spill] sm:$0xff] }
 0x94a   : > { %15329 = vpow2.f32 %v5961_v53  ;;  %v5965_v5 = vmul.f32 1.442695, %v5928_v7  ;;  %v14013_v7 = vpack.c.bf16 %v14692_v55, %v14691_v0  ;;  %v21115_v55 = vld [vmem:[#allocation34_spill] sm:$0xff] }
 0x94b   : > { %v5963_v24 = vmul.f32 1.442695, %v5927_v46  ;;  %7077 = vrot.lane.b32.xlu1 %v21109_v60, %s15910_s18  ;;  %v21114_v60 = vld [vmem:[#allocation54_spill] sm:$0xff] }
 0x94c   : > { %v5850_v44 = vpop.xlane.xlu1 %5849 }
 0x94d   : > { %15331 = vpow2.f32 %v5963_v24  ;;  %14754 = vrot.lane.b32.xlu0 %v21110_v13, %s15910_s18  ;;  %v5930_v9 = vsub.f32 %v18674_v3, %v5850_v44  ;;  %v14701_v24 = vunpack.i.l.bf16 %v18807_v20 }
 0x94e   : > { %15333 = vpow2.f32 %v5965_v5  ;;  %v21113_v5 = vld [vmem:[#allocation49_spill] sm:$0xff] }
 0x94f   : > { %v18844_v1 = vpop.eup %15323  ;;  %7079 = vrot.lane.b32.xlu1 %v21111_v49, %s15910_s18  ;;  %v5969_v12 = vmul.f32 1.442695, %v5930_v9  ;;  %v21117_v9 = vld [vmem:[#allocation42_spill] sm:$0xff] }
 0x950   : > { %v18848_v53 = vpop.eup %15325  ;;  %13169 = vmatprep.mubr.msk.f32.mxu0 %vm2127_vm5, %v18844_v1  ;;  %v5847_v22 = vpop.xlane.xlu1 %5846  ;;  %v18888_v49 = vld [vmem:[#allocation7 + $0x20] sm:$0xff]  }
 0x951   : > { %7075 = vrot.lane.b32.xlu0 %v21112_v51, %s15910_s18  ;;  %v5929_v3 = vsub.f32 %v18679_v43, %v5847_v22  ;;  %13170 = vmatmul.mubr.msk.f32.vlgmr.msra.gmra.mrb[152].mxu0 %vm2127_vm5, %v18848_v53  ;;  %v14702_v43 = vunpack.i.h.bf16 %v18807_v20  ;;  %v21116_v20 = vld [vmem:[#allocation35_spill] sm:$0xff]  ;;  %v21118_v22 = vld [vmem:[#allocation37_spill] sm:$0xff] }
 0x952   : > { %14012 = vmatpush3.bf16.msra.mxu0 %v18619_v32  ;;  %v14017_v32 = vpack.c.bf16 %v14697_v48, %v14696_v25 }
 0x953   : > { %v18860_v4 = vpop.eup %15327  ;;  %v5967_v46 = vmul.f32 1.442695, %v5929_v3  ;;  %14759 = vrot.lane.b32.xlu1 %v21113_v5, %s15910_s18  ;;  %14014 = vmatprep.subr.bf16.mxu0 %v14013_v7  ;;  %v14021_v13 = vpack.c.bf16 %v14702_v43, %v14701_v24 }
 0x954   : > { %v18864_v17 = vpop.eup %15329  ;;  %13172 = vmatprep.mubr.msk.f32.mxu0 %vm2127_vm5, %v18860_v4 }
 0x955   : > { %15335 = vpow2.f32 %v5967_v46  ;;  %14764 = vrot.lane.b32.xlu0 %v21114_v60, %s15910_s18  ;;  %13173 = vmatmul.mubr.msk.f32.gmra.mrb[154].mxu0 %vm2127_vm5, %v18864_v17  ;;  %v21119_v46 = vld [vmem:[#allocation38_spill] sm:$0xff]  ;;  %v21120_v60 = vld [vmem:[#allocation57_spill] sm:$0xff] }
 0x956   : > { %15337 = vpow2.f32 %v5969_v12  ;;  %14016 = vmatpush3.bf16.msra.mxu0 %v14013_v7 }
 0x957   : > { %v18874_v44 = vpop.eup %15331  ;;  %7234 = vrot.lane.b32.xlu1 %v21115_v55, %s15910_s18  ;;  %14018 = vmatprep.subr.bf16.mxu0 %v14017_v32 }
 0x958   : > { %v18878_v0 = vpop.eup %15333  ;;  %13175 = vmatprep.mubr.msk.f32.mxu0 %vm2127_vm5, %v18874_v44 }
 0x959   : > { %7236 = vrot.lane.b32.xlu0 %v21116_v20, %s15910_s18  ;;  %13176 = vmatmul.mubr.msk.f32.gmra.mrb[156].mxu0 %vm2127_vm5, %v18878_v0  ;;  %v21121_v20 = vld [vmem:[#allocation60_spill] sm:$0xff] }
 0x95a   : > { %14020 = vmatpush3.bf16.msra.mxu0 %v14017_v32 }
 0x95b   : > { %7242 = vrot.lane.b32.xlu1 %v21117_v9, %s15910_s18  ;;  %14022 = vmatprep.subr.bf16.mxu0 %v14021_v13 }
 0x95d   : > { %7238 = vrot.lane.b32.xlu0 %v21118_v22, %s15910_s18 }
 0x95e   : > { %14024 = vmatpush3.bf16.msra.mxu0 %v14021_v13 }
 0x95f   : > { %v18892_v48 = vpop.eup %15335  ;;  %v5856_v25 = vpop.xlane.xlu0 %5855  ;;  %13265 = vmatprep.subr.bf16.mxu0 %v18888_v49 }
 0x960   : > { %v18895_v51 = vpop.eup %15337  ;;  %v5932_v3 = vsub.f32 %v18684_v61, %v5856_v25  ;;  %v5853_v7 = vpop.xlane.xlu1 %5852  ;;  %13178 = vmatprep.mubr.msk.f32.mxu0 %vm2127_vm5, %v18892_v48 }
 0x961   : > { %v5931_v12 = vsub.f32 %v18687_v39, %v5853_v7  ;;  %7240 = vrot.lane.b32.xlu0 %v21119_v46, %s15910_s18  ;;  %13179 = vmatmul.mubr.msk.f32.gmra.mrb[158].mxu0 %vm2127_vm5, %v18895_v51  ;;  %v14711_v7 = vunpack.i.l.bf16 %v18815_v37 }
 0x962   : > { %v5973_v5 = vmul.f32 1.442695, %v5932_v3  ;;  %v14712_v3 = vunpack.i.h.bf16 %v18815_v37 }
 0x963   : > { %v5971_v43 = vmul.f32 1.442695, %v5931_v12 }
 0x964   : > { %v5862_v24 = vpop.xlane.xlu1 %5861  ;;  %v14029_v37 = vpack.c.bf16 %v14712_v3, %v14711_v7 }
 0x965   : > { %15339 = vpow2.f32 %v5971_v43  ;;  %14769 = vrot.lane.b32.xlu0 %v21120_v60, %s15910_s18  ;;  %v5934_v61 = vsub.f32 %v18694_v18, %v5862_v24  ;;  %v21122_v18 = vld [vmem:[#allocation43_spill] sm:$0xff] }
 0x966   : > { %15341 = vpow2.f32 %v5973_v5 }
 0x967   : > { %v5868_v32 = vpop.xlane.xlu0 %5867  ;;  %v5977_v13 = vmul.f32 1.442695, %v5934_v61 }
 0x968   : > { %v5859_v55 = vpop.xlane.xlu1 %5858  ;;  %v5936_v9 = vsub.f32 %v18702_v40, %v5868_v32 }
 0x969   : > { %v5933_v39 = vsub.f32 %v18699_v41, %v5859_v55  ;;  %14774 = vrot.lane.b32.xlu0 %v21121_v20, %s15910_s18 }
 0x96a   : > { %v5981_v41 = vmul.f32 1.442695, %v5936_v9  ;;  %v6034_v9 = vsel %vm2127_vm5, %v18878_v0, 0.0  ;;  %v6031_v0 = vsel %vm2127_vm5, %v18874_v44, 0.0  ;;  %v6019_v44 = vsel %vm2127_vm5, %v18844_v1, 0.0 }
 0x96b   : > { %v5975_v22 = vmul.f32 1.442695, %v5933_v39 }
 0x96c   : > { %v5865_v25 = vpop.xlane.xlu1 %5864 }
 0x96d   : > { %15343 = vpow2.f32 %v5975_v22  ;;  %v5935_v12 = vsub.f32 %v18707_v45, %v5865_v25  ;;  %7244 = vrot.lane.b32.xlu0 %v21122_v18, %s15910_s18 }
 0x96e   : > { %15345 = vpow2.f32 %v5977_v13 }
 0x96f   : > { %v18917_v46 = vpop.eup %15339  ;;  %v5979_v5 = vmul.f32 1.442695, %v5935_v12 }
 0x970   : > { %v18919_v43 = vpop.eup %15341  ;;  %13197 = vmatprep.mubr.msk.f32.mxu1 %vm2127_vm5, %v18917_v46  ;;  %v5874_v40 = vpop.xlane.xlu1 %5873 }
 0x971   : > { %15347 = vpow2.f32 %v5979_v5  ;;  %13198 = vmatmul.mubr.msk.f32.vlgmr.msra.gmra.mrb[156].mxu1 %vm2127_vm5, %v18919_v43  ;;  %v5938_v45 = vsub.f32 %v18712_v11, %v5874_v40 }
 0x972   : > { %15349 = vpow2.f32 %v5981_v41  ;;  %14028 = vmatpush3.bf16.msra.mxu1 %v18630_v33 }
 0x973   : > { %14030 = vmatprep.subr.bf16.mxu1 %v14029_v37  ;;  %v5985_v61 = vmul.f32 1.442695, %v5938_v45 }
 0x974   : > { %v5871_v24 = vpop.xlane.xlu1 %5870 }
 0x975   : > { %v5937_v60 = vsub.f32 %v18717_v62, %v5871_v24  ;;  %v6022_v62 = vsel %vm2127_vm5, %v18848_v53, 0.0 }
 0x976   : > { %14032 = vmatpush3.bf16.msra.mxu1 %v14029_v37 }
 0x977   : > { %v18928_v32 = vpop.eup %15343  ;;  %v5983_v55 = vmul.f32 1.442695, %v5937_v60 }
 0x978   : > { %v18930_v39 = vpop.eup %15345  ;;  %13200 = vmatprep.mubr.msk.f32.mxu1 %vm2127_vm5, %v18928_v32 }
 0x979   : > { %15351 = vpow2.f32 %v5983_v55  ;;  %13201 = vmatmul.mubr.msk.f32.gmra.mrb[158].mxu1 %vm2127_vm5, %v18930_v39 }
 0x97a   : > { %15353 = vpow2.f32 %v5985_v61 }
 0x97b   : > { %v18936_v33 = vpop.eup %15347 }
 0x97c   : > { %v18938_v11 = vpop.eup %15349  ;;  %13203 = vmatprep.mubr.msk.f32.mxu1 %vm2127_vm5, %v18936_v33 }
 0x97d   : > { %13204 = vmatmul.mubr.msk.f32.gmra.mrb[160].mxu1 %vm2127_vm5, %v18938_v11 }
 0x97f   : > { %6023 = vadd.xlane.f32.xlu1 %v6022_v62  ;;  %v5880_v20 = vpop.xlane.xlu1 %5879 }
 0x980   : > { %v5940_v13 = vsub.f32 %v18724_v52, %v5880_v20 }
 0x982   : > { %v5989_v25 = vmul.f32 1.442695, %v5940_v13  ;;  %v6028_v13 = vsel %vm2127_vm5, %v18864_v17, 0.0  ;;  %v6025_v17 = vsel %vm2127_vm5, %v18860_v4, 0.0  ;;  %v6046_v4 = vsel %vm2127_vm5, %v18919_v43, 0.0 }
 0x983   : > { %v18949_v22 = vpop.eup %15351  ;;  %6035 = vadd.xlane.f32.xlu1 %v6034_v9  ;;  %v5877_v3 = vpop.xlane.xlu1 %5876 }
 0x984   : > { %v18951_v7 = vpop.eup %15353  ;;  %v5939_v12 = vsub.f32 %v18727_v21, %v5877_v3  ;;  %v5883_v18 = vpop.xlane.xlu0 %5882  ;;  %13206 = vmatprep.mubr.msk.f32.mxu1 %vm2127_vm5, %v18949_v22  ;;  %15355 = vpow2.f32 %v5989_v25  ;;  %v14920_v3 = vld [vmem:[#allocation7 + $0x28] sm:$0xff]  }
 0x985   : > { %v5941_v53 = vsub.f32 %v18732_v57, %v5883_v18  ;;  %13207 = vmatmul.mubr.msk.f32.gmra.mrb[162].mxu1 %vm2127_vm5, %v18951_v7  ;;  %v6040_v57 = vsel %vm2127_vm5, %v18895_v51, 0.0 }
 0x986   : > { %v5987_v52 = vmul.f32 1.442695, %v5939_v12 }
 0x987   : > { %v5991_v41 = vmul.f32 1.442695, %v5941_v53  ;;  %6032 = vadd.xlane.f32.xlu1 %v6031_v0  ;;  %v5886_v5 = vpop.xlane.xlu1 %5885  ;;  %v6064_v0 = vsel %vm2127_vm5, %v18951_v7, 0.0 }
 0x988   : > { %15357 = vpow2.f32 %v5987_v52  ;;  %v5942_v21 = vsub.f32 %v18735_v30, %v5886_v5  ;;  %v5889_v40 = vpop.xlane.xlu0 %5888 }
 0x989   : > { %15359 = vpow2.f32 %v5991_v41  ;;  %v5943_v37 = vsub.f32 %v18742_v28, %v5889_v40  ;;  %v6037_v28 = vsel %vm2127_vm5, %v18892_v48, 0.0 }
 0x98a   : > { %v5993_v45 = vmul.f32 1.442695, %v5942_v21 }
 0x98b   : > { %v5995_v24 = vmul.f32 1.442695, %v5943_v37  ;;  %6041 = vadd.xlane.f32.xlu1 %v6040_v57  ;;  %v5892_v60 = vpop.xlane.xlu1 %5891 }
 0x98c   : > { %15361 = vpow2.f32 %v5993_v45  ;;  %v5944_v61 = vsub.f32 %v18745_v47, %v5892_v60  ;;  %v5895_v55 = vpop.xlane.xlu0 %5894  ;;  %6020 = vadd.xlane.f32.xlu0 %v6019_v44 }
 0x98d   : > { %15363 = vpow2.f32 %v5995_v24  ;;  %v5945_v30 = vsub.f32 %v18752_v50, %v5895_v55  ;;  %v6043_v50 = vsel %vm2127_vm5, %v18917_v46, 0.0  ;;  %v6052_v46 = vsel %vm2127_vm5, %v18930_v39, 0.0 }
 0x98e   : > { %v5997_v62 = vmul.f32 1.442695, %v5944_v61  ;;  %v18974_v47 = vpop.eup %15355  ;;  %v6058_v39 = vsel %vm2127_vm5, %v18938_v11, 0.0  ;;  %v6061_v11 = vsel %vm2127_vm5, %v18949_v22, 0.0  ;;  %v21123_v22 = vld [vmem:[#allocation46_spill] sm:$0xff] }
 0x98f   : > { %v5999_v20 = vmul.f32 1.442695, %v5945_v30  ;;  %6038 = vadd.xlane.f32.xlu1 %v6037_v28  ;;  %v5898_v51 = vpop.xlane.xlu1 %5897 }
 0x990   : > { %15365 = vpow2.f32 %v5997_v62  ;;  %v5946_v1 = vsub.f32 %v18755_v34, %v5898_v51  ;;  %6029 = vadd.xlane.f32.xlu0 %v6028_v13 }
 0x991   : > { %15367 = vpow2.f32 %v5999_v20 }
 0x992   : > { %v15358_v9 = vpop.eup %15357  ;;  %v6001_v25 = vmul.f32 1.442695, %v5946_v1 }
 0x993   : > { %v18978_v48 = vpop.eup %15359  ;;  %6044 = vadd.xlane.f32.xlu1 %v6043_v50  ;;  %13225 = vmatprep.mubr.msk.f32.mxu0 %vm2127_vm5, %v15358_v9  ;;  %v6067_v45 = vsel %vm2127_vm5, %v15358_v9, 0.0 }
 0x994   : > { %15369 = vpow2.f32 %v6001_v25  ;;  %6026 = vadd.xlane.f32.xlu0 %v6025_v17  ;;  %13226 = vmatmul.mubr.msk.f32.vlgmr.msra.gmra.mrb[160].mxu0 %vm2127_vm5, %v18974_v47 }
 0x995   : > { %13228 = vmatprep.mubr.msk.f32.mxu0 %vm2127_vm5, %v18978_v48  ;;  %13266 = vmatpush3.bf16.msra.mxu0 %v18888_v49  ;;  %v6049_v49 = vsel %vm2127_vm5, %v18928_v32, 0.0 }
 0x996   : > { %v15362_v34 = vpop.eup %15361  ;;  %13267 = vmatprep.subr.bf16.mxu0 %v14920_v3 }
 0x997   : > { %v18990_v12 = vpop.eup %15363  ;;  %6053 = vadd.xlane.f32.xlu1 %v6052_v46  ;;  %v6076_v44 = vsel %vm2127_vm5, %v15362_v34, 0.0 }
 0x998   : > { %6047 = vadd.xlane.f32.xlu0 %v6046_v4  ;;  %13229 = vmatmul.mubr.msk.f32.gmra.mrb[162].mxu0 %vm2127_vm5, %v15362_v34 }
 0x999   : > { %13231 = vmatprep.mubr.msk.f32.mxu0 %vm2127_vm5, %v18990_v12  ;;  %13268 = vmatpush3.bf16.msra.mxu0 %v14920_v3 }
 0x99a   : > { %v15366_v18 = vpop.eup %15365 }
 0x99b   : > { %v18999_v53 = vpop.eup %15367  ;;  %6050 = vadd.xlane.f32.xlu1 %v6049_v49 }
 0x99c   : > { %6059 = vadd.xlane.f32.xlu0 %v6058_v39  ;;  %13232 = vmatmul.mubr.msk.f32.gmra.mrb[164].mxu0 %vm2127_vm5, %v15366_v18 }
 0x99d   : > { %13234 = vmatprep.mubr.msk.f32.mxu0 %vm2127_vm5, %v18999_v53 }
 0x99e   : > { %v15370_v43 = vpop.eup %15369 }
 0x99f   : > { %v5904_v52 = vpop.xlane.xlu1 %5903  ;;  %v6088_v3 = vsel %vm2127_vm5, %v15370_v43, 0.0 }
 0x9a0   : > { %v5901_v41 = vpop.xlane.xlu0 %5900  ;;  %6065 = vadd.xlane.f32.xlu0 %v6064_v0  ;;  %13235 = vmatmul.mubr.msk.f32.gmra.mrb[166].mxu0 %vm2127_vm5, %v15370_v43  ;;  %v5948_v57 = vsub.f32 %v18764_v63, %v5904_v52 }
 0x9a1   : > { %v5947_v32 = vsub.f32 %v18767_v8, %v5901_v41 }
 0x9a2   : > { %v6005_v61 = vmul.f32 1.442695, %v5948_v57 }
 0x9a3   : > { %v6003_v5 = vmul.f32 1.442695, %v5947_v32  ;;  %v5910_v21 = vpop.xlane.xlu1 %5909 }
 0x9a4   : > { %v5907_v40 = vpop.xlane.xlu0 %5906  ;;  %6062 = vadd.xlane.f32.xlu0 %v6061_v11  ;;  %v5950_v24 = vsub.f32 %v18774_v2, %v5910_v21  ;;  %v6082_v2 = vsel %vm2127_vm5, %v15366_v18, 0.0 }
 0x9a5   : > { %15371 = vpow2.f32 %v6003_v5  ;;  %v5949_v60 = vsub.f32 %v18777_v19, %v5907_v40 }
 0x9a6   : > { %v6009_v30 = vmul.f32 1.442695, %v5950_v24  ;;  %15373 = vpow2.f32 %v6005_v61 }
 0x9a7   : > { %v5916_v37 = vpop.xlane.xlu1 %5915  ;;  %v6007_v63 = vmul.f32 1.442695, %v5949_v60 }
 0x9a8   : > { %v5913_v7 = vpop.xlane.xlu0 %5912  ;;  %6068 = vadd.xlane.f32.xlu0 %v6067_v45  ;;  %v5952_v62 = vsub.f32 %v18784_v14, %v5916_v37  ;;  %15375 = vpow2.f32 %v6009_v30 }
 0x9a9   : > { %v5951_v20 = vsub.f32 %v18787_v38, %v5913_v7  ;;  %15377 = vpow2.f32 %v6007_v63 }
 0x9aa   : > { %v6013_v50 = vmul.f32 1.442695, %v5952_v62 }
 0x9ab   : > { %v5922_v8 = vpop.xlane.xlu1 %5921  ;;  %v6011_v38 = vmul.f32 1.442695, %v5951_v20 }
 0x9ac   : > { %v5919_v55 = vpop.xlane.xlu0 %5918  ;;  %7246 = vrot.lane.b32.xlu1 %v21123_v22, %s15910_s18  ;;  %6077 = vadd.xlane.f32.xlu0 %v6076_v44  ;;  %v5954_v14 = vsub.f32 %v18794_v27, %v5922_v8  ;;  %15379 = vpow2.f32 %v6013_v50  ;;  %v6085_v27 = vsel %vm2127_vm5, %v18999_v53, 0.0 }
 0x9ad   : > { %v5953_v17 = vsub.f32 %v18797_v6, %v5919_v55  ;;  %15381 = vpow2.f32 %v6011_v38 }
 0x9ae   : > { %v6017_v39 = vmul.f32 1.442695, %v5954_v14 }
 0x9af   : > { %v15372_v28 = vpop.eup %15371  ;;  %v14720_v51 = vpop.permute.xlu1 %14719  ;;  %v6015_v52 = vmul.f32 1.442695, %v5953_v17 }
 0x9b0   : > { %v14715_v19 = vpop.permute.xlu0 %14714  ;;  %13253 = vmatprep.mubr.msk.f32.mxu1 %vm2127_vm5, %v15372_v28  ;;  %6083 = vadd.xlane.f32.xlu0 %v6082_v2  ;;  %v14722_v13 = vunpack.i.h.bf16 %v14720_v51  ;;  %v14721_v1 = vunpack.i.l.bf16 %v14720_v51  ;;  %v19028_v41 = vpop.eup %15373  ;;  %15383 = vpow2.f32 %v6017_v39  ;;  %v6091_v32 = vsel %vm2127_vm5, %v15372_v28, 0.0 }
 0x9b1   : > { %v14717_v9 = vunpack.i.h.bf16 %v14715_v19  ;;  %v14716_v25 = vunpack.i.l.bf16 %v14715_v19  ;;  %15385 = vpow2.f32 %v6015_v52 }
 0x9b2   : > { %v14037_v49 = vpack.c.bf16 %v14722_v13, %v14721_v1  ;;  %v15376_v5 = vpop.eup %15375 }
 0x9b3   : > { %v14033_v34 = vpack.c.bf16 %v14717_v9, %v14716_v25  ;;  %v14740_v43 = vpop.permute.xlu1 %14739  ;;  %v19033_v11 = vpop.eup %15377  ;;  %v6100_v45 = vsel %vm2127_vm5, %v15376_v5, 0.0  ;;  %v6055_v9 = vsel %vm2127_vm5, %v18936_v33, 0.0 }
 0x9b4   : > { %v14725_v46 = vpop.permute.xlu0 %14724  ;;  %6089 = vadd.xlane.f32.xlu0 %v6088_v3  ;;  %v14742_v13 = vunpack.i.h.bf16 %v14740_v43  ;;  %v14741_v1 = vunpack.i.l.bf16 %v14740_v43  ;;  %v6094_v43 = vsel %vm2127_vm5, %v19028_v41, 0.0 }
 0x9b5   : > { %v14727_v4 = vunpack.i.h.bf16 %v14725_v46  ;;  %v14726_v18 = vunpack.i.l.bf16 %v14725_v46  ;;  %14034 = vmatprep.subr.bf16.mxu1 %v14033_v34 }
 0x9b6   : > { %14036 = vmatpush3.bf16.msra.mxu1 %v14033_v34  ;;  %v15380_v57 = vpop.eup %15379  ;;  %v14059_v38 = vpack.c.bf16 %v14742_v13, %v14741_v1  ;;  %v6070_v34 = vsel %vm2127_vm5, %v18974_v47, 0.0  ;;  %v6079_v47 = vsel %vm2127_vm5, %v18990_v12, 0.0  ;;  %v6097_v12 = vsel %vm2127_vm5, %v19033_v11, 0.0  ;;  %v21137_v1 = vld [vmem:[#allocation74_spill] sm:$0xff] }
 0x9b7   : > { %14038 = vmatprep.subr.bf16.mxu1 %v14037_v49  ;;  %v14041_v6 = vpack.c.bf16 %v14727_v4, %v14726_v18  ;;  %v7066_v53 = vpop.permute.xlu1 %7065  ;;  %v19040_v24 = vpop.eup %15381  ;;  %v6106_v8 = vsel %vm2127_vm5, %v15380_v57, 0.0  ;;  %v6073_v18 = vsel %vm2127_vm5, %v18978_v48, 0.0 }
 0x9b8   : > { %v14730_v0 = vpop.permute.xlu0 %14729  ;;  %6086 = vadd.xlane.f32.xlu0 %v6085_v27 }
 0x9b9   : > { %v14732_v40 = vunpack.i.h.bf16 %v14730_v0  ;;  %v14731_v37 = vunpack.i.l.bf16 %v14730_v0 }
 0x9ba   : > { %14040 = vmatpush3.bf16.msra.mxu1 %v14037_v49  ;;  %v15384_v44 = vpop.eup %15383 }
 0x9bb   : > { %14043 = vmatprep.subr.msk.bf16.mxu1 %vm16611_vm1, %v14041_v6  ;;  %v14047_v60 = vpack.c.bf16 %v14732_v40, %v14731_v37  ;;  %v7070_v61 = vpop.permute.xlu1 %7069  ;;  %v15386_v22 = vpop.eup %15385  ;;  %v6112_v28 = vsel %vm2127_vm5, %v15384_v44, 0.0 }
 0x9bc   : > { %v14735_v21 = vpop.permute.xlu0 %14734  ;;  %6092 = vadd.xlane.f32.xlu0 %v6091_v32  ;;  %v6109_v2 = vsel %vm2127_vm5, %v15386_v22, 0.0 }
 0x9bd   : > { %13254 = vmatmul.mubr.msk.f32.vlgmr.msra.gmra.mrb[164].mxu1 %vm2127_vm5, %v19028_v41  ;;  %v14737_v30 = vunpack.i.h.bf16 %v14735_v21  ;;  %v14736_v62 = vunpack.i.l.bf16 %v14735_v21  ;;  %v6103_v21 = vsel %vm2127_vm5, %v19040_v24, 0.0 }
 0x9be   : > { %13256 = vmatprep.mubr.msk.f32.mxu1 %vm2127_vm5, %v19033_v11  ;;  %v21126_v11 = vld [vmem:[#allocation53_spill] sm:$0xff] }
 0x9bf   : > { %v14053_v20 = vpack.c.bf16 %v14737_v30, %v14736_v62  ;;  %v7072_v51 = vpop.permute.xlu1 %7071  ;;  %v21131_v30 = vld [vmem:[#allocation62_spill] sm:$0xff] }
 0x9c0   : > { %v14745_v7 = vpop.permute.xlu0 %14744  ;;  %6101 = vadd.xlane.f32.xlu0 %v6100_v45 }
 0x9c1   : > { %13257 = vmatmul.mubr.msk.f32.gmra.mrb[166].mxu1 %vm2127_vm5, %v15376_v5  ;;  %v14747_v33 = vunpack.i.h.bf16 %v14745_v7  ;;  %v14746_v46 = vunpack.i.l.bf16 %v14745_v7  ;;  %v21125_v5 = vld [vmem:[#allocation68_spill] sm:$0xff] }
 0x9c2   : > { %13259 = vmatprep.mubr.msk.f32.mxu1 %vm2127_vm5, %v19040_v24  ;;  %v21127_v24 = vld [vmem:[#allocation56_spill] sm:$0xff] }
 0x9c3   : > { %14046 = vmatpush3.bf16.xpose.msk.msra.mxu1 %vm16611_vm1, %v14041_v6  ;;  %v14750_v25 = vpop.permute.xlu1 %14749  ;;  %v14065_v49 = vpack.c.bf16 %v14747_v33, %v14746_v46  ;;  %v21124_v6 = vld [vmem:[#allocation48_spill] sm:$0xff]  ;;  %v21142_v46 = vld [vmem:[#allocation67_spill] sm:$0xff] }
 0x9c4   : > { %v7068_v55 = vpop.permute.xlu0 %7067  ;;  %6107 = vadd.xlane.f32.xlu0 %v6106_v8  ;;  %14049 = vmatprep.subr.msk.bf16.mxu1 %vm16611_vm1, %v14047_v60  ;;  %v14752_v52 = vunpack.i.h.bf16 %v14750_v25  ;;  %v14751_v27 = vunpack.i.l.bf16 %v14750_v25  ;;  %v21138_v25 = vld [vmem:[#allocation58_spill] sm:$0xff] }
 0x9c5   : > { %13260 = vmatmul.mubr.msk.f32.gmra.mrb[168].mxu1 %vm2127_vm5, %v15380_v57 }
 0x9c6   : > { %13262 = vmatprep.mubr.msk.f32.mxu1 %vm2127_vm5, %v15386_v22  ;;  %v14071_v48 = vpack.c.bf16 %v14752_v52, %v14751_v27  ;;  %v21130_v22 = vld [vmem:[#allocation63_spill] sm:$0xff]  ;;  %v21145_v52 = vld [vmem:[#allocation78_spill] sm:$0xff] }
 0x9c7   : > { %v7074_v4 = vpop.permute.xlu1 %7073 }
 0x9c8   : > { %v14755_v63 = vpop.permute.xlu0 %14754  ;;  %6113 = vadd.xlane.f32.xlu0 %v6112_v28  ;;  %v21132_v28 = vld [vmem:[#allocation51_spill] sm:$0xff] }
 0x9c9   : > { %13263 = vmatmul.mubr.msk.f32.gmra.mrb[170].mxu1 %vm2127_vm5, %v15384_v44  ;;  %v14757_v41 = vunpack.i.h.bf16 %v14755_v63  ;;  %v14756_v32 = vunpack.i.l.bf16 %v14755_v63  ;;  %v21128_v44 = vld [vmem:[#allocation76_spill] sm:$0xff]  ;;  %v21133_v63 = vld [vmem:[#allocation66_spill] sm:$0xff] }
 0x9ca   : > { %13317 = vmatprep.mubr.msk.f32.mxu1 %vm1514_vm0, %v7066_v53 }
 0x9cb   : > { %14052 = vmatpush3.bf16.xpose.msk.msra.mxu1 %vm16611_vm1, %v14047_v60  ;;  %v7078_v39 = vpop.permute.xlu1 %7077  ;;  %v14077_v40 = vpack.c.bf16 %v14757_v41, %v14756_v32 }
 0x9cc   : > { %v7076_v19 = vpop.permute.xlu0 %7075  ;;  %6110 = vadd.xlane.f32.xlu0 %v6109_v2  ;;  %14055 = vmatprep.subr.msk.bf16.mxu1 %vm16611_vm1, %v14053_v20 }
 0x9cf   : > { %v7080_v0 = vpop.permute.xlu1 %7079 }
 0x9d0   : > { %v14765_v50 = vpop.permute.xlu0 %14764  ;;  %6056 = vadd.xlane.f32.xlu1 %v6055_v9 }
 0x9d1   : > { %v14767_v14 = vunpack.i.h.bf16 %v14765_v50  ;;  %v14766_v3 = vunpack.i.l.bf16 %v14765_v50  ;;  %v21139_v50 = vld [vmem:[#allocation77_spill] sm:$0xff] }
 0x9d3   : > { %v19062_v17 = vpack.c.bf16 %v14767_v14, %v14766_v3  ;;  %14058 = vmatpush3.bf16.xpose.msk.msra.mxu1 %vm16611_vm1, %v14053_v20  ;;  %v14760_v53 = vpop.permute.xlu1 %14759  ;;  %v21134_v20 = vld [vmem:[#allocation55_spill] sm:$0xff]  ;;  %v21140_v3 = vld [vmem:[#allocation61_spill] sm:$0xff] }
 0x9d4   : > { %6071 = vadd.xlane.f32.xlu1 %v6070_v34  ;;  %14061 = vmatprep.subr.msk.bf16.mxu1 %vm16611_vm1, %v14059_v38  ;;  %v7237_v37 = vpop.permute.xlu0 %7236  ;;  %v14762_v45 = vunpack.i.h.bf16 %v14760_v53  ;;  %v14761_v57 = vunpack.i.l.bf16 %v14760_v53  ;;  %v21141_v34 = vld [vmem:[#allocation79_spill] sm:$0xff] }
 0x9d5   : > { %14091 = vmatprep.subr.msk.bf16.mxu0 %vm16611_vm1, %v19062_v17 }
 0x9d6   : > { %v14083_v8 = vpack.c.bf16 %v14762_v45, %v14761_v57 }
 0x9d7   : > { %v7235_v7 = vpop.permute.xlu1 %7234 }
 0x9d8   : > { %6074 = vadd.xlane.f32.xlu1 %v6073_v18  ;;  %v7239_v60 = vpop.permute.xlu0 %7238 }
 0x9db   : > { %14064 = vmatpush3.bf16.xpose.msk.msra.mxu1 %vm16611_vm1, %v14059_v38  ;;  %v7243_v13 = vpop.permute.xlu1 %7242 }
 0x9dc   : > { %6080 = vadd.xlane.f32.xlu1 %v6079_v47  ;;  %14067 = vmatprep.subr.msk.bf16.mxu1 %vm16611_vm1, %v14065_v49 }
 0x9e0   : > { %6095 = vadd.xlane.f32.xlu1 %v6094_v43 }
 0x9e2   : > { %7248 = vrot.lane.b32.xlu0 %v21124_v6, %s15910_s18  ;;  %13318 = vmatmul.mubr.msk.f32.vlgmr.msra.gmra.mrb[172].mxu1 %vm1514_vm0, %v7068_v55  ;;  %v7241_v55 = vpop.permute.xlu0 %7240 }
 0x9e3   : > { %13320 = vmatprep.mubr.msk.f32.mxu1 %vm1514_vm0, %v7070_v61  ;;  %14070 = vmatpush3.bf16.xpose.msk.msra.mxu1 %vm16611_vm1, %v14065_v49  ;;  %v21129_v61 = vld [vmem:[#allocation59_spill] sm:$0xff]  ;;  %v21143_v49 = vld [vmem:[#allocation70_spill] sm:$0xff] }
 0x9e4   : > { %6098 = vadd.xlane.f32.xlu1 %v6097_v12  ;;  %14073 = vmatprep.subr.msk.bf16.mxu1 %vm16611_vm1, %v14071_v48 }
 0x9e6   : > { %14784 = vrot.lane.b32.xlu0 %v21125_v5, %s15910_s18  ;;  %13321 = vmatmul.mubr.msk.f32.gmra.mrb[174].mxu1 %vm1514_vm0, %v7072_v51  ;;  %v19125_v62 = vpop.permute.xlu0 %14769  ;;  %v21135_v51 = vld [vmem:[#allocation69_spill] sm:$0xff] }
 0x9e7   : > { %13323 = vmatprep.mubr.msk.f32.mxu1 %vm1514_vm0, %v7074_v4 }
 0x9e8   : > { %6104 = vadd.xlane.f32.xlu1 %v6103_v21 }
 0x9ea   : > { %7405 = vrot.lane.b32.xlu0 %v21126_v11, %s15910_s18  ;;  %13324 = vmatmul.mubr.msk.f32.gmra.mrb[176].mxu1 %vm1514_vm0, %v7076_v19  ;;  %v19136_v2 = vpop.permute.xlu0 %14774  ;;  %v21136_v19 = vld [vmem:[#allocation71_spill] sm:$0xff] }
 0x9eb   : > { %13326 = vmatprep.mubr.msk.f32.mxu1 %vm1514_vm0, %v7078_v39  ;;  %14076 = vmatpush3.bf16.xpose.msk.msra.mxu1 %vm16611_vm1, %v14071_v48 }
 0x9ec   : > { %14079 = vmatprep.subr.msk.bf16.mxu1 %vm16611_vm1, %v14077_v40 }
 0x9ee   : > { %7409 = vrot.lane.b32.xlu0 %v21127_v24, %s15910_s18  ;;  %13327 = vmatmul.mubr.msk.f32.gmra.mrb[178].mxu1 %vm1514_vm0, %v7080_v0  ;;  %v7245_v9 = vpop.permute.xlu0 %7244 }
 0x9ef   : > { %13345 = vmatprep.mubr.msk.f32.mxu1 %vm1514_vm0, %v7235_v7  ;;  %v14771_v7 = vunpack.i.l.bf16 %v19125_v62 }
 0x9f2   : > { %14794 = vrot.lane.b32.xlu0 %v21128_v44, %s15910_s18 }
 0x9f3   : > { %14082 = vmatpush3.bf16.xpose.msk.msra.mxu1 %vm16611_vm1, %v14077_v40 }
 0x9f4   : > { %14085 = vmatprep.subr.msk.bf16.mxu1 %vm16611_vm1, %v14083_v8 }
 0x9f6   : > { %7413 = vrot.lane.b32.xlu0 %v21129_v61, %s15910_s18 }
 0x9f9   : > { %14779 = vrot.lane.b32.xlu1 %v21130_v22, %s15910_s18 }
 0x9fa   : > { %7417 = vrot.lane.b32.xlu0 %v21131_v30, %s15910_s18 }
 0x9fb   : > { %14088 = vmatpush3.bf16.xpose.msk.msra.mxu1 %vm16611_vm1, %v14083_v8 }
 0x9fd   : > { %7403 = vrot.lane.b32.xlu1 %v21132_v28, %s15910_s18 }
 0x9fe   : > { %7572 = vrot.lane.b32.xlu0 %v21133_v63, %s15910_s18 }
 0xa01   : > { %7407 = vrot.lane.b32.xlu1 %v21134_v20, %s15910_s18  ;;  %v14777_v20 = vunpack.i.h.bf16 %v19136_v2 }
 0xa02   : > { %7576 = vrot.lane.b32.xlu0 %v21135_v51, %s15910_s18  ;;  %13346 = vmatmul.mubr.msk.f32.vlgmr.msra.gmra.mrb[180].mxu1 %vm1514_vm0, %v7237_v37  ;;  %v14776_v51 = vunpack.i.l.bf16 %v19136_v2 }
 0xa03   : > { %13348 = vmatprep.mubr.msk.f32.mxu1 %vm1514_vm0, %v7239_v60 }
 0xa05   : > { %14789 = vrot.lane.b32.xlu1 %v21136_v19, %s15910_s18 }
 0xa06   : > { %7580 = vrot.lane.b32.xlu0 %v21137_v1, %s15910_s18  ;;  %13349 = vmatmul.mubr.msk.f32.gmra.mrb[182].mxu1 %vm1514_vm0, %v7241_v55 }
 0xa07   : > { %13351 = vmatprep.mubr.msk.f32.mxu1 %vm1514_vm0, %v7243_v13 }
 0xa09   : > { %7411 = vrot.lane.b32.xlu1 %v21138_v25, %s15910_s18 }
 0xa0a   : > { %7584 = vrot.lane.b32.xlu0 %v21139_v50, %s15910_s18  ;;  %13352 = vmatmul.mubr.msk.f32.gmra.mrb[184].mxu1 %vm1514_vm0, %v7245_v9  ;;  %v14101_v9 = vpack.c.bf16 %v14777_v20, %v14776_v51 }
 0xa0c   : > { %v6024_v14 = vpop.xlane.xlu1 %6023 }
 0xa0d   : > { %7415 = vrot.lane.b32.xlu1 %v21140_v3, %s15910_s18  ;;  %15387 = vrcp.f32 %v6024_v14 }
 0xa0e   : > { %14809 = vrot.lane.b32.xlu0 %v21036_v23, %s15910_s18 }
 0xa10   : > { %v6036_v38 = vpop.xlane.xlu1 %6035 }
 0xa11   : > { %14799 = vrot.lane.b32.xlu1 %v21141_v34, %s15910_s18 }
 0xa12   : > { %14819 = vrot.lane.b32.xlu0 %v21037_v29, %s15910_s18  ;;  %v21144_v29 = vld [vmem:[#allocation75_spill] sm:$0xff] }
 0xa14   : > { %v6033_v33 = vpop.xlane.xlu1 %6032 }
 0xa15   : > { %7574 = vrot.lane.b32.xlu1 %v21142_v46, %s15910_s18 }
 0xa16   : > { %14829 = vrot.lane.b32.xlu0 %v21029_v42, %s15910_s18 }
 0xa18   : > { %v6042_v4 = vpop.xlane.xlu1 %6041 }
 0xa19   : > { %v6021_v18 = vpop.xlane.xlu0 %6020  ;;  %7578 = vrot.lane.b32.xlu1 %v21143_v49, %s15910_s18 }
 0xa1a   : > { %14839 = vrot.lane.b32.xlu0 %v21031_v16, %s15910_s18  ;;  %15389 = vrcp.f32 %v6021_v18  ;;  %v15388_v16 = vpop.eup %15387 }
 0xa1c   : > { %v6039_v23 = vpop.xlane.xlu1 %6038 }
 0xa1d   : > { %v6030_v47 = vpop.xlane.xlu0 %6029  ;;  %7582 = vrot.lane.b32.xlu1 %v21144_v29, %s15910_s18 }
 0xa1e   : > { %14849 = vrot.lane.b32.xlu0 %v21033_v26, %s15910_s18  ;;  %15391 = vrcp.f32 %v6030_v47 }
 0xa1f   : > { %15393 = vrcp.f32 %v6036_v38 }
 0xa20   : > { %v19170_v42 = vpop.xlane.xlu1 %6044 }
 0xa21   : > { %v6027_v39 = vpop.xlane.xlu0 %6026  ;;  %7586 = vrot.lane.b32.xlu1 %v21145_v52, %s15910_s18 }
 0xa22   : > { %15395 = vrcp.f32 %v6027_v39  ;;  %14859 = vrot.lane.b32.xlu0 %v21034_v35, %s15910_s18 }
 0xa23   : > { %15397 = vrcp.f32 %v6033_v33 }
 0xa24   : > { %v6054_v27 = vpop.xlane.xlu1 %6053  ;;  %v13171_v43 = vpop.f32.mrb[152].mxu0  ;;  %15399 = vrcp.f32 %v6042_v4 }
 0xa25   : > { %v15390_v48 = vpop.eup %15389  ;;  %v6760_v0 = vmul.f32 %v15388_v16, %v13171_v43  ;;  %v6048_v6 = vpop.xlane.xlu0 %6047  ;;  %14804 = vrot.lane.b32.xlu1 %v21023_v36, %s15910_s18  ;;  %15401 = vrcp.f32 %v6039_v23  ;;  %v14772_v36 = vunpack.i.h.bf16 %v19125_v62 }
 0xa26   : > { %v6229_v26 = vpop.f32.mrb[153].mxu0  ;;  %15403 = vrcp.f32 %v6048_v6 }
 0xa27   : > { %v6759_v12 = vmul.f32 %v15390_v48, %v6229_v26  ;;  %v14095_v30 = vpack.c.bf16 %v14772_v36, %v14771_v7  ;;  %15405 = vrcp.f32 %v19170_v42 }
 0xa28   : > { %v6051_v32 = vpop.xlane.xlu1 %6050  ;;  %v13174_v5 = vpop.f32.mrb[154].mxu0  ;;  %15407 = vrcp.f32 %v6054_v27 }
 0xa29   : > { %v6791_v41 = vpack.c.bf16 %v6760_v0, %v6759_v12  ;;  %v19178_v21 = vpop.xlane.xlu0 %6059  ;;  %14814 = vrot.lane.b32.xlu1 %v21025_v15, %s15910_s18  ;;  %v6239_v35 = vpop.f32.mrb[155].mxu0  ;;  %15409 = vrcp.f32 %v6051_v32 }
 0xa2a   : > { %v15392_v53 = vpop.eup %15391 }
 0xa2b   : > { %13269 = vmatprep.mubr.msk.bf16.mxu0 %vm1514_vm0, %v6791_v41  ;;  %v15394_v40 = vpop.eup %15393  ;;  %v6762_v24 = vmul.f32 %v15392_v53, %v13174_v5 }
 0xa2c   : > { %v15396_v11 = vpop.eup %15395  ;;  %v7247_v37 = vpop.permute.xlu1 %7246 }
 0xa2d   : > { %v13177_v45 = vpop.f32.mrb[156].mxu0  ;;  %v15398_v57 = vpop.eup %15397  ;;  %v6761_v60 = vmul.f32 %v15396_v11, %v6239_v35  ;;  %14824 = vrot.lane.b32.xlu1 %v21027_v10, %s15910_s18  ;;  %13354 = vmatprep.mubr.msk.f32.mxu1 %vm1514_vm0, %v7247_v37 }
 0xa2e   : > { %v6764_v8 = vmul.f32 %v15394_v40, %v13177_v45  ;;  %v6066_v44 = vpop.xlane.xlu0 %6065  ;;  %v6249_v15 = vpop.f32.mrb[157].mxu0 }
 0xa2f   : > { %v6763_v61 = vmul.f32 %v15398_v57, %v6249_v15  ;;  %v6792_v55 = vpack.c.bf16 %v6762_v24, %v6761_v60  ;;  %v15400_v10 = vpop.eup %15399  ;;  %15411 = vrcp.f32 %v6066_v44 }
 0xa30   : > { %v15402_v63 = vpop.eup %15401 }
 0xa31   : > { %v6793_v22 = vpack.c.bf16 %v6764_v8, %v6763_v61  ;;  %14834 = vrot.lane.b32.xlu1 %v21038_v58, %s15910_s18  ;;  %13270 = vmatmul.mubr.msk.bf16.vlgmr.msra.gmra.mrb[120].mxu0 %vm1514_vm0, %v6792_v55  ;;  %v15404_v50 = vpop.eup %15403 }
 0xa32   : > { %v6063_v28 = vpop.xlane.xlu0 %6062  ;;  %14094 = vmatpush3.bf16.xpose.msk.msra.mxu0 %vm16611_vm1, %v19062_v17  ;;  %v15406_v14 = vpop.eup %15405 }
 0xa33   : > { %13273 = vmatprep.mubr.msk.bf16.mxu0 %vm1514_vm0, %v6793_v22  ;;  %14097 = vmatprep.subr.msk.bf16.mxu0 %vm16611_vm1, %v14095_v30  ;;  %v15408_v18 = vpop.eup %15407  ;;  %15413 = vrcp.f32 %v6063_v28 }
 0xa34   : > { %v13180_v62 = vpop.f32.mrb[158].mxu0  ;;  %v15410_v23 = vpop.eup %15409  ;;  %15415 = vrcp.f32 %v19178_v21 }
 0xa35   : > { %v6766_v19 = vmul.f32 %v15400_v10, %v13180_v62  ;;  %14844 = vrot.lane.b32.xlu1 %v21039_v54, %s15910_s18  ;;  %v6259_v13 = vpop.f32.mrb[159].mxu0 }
 0xa36   : > { %v6069_v58 = vpop.xlane.xlu0 %6068  ;;  %v6765_v1 = vmul.f32 %v15402_v63, %v6259_v13 }
 0xa38   : > { %v6794_v17 = vpack.c.bf16 %v6766_v19, %v6765_v1 }
 0xa39   : > { %14854 = vrot.lane.b32.xlu1 %v21040_v59, %s15910_s18  ;;  %v15412_v0 = vpop.eup %15411 }
 0xa3a   : > { %v6078_v25 = vpop.xlane.xlu0 %6077  ;;  %14100 = vmatpush3.bf16.xpose.msk.msra.mxu0 %vm16611_vm1, %v14095_v30 }
 0xa3b   : > { %14103 = vmatprep.subr.msk.bf16.mxu0 %vm16611_vm1, %v14101_v9  ;;  %13274 = vmatmul.mubr.msk.bf16.gmra.mrb[124].mxu0 %vm1514_vm0, %v6794_v17 }
 0xa3d   : > { %v15414_v26 = vpop.eup %15413 }
 0xa3e   : > { %v6084_v54 = vpop.xlane.xlu0 %6083  ;;  %v15416_v21 = vpop.eup %15415 }
 0xa42   : > { %v6090_v2 = vpop.xlane.xlu0 %6089  ;;  %14106 = vmatpush3.bf16.xpose.msk.msra.mxu0 %vm16611_vm1, %v14101_v9 }
 0xa44   : > { %v13199_v59 = vpop.f32.mrb[156].mxu1 }
 0xa45   : > { %v6768_v3 = vmul.f32 %v15404_v50, %v13199_v59  ;;  %v6382_v38 = vpop.f32.mrb[157].mxu1 }
 0xa46   : > { %v6087_v34 = vpop.xlane.xlu0 %6086  ;;  %v6767_v33 = vmul.f32 %v15406_v14, %v6382_v38 }
 0xa48   : > { %v6795_v46 = vpack.c.bf16 %v6768_v3, %v6767_v33 }
 0xa4a   : > { %v19211_v4 = vpop.xlane.xlu0 %6092  ;;  %13277 = vmatprep.mubr.msk.bf16.mxu0 %vm1514_vm0, %v6795_v46 }
 0xa4c   : > { %v13202_v49 = vpop.f32.mrb[158].mxu1 }
 0xa4d   : > { %v6770_v47 = vmul.f32 %v15408_v18, %v13202_v49  ;;  %v6392_v29 = vpop.f32.mrb[159].mxu1 }
 0xa4e   : > { %v19214_v42 = vpop.xlane.xlu0 %6101  ;;  %v6769_v39 = vmul.f32 %v15410_v23, %v6392_v29 }
 0xa50   : > { %v6796_v52 = vpack.c.bf16 %v6770_v47, %v6769_v39  ;;  %v13205_v16 = vpop.f32.mrb[160].mxu1 }
 0xa51   : > { %v6402_v27 = vpop.f32.mrb[161].mxu1  ;;  %v6772_v15 = vmul.f32 %v15416_v21, %v13205_v16 }
 0xa52   : > { %v19216_v43 = vpop.xlane.xlu0 %6107  ;;  %13278 = vmatmul.mubr.msk.bf16.gmra.mrb[128].mxu0 %vm1514_vm0, %v6796_v52 }
 0xa56   : > { %v19219_v48 = vpop.xlane.xlu0 %6113 }
 0xa58   : > { %v13208_v6 = vpop.f32.mrb[162].mxu1 }
 0xa59   : > { %v6774_v12 = vmul.f32 %v15412_v0, %v13208_v6  ;;  %v6412_v41 = vpop.f32.mrb[163].mxu1 }
 0xa5a   : > { %v19221_v32 = vpop.xlane.xlu0 %6110  ;;  %v6773_v5 = vmul.f32 %v15414_v26, %v6412_v41 }
 0xa5c   : > { %v6798_v35 = vpack.c.bf16 %v6774_v12, %v6773_v5 }
 0xa5d   : > { %v6057_v40 = vpop.xlane.xlu1 %6056 }
 0xa5e   : > { %v7249_v53 = vpop.permute.xlu0 %7248  ;;  %15417 = vrcp.f32 %v6057_v40 }
 0xa5f   : > { %13355 = vmatmul.mubr.msk.f32.gmra.mrb[186].mxu1 %vm1514_vm0, %v7249_v53  ;;  %15419 = vrcp.f32 %v6069_v58 }
 0xa61   : > { %v6072_v36 = vpop.xlane.xlu1 %6071 }
 0xa62   : > { %v14785_v11 = vpop.permute.xlu0 %14784  ;;  %15421 = vrcp.f32 %v6072_v36 }
 0xa63   : > { %v14787_v37 = vunpack.i.h.bf16 %v14785_v11  ;;  %v14786_v45 = vunpack.i.l.bf16 %v14785_v11  ;;  %15423 = vrcp.f32 %v6078_v25 }
 0xa65   : > { %v14113_v57 = vpack.c.bf16 %v14787_v37, %v14786_v45  ;;  %v6075_v24 = vpop.xlane.xlu1 %6074 }
 0xa66   : > { %v19225_v7 = vpop.permute.xlu0 %7405  ;;  %15425 = vrcp.f32 %v6075_v24 }
 0xa67   : > { %14115 = vmatprep.subr.msk.bf16.mxu1 %vm16611_vm1, %v14113_v57  ;;  %15427 = vrcp.f32 %v6084_v54  ;;  %v13227_v60 = vpop.f32.mrb[160].mxu0 }
 0xa68   : > { %14118 = vmatpush3.bf16.xpose.msk.msra.mxu1 %vm16611_vm1, %v14113_v57  ;;  %v15418_v8 = vpop.eup %15417  ;;  %15429 = vrcp.f32 %v6090_v2  ;;  %v6535_v44 = vpop.f32.mrb[161].mxu0 }
 0xa69   : > { %15431 = vrcp.f32 %v6087_v34  ;;  %v6081_v55 = vpop.xlane.xlu1 %6080  ;;  %v6771_v22 = vmul.f32 %v15418_v8, %v6402_v27  ;;  %v15420_v30 = vpop.eup %15419 }
 0xa6a   : > { %v19231_v61 = vpop.permute.xlu0 %7409  ;;  %15433 = vrcp.f32 %v6081_v55  ;;  %v6775_v51 = vmul.f32 %v15420_v30, %v6535_v44 }
 0xa6b   : > { %v13230_v28 = vpop.f32.mrb[162].mxu0  ;;  %v6797_v10 = vpack.c.bf16 %v6772_v15, %v6771_v22 }
 0xa6c   : > { %v15422_v62 = vpop.eup %15421  ;;  %v6545_v63 = vpop.f32.mrb[163].mxu0 }
 0xa6d   : > { %v6776_v20 = vmul.f32 %v15422_v62, %v13227_v60  ;;  %13281 = vmatprep.mubr.msk.bf16.mxu0 %vm1514_vm0, %v6797_v10  ;;  %v6096_v58 = vpop.xlane.xlu1 %6095  ;;  %v15424_v13 = vpop.eup %15423 }
 0xa6e   : > { %v14795_v19 = vpop.permute.xlu0 %14794  ;;  %13282 = vmatmul.mubr.msk.bf16.gmra.mrb[132].mxu0 %vm1514_vm0, %v6798_v35  ;;  %v6778_v2 = vmul.f32 %v15424_v13, %v13230_v28  ;;  %15435 = vrcp.f32 %v6096_v58 }
 0xa6f   : > { %v6799_v1 = vpack.c.bf16 %v6776_v20, %v6775_v51  ;;  %v13233_v17 = vpop.f32.mrb[164].mxu0  ;;  %v14797_v53 = vunpack.i.h.bf16 %v14795_v19  ;;  %v14796_v11 = vunpack.i.l.bf16 %v14795_v19  ;;  %15437 = vrcp.f32 %v19211_v4 }
 0xa70   : > { %v15426_v9 = vpop.eup %15425  ;;  %v6555_v25 = vpop.f32.mrb[165].mxu0  ;;  %15439 = vrcp.f32 %v19214_v42 }
 0xa71   : > { %v15428_v54 = vpop.eup %15427  ;;  %v6777_v50 = vmul.f32 %v15426_v9, %v6545_v63  ;;  %13285 = vmatprep.mubr.msk.bf16.mxu0 %vm1514_vm0, %v6799_v1  ;;  %v6099_v14 = vpop.xlane.xlu1 %6098  ;;  %v14125_v21 = vpack.c.bf16 %v14797_v53, %v14796_v11 }
 0xa72   : > { %v19235_v59 = vpop.permute.xlu0 %7413  ;;  %v15430_v3 = vpop.eup %15429  ;;  %v6780_v23 = vmul.f32 %v15428_v54, %v13233_v17  ;;  %15441 = vrcp.f32 %v6099_v14 }
 0xa73   : > { %v15432_v38 = vpop.eup %15431  ;;  %v6800_v34 = vpack.c.bf16 %v6778_v2, %v6777_v50  ;;  %v13236_v33 = vpop.f32.mrb[166].mxu0  ;;  %15443 = vrcp.f32 %v19216_v43 }
 0xa74   : > { %v15434_v46 = vpop.eup %15433  ;;  %v6782_v18 = vmul.f32 %v15430_v3, %v13236_v33  ;;  %v6565_v49 = vpop.f32.mrb[167].mxu0 }
 0xa75   : > { %v6779_v47 = vmul.f32 %v15434_v46, %v6555_v25  ;;  %v6781_v29 = vmul.f32 %v15432_v38, %v6565_v49  ;;  %v6105_v52 = vpop.xlane.xlu1 %6104 }
 0xa76   : > { %v19238_v39 = vpop.permute.xlu0 %7417  ;;  %13286 = vmatmul.mubr.msk.bf16.gmra.mrb[136].mxu0 %vm1514_vm0, %v6800_v34  ;;  %15445 = vrcp.f32 %v6105_v52 }
 0xa77   : > { %v6801_v16 = vpack.c.bf16 %v6780_v23, %v6779_v47  ;;  %v6802_v27 = vpack.c.bf16 %v6782_v18, %v6781_v29  ;;  %15447 = vrcp.f32 %v19219_v48 }
 0xa78   : > { %v15436_v8 = vpop.eup %15435  ;;  %15449 = vrcp.f32 %v19221_v32 }
 0xa79   : > { %13289 = vmatprep.mubr.msk.bf16.mxu0 %vm1514_vm0, %v6801_v16  ;;  %v14780_v6 = vpop.permute.xlu1 %14779  ;;  %v15438_v55 = vpop.eup %15437 }
 0xa7a   : > { %v7573_v0 = vpop.permute.xlu0 %7572  ;;  %v14782_v26 = vunpack.i.h.bf16 %v14780_v6  ;;  %v14781_v12 = vunpack.i.l.bf16 %v14780_v6  ;;  %v15440_v62 = vpop.eup %15439 }
 0xa7b   : > { %13401 = vmatprep.mubr.msk.f32.mxu1 %vm1514_vm0, %v7573_v0 }
 0xa7c   : > { %v14107_v41 = vpack.c.bf16 %v14782_v26, %v14781_v12  ;;  %v15442_v13 = vpop.eup %15441 }
 0xa7d   : > { %v19243_v5 = vpop.permute.xlu1 %7403  ;;  %v15444_v17 = vpop.eup %15443 }
 0xa7e   : > { %13290 = vmatmul.mubr.msk.bf16.gmra.mrb[140].mxu0 %vm1514_vm0, %v6802_v27  ;;  %14109 = vmatprep.subr.msk.bf16.mxu0 %vm16611_vm1, %v14107_v41  ;;  %v7577_v45 = vpop.permute.xlu0 %7576 }
 0xa7f   : > { %14112 = vmatpush3.bf16.xpose.msk.msra.mxu0 %vm16611_vm1, %v14107_v41 }
 0xa80   : > { %v15446_v32 = vpop.eup %15445 }
 0xa81   : > { %v19250_v35 = vpop.permute.xlu1 %7407  ;;  %v15448_v38 = vpop.eup %15447 }
 0xa82   : > { %v7581_v4 = vpop.permute.xlu0 %7580  ;;  %v15450_v49 = vpop.eup %15449 }
 0xa85   : > { %v14790_v40 = vpop.permute.xlu1 %14789 }
 0xa86   : > { %v14792_v36 = vunpack.i.h.bf16 %v14790_v40  ;;  %v14791_v37 = vunpack.i.l.bf16 %v14790_v40  ;;  %v7585_v43 = vpop.permute.xlu0 %7584 }
 0xa88   : > { %v14119_v57 = vpack.c.bf16 %v14792_v36, %v14791_v37 }
 0xa89   : > { %v19253_v24 = vpop.permute.xlu1 %7411 }
 0xa8a   : > { %14121 = vmatprep.subr.msk.bf16.mxu1 %vm16611_vm1, %v14119_v57  ;;  %v14810_v50 = vpop.permute.xlu0 %14809 }
 0xa8b   : > { %14124 = vmatpush3.bf16.xpose.msk.msra.mxu1 %vm16611_vm1, %v14119_v57  ;;  %v14812_v26 = vunpack.i.h.bf16 %v14810_v50  ;;  %v14811_v12 = vunpack.i.l.bf16 %v14810_v50 }
 0xa8c   : > { %14127 = vmatprep.subr.msk.bf16.mxu1 %vm16611_vm1, %v14125_v21 }
 0xa8d   : > { %v19262_v60 = vpop.permute.xlu1 %7415 }
 0xa8e   : > { %v14820_v29 = vpop.permute.xlu0 %14819 }
 0xa8f   : > { %v14821_v57 = vunpack.i.l.bf16 %v14820_v29 }
 0xa90   : > { %v13255_v44 = vpop.f32.mrb[164].mxu1 }
 0xa91   : > { %v6784_v42 = vmul.f32 %v15436_v8, %v13255_v44  ;;  %v14800_v15 = vpop.permute.xlu1 %14799  ;;  %v6688_v28 = vpop.f32.mrb[165].mxu1 }
 0xa92   : > { %v14802_v22 = vunpack.i.h.bf16 %v14800_v15  ;;  %v14801_v30 = vunpack.i.l.bf16 %v14800_v15  ;;  %v6783_v10 = vmul.f32 %v15438_v55, %v6688_v28  ;;  %v19281_v27 = vpop.permute.xlu0 %14829 }
 0xa93   : > { %14130 = vmatpush3.bf16.xpose.msk.msra.mxu1 %vm16611_vm1, %v14125_v21 }
 0xa94   : > { %v14131_v63 = vpack.c.bf16 %v14802_v22, %v14801_v30  ;;  %v13258_v20 = vpop.f32.mrb[166].mxu1  ;;  %v6803_v51 = vpack.c.bf16 %v6784_v42, %v6783_v10  ;;  %v21146_v30 = vld [vmem:[#allocation83_spill] sm:$0xff] }
 0xa95   : > { %v6786_v19 = vmul.f32 %v15440_v62, %v13258_v20  ;;  %v7575_v58 = vpop.permute.xlu1 %7574  ;;  %v6698_v1 = vpop.f32.mrb[167].mxu1  ;;  %v21147_v62 = vld [vmem:[#allocation84_spill] sm:$0xff] }
 0xa96   : > { %14133 = vmatprep.subr.msk.bf16.mxu1 %vm16611_vm1, %v14131_v63  ;;  %v6785_v48 = vmul.f32 %v15442_v13, %v6698_v1  ;;  %13293 = vmatprep.mubr.msk.bf16.mxu0 %vm1514_vm0, %v6803_v51  ;;  %v19289_v36 = vpop.permute.xlu0 %14839  ;;  %v21148_v1 = vld [vmem:[#allocation85_spill] sm:$0xff] }
 0xa98   : > { %v13261_v9 = vpop.f32.mrb[168].mxu1  ;;  %v6804_v25 = vpack.c.bf16 %v6786_v19, %v6785_v48 }
 0xa99   : > { %v6788_v54 = vmul.f32 %v15444_v17, %v13261_v9  ;;  %v7579_v2 = vpop.permute.xlu1 %7578  ;;  %v6708_v14 = vpop.f32.mrb[169].mxu1 }
 0xa9a   : > { %v6787_v3 = vmul.f32 %v15446_v32, %v6708_v14  ;;  %13294 = vmatmul.mubr.msk.bf16.gmra.mrb[144].mxu0 %vm1514_vm0, %v6804_v25 }
 0xa9b   : > { %14136 = vmatpush3.bf16.xpose.msk.msra.mxu1 %vm16611_vm1, %v14131_v63 }
 0xa9c   : > { %v13264_v34 = vpop.f32.mrb[170].mxu1  ;;  %v6805_v33 = vpack.c.bf16 %v6788_v54, %v6787_v3  ;;  %v21149_v54 = vld [vmem:[#allocation86_spill] sm:$0xff] }
 0xa9d   : > { %v6790_v46 = vmul.f32 %v15448_v38, %v13264_v34  ;;  %v7583_v18 = vpop.permute.xlu1 %7582  ;;  %v6718_v23 = vpop.f32.mrb[171].mxu1 }
 0xa9e   : > { %v6789_v47 = vmul.f32 %v15450_v49, %v6718_v23  ;;  %13297 = vmatprep.mubr.msk.bf16.mxu0 %vm1514_vm0, %v6805_v33 }
 0xaa0   : > { %v6806_v52 = vpack.c.bf16 %v6790_v46, %v6789_v47  ;;  %v21150_v46 = vld [vmem:[#allocation88_spill] sm:$0xff] }
 0xaa1   : > { %v7587_v16 = vpop.permute.xlu1 %7586 }
 0xaa2   : > { %13402 = vmatmul.mubr.msk.f32.vlgmr.msra.gmra.mrb[188].mxu1 %vm1514_vm0, %v7575_v58  ;;  %13298 = vmatmul.mubr.msk.bf16.gmra.mrb[148].mxu0 %vm1514_vm0, %v6806_v52  ;;  %v21151_v52 = vld [vmem:[#allocation89_spill] sm:$0xff] }
 0xaa3   : > { %13404 = vmatprep.mubr.msk.f32.mxu1 %vm1514_vm0, %v7577_v45  ;;  %13373 = vmatprep.mubr.msk.f32.mxu0 %vm1514_vm0, %v19243_v5  ;;  %v14141_v5 = vpack.c.bf16 %v14812_v26, %v14811_v12  ;;  %v14822_v45 = vunpack.i.h.bf16 %v14820_v29 }
 0xaa5   : > { %v14805_v56 = vpop.permute.xlu1 %14804  ;;  %v14149_v44 = vpack.c.bf16 %v14822_v45, %v14821_v57 }
 0xaa6   : > { %v14807_v0 = vunpack.i.h.bf16 %v14805_v56  ;;  %v14806_v6 = vunpack.i.l.bf16 %v14805_v56  ;;  %13405 = vmatmul.mubr.msk.f32.gmra.mrb[190].mxu1 %vm1514_vm0, %v7579_v2 }
 0xaa7   : > { %13407 = vmatprep.mubr.msk.f32.mxu1 %vm1514_vm0, %v7581_v4  ;;  %v14850_v4 = vpop.permute.xlu0 %14849 }
 0xaa8   : > { %v14137_v41 = vpack.c.bf16 %v14807_v0, %v14806_v6  ;;  %v21152_v0 = vld [vmem:[#allocation90_spill] sm:$0xff] }
 0xaa9   : > { %v14815_v53 = vpop.permute.xlu1 %14814 }
 0xaaa   : > { %13408 = vmatmul.mubr.msk.f32.gmra.mrb[192].mxu1 %vm1514_vm0, %v7583_v18  ;;  %14138 = vmatprep.subr.bf16.mxu0 %v14137_v41  ;;  %v14817_v40 = vunpack.i.h.bf16 %v14815_v53  ;;  %v14816_v11 = vunpack.i.l.bf16 %v14815_v53 }
 0xaab   : > { %13374 = vmatmul.mubr.msk.f32.vlgmr.msra.gmra.mrb[168].mxu0 %vm1514_vm0, %v19225_v7  ;;  %13410 = vmatprep.mubr.msk.f32.mxu1 %vm1514_vm0, %v7585_v43  ;;  %v14860_v9 = vpop.permute.xlu0 %14859 }
 0xaac   : > { %13376 = vmatprep.mubr.msk.f32.mxu0 %vm1514_vm0, %v19250_v35  ;;  %14140 = vmatpush3.bf16.msra.mxu0 %v14137_v41  ;;  %v14145_v21 = vpack.c.bf16 %v14817_v40, %v14816_v11  ;;  %v14862_v50 = vunpack.i.h.bf16 %v14860_v9  ;;  %v14861_v14 = vunpack.i.l.bf16 %v14860_v9 }
 0xaad   : > { %14142 = vmatprep.subr.bf16.mxu0 %v14141_v5  ;;  %v14825_v37 = vpop.permute.xlu1 %14824 }
 0xaae   : > { %13411 = vmatmul.mubr.msk.f32.gmra.mrb[194].mxu1 %vm1514_vm0, %v7587_v16  ;;  %v14827_v35 = vunpack.i.h.bf16 %v14825_v37  ;;  %v14826_v8 = vunpack.i.l.bf16 %v14825_v37  ;;  %v14181_v29 = vpack.c.bf16 %v14862_v50, %v14861_v14 }
 0xaaf   : > { %13377 = vmatmul.mubr.msk.f32.gmra.mrb[170].mxu0 %vm1514_vm0, %v19231_v61  ;;  %v14852_v61 = vunpack.i.h.bf16 %v14850_v4 }
 0xab0   : > { %13379 = vmatprep.mubr.msk.f32.mxu0 %vm1514_vm0, %v19253_v24  ;;  %14144 = vmatpush3.bf16.msra.mxu0 %v14141_v5  ;;  %v14851_v24 = vunpack.i.l.bf16 %v14850_v4 }
 0xab1   : > { %14146 = vmatprep.subr.bf16.mxu0 %v14145_v21  ;;  %v19298_v7 = vpop.permute.xlu1 %14834 }
 0xab2   : > { %v14173_v17 = vpack.c.bf16 %v14852_v61, %v14851_v24 }
 0xab3   : > { %13380 = vmatmul.mubr.msk.f32.gmra.mrb[172].mxu0 %vm1514_vm0, %v19235_v59  ;;  %v19312_v59 = vpack.c.bf16 %v14827_v35, %v14826_v8 }
 0xab4   : > { %13382 = vmatprep.mubr.msk.f32.mxu0 %vm1514_vm0, %v19262_v60  ;;  %14148 = vmatpush3.bf16.msra.mxu0 %v14145_v21 }
 0xab5   : > { %14150 = vmatprep.subr.bf16.mxu0 %v14149_v44  ;;  %v14845_v42 = vpop.permute.xlu1 %14844  ;;  %v13319_v15 = vpop.f32.mrb[172].mxu1 }
 0xab6   : > { %v14847_v55 = vunpack.i.h.bf16 %v14845_v42  ;;  %v14846_v22 = vunpack.i.l.bf16 %v14845_v42  ;;  %v19305_v28 = vadd.f32 %v13319_v15, %v21146_v30  ;;  %v7195_v10 = vpop.f32.mrb[173].mxu1 }
 0xab7   : > { %v19308_v43 = vadd.f32 %v7195_v10, %v21147_v62  ;;  %13383 = vmatmul.mubr.msk.f32.gmra.mrb[174].mxu0 %vm1514_vm0, %v19238_v39 }
 0xab8   : > { %14152 = vmatpush3.bf16.msra.mxu0 %v14149_v44  ;;  %v7744_v60 = vsel %vm2127_vm5, %v19305_v28, -inf  ;;  %v14169_v63 = vpack.c.bf16 %v14847_v55, %v14846_v22 }
 0xab9   : > { %14154 = vmatprep.subr.bf16.mxu0 %v19312_v59  ;;  %v14855_v20 = vpop.permute.xlu1 %14854  ;;  %7745 = vmax.xlane.f32.xlu1 %v7744_v60  ;;  %v13322_v51 = vpop.f32.mrb[174].mxu1  ;;  %v7741_v19 = vsel %vm2127_vm5, %v19308_v43, -inf }
 0xaba   : > { %v14857_v58 = vunpack.i.h.bf16 %v14855_v20  ;;  %v14856_v13 = vunpack.i.l.bf16 %v14855_v20  ;;  %v19320_v48 = vadd.f32 %v13322_v51, %v21148_v1  ;;  %v7205_v39 = vpop.f32.mrb[175].mxu1  ;;  %14170 = vmatprep.subr.bf16.mxu1 %v14169_v63  ;;  %7742 = vmax.xlane.f32.xlu0 %v7741_v19 }
 0xabb   : > { %14172 = vmatpush3.bf16.msra.mxu1 %v14169_v63  ;;  %v19325_v2 = vadd.f32 %v7205_v39, %v21149_v54 }
 0xabc   : > { %14174 = vmatprep.subr.bf16.mxu1 %v14173_v17  ;;  %v7750_v25 = vsel %vm2127_vm5, %v19320_v48, -inf  ;;  %v14177_v34 = vpack.c.bf16 %v14857_v58, %v14856_v13 }
 0xabd   : > { %v13325_v32 = vpop.f32.mrb[176].mxu1  ;;  %v7747_v23 = vsel %vm2127_vm5, %v19325_v2, -inf }
 0xabe   : > { %v19328_v3 = vadd.f32 %v13325_v32, %v21098_v31  ;;  %v7215_v38 = vpop.f32.mrb[177].mxu1  ;;  %7751 = vmax.xlane.f32.xlu0 %v7750_v25 }
 0xabf   : > { %14176 = vmatpush3.bf16.msra.mxu1 %v14173_v17  ;;  %v19333_v18 = vadd.f32 %v7215_v38, %v21150_v46 }
 0xac0   : > { %14178 = vmatprep.subr.bf16.mxu1 %v14177_v34  ;;  %v7756_v33 = vsel %vm2127_vm5, %v19328_v3, -inf }
 0xac1   : > { %7757 = vmax.xlane.f32.xlu1 %v7756_v33  ;;  %v13328_v49 = vpop.f32.mrb[178].mxu1  ;;  %v7753_v56 = vsel %vm2127_vm5, %v19333_v18, -inf }
 0xac2   : > { %v7225_v47 = vpop.f32.mrb[179].mxu1  ;;  %7748 = vmax.xlane.f32.xlu0 %v7747_v23  ;;  %v19338_v16 = vadd.f32 %v13328_v49, %v21151_v52 }
 0xac3   : > { %14180 = vmatpush3.bf16.msra.mxu1 %v14177_v34  ;;  %v19343_v6 = vadd.f32 %v7225_v47, %v21152_v0 }
 0xac4   : > { %14182 = vmatprep.subr.bf16.mxu1 %v14181_v29  ;;  %v7762_v26 = vsel %vm2127_vm5, %v19338_v16, -inf }
 0xac5   : > { %v7759_v12 = vsel %vm2127_vm5, %v19343_v6, -inf }
 0xac6   : > { %7754 = vmax.xlane.f32.xlu0 %v7753_v56 }
 0xac7   : > { %14184 = vmatpush3.bf16.msra.mxu1 %v14181_v29 }
 0xaca   : > { %7763 = vmax.xlane.f32.xlu0 %v7762_v26 }
 0xace   : > { %7760 = vmax.xlane.f32.xlu0 %v7759_v12  ;;  %v14836_v12 = vunpack.i.l.bf16 %v19298_v7 }
 0xad5   : > { %v13347_v41 = vpop.f32.mrb[180].mxu1 }
 0xad6   : > { %v19350_v53 = vadd.f32 %v13347_v41, %v21146_v30  ;;  %v7364_v40 = vpop.f32.mrb[181].mxu1 }
 0xad7   : > { %v19353_v11 = vadd.f32 %v7364_v40, %v21147_v62  ;;  %v14842_v40 = vunpack.i.h.bf16 %v19289_v36 }
 0xad8   : > { %v7768_v5 = vsel %vm2127_vm5, %v19350_v53, -inf }
 0xad9   : > { %v13350_v37 = vpop.f32.mrb[182].mxu1  ;;  %7769 = vmax.xlane.f32.xlu0 %v7768_v5  ;;  %v7765_v45 = vsel %vm2127_vm5, %v19353_v11, -inf  ;;  %v14841_v5 = vunpack.i.l.bf16 %v19289_v36 }
 0xada   : > { %v19360_v57 = vadd.f32 %v13350_v37, %v21148_v1  ;;  %v7374_v21 = vpop.f32.mrb[183].mxu1  ;;  %7766 = vmax.xlane.f32.xlu1 %v7765_v45 }
 0xadb   : > { %v19365_v35 = vadd.f32 %v7374_v21, %v21149_v54 }
 0xadc   : > { %v7774_v4 = vsel %vm2127_vm5, %v19360_v57, -inf }
 0xadd   : > { %v13353_v8 = vpop.f32.mrb[184].mxu1  ;;  %v7771_v24 = vsel %vm2127_vm5, %v19365_v35, -inf }
 0xade   : > { %v19368_v44 = vadd.f32 %v13353_v8, %v21098_v31  ;;  %v7384_v61 = vpop.f32.mrb[185].mxu1  ;;  %7775 = vmax.xlane.f32.xlu1 %v7774_v4 }
 0xadf   : > { %v19371_v42 = vadd.f32 %v7384_v61, %v21150_v46 }
 0xae0   : > { %v7780_v15 = vsel %vm2127_vm5, %v19368_v44, -inf }
 0xae1   : > { %7781 = vmax.xlane.f32.xlu0 %v7780_v15  ;;  %v7777_v55 = vsel %vm2127_vm5, %v19371_v42, -inf }
 0xae2   : > { %7772 = vmax.xlane.f32.xlu1 %v7771_v24 }
 0xae5   : > { %7778 = vmax.xlane.f32.xlu0 %v7777_v55 }
 0xb32   : > { %v13356_v22 = vpop.f32.mrb[186].mxu1 }
 0xb33   : > { %v19380_v10 = vadd.f32 %v13356_v22, %v21151_v52  ;;  %v7394_v60 = vpop.f32.mrb[187].mxu1 }
 0xb34   : > { %v19383_v63 = vadd.f32 %v7394_v60, %v21152_v0 }
 0xb35   : > { %v7786_v20 = vsel %vm2127_vm5, %v19380_v10, -inf }
 0xb36   : > { %7787 = vmax.xlane.f32.xlu0 %v7786_v20  ;;  %v7783_v51 = vsel %vm2127_vm5, %v19383_v63, -inf }
 0xb37   : > { %7784 = vmax.xlane.f32.xlu1 %v7783_v51 }
 0xb46   : > { %v7746_v19 = vpop.xlane.xlu1 %7745 }
 0xb47   : > { %v7838_v58 = vsub.f32 %v19305_v28, %v7746_v19  ;;  %v7743_v13 = vpop.xlane.xlu0 %7742  ;;  %v14832_v28 = vunpack.i.h.bf16 %v19281_v27 }
 0xb48   : > { %v7837_v39 = vsub.f32 %v19308_v43, %v7743_v13  ;;  %v14831_v43 = vunpack.i.l.bf16 %v19281_v27 }
 0xb49   : > { %v7871_v17 = vmul.f32 1.442695, %v7838_v58 }
 0xb4a   : > { %v7869_v9 = vmul.f32 1.442695, %v7837_v39  ;;  %v14157_v27 = vpack.c.bf16 %v14832_v28, %v14831_v43 }
 0xb4b   : > { %v7752_v25 = vpop.xlane.xlu0 %7751 }
 0xb4c   : > { %15451 = vpow2.f32 %v7869_v9  ;;  %v7840_v32 = vsub.f32 %v19320_v48, %v7752_v25 }
 0xb4d   : > { %15453 = vpow2.f32 %v7871_v17 }
 0xb4e   : > { %v7758_v50 = vpop.xlane.xlu1 %7757  ;;  %v7875_v34 = vmul.f32 1.442695, %v7840_v32 }
 0xb4f   : > { %v7749_v14 = vpop.xlane.xlu0 %7748  ;;  %v7842_v33 = vsub.f32 %v19328_v3, %v7758_v50  ;;  %v14837_v3 = vunpack.i.h.bf16 %v19298_v7 }
 0xb50   : > { %v7839_v38 = vsub.f32 %v19325_v2, %v7749_v14 }
 0xb51   : > { %v7879_v29 = vmul.f32 1.442695, %v7842_v33  ;;  %v14161_v45 = vpack.c.bf16 %v14837_v3, %v14836_v12 }
 0xb52   : > { %v7873_v49 = vmul.f32 1.442695, %v7839_v38 }
 0xb53   : > { %v7755_v23 = vpop.xlane.xlu0 %7754 }
 0xb54   : > { %15455 = vpow2.f32 %v7873_v49  ;;  %v7841_v47 = vsub.f32 %v19333_v18, %v7755_v23 }
 0xb55   : > { %15457 = vpow2.f32 %v7875_v34 }
 0xb56   : > { %v19397_v56 = vpop.eup %15451  ;;  %v7877_v48 = vmul.f32 1.442695, %v7841_v47 }
 0xb57   : > { %v19399_v26 = vpop.eup %15453  ;;  %v7764_v2 = vpop.xlane.xlu0 %7763  ;;  %13429 = vmatprep.mubr.msk.f32.mxu0 %vm2127_vm5, %v19397_v56 }
 0xb58   : > { %15459 = vpow2.f32 %v7877_v48  ;;  %13430 = vmatmul.mubr.msk.f32.vlgmr.msra.gmra.mrb[176].mxu0 %vm2127_vm5, %v19399_v26  ;;  %v7844_v18 = vsub.f32 %v19338_v16, %v7764_v2 }
 0xb59   : > { %15461 = vpow2.f32 %v7879_v29  ;;  %14156 = vmatpush3.bf16.msra.mxu0 %v19312_v59  ;;  %v14165_v59 = vpack.c.bf16 %v14842_v40, %v14841_v5 }
 0xb5a   : > { %14158 = vmatprep.subr.bf16.mxu0 %v14157_v27  ;;  %v7883_v7 = vmul.f32 1.442695, %v7844_v18 }
 0xb5b   : > { %v7761_v41 = vpop.xlane.xlu0 %7760 }
 0xb5c   : > { %v7843_v37 = vsub.f32 %v19343_v6, %v7761_v41 }
 0xb5d   : > { %14160 = vmatpush3.bf16.msra.mxu0 %v14157_v27 }
 0xb5e   : > { %v19412_v21 = vpop.eup %15455  ;;  %v7881_v4 = vmul.f32 1.442695, %v7843_v37  ;;  %14162 = vmatprep.subr.bf16.mxu0 %v14161_v45 }
 0xb5f   : > { %v19414_v8 = vpop.eup %15457  ;;  %13432 = vmatprep.mubr.msk.f32.mxu0 %vm2127_vm5, %v19412_v21 }
 0xb60   : > { %15463 = vpow2.f32 %v7881_v4  ;;  %13433 = vmatmul.mubr.msk.f32.gmra.mrb[178].mxu0 %vm2127_vm5, %v19414_v8 }
 0xb61   : > { %15465 = vpow2.f32 %v7883_v7  ;;  %14164 = vmatpush3.bf16.msra.mxu0 %v14161_v45 }
 0xb62   : > { %v19420_v36 = vpop.eup %15459  ;;  %14166 = vmatprep.subr.bf16.mxu0 %v14165_v59 }
 0xb63   : > { %v19422_v16 = vpop.eup %15461  ;;  %13435 = vmatprep.mubr.msk.f32.mxu0 %vm2127_vm5, %v19420_v36 }
 0xb64   : > { %13436 = vmatmul.mubr.msk.f32.gmra.mrb[180].mxu0 %vm2127_vm5, %v19422_v16 }
 0xb65   : > { %14168 = vmatpush3.bf16.msra.mxu0 %v14165_v59 }
 0xb66   : > { %v7770_v6 = vpop.xlane.xlu0 %7769 }
 0xb67   : > { %v7846_v61 = vsub.f32 %v19350_v53, %v7770_v6  ;;  %v7767_v15 = vpop.xlane.xlu1 %7766 }
 0xb68   : > { %v7845_v24 = vsub.f32 %v19353_v11, %v7767_v15 }
 0xb69   : > { %v7887_v55 = vmul.f32 1.442695, %v7846_v61 }
 0xb6a   : > { %v19430_v22 = vpop.eup %15463  ;;  %v7885_v60 = vmul.f32 1.442695, %v7845_v24 }
 0xb6b   : > { %v19432_v20 = vpop.eup %15465  ;;  %v7776_v51 = vpop.xlane.xlu1 %7775  ;;  %13438 = vmatprep.mubr.msk.f32.mxu0 %vm2127_vm5, %v19430_v22 }
 0xb6c   : > { %15467 = vpow2.f32 %v7885_v60  ;;  %13439 = vmatmul.mubr.msk.f32.gmra.mrb[182].mxu0 %vm2127_vm5, %v19432_v20  ;;  %v7848_v53 = vsub.f32 %v19360_v57, %v7776_v51 }
 0xb6d   : > { %15469 = vpow2.f32 %v7887_v55 }
 0xb6e   : > { %v7782_v19 = vpop.xlane.xlu0 %7781  ;;  %v7891_v13 = vmul.f32 1.442695, %v7848_v53 }
 0xb6f   : > { %v7773_v58 = vpop.xlane.xlu1 %7772  ;;  %v7850_v39 = vsub.f32 %v19368_v44, %v7782_v19 }
 0xb70   : > { %v7847_v11 = vsub.f32 %v19365_v35, %v7773_v58  ;;  %v21153_v58 = vld [vmem:[#allocation73_spill] sm:$0xff] }
 0xb71   : > { %v7895_v32 = vmul.f32 1.442695, %v7850_v39 }
 0xb72   : > { %v7889_v17 = vmul.f32 1.442695, %v7847_v11  ;;  %v7779_v9 = vpop.xlane.xlu0 %7778  ;;  %v21154_v11 = vld [vmem:[#allocation72_spill] sm:$0xff] }
 0xb73   : > { %v7849_v25 = vsub.f32 %v19371_v42, %v7779_v9 }
 0xb74   : > { %15471 = vpow2.f32 %v7889_v17 }
 0xb75   : > { %15473 = vpow2.f32 %v7891_v13  ;;  %v7893_v50 = vmul.f32 1.442695, %v7849_v25  ;;  %v13403_v14 = vpop.f32.mrb[188].mxu1 }
 0xb76   : > { %v19442_v38 = vpop.eup %15467  ;;  %v19445_v57 = vadd.f32 %v13403_v14, %v21146_v30  ;;  %v7702_v34 = vpop.f32.mrb[189].mxu1 }
 0xb77   : > { %v19447_v33 = vpop.eup %15469  ;;  %15475 = vpow2.f32 %v7893_v50  ;;  %v19450_v35 = vadd.f32 %v7702_v34, %v21147_v62  ;;  %13457 = vmatprep.mubr.msk.f32.mxu0 %vm2127_vm5, %v19442_v38 }
 0xb78   : > { %13458 = vmatmul.mubr.msk.f32.vlgmr.msra.gmra.mrb[184].mxu0 %vm2127_vm5, %v19447_v33  ;;  %v7816_v44 = vsel %vm2127_vm5, %v19445_v57, -inf  ;;  %15477 = vpow2.f32 %v7895_v32 }
 0xb79   : > { %v13406_v42 = vpop.f32.mrb[190].mxu1  ;;  %7817 = vmax.xlane.f32.xlu0 %v7816_v44  ;;  %v7813_v49 = vsel %vm2127_vm5, %v19450_v35, -inf }
 0xb7a   : > { %v19461_v23 = vadd.f32 %v13406_v42, %v21148_v1  ;;  %v7712_v28 = vpop.f32.mrb[191].mxu1  ;;  %7814 = vmax.xlane.f32.xlu1 %v7813_v49 }
 0xb7b   : > { %v19466_v47 = vadd.f32 %v7712_v28, %v21149_v54 }
 0xb7c   : > { %v7822_v43 = vsel %vm2127_vm5, %v19461_v23, -inf }
 0xb7d   : > { %v13409_v29 = vpop.f32.mrb[192].mxu1  ;;  %v7819_v45 = vsel %vm2127_vm5, %v19466_v47, -inf }
 0xb7e   : > { %v19468_v48 = vpop.eup %15471  ;;  %v13375_v2 = vpop.f32.mrb[168].mxu0  ;;  %7823 = vmax.xlane.f32.xlu1 %v7822_v43  ;;  %v19524_v17 = vadd.f32 %v13409_v29, %v21098_v31 }
 0xb7f   : > { %v7722_v3 = vpop.f32.mrb[193].mxu1  ;;  %v19470_v12 = vpop.eup %15473  ;;  %v19473_v27 = vadd.f32 %v13375_v2, %v21146_v30  ;;  %13460 = vmatprep.mubr.msk.f32.mxu0 %vm2127_vm5, %v19468_v48 }
 0xb80   : > { %v7533_v18 = vpop.f32.mrb[169].mxu0  ;;  %13461 = vmatmul.mubr.msk.f32.gmra.mrb[186].mxu0 %vm2127_vm5, %v19470_v12  ;;  %v19482_v40 = vadd.f32 %v7722_v3, %v21150_v46  ;;  %v7828_v34 = vsel %vm2127_vm5, %v19524_v17, -inf  ;;  %v21156_v3 = vld [vmem:[#allocation81_spill] sm:$0xff] }
 0xb81   : > { %v19479_v41 = vpop.eup %15475  ;;  %v19485_v5 = vadd.f32 %v7533_v18, %v21147_v62  ;;  %v13412_v37 = vpop.f32.mrb[194].mxu1  ;;  %v7792_v30 = vsel %vm2127_vm5, %v19473_v27, -inf  ;;  %v7933_v18 = vsel %vm2127_vm5, %v19397_v56, 0.0  ;;  %v7954_v56 = vsel %vm2127_vm5, %v19432_v20, 0.0 }
 0xb82   : > { %7793 = vmax.xlane.f32.xlu0 %v7792_v30  ;;  %v13378_v7 = vpop.f32.mrb[170].mxu0  ;;  %v7732_v4 = vpop.f32.mrb[195].mxu1  ;;  %7820 = vmax.xlane.f32.xlu1 %v7819_v45  ;;  %v7825_v61 = vsel %vm2127_vm5, %v19482_v40, -inf  ;;  %v7939_v30 = vsel %vm2127_vm5, %v19412_v21, 0.0  ;;  %v7948_v45 = vsel %vm2127_vm5, %v19422_v16, 0.0 }
 0xb83   : > { %v19491_v59 = vpop.eup %15477  ;;  %v7543_v6 = vpop.f32.mrb[171].mxu0  ;;  %13463 = vmatprep.mubr.msk.f32.mxu0 %vm2127_vm5, %v19479_v41  ;;  %v19498_v62 = vadd.f32 %v13378_v7, %v21148_v1  ;;  %v7789_v15 = vsel %vm2127_vm5, %v19485_v5, -inf  ;;  %v7942_v7 = vsel %vm2127_vm5, %v19414_v8, 0.0  ;;  %v7960_v8 = vsel %vm2127_vm5, %v19447_v33, 0.0 }
 0xb84   : > { %13464 = vmatmul.mubr.msk.f32.gmra.mrb[188].mxu0 %vm2127_vm5, %v19491_v59  ;;  %v19505_v60 = vadd.f32 %v7543_v6, %v21149_v54 }
 0xb85   : > { %v7798_v51 = vsel %vm2127_vm5, %v19498_v62, -inf }
 0xb86   : > { %7826 = vmax.xlane.f32.xlu0 %v7825_v61  ;;  %v13381_v24 = vpop.f32.mrb[172].mxu0  ;;  %7790 = vmax.xlane.f32.xlu1 %v7789_v15  ;;  %v7795_v19 = vsel %vm2127_vm5, %v19505_v60, -inf  ;;  %v7951_v15 = vsel %vm2127_vm5, %v19430_v22, 0.0  ;;  %v7972_v22 = vsel %vm2127_vm5, %v19491_v59, 0.0  ;;  %v7969_v59 = vsel %vm2127_vm5, %v19479_v41, 0.0 }
 0xb87   : > { %v7553_v55 = vpop.f32.mrb[173].mxu0  ;;  %v19535_v32 = vadd.f32 %v13381_v24, %v21098_v31  ;;  %v7957_v24 = vsel %vm2127_vm5, %v19442_v38, 0.0 }
 0xb88   : > { %v19516_v13 = vadd.f32 %v7553_v55, %v21150_v46  ;;  %v19532_v46 = vadd.f32 %v7732_v4, %v21152_v0 }
 0xb89   : > { %v7804_v29 = vsel %vm2127_vm5, %v19535_v32, -inf }
 0xb8a   : > { %v13384_v53 = vpop.f32.mrb[174].mxu0  ;;  %7799 = vmax.xlane.f32.xlu1 %v7798_v51  ;;  %v7801_v39 = vsel %vm2127_vm5, %v19516_v13, -inf  ;;  %v7831_v43 = vsel %vm2127_vm5, %v19532_v46, -inf }
 0xb8b   : > { %v7563_v1 = vpop.f32.mrb[175].mxu0  ;;  %v19519_v54 = vadd.f32 %v13384_v53, %v21151_v52  ;;  %v7963_v53 = vsel %vm2127_vm5, %v19468_v48, 0.0 }
 0xb8c   : > { %v19527_v9 = vadd.f32 %v7563_v1, %v21152_v0  ;;  %v19544_v0 = vadd.f32 %v13412_v37, %v21151_v52  ;;  %v21155_v52 = vld [vmem:[#allocation80_spill] sm:$0xff]  ;;  %v7936_v37 = vsel %vm2127_vm5, %v19399_v26, 0.0  ;;  %v7945_v26 = vsel %vm2127_vm5, %v19420_v36, 0.0 }
 0xb8d   : > { %v7810_v25 = vsel %vm2127_vm5, %v19519_v54, -inf }
 0xb8e   : > { %7796 = vmax.xlane.f32.xlu1 %v7795_v19  ;;  %v7807_v14 = vsel %vm2127_vm5, %v19527_v9, -inf }
 0xb9c   : > { %14869 = vrot.lane.b32.xlu0 %v21153_v58, %s15910_s18 }
 0xb9f   : > { %14864 = vrot.lane.b32.xlu1 %v21154_v11, %s15910_s18 }
 0xbbb   : > { %7802 = vmax.xlane.f32.xlu0 %v7801_v39 }
 0xbbf   : > { %7811 = vmax.xlane.f32.xlu0 %v7810_v25 }
 0xbc3   : > { %v7788_v50 = vpop.xlane.xlu0 %7787  ;;  %7808 = vmax.xlane.f32.xlu0 %v7807_v14  ;;  %7829 = vmax.xlane.f32.xlu1 %v7828_v34 }
 0xbc4   : > { %v7852_v44 = vsub.f32 %v19380_v10, %v7788_v50  ;;  %v7785_v42 = vpop.xlane.xlu1 %7784  ;;  %v7834_v10 = vsel %vm2127_vm5, %v19544_v0, -inf }
 0xbc5   : > { %v7851_v49 = vsub.f32 %v19383_v63, %v7785_v42 }
 0xbc6   : > { %v7899_v28 = vmul.f32 1.442695, %v7852_v44 }
 0xbc7   : > { %v7897_v31 = vmul.f32 1.442695, %v7851_v49  ;;  %7832 = vmax.xlane.f32.xlu0 %v7831_v43  ;;  %7805 = vmax.xlane.f32.xlu1 %v7804_v29 }
 0xbc9   : > { %15479 = vpow2.f32 %v7897_v31 }
 0xbca   : > { %15481 = vpow2.f32 %v7899_v28 }
 0xbcb   : > { %7835 = vmax.xlane.f32.xlu0 %v7834_v10 }
 0xbd3   : > { %v15480_v63 = vpop.eup %15479 }
 0xbd4   : > { %v15482_v2 = vpop.eup %15481  ;;  %13466 = vmatprep.mubr.msk.f32.mxu0 %vm2127_vm5, %v15480_v63  ;;  %v7975_v39 = vsel %vm2127_vm5, %v15480_v63, 0.0 }
 0xbd5   : > { %13467 = vmatmul.mubr.msk.f32.gmra.mrb[190].mxu0 %vm2127_vm5, %v15482_v2 }
 0xbd8   : > { %14874 = vrot.lane.b32.xlu1 %v21155_v52, %s15910_s18 }
 0xbe1   : > { %14879 = vrot.lane.b32.xlu0 %v21156_v3, %s15910_s18  ;;  %s20361_s18 = scalar_lea.vmem [#allocation11], %s11075_s11  ;;  %s11640_s11 = sshll.u32 %s16000_s25, 12 }
 0xbe2   : > { %s10952_s13 = sshll.u32 %s20361_s18, 4  ;;  %s20458_s9 = scalar_lea.hbm %s21204_s14, %s11640_s11  ;;  %s20460_s13 = int_to_ptr.vmem [resolvable:$true] %s10952_s13 }
 0xbe3   : > { %s15817_s25 = scalar_lea.vmem %s20460_s13, 4096  ;;  %p15824_p12 = scmp.lt.s32.totalorder %s20460_s13, %s15822_s29 }
 0xbe4   : > { %p15818_p3 = scmp.ne.s32.totalorder %s20460_s13, %s15817_s25 }
 0xbe6   : > { %p15819_p5 = pnand %p15818_p3, %p16135_p10 }
 0xbe8   : > { %p15820_p7 = pneg %p15819_p5 }
 0xbfc   : > { %7934 = vadd.xlane.f32.xlu1 %v7933_v18 }
 0xc00   : > { %7937 = vadd.xlane.f32.xlu0 %v7936_v37  ;;  %7940 = vadd.xlane.f32.xlu1 %v7939_v30 }
 0xc04   : > { %7949 = vadd.xlane.f32.xlu0 %v7948_v45  ;;  %7943 = vadd.xlane.f32.xlu1 %v7942_v7 }
 0xc06   : > { %v19573_v61 = vpop.xlane.xlu0 %7817 }
 0xc07   : > { %v7815_v4 = vpop.xlane.xlu1 %7814 }
 0xc08   : > { %v7861_v6 = vsub.f32 %v19450_v35, %v7815_v4  ;;  %7955 = vadd.xlane.f32.xlu0 %v7954_v56  ;;  %7946 = vadd.xlane.f32.xlu1 %v7945_v26  ;;  %v7966_v35 = vsel %vm2127_vm5, %v19470_v12, 0.0 }
 0xc0a   : > { %v7917_v21 = vmul.f32 1.442695, %v7861_v6 }
 0xc0b   : > { %v19575_v16 = vpop.xlane.xlu1 %7823 }
 0xc0c   : > { %15483 = vpow2.f32 %v7917_v21  ;;  %7961 = vadd.xlane.f32.xlu0 %v7960_v8  ;;  %7952 = vadd.xlane.f32.xlu1 %v7951_v15 }
 0xc0f   : > { %v7794_v20 = vpop.xlane.xlu0 %7793  ;;  %v19581_v36 = vpop.xlane.xlu1 %7820 }
 0xc10   : > { %v7854_v55 = vsub.f32 %v19473_v27, %v7794_v20  ;;  %7967 = vadd.xlane.f32.xlu0 %v7966_v35  ;;  %7958 = vadd.xlane.f32.xlu1 %v7957_v24  ;;  %v7978_v27 = vsel %vm2127_vm5, %v15482_v2, 0.0 }
 0xc12   : > { %v7903_v33 = vmul.f32 1.442695, %v7854_v55  ;;  %v7862_v55 = vsub.f32 %v19445_v57, %v19573_v61 }
 0xc13   : > { %v7791_v51 = vpop.xlane.xlu1 %7790  ;;  %v19600_v58 = vpop.xlane.xlu0 %7826 }
 0xc14   : > { %15485 = vpow2.f32 %v7903_v33  ;;  %7973 = vadd.xlane.f32.xlu0 %v7972_v22  ;;  %v7853_v1 = vsub.f32 %v19485_v5, %v7791_v51  ;;  %7964 = vadd.xlane.f32.xlu1 %v7963_v53  ;;  %v7863_v22 = vsub.f32 %v19466_v47, %v19581_v36  ;;  %v7864_v47 = vsub.f32 %v19461_v23, %v19575_v16 }
 0xc16   : > { %v19593_v12 = vpop.eup %15483  ;;  %v7901_v38 = vmul.f32 1.442695, %v7853_v1  ;;  %v7921_v57 = vmul.f32 1.442695, %v7863_v22  ;;  %v7923_v23 = vmul.f32 1.442695, %v7864_v47 }
 0xc17   : > { %13513 = vmatprep.mubr.msk.f32.mxu0 %vm2127_vm5, %v19593_v12  ;;  %v7800_v19 = vpop.xlane.xlu1 %7799  ;;  %v14870_v14 = vpop.permute.xlu0 %14869 }
 0xc18   : > { %7979 = vadd.xlane.f32.xlu0 %v7978_v27  ;;  %v7856_v48 = vsub.f32 %v19498_v62, %v7800_v19  ;;  %7970 = vadd.xlane.f32.xlu1 %v7969_v59  ;;  %15487 = vpow2.f32 %v7901_v38  ;;  %v14872_v49 = vunpack.i.h.bf16 %v14870_v14  ;;  %v14871_v28 = vunpack.i.l.bf16 %v14870_v14 }
 0xc19   : > { %v7919_v27 = vmul.f32 1.442695, %v7862_v55 }
 0xc1a   : > { %v7907_v5 = vmul.f32 1.442695, %v7856_v48 }
 0xc1b   : > { %v7797_v11 = vpop.xlane.xlu1 %7796 }
 0xc1c   : > { %15489 = vpow2.f32 %v7907_v5  ;;  %v7855_v25 = vsub.f32 %v19505_v60, %v7797_v11  ;;  %7976 = vadd.xlane.f32.xlu1 %v7975_v39  ;;  %v14189_v60 = vpack.c.bf16 %v14872_v49, %v14871_v28 }
 0xc1e   : > { %v15486_v50 = vpop.eup %15485  ;;  %v7905_v34 = vmul.f32 1.442695, %v7855_v25 }
 0xc1f   : > { %v7984_v41 = vsel %vm2127_vm5, %v15486_v50, 0.0  ;;  %v14865_v44 = vpop.permute.xlu1 %14864 }
 0xc20   : > { %15491 = vpow2.f32 %v7905_v34  ;;  %7985 = vadd.xlane.f32.xlu0 %v7984_v41  ;;  %v14867_v42 = vunpack.i.h.bf16 %v14865_v44  ;;  %v14866_v62 = vunpack.i.l.bf16 %v14865_v44 }
 0xc22   : > { %v14185_v31 = vpack.c.bf16 %v14867_v42, %v14866_v62  ;;  %v15488_v43 = vpop.eup %15487 }
 0xc23   : > { %13485 = vmatprep.mubr.msk.f32.mxu1 %vm2127_vm5, %v15488_v43  ;;  %v7981_v29 = vsel %vm2127_vm5, %v15488_v43, 0.0  ;;  %v14921_v43 = vld [vmem:[#allocation7 + $0x30] sm:$0xff]  }
 0xc24   : > { %14186 = vmatprep.subr.bf16.mxu0 %v14185_v31  ;;  %13486 = vmatmul.mubr.msk.f32.vlgmr.msra.gmra.mrb[196].mxu1 %vm2127_vm5, %v15486_v50 }
 0xc25   : > { %7982 = vadd.xlane.f32.xlu1 %v7981_v29  ;;  %14188 = vmatpush3.bf16.msra.mxu0 %v14185_v31 }
 0xc26   : > { %v15490_v10 = vpop.eup %15489  ;;  %14190 = vmatprep.subr.bf16.mxu0 %v14189_v60 }
 0xc27   : > { %v7990_v63 = vsel %vm2127_vm5, %v15490_v10, 0.0 }
 0xc28   : > { %7991 = vadd.xlane.f32.xlu0 %v7990_v63 }
 0xc29   : > { %14192 = vmatpush3.bf16.msra.mxu0 %v14189_v60 }
 0xc2a   : > { %v15492_v2 = vpop.eup %15491 }
 0xc2b   : > { %v19610_v52 = vpop.f32.mrb[176].mxu0  ;;  %13488 = vmatprep.mubr.msk.f32.mxu1 %vm2127_vm5, %v15492_v2  ;;  %v7987_v3 = vsel %vm2127_vm5, %v15492_v2, 0.0 }
 0xc2c   : > { %v19614_v18 = vpop.f32.mrb[177].mxu0  ;;  %13489 = vmatmul.mubr.msk.f32.gmra.mrb[198].mxu1 %vm2127_vm5, %v15490_v10  ;;  %7988 = vadd.xlane.f32.xlu1 %v7987_v3  ;;  %v8005_v10 = vsel %vm2127_vm5, %v19593_v12, 0.0  ;;  %v14922_v3 = vld [vmem:[#allocation7 + $0x38] sm:$0xff]  }
 0xc33   : > { %v19617_v37 = vpop.f32.mrb[178].mxu0 }
 0xc34   : > { %v19619_v30 = vpop.f32.mrb[179].mxu0 }
 0xc37   : > { %v19621_v45 = vpop.f32.mrb[180].mxu0 }
 0xc38   : > { %v19623_v7 = vpop.f32.mrb[181].mxu0 }
 0xc3f   : > { %v19625_v4 = vpop.f32.mrb[182].mxu0 }
 0xc40   : > { %v19627_v56 = vpop.f32.mrb[183].mxu0 }
 0xc48   : > { %v7803_v26 = vpop.xlane.xlu0 %7802 }
 0xc49   : > { %v7857_v6 = vsub.f32 %v19516_v13, %v7803_v26 }
 0xc4b   : > { %v7909_v21 = vmul.f32 1.442695, %v7857_v6  ;;  %v19630_v8 = vpop.f32.mrb[184].mxu0 }
 0xc4c   : > { %v7812_v15 = vpop.xlane.xlu0 %7811  ;;  %v19632_v20 = vpop.f32.mrb[185].mxu0 }
 0xc4d   : > { %15493 = vpow2.f32 %v7909_v21  ;;  %v7860_v13 = vsub.f32 %v19519_v54, %v7812_v15  ;;  %v21157_v15 = vmov 0  }
 0xc4f   : > { %v7915_v36 = vmul.f32 1.442695, %v7860_v13 }
 0xc50   : > { %v7809_v35 = vpop.xlane.xlu0 %7808  ;;  %v7830_v24 = vpop.xlane.xlu1 %7829 }
 0xc51   : > { %v7859_v33 = vsub.f32 %v19527_v9, %v7809_v35  ;;  %v7865_v9 = vsub.f32 %v19482_v40, %v19600_v58  ;;  %v7866_v16 = vsub.f32 %v19524_v17, %v7830_v24 }
 0xc53   : > { %v7913_v51 = vmul.f32 1.442695, %v7859_v33  ;;  %v19639_v53 = vpop.f32.mrb[186].mxu0  ;;  %v7925_v58 = vmul.f32 1.442695, %v7865_v9 }
 0xc54   : > { %v7833_v1 = vpop.xlane.xlu0 %7832  ;;  %v19642_v38 = vpop.f32.mrb[187].mxu0  ;;  %v7927_v28 = vmul.f32 1.442695, %v7866_v16 }
 0xc55   : > { %15495 = vpow2.f32 %v7913_v51  ;;  %v7806_v19 = vpop.xlane.xlu1 %7805  ;;  %v7867_v50 = vsub.f32 %v19532_v46, %v7833_v1 }
 0xc56   : > { %v7858_v59 = vsub.f32 %v19535_v32, %v7806_v19  ;;  %15497 = vpow2.f32 %v7919_v27 }
 0xc57   : > { %v15494_v48 = vpop.eup %15493  ;;  %v19647_v61 = vpop.f32.mrb[188].mxu0  ;;  %v7929_v62 = vmul.f32 1.442695, %v7867_v50 }
 0xc58   : > { %v7911_v54 = vmul.f32 1.442695, %v7858_v59  ;;  %v7836_v5 = vpop.xlane.xlu0 %7835  ;;  %13491 = vmatprep.mubr.msk.f32.mxu1 %vm2127_vm5, %v15494_v48  ;;  %v19652_v11 = vpop.f32.mrb[189].mxu0  ;;  %v7993_v39 = vsel %vm2127_vm5, %v15494_v48, 0.0 }
 0xc59   : > { %7994 = vadd.xlane.f32.xlu1 %v7993_v39  ;;  %v14875_v32 = vpop.permute.xlu1 %14874  ;;  %v7868_v31 = vsub.f32 %v19544_v0, %v7836_v5 }
 0xc5a   : > { %15499 = vpow2.f32 %v7911_v54  ;;  %v14877_v25 = vunpack.i.h.bf16 %v14875_v32  ;;  %v14876_v40 = vunpack.i.l.bf16 %v14875_v32 }
 0xc5b   : > { %15501 = vpow2.f32 %v7921_v57  ;;  %v7931_v60 = vmul.f32 1.442695, %v7868_v31 }
 0xc5c   : > { %15503 = vpow2.f32 %v7915_v36  ;;  %v14880_v14 = vpop.permute.xlu0 %14879  ;;  %v14193_v34 = vpack.c.bf16 %v14877_v25, %v14876_v40 }
 0xc5d   : > { %v14882_v41 = vunpack.i.h.bf16 %v14880_v14  ;;  %v14881_v44 = vunpack.i.l.bf16 %v14880_v14  ;;  %15505 = vpow2.f32 %v7925_v58 }
 0xc5e   : > { %14194 = vmatprep.subr.bf16.mxu0 %v14193_v34  ;;  %15507 = vpow2.f32 %v7923_v23 }
 0xc5f   : > { %v15496_v42 = vpop.eup %15495  ;;  %v14197_v49 = vpack.c.bf16 %v14882_v41, %v14881_v44  ;;  %14196 = vmatpush3.bf16.msra.mxu0 %v14193_v34  ;;  %15509 = vpow2.f32 %v7929_v62 }
 0xc60   : > { %v7999_v46 = vsel %vm2127_vm5, %v15496_v42, 0.0  ;;  %v15498_v17 = vpop.eup %15497  ;;  %15511 = vpow2.f32 %v7927_v28 }
 0xc61   : > { %8000 = vadd.xlane.f32.xlu1 %v7999_v46  ;;  %14198 = vmatprep.subr.bf16.mxu0 %v14197_v49  ;;  %15513 = vpow2.f32 %v7931_v60  ;;  %v8008_v55 = vsel %vm2127_vm5, %v15498_v17, 0.0 }
 0xc63   : > { %14200 = vmatpush3.bf16.msra.mxu0 %v14197_v49 }
 0xc64   : > { %v15500_v29 = vpop.eup %15499  ;;  %13525 = vmatprep.subr.bf16.mxu0 %v14921_v43 }
 0xc65   : > { %v15502_v63 = vpop.eup %15501  ;;  %8006 = vadd.xlane.f32.xlu1 %v8005_v10  ;;  %13492 = vmatmul.mubr.msk.f32.gmra.mrb[200].mxu1 %vm2127_vm5, %v15500_v29  ;;  %v7996_v0 = vsel %vm2127_vm5, %v15500_v29, 0.0 }
 0xc66   : > { %v15504_v2 = vpop.eup %15503  ;;  %13494 = vmatprep.mubr.msk.f32.mxu1 %vm2127_vm5, %v15496_v42  ;;  %7997 = vadd.xlane.f32.xlu0 %v7996_v0  ;;  %v8011_v26 = vsel %vm2127_vm5, %v15502_v63, 0.0 }
 0xc67   : > { %13514 = vmatmul.mubr.msk.f32.vlgmr.msra.gmra.mrb[192].mxu0 %vm2127_vm5, %v15498_v17  ;;  %v15506_v12 = vpop.eup %15505  ;;  %v8002_v6 = vsel %vm2127_vm5, %v15504_v2, 0.0 }
 0xc68   : > { %13516 = vmatprep.mubr.msk.f32.mxu0 %vm2127_vm5, %v15502_v63  ;;  %13526 = vmatpush3.bf16.msra.mxu0 %v14921_v43  ;;  %v15508_v21 = vpop.eup %15507  ;;  %v8017_v35 = vsel %vm2127_vm5, %v15506_v12, 0.0 }
 0xc69   : > { %8012 = vadd.xlane.f32.xlu1 %v8011_v26  ;;  %13495 = vmatmul.mubr.msk.f32.gmra.mrb[202].mxu1 %vm2127_vm5, %v15504_v2  ;;  %v15510_v24 = vpop.eup %15509  ;;  %v8014_v51 = vsel %vm2127_vm5, %v15508_v21, 0.0 }
 0xc6a   : > { %8003 = vadd.xlane.f32.xlu0 %v8002_v6  ;;  %13527 = vmatprep.subr.bf16.mxu0 %v14922_v3  ;;  %v15512_v33 = vpop.eup %15511  ;;  %v8023_v22 = vsel %vm2127_vm5, %v15510_v24, 0.0 }
 0xc6b   : > { %13517 = vmatmul.mubr.msk.f32.gmra.mrb[194].mxu0 %vm2127_vm5, %v15508_v21  ;;  %9742 = vmatprep.mubr.bf16.mxu1 %v21157_v15  ;;  %v15514_v13 = vpop.eup %15513  ;;  %v8020_v1 = vsel %vm2127_vm5, %v15512_v33, 0.0 }
 0xc6c   : > { %13519 = vmatprep.mubr.msk.f32.mxu0 %vm2127_vm5, %v15506_v12  ;;  %13528 = vmatpush3.bf16.msra.mxu0 %v14922_v3  ;;  %v8026_v27 = vsel %vm2127_vm5, %v15514_v13, 0.0 }
 0xc6d   : > { %8018 = vadd.xlane.f32.xlu1 %v8017_v35 }
 0xc6e   : > { %8009 = vadd.xlane.f32.xlu0 %v8008_v55 }
 0xc6f   : > { %13520 = vmatmul.mubr.msk.f32.gmra.mrb[196].mxu0 %vm2127_vm5, %v15512_v33 }
 0xc70   : > { %13522 = vmatprep.mubr.msk.f32.mxu0 %vm2127_vm5, %v15510_v24 }
 0xc71   : > { %8024 = vadd.xlane.f32.xlu1 %v8023_v22 }
 0xc72   : > { %8015 = vadd.xlane.f32.xlu0 %v8014_v51 }
 0xc73   : > { %13523 = vmatmul.mubr.msk.f32.gmra.mrb[198].mxu0 %vm2127_vm5, %v15514_v13 }
 0xc76   : > { %8021 = vadd.xlane.f32.xlu0 %v8020_v1 }
 0xc7a   : > { %8027 = vadd.xlane.f32.xlu0 %v8026_v27 }
 0xc89   : > { %v7935_v19 = vpop.xlane.xlu1 %7934 }
 0xc8a   : > { %15515 = vrcp.f32 %v7935_v19 }
 0xc8d   : > { %v7938_v59 = vpop.xlane.xlu0 %7937  ;;  %v7941_v48 = vpop.xlane.xlu1 %7940 }
 0xc8e   : > { %15517 = vrcp.f32 %v7938_v59 }
 0xc8f   : > { %15519 = vrcp.f32 %v7941_v48 }
 0xc91   : > { %v7950_v57 = vpop.xlane.xlu0 %7949  ;;  %v7944_v9 = vpop.xlane.xlu1 %7943 }
 0xc92   : > { %15521 = vrcp.f32 %v7944_v9 }
 0xc93   : > { %15523 = vrcp.f32 %v7950_v57 }
 0xc94   : > { %v15516_v54 = vpop.eup %15515 }
 0xc95   : > { %v7956_v47 = vpop.xlane.xlu0 %7955  ;;  %v7947_v36 = vpop.xlane.xlu1 %7946  ;;  %v8673_v25 = vmul.f32 %v15516_v54, %v19614_v18 }
 0xc96   : > { %15525 = vrcp.f32 %v7947_v36 }
 0xc97   : > { %15527 = vrcp.f32 %v7956_v47 }
 0xc98   : > { %v15518_v5 = vpop.eup %15517 }
 0xc99   : > { %v7962_v39 = vpop.xlane.xlu0 %7961  ;;  %v7953_v32 = vpop.xlane.xlu1 %7952  ;;  %v8674_v40 = vmul.f32 %v15518_v5, %v19610_v52 }
 0xc9a   : > { %v15520_v58 = vpop.eup %15519  ;;  %15529 = vrcp.f32 %v7953_v32 }
 0xc9b   : > { %v8705_v50 = vpack.c.bf16 %v8674_v40, %v8673_v25  ;;  %15531 = vrcp.f32 %v7962_v39  ;;  %v8675_v34 = vmul.f32 %v15520_v58, %v19619_v30 }
 0xc9c   : > { %v15522_v23 = vpop.eup %15521 }
 0xc9d   : > { %v7968_v16 = vpop.xlane.xlu0 %7967  ;;  %13529 = vmatprep.mubr.msk.bf16.mxu0 %vm1514_vm0, %v8705_v50  ;;  %v7959_v14 = vpop.xlane.xlu1 %7958  ;;  %v8676_v41 = vmul.f32 %v15522_v23, %v19617_v37 }
 0xc9e   : > { %v15524_v44 = vpop.eup %15523  ;;  %15533 = vrcp.f32 %v7959_v14 }
 0xc9f   : > { %v8706_v42 = vpack.c.bf16 %v8676_v41, %v8675_v34  ;;  %15535 = vrcp.f32 %v7968_v16  ;;  %v8678_v28 = vmul.f32 %v15524_v44, %v19621_v45 }
 0xca0   : > { %v15526_v62 = vpop.eup %15525 }
 0xca1   : > { %v7974_v18 = vpop.xlane.xlu0 %7973  ;;  %v7965_v52 = vpop.xlane.xlu1 %7964  ;;  %13530 = vmatmul.mubr.msk.bf16.vlgmr.msra.gmra.mrb[120].mxu0 %vm1514_vm0, %v8706_v42  ;;  %v8677_v49 = vmul.f32 %v15526_v62, %v19623_v7 }
 0xca2   : > { %v15528_v31 = vpop.eup %15527  ;;  %15537 = vrcp.f32 %v7965_v52 }
 0xca3   : > { %v8707_v46 = vpack.c.bf16 %v8678_v28, %v8677_v49  ;;  %15539 = vrcp.f32 %v7974_v18  ;;  %v8680_v29 = vmul.f32 %v15528_v31, %v19625_v4 }
 0xca4   : > { %v15530_v43 = vpop.eup %15529 }
 0xca5   : > { %v7980_v30 = vpop.xlane.xlu0 %7979  ;;  %v7971_v37 = vpop.xlane.xlu1 %7970  ;;  %13533 = vmatprep.mubr.msk.bf16.mxu0 %vm1514_vm0, %v8707_v46  ;;  %v8679_v17 = vmul.f32 %v15530_v43, %v19627_v56 }
 0xca6   : > { %v15532_v60 = vpop.eup %15531  ;;  %15541 = vrcp.f32 %v7971_v37 }
 0xca7   : > { %15543 = vrcp.f32 %v7980_v30  ;;  %v8708_v63 = vpack.c.bf16 %v8680_v29, %v8679_v17  ;;  %v8682_v3 = vmul.f32 %v15532_v60, %v19630_v8 }
 0xca8   : > { %v13468_v10 = vpop.f32.mrb[190].mxu0  ;;  %v15534_v45 = vpop.eup %15533 }
 0xca9   : > { %v8326_v7 = vpop.f32.mrb[191].mxu0  ;;  %v7977_v0 = vpop.xlane.xlu1 %7976  ;;  %13534 = vmatmul.mubr.msk.bf16.gmra.mrb[124].mxu0 %vm1514_vm0, %v8708_v63  ;;  %v8681_v2 = vmul.f32 %v15534_v45, %v19632_v20 }
 0xcaa   : > { %15545 = vrcp.f32 %v7977_v0  ;;  %v15536_v26 = vpop.eup %15535 }
 0xcab   : > { %v8709_v12 = vpack.c.bf16 %v8682_v3, %v8681_v2  ;;  %v8684_v6 = vmul.f32 %v15536_v26, %v19639_v53 }
 0xcac   : > { %v15538_v56 = vpop.eup %15537 }
 0xcad   : > { %13537 = vmatprep.mubr.msk.bf16.mxu0 %vm1514_vm0, %v8709_v12  ;;  %v8683_v4 = vmul.f32 %v15538_v56, %v19642_v38  ;;  %v15540_v21 = vpop.eup %15539  ;;  %v7986_v53 = vpop.xlane.xlu0 %7985 }
 0xcae   : > { %v8686_v20 = vmul.f32 %v15540_v21, %v19647_v61  ;;  %15547 = vrcp.f32 %v7986_v53 }
 0xcaf   : > { %v8710_v35 = vpack.c.bf16 %v8684_v6, %v8683_v4 }
 0xcb0   : > { %v15542_v24 = vpop.eup %15541 }
 0xcb1   : > { %v15544_v55 = vpop.eup %15543  ;;  %13538 = vmatmul.mubr.msk.bf16.gmra.mrb[128].mxu0 %vm1514_vm0, %v8710_v35  ;;  %v8685_v33 = vmul.f32 %v15542_v24, %v19652_v11 }
 0xcb2   : > { %v8688_v51 = vmul.f32 %v15544_v55, %v13468_v10  ;;  %v7983_v38 = vpop.xlane.xlu1 %7982 }
 0xcb3   : > { %v8711_v22 = vpack.c.bf16 %v8686_v20, %v8685_v33  ;;  %15549 = vrcp.f32 %v7983_v38 }
 0xcb4   : > { %v15546_v8 = vpop.eup %15545 }
 0xcb5   : > { %v8687_v13 = vmul.f32 %v15546_v8, %v8326_v7  ;;  %13541 = vmatprep.mubr.msk.bf16.mxu0 %vm1514_vm0, %v8711_v22  ;;  %v7992_v27 = vpop.xlane.xlu0 %7991 }
 0xcb6   : > { %15551 = vrcp.f32 %v7992_v27 }
 0xcb7   : > { %v8712_v1 = vpack.c.bf16 %v8688_v51, %v8687_v13 }
 0xcb8   : > { %v15548_v11 = vpop.eup %15547 }
 0xcb9   : > { %13542 = vmatmul.mubr.msk.bf16.gmra.mrb[132].mxu0 %vm1514_vm0, %v8712_v1  ;;  %v7989_v19 = vpop.xlane.xlu1 %7988 }
 0xcba   : > { %15553 = vrcp.f32 %v7989_v19 }
 0xcbd   : > { %v15550_v61 = vpop.eup %15549 }
 0xcc0   : > { %v15552_v36 = vpop.eup %15551 }
 0xcc4   : > { %v15554_v5 = vpop.eup %15553 }
 0xce6   : > { %v7995_v50 = vpop.xlane.xlu1 %7994 }
 0xcee   : > { %v8001_v16 = vpop.xlane.xlu1 %8000 }
 0xcf2   : > { %v8007_v34 = vpop.xlane.xlu1 %8006 }
 0xcf3   : > { %v7998_v58 = vpop.xlane.xlu0 %7997 }
 0xcf4   : > { %15555 = vrcp.f32 %v7998_v58 }
 0xcf5   : > { %15557 = vrcp.f32 %v7995_v50 }
 0xcf6   : > { %v8013_v44 = vpop.xlane.xlu1 %8012 }
 0xcf7   : > { %v13487_v59 = vpop.f32.mrb[196].mxu1  ;;  %v8004_v23 = vpop.xlane.xlu0 %8003 }
 0xcf8   : > { %v8690_v48 = vmul.f32 %v15548_v11, %v13487_v59  ;;  %v8449_v57 = vpop.f32.mrb[197].mxu1 }
 0xcf9   : > { %v8689_v9 = vmul.f32 %v15550_v61, %v8449_v57 }
 0xcfa   : > { %v8019_v62 = vpop.xlane.xlu1 %8018 }
 0xcfb   : > { %v8713_v47 = vpack.c.bf16 %v8690_v48, %v8689_v9  ;;  %v8010_v14 = vpop.xlane.xlu0 %8009  ;;  %v19715_v9 = vld [vmem:[%s20512_s5] ss:$0 sm:$0xff] }
 0xcfc   : > { %15559 = vrcp.f32 %v8010_v14  ;;  %v15645_v14 = vld [vmem:[%s16193_s26 + $0x10] sm:$0xff] }
 0xcfd   : > { %13545 = vmatprep.mubr.msk.bf16.mxu0 %vm1514_vm0, %v8713_v47  ;;  %15561 = vrcp.f32 %v8007_v34 }
 0xcfe   : > { %15563 = vrcp.f32 %v8004_v23  ;;  %v15556_v18 = vpop.eup %15555  ;;  %v8025_v30 = vpop.xlane.xlu1 %8024  ;;  %v15644_v23 = vld [vmem:[%s16193_s26 + $0x8] sm:$0xff] }
 0xcff   : > { %v13490_v54 = vpop.f32.mrb[198].mxu1  ;;  %v8016_v41 = vpop.xlane.xlu0 %8015  ;;  %15565 = vrcp.f32 %v8001_v16 }
 0xd00   : > { %v8692_v39 = vmul.f32 %v15552_v36, %v13490_v54  ;;  %v8459_v32 = vpop.f32.mrb[199].mxu1  ;;  %15567 = vrcp.f32 %v8016_v41  ;;  %v15558_v49 = vpop.eup %15557 }
 0xd01   : > { %v8691_v25 = vmul.f32 %v15554_v5, %v8459_v32  ;;  %15569 = vrcp.f32 %v8013_v44 }
 0xd03   : > { %v8714_v40 = vpack.c.bf16 %v8692_v39, %v8691_v25  ;;  %v8022_v42 = vpop.xlane.xlu0 %8021  ;;  %v15643_v25 = vld [vmem:[%s16193_s26] sm:$0xff] }
 0xd04   : > { %15571 = vrcp.f32 %v8022_v42  ;;  %v15646_v42 = vld [vmem:[%s16193_s26 + $0x18] sm:$0xff] }
 0xd05   : > { %13546 = vmatmul.mubr.msk.bf16.gmra.mrb[136].mxu0 %vm1514_vm0, %v8714_v40  ;;  %15573 = vrcp.f32 %v8019_v62 }
 0xd06   : > { %v15560_v43 = vpop.eup %15559 }
 0xd07   : > { %v8028_v28 = vpop.xlane.xlu0 %8027  ;;  %v15562_v29 = vpop.eup %15561 }
 0xd08   : > { %v15564_v7 = vpop.eup %15563  ;;  %15575 = vrcp.f32 %v8028_v28 }
 0xd09   : > { %v15566_v2 = vpop.eup %15565  ;;  %15577 = vrcp.f32 %v8025_v30 }
 0xd0a   : > { %v15568_v12 = vpop.eup %15567 }
 0xd0b   : > { %v15570_v21 = vpop.eup %15569 }
 0xd0e   : > { %v15572_v20 = vpop.eup %15571 }
 0xd0f   : > { %v15574_v51 = vpop.eup %15573 }
 0xd12   : > { %v15576_v38 = vpop.eup %15575 }
 0xd13   : > { %v15578_v11 = vpop.eup %15577 }
 0xd38   : > { %v13493_v52 = vpop.f32.mrb[200].mxu1 }
 0xd39   : > { %v8694_v31 = vmul.f32 %v15556_v18, %v13493_v52  ;;  %v8469_v46 = vpop.f32.mrb[201].mxu1 }
 0xd3a   : > { %v8693_v37 = vmul.f32 %v15558_v49, %v8469_v46  ;;  %v13515_v17 = vpop.f32.mrb[192].mxu0 }
 0xd3b   : > { %v8698_v60 = vmul.f32 %v15560_v43, %v13515_v17  ;;  %v8602_v10 = vpop.f32.mrb[193].mxu0 }
 0xd3c   : > { %v8715_v63 = vpack.c.bf16 %v8694_v31, %v8693_v37  ;;  %v8697_v45 = vmul.f32 %v15562_v29, %v8602_v10  ;;  %v13496_v0 = vpop.f32.mrb[202].mxu1  ;;  %v15647_v31 = vld [vmem:[%s16193_s26 + $0x20] sm:$0xff]  ;;  %v15648_v37 = vld [vmem:[%s16193_s26 + $0x28] sm:$0xff]  ;;  %v15649_v29 = vld [vmem:[%s16193_s26 + $0x30] sm:$0xff] }
 0xd3d   : > { %v8696_v3 = vmul.f32 %v15564_v7, %v13496_v0  ;;  %v8479_v26 = vpop.f32.mrb[203].mxu1 }
 0xd3e   : > { %v8717_v56 = vpack.c.bf16 %v8698_v60, %v8697_v45  ;;  %v8695_v4 = vmul.f32 %v15566_v2, %v8479_v26  ;;  %v13518_v6 = vpop.f32.mrb[194].mxu0  ;;  %13549 = vmatprep.mubr.msk.bf16.mxu0 %vm1514_vm0, %v8715_v63  ;;  %v15650_v63 = vld [vmem:[%s16193_s26 + $0x38] sm:$0xff] }
 0xd3f   : > { %v8700_v35 = vmul.f32 %v15568_v12, %v13518_v6  ;;  %v8612_v24 = vpop.f32.mrb[195].mxu0  ;;  %v15651_v12 = vld [vmem:[%s16193_s26 + $0x40] sm:$0xff] }
 0xd40   : > { %v8716_v55 = vpack.c.bf16 %v8696_v3, %v8695_v4  ;;  %v8699_v33 = vmul.f32 %v15570_v21, %v8612_v24  ;;  %v15652_v21 = vld [vmem:[%s16193_s26 + $0x48] sm:$0xff]  ;;  %v15653_v24 = vld [vmem:[%s16193_s26 + $0x50] sm:$0xff] }
 0xd42   : > { %v8718_v8 = vpack.c.bf16 %v8700_v35, %v8699_v33  ;;  %v13521_v22 = vpop.f32.mrb[196].mxu0  ;;  %13550 = vmatmul.mubr.msk.bf16.gmra.mrb[140].mxu0 %vm1514_vm0, %v8716_v55 }
 0xd43   : > { %v8702_v13 = vmul.f32 %v15572_v20, %v13521_v22  ;;  %v8622_v1 = vpop.f32.mrb[197].mxu0  ;;  %13553 = vmatprep.mubr.msk.bf16.mxu0 %vm1514_vm0, %v8717_v56  ;;  %v21158_v20 = vld [vmem:[#allocation28_spill] sm:$0xff] }
 0xd44   : > { %v8701_v53 = vmul.f32 %v15574_v51, %v8622_v1  ;;  %v15654_v51 = vld [vmem:[%s16193_s26 + $0x58] sm:$0xff]  ;;  %v21159_v1 = vld [vmem:[#allocation32_spill] sm:$0xff] }
 0xd46   : > { %v8719_v27 = vpack.c.bf16 %v8702_v13, %v8701_v53  ;;  %v13524_v19 = vpop.f32.mrb[198].mxu0 }
 0xd47   : > { %v8704_v59 = vmul.f32 %v15576_v38, %v13524_v19  ;;  %v8632_v61 = vpop.f32.mrb[199].mxu0 }
 0xd48   : > { %v8703_v48 = vmul.f32 %v15578_v11, %v8632_v61  ;;  %v21161_v61 = vld [vmem:[#allocation22_spill] sm:$0xff] }
 0xd4a   : > { %v8720_v57 = vpack.c.bf16 %v8704_v59, %v8703_v48  ;;  %13554 = vmatmul.mubr.msk.bf16.gmra.mrb[144].mxu0 %vm1514_vm0, %v8718_v8 }
 0xd4b   : > { %13557 = vmatprep.mubr.msk.bf16.mxu0 %vm1514_vm0, %v8719_v27  ;;  %v21160_v27 = vld [vmem:[#allocation24_spill] sm:$0xff] }
 0xd52   : > { %13558 = vmatmul.mubr.msk.bf16.gmra.mrb[148].mxu0 %vm1514_vm0, %v8720_v57 }
 0xd53   : > { %9935 = vmatprep.mubr.bf16.mxu0 %v21157_v15 }
 0xd74   : > { %v13531_v47 = vpop.f32.mrb[120].mxu0 }
 0xd75   : > { %v8820_v36 = vpop.f32.mrb[121].mxu0  ;;  %v8988_v32 = vadd.f32 %v13531_v47, %v19715_v9 }
 0xd76   : > { %v8986_v54 = vadd.f32 %v19715_v9, %v8820_v36  ;;  %v13532_v5 = vpop.f32.mrb[122].mxu0  ;;  %v15655_v36 = vld [vmem:[%s16193_s26 + $0x60] sm:$0xff] }
 0xd77   : > { %v8823_v39 = vpop.f32.mrb[123].mxu0  ;;  %v8989_v50 = vadd.f32 %v13532_v5, %v19715_v9  ;;  %v19729_v34 = vadd.f32 %v15645_v14, %v8988_v32 }
 0xd78   : > { %v19720_v40 = vadd.f32 %v15643_v25, %v8986_v54  ;;  %v8987_v58 = vadd.f32 %v19715_v9, %v8823_v39  ;;  %v15656_v39 = vld [vmem:[%s16193_s26 + $0x68] sm:$0xff]  ;;  %v15657_v25 = vld [vmem:[%s16193_s26 + $0x70] sm:$0xff] }
 0xd79   : > { %v19733_v62 = vadd.f32 %v15646_v42, %v8989_v50  ;;  %v15658_v50 = vld [vmem:[%s16193_s26 + $0x78] sm:$0xff] }
 0xd7a   : > { %v19725_v16 = vadd.f32 %v15644_v23, %v8987_v58  ;;  %9050 = vadd.xlane.f32.xlu1 %v19720_v40 }
 0xd7c   : > { %9052 = vadd.xlane.f32.xlu0 %v19725_v16  ;;  %v13535_v41 = vpop.f32.mrb[124].mxu0 }
 0xd7d   : > { %v8836_v44 = vpop.f32.mrb[125].mxu0  ;;  %v8992_v28 = vadd.f32 %v13535_v41, %v19715_v9  ;;  %v21163_v41 = vld [vmem:[#allocation18_spill] sm:$0xff] }
 0xd7e   : > { %v8990_v18 = vadd.f32 %v19715_v9, %v8836_v44  ;;  %9054 = vadd.xlane.f32.xlu1 %v19729_v34  ;;  %v13536_v52 = vpop.f32.mrb[126].mxu0 }
 0xd7f   : > { %v8839_v49 = vpop.f32.mrb[127].mxu0  ;;  %v8993_v30 = vadd.f32 %v13536_v52, %v19715_v9  ;;  %v19749_v60 = vadd.f32 %v15649_v29, %v8992_v28  ;;  %v21165_v28 = vld [vmem:[#allocation116_spill] sm:$0xff] }
 0xd80   : > { %v19739_v46 = vadd.f32 %v15647_v31, %v8990_v18  ;;  %v8991_v43 = vadd.f32 %v19715_v9, %v8839_v49  ;;  %9056 = vadd.xlane.f32.xlu0 %v19733_v62  ;;  %v21164_v18 = vld [vmem:[#allocation21_spill] sm:$0xff] }
 0xd81   : > { %v19753_v45 = vadd.f32 %v15650_v63, %v8993_v30  ;;  %v15659_v63 = vld [vmem:[%s16193_s26 + $0x80] sm:$0xff] }
 0xd82   : > { %v19745_v17 = vadd.f32 %v15648_v37, %v8991_v43  ;;  %9058 = vadd.xlane.f32.xlu1 %v19739_v46  ;;  %v21166_v37 = vld [vmem:[#allocation118_spill] sm:$0xff] }
 0xd84   : > { %9060 = vadd.xlane.f32.xlu0 %v19745_v17  ;;  %v13539_v10 = vpop.f32.mrb[128].mxu0 }
 0xd85   : > { %v8852_v7 = vpop.f32.mrb[129].mxu0  ;;  %v8996_v26 = vadd.f32 %v13539_v10, %v19715_v9 }
 0xd86   : > { %v8994_v0 = vadd.f32 %v19715_v9, %v8852_v7  ;;  %9062 = vadd.xlane.f32.xlu1 %v19749_v60  ;;  %v13540_v2 = vpop.f32.mrb[130].mxu0 }
 0xd87   : > { %v8855_v3 = vpop.f32.mrb[131].mxu0  ;;  %v8997_v6 = vadd.f32 %v13540_v2, %v19715_v9  ;;  %v19769_v55 = vadd.f32 %v15653_v24, %v8996_v26  ;;  %v14923_v24 = vld [vmem:[#allocation8] ss:$16 sps:$4 sm:$0xff]  }
 0xd88   : > { %v19759_v56 = vadd.f32 %v15651_v12, %v8994_v0  ;;  %v8995_v4 = vadd.f32 %v19715_v9, %v8855_v3  ;;  %9064 = vadd.xlane.f32.xlu0 %v19753_v45  ;;  %v15660_v3 = vld [vmem:[%s16193_s26 + $0x88] sm:$0xff]  ;;  %v15661_v12 = vld [vmem:[%s16193_s26 + $0x90] sm:$0xff] }
 0xd89   : > { %v19774_v13 = vadd.f32 %v15654_v51, %v8997_v6  ;;  %v15662_v6 = vld [vmem:[%s16193_s26 + $0x98] sm:$0xff] }
 0xd8a   : > { %v19765_v35 = vadd.f32 %v15652_v21, %v8995_v4  ;;  %9066 = vadd.xlane.f32.xlu1 %v19759_v56  ;;  %v14934_v51 = vld [vmem:[#allocation8 + $0x2c] ss:$16 sps:$4 sm:$0xff]  }
 0xd8c   : > { %9068 = vadd.xlane.f32.xlu0 %v19765_v35  ;;  %v13543_v33 = vpop.f32.mrb[132].mxu0 }
 0xd8d   : > { %v14205_v8 = vadd.f32 %v13543_v33, %v21158_v20  ;;  %v8868_v22 = vpop.f32.mrb[133].mxu0  ;;  %v14925_v33 = vld [vmem:[#allocation8 + $0x4] ss:$16 sps:$4 sm:$0xff]   ;;  %v14926_v20 = vld [vmem:[#allocation8 + $0x8] ss:$16 sps:$4 sm:$0xff]  }
 0xd8e   : > { %v14206_v53 = vadd.f32 %v8868_v22, %v21159_v1  ;;  %9070 = vadd.xlane.f32.xlu1 %v19769_v55  ;;  %v13544_v38 = vpop.f32.mrb[134].mxu0  ;;  %v14931_v22 = vld [vmem:[#allocation8 + $0x24] ss:$16 sps:$4 sm:$0xff]   ;;  %9710 = vmatprep.subr.bf16.mxu1 %v14925_v33  ;;  %v14929_v1 = vld [vmem:[#allocation8 + $0x20] ss:$16 sps:$4 sm:$0xff]  }
 0xd8f   : > { %v14207_v19 = vadd.f32 %v13544_v38, %v21160_v27  ;;  %v8871_v11 = vpop.f32.mrb[135].mxu0  ;;  %v9000_v57 = vadd.f32 %v14205_v8, %v19715_v9  ;;  %v14928_v8 = vld [vmem:[#allocation8 + $0xc] ss:$16 sps:$4 sm:$0xff]   ;;  %9711 = vmatpush1.bf16.msra.mxu1 %v14923_v24  ;;  %v14937_v24 = vld [vmem:[#allocation8 + $0x44] ss:$16 sps:$4 sm:$0xff]  }
 0xd90   : > { %v8998_v59 = vadd.f32 %v14206_v53, %v19715_v9  ;;  %v14208_v48 = vadd.f32 %v8871_v11, %v21161_v61  ;;  %9072 = vadd.xlane.f32.xlu0 %v19774_v13  ;;  %9903 = vmatprep.subr.bf16.mxu0 %v14928_v8  ;;  %v14932_v53 = vld [vmem:[#allocation8 + $0x28] ss:$16 sps:$4 sm:$0xff]   ;;  %v14940_v33 = vld [vmem:[#allocation8 + $0x4c] ss:$16 sps:$4 sm:$0xff]   ;;  %v21177_v8 = vld [vmem:[#allocation128_spill] sm:$0xff] }
 0xd91   : > { %v9001_v5 = vadd.f32 %v14207_v19, %v19715_v9  ;;  %v19794_v58 = vadd.f32 %v15657_v25, %v9000_v57  ;;  %9904 = vmatpush1.bf16.msra.mxu0 %v14926_v20  ;;  %9712 = vmatprep.subr.bf16.mxu1 %v14931_v22 }
 0xd92   : > { %v8999_v47 = vadd.f32 %v14208_v48, %v19715_v9  ;;  %v19785_v54 = vadd.f32 %v15655_v36, %v8998_v59  ;;  %9905 = vmatprep.subr.bf16.mxu0 %v14934_v51 }
 0xd93   : > { %v19798_v23 = vadd.f32 %v15658_v50, %v9001_v5  ;;  %9713 = vmatpush1.bf16.msra.mxu1 %v14929_v1  ;;  %v14935_v1 = vld [vmem:[#allocation8 + $0x40] ss:$16 sps:$4 sm:$0xff]  }
 0xd94   : > { %9074 = vadd.xlane.f32.xlu1 %v19785_v54  ;;  %v19790_v32 = vadd.f32 %v15656_v39, %v8999_v47  ;;  %v21171_v39 = vld [vmem:[#allocation120_spill] sm:$0xff]  ;;  %9714 = vmatprep.subr.bf16.mxu1 %v14937_v24 }
 0xd95   : > { %21162 = vst [vmem:[#allocation91_spill] sm:$0xff] %v19798_v23  ;;  %9906 = vmatpush1.bf16.msra.mxu0 %v14932_v53  ;;  %v14938_v53 = vld [vmem:[#allocation8 + $0x48] ss:$16 sps:$4 sm:$0xff]  }
 0xd96   : > { %9076 = vadd.xlane.f32.xlu0 %v19790_v32  ;;  %9907 = vmatprep.subr.bf16.mxu0 %v14940_v33  ;;  %v21183_v33 = vld [vmem:[#allocation102_spill] sm:$0xff] }
 0xd97   : > { %9715 = vmatpush1.bf16.msra.mxu1 %v14935_v1  ;;  %v14950_v1 = vld [vmem:[#allocation8 + $0x88] ss:$16 sps:$4 sm:$0xff]  }
 0xd98   : > { %9078 = vadd.xlane.f32.xlu1 %v19794_v58 }
 0xd99   : > { %9908 = vmatpush1.bf16.msra.mxu0 %v14938_v53 }
 0xd9a   : > { %9080 = vadd.xlane.f32.xlu0 %v19798_v23 }
 0xdd8   : > { %v13547_v14 = vpop.f32.mrb[136].mxu0 }
 0xdd9   : > { %v14209_v44 = vadd.f32 %v13547_v14, %v21163_v41  ;;  %v8884_v42 = vpop.f32.mrb[137].mxu0  ;;  %v21172_v41 = vld [vmem:[#allocation122_spill] sm:$0xff] }
 0xdda   : > { %v14210_v52 = vadd.f32 %v8884_v42, %v21164_v18  ;;  %v13548_v49 = vpop.f32.mrb[138].mxu0  ;;  %v21173_v18 = vld [vmem:[#allocation124_spill] sm:$0xff] }
 0xddb   : > { %v14211_v31 = vadd.f32 %v13548_v49, %v21165_v28  ;;  %v8887_v43 = vpop.f32.mrb[139].mxu0  ;;  %v9004_v10 = vadd.f32 %v14209_v44, %v19715_v9 }
 0xddc   : > { %v9002_v30 = vadd.f32 %v14210_v52, %v19715_v9  ;;  %v14212_v29 = vadd.f32 %v8887_v43, %v21166_v37  ;;  %v21174_v43 = vld [vmem:[#allocation126_spill] sm:$0xff] }
 0xddd   : > { %v9005_v2 = vadd.f32 %v14211_v31, %v19715_v9  ;;  %v19818_v4 = vadd.f32 %v15661_v12, %v9004_v10  ;;  %v15663_v10 = vld [vmem:[%s16193_s26 + $0xa0] sm:$0xff]  ;;  %v15664_v12 = vld [vmem:[%s16193_s26 + $0xa8] sm:$0xff] }
 0xdde   : > { %v9003_v7 = vadd.f32 %v14212_v29, %v19715_v9  ;;  %v19809_v0 = vadd.f32 %v15659_v63, %v9002_v30 }
 0xddf   : > { %21169 = vst [vmem:[#allocation121_spill] sm:$0xff] %v19818_v4  ;;  %v19822_v21 = vadd.f32 %v15662_v6, %v9005_v2 }
 0xde0   : > { %21167 = vst [vmem:[#allocation119_spill] sm:$0xff] %v19809_v0  ;;  %9082 = vadd.xlane.f32.xlu1 %v19809_v0  ;;  %v19814_v26 = vadd.f32 %v15660_v3, %v9003_v7 }
 0xde1   : > { %21170 = vst [vmem:[#allocation110_spill] sm:$0xff] %v19822_v21 }
 0xde2   : > { %21168 = vst [vmem:[#allocation94_spill] sm:$0xff] %v19814_v26  ;;  %9084 = vadd.xlane.f32.xlu0 %v19814_v26 }
 0xde4   : > { %9086 = vadd.xlane.f32.xlu1 %v19818_v4 }
 0xde6   : > { %9088 = vadd.xlane.f32.xlu0 %v19822_v21 }
 0xe07   : > { %v9051_v38 = vpop.xlane.xlu1 %9050 }
 0xe08   : > { %v9114_v27 = vmul.f32 0.0078125, %v9051_v38 }
 0xe09   : > { %v9053_v19 = vpop.xlane.xlu0 %9052 }
 0xe0a   : > { %v19826_v11 = vsub.f32 %v19720_v40, %v9114_v27  ;;  %v9115_v59 = vmul.f32 0.0078125, %v9053_v19  ;;  %v21178_v19 = vld [vmem:[#allocation130_spill] sm:$0xff] }
 0xe0b   : > { %v9055_v47 = vpop.xlane.xlu1 %9054 }
 0xe0c   : > { %v19829_v61 = vsub.f32 %v19725_v16, %v9115_v59  ;;  %v9178_v48 = vmul.f32 %v19826_v11, %v19826_v11  ;;  %v9116_v14 = vmul.f32 0.0078125, %v9055_v47  ;;  %v21179_v47 = vld [vmem:[#allocation107_spill] sm:$0xff] }
 0xe0d   : > { %v9057_v5 = vpop.xlane.xlu0 %9056 }
 0xe0e   : > { %9210 = vadd.xlane.f32.xlu1 %v9178_v48  ;;  %v9179_v57 = vmul.f32 %v19829_v61, %v19829_v61  ;;  %v9117_v28 = vmul.f32 0.0078125, %v9057_v5  ;;  %v19841_v37 = vsub.f32 %v19729_v34, %v9116_v14 }
 0xe0f   : > { %v9059_v63 = vpop.xlane.xlu1 %9058 }
 0xe10   : > { %9212 = vadd.xlane.f32.xlu0 %v9179_v57  ;;  %v19848_v2 = vsub.f32 %v19733_v62, %v9117_v28  ;;  %v9118_v38 = vmul.f32 0.0078125, %v9059_v63  ;;  %v9180_v57 = vmul.f32 %v19841_v37, %v19841_v37 }
 0xe11   : > { %v9061_v20 = vpop.xlane.xlu0 %9060 }
 0xe12   : > { %v19870_v28 = vsub.f32 %v19739_v46, %v9118_v38 }
 0xe15   : > { %v13551_v36 = vpop.f32.mrb[140].mxu0  ;;  %v9065_v24 = vpop.xlane.xlu0 %9064 }
 0xe16   : > { %v14213_v25 = vadd.f32 %v13551_v36, %v21171_v39  ;;  %v8900_v50 = vpop.f32.mrb[141].mxu0  ;;  %v9119_v39 = vmul.f32 0.0078125, %v9061_v20 }
 0xe17   : > { %v14214_v44 = vadd.f32 %v8900_v50, %v21172_v41  ;;  %v13552_v42 = vpop.f32.mrb[142].mxu0  ;;  %v9181_v41 = vmul.f32 %v19848_v2, %v19848_v2 }
 0xe18   : > { %v14215_v52 = vadd.f32 %v13552_v42, %v21173_v18  ;;  %v8903_v49 = vpop.f32.mrb[143].mxu0  ;;  %v9008_v27 = vadd.f32 %v14213_v25, %v19715_v9  ;;  %v21180_v25 = vld [vmem:[#allocation111_spill] sm:$0xff]  ;;  %v14941_v18 = vld [vmem:[#allocation8 + $0x60] ss:$16 sps:$4 sm:$0xff]  }
 0xe19   : > { %v9006_v31 = vadd.f32 %v14214_v44, %v19715_v9  ;;  %v14216_v30 = vadd.f32 %v8903_v49, %v21174_v43  ;;  %v14943_v44 = vld [vmem:[#allocation8 + $0x64] ss:$16 sps:$4 sm:$0xff]   ;;  %v14946_v42 = vld [vmem:[#allocation8 + $0x6c] ss:$16 sps:$4 sm:$0xff]   ;;  %v14944_v49 = vld [vmem:[#allocation8 + $0x68] ss:$16 sps:$4 sm:$0xff]  }
 0xe1a   : > { %v9009_v50 = vadd.f32 %v14215_v52, %v19715_v9  ;;  %9716 = vmatprep.subr.bf16.mxu1 %v14943_v44  ;;  %v9063_v52 = vpop.xlane.xlu1 %9062  ;;  %9909 = vmatprep.subr.bf16.mxu0 %v14946_v42  ;;  %v14955_v42 = vld [vmem:[#allocation8 + $0xa4] ss:$16 sps:$4 sm:$0xff]  }
 0xe1b   : > { %v9007_v29 = vadd.f32 %v14216_v30, %v19715_v9  ;;  %v19845_v7 = vadd.f32 %v15663_v10, %v9006_v31  ;;  %v15665_v31 = vld [vmem:[%s16193_s26 + $0xb0] sm:$0xff]  ;;  %9717 = vmatpush1.bf16.msra.mxu1 %v14941_v18  ;;  %v19876_v30 = vsub.f32 %v19745_v17, %v9119_v39  ;;  %v15666_v10 = vld [vmem:[%s16193_s26 + $0xb8] sm:$0xff]  ;;  %9910 = vmatpush1.bf16.msra.mxu0 %v14944_v49  ;;  %v9120_v53 = vmul.f32 0.0078125, %v9063_v52 }
 0xe1c   : > { %v19873_v43 = vadd.f32 %v15665_v31, %v9008_v27  ;;  %v19880_v63 = vadd.f32 %v15666_v10, %v9009_v50  ;;  %v21184_v27 = vld [vmem:[#allocation115_spill] sm:$0xff]  ;;  %v9121_v50 = vmul.f32 0.0078125, %v9065_v24  ;;  %v14953_v49 = vld [vmem:[#allocation8 + $0xa0] ss:$16 sps:$4 sm:$0xff]  }
 0xe1d   : > { %21175 = vst [vmem:[#allocation123_spill] sm:$0xff] %v19845_v7  ;;  %9090 = vadd.xlane.f32.xlu1 %v19845_v7  ;;  %v13555_v3 = vpop.f32.mrb[144].mxu0  ;;  %v19852_v6 = vadd.f32 %v15664_v12, %v9007_v29  ;;  %v14952_v12 = vld [vmem:[#allocation8 + $0x8c] ss:$16 sps:$4 sm:$0xff]   ;;  %v9183_v44 = vmul.f32 %v19876_v30, %v19876_v30  ;;  %v14956_v31 = vld [vmem:[#allocation8 + $0xa8] ss:$16 sps:$4 sm:$0xff]   ;;  %v19900_v52 = vsub.f32 %v19749_v60, %v9120_v53 }
 0xe1e   : > { %v19855_v22 = vadd.f32 %v13555_v3, %v21177_v8  ;;  %v8916_v51 = vpop.f32.mrb[145].mxu0  ;;  %21181 = vst [vmem:[#allocation125_spill] sm:$0xff] %v19873_v43  ;;  %21182 = vst [vmem:[#allocation127_spill] sm:$0xff] %v19880_v63  ;;  %v14949_v3 = vld [vmem:[#allocation8 + $0x84] ss:$16 sps:$4 sm:$0xff]   ;;  %9911 = vmatprep.subr.bf16.mxu0 %v14952_v12  ;;  %v15668_v12 = vld [vmem:[%s16193_s26 + $0xc8] sm:$0xff] }
 0xe1f   : > { %21176 = vst [vmem:[#allocation134_spill] sm:$0xff] %v19852_v6  ;;  %v14218_v59 = vadd.f32 %v8916_v51, %v21178_v19  ;;  %9092 = vadd.xlane.f32.xlu0 %v19852_v6  ;;  %v13556_v48 = vpop.f32.mrb[146].mxu0  ;;  %v14947_v51 = vld [vmem:[#allocation8 + $0x80] ss:$16 sps:$4 sm:$0xff]   ;;  %9718 = vmatprep.subr.bf16.mxu1 %v14949_v3  ;;  %v14958_v18 = vld [vmem:[#allocation8 + $0xac] ss:$16 sps:$4 sm:$0xff]   ;;  %v19906_v3 = vsub.f32 %v19753_v45, %v9121_v50 }
 0xe20   : > { %v19863_v36 = vadd.f32 %v13556_v48, %v21179_v47  ;;  %v8919_v5 = vpop.f32.mrb[147].mxu0  ;;  %v21185_v47 = vld [vmem:[#allocation95_spill] sm:$0xff]  ;;  %9719 = vmatpush1.bf16.msra.mxu1 %v14947_v51  ;;  %9912 = vmatpush1.bf16.msra.mxu0 %v14950_v1  ;;  %v9069_v51 = vpop.xlane.xlu0 %9068  ;;  %v14959_v1 = vld [vmem:[#allocation8 + $0xc0] ss:$16 sps:$4 sm:$0xff]   ;;  %v14967_v50 = vld [vmem:[#allocation8 + $0xe4] ss:$16 sps:$4 sm:$0xff]  }
 0xe21   : > { %v14220_v14 = vadd.f32 %v8919_v5, %v21180_v25  ;;  %9214 = vadd.xlane.f32.xlu1 %v9180_v57  ;;  %v9010_v38 = vadd.f32 %v14218_v59, %v19715_v9  ;;  %v9182_v57 = vmul.f32 %v19870_v28, %v19870_v28  ;;  %v21186_v25 = vld [vmem:[#allocation117_spill] sm:$0xff]  ;;  %9720 = vmatprep.subr.bf16.mxu1 %v14955_v42  ;;  %v15669_v42 = vld [vmem:[%s16193_s26 + $0xd0] sm:$0xff] }
 0xe22   : > { %9913 = vmatprep.subr.bf16.mxu0 %v14958_v18  ;;  %v14962_v53 = vld [vmem:[#allocation8 + $0xc8] ss:$16 sps:$4 sm:$0xff]  }
 0xe23   : > { %9216 = vadd.xlane.f32.xlu0 %v9181_v41  ;;  %v9011_v59 = vadd.f32 %v14220_v14, %v19715_v9  ;;  %v9067_v14 = vpop.xlane.xlu1 %9066 }
 0xe24   : > { %9721 = vmatpush1.bf16.msra.mxu1 %v14953_v49  ;;  %9914 = vmatpush1.bf16.msra.mxu0 %v14956_v31  ;;  %v15670_v31 = vld [vmem:[%s16193_s26 + $0xd8] sm:$0xff] }
 0xe25   : > { %9094 = vadd.xlane.f32.xlu1 %v19873_v43  ;;  %v13559_v29 = vpop.f32.mrb[148].mxu0  ;;  %v19910_v24 = vadd.f32 %v15668_v12, %v9011_v59  ;;  %v14965_v59 = vld [vmem:[#allocation8 + $0xe0] ss:$16 sps:$4 sm:$0xff]  }
 0xe26   : > { %v19883_v20 = vadd.f32 %v13559_v29, %v21183_v33  ;;  %v8932_v8 = vpop.f32.mrb[149].mxu0  ;;  %v15667_v29 = vld [vmem:[%s16193_s26 + $0xc0] sm:$0xff] }
 0xe27   : > { %v19887_v19 = vadd.f32 %v8932_v8, %v21184_v27  ;;  %9096 = vadd.xlane.f32.xlu0 %v19880_v63  ;;  %v13560_v48 = vpop.f32.mrb[150].mxu0  ;;  %v19903_v10 = vadd.f32 %v15667_v29, %v9010_v38  ;;  %21188 = vst [vmem:[#allocation105_spill] sm:$0xff] %v19910_v24  ;;  %v14961_v33 = vld [vmem:[#allocation8 + $0xc4] ss:$16 sps:$4 sm:$0xff]   ;;  %v14964_v8 = vld [vmem:[#allocation8 + $0xcc] ss:$16 sps:$4 sm:$0xff]   ;;  %v9012_v27 = vadd.f32 %v19855_v22, %v19715_v9 }
 0xe28   : > { %v19893_v5 = vadd.f32 %v13560_v48, %v21185_v47  ;;  %v8935_v39 = vpop.f32.mrb[151].mxu0  ;;  %v9122_v38 = vmul.f32 0.0078125, %v9067_v14  ;;  %v9184_v48 = vmul.f32 %v19900_v52, %v19900_v52  ;;  %9722 = vmatprep.subr.bf16.mxu1 %v14961_v33  ;;  %9915 = vmatprep.subr.bf16.mxu0 %v14964_v8  ;;  %v9013_v47 = vadd.f32 %v19863_v36, %v19715_v9  ;;  %v14970_v22 = vld [vmem:[#allocation8 + $0xec] ss:$16 sps:$4 sm:$0xff]   ;;  %v9071_v36 = vpop.xlane.xlu1 %9070 }
 0xe29   : > { %v14224_v41 = vadd.f32 %v8935_v39, %v21186_v25  ;;  %9218 = vadd.xlane.f32.xlu1 %v9182_v57  ;;  %21187 = vst [vmem:[#allocation129_spill] sm:$0xff] %v19903_v10  ;;  %v9123_v57 = vmul.f32 0.0078125, %v9069_v51  ;;  %v9185_v39 = vmul.f32 %v19906_v3, %v19906_v3  ;;  %9723 = vmatpush1.bf16.msra.mxu1 %v14959_v1  ;;  %v14968_v25 = vld [vmem:[#allocation8 + $0xe8] ss:$16 sps:$4 sm:$0xff]   ;;  %v9073_v14 = vpop.xlane.xlu0 %9072  ;;  %v9124_v12 = vmul.f32 0.0078125, %v9071_v36 }
 0xe2a   : > { %9916 = vmatpush1.bf16.msra.mxu0 %v14962_v53  ;;  %v19925_v18 = vadd.f32 %v15669_v42, %v9012_v27  ;;  %9724 = vmatprep.subr.bf16.mxu1 %v14967_v50  ;;  %v19932_v29 = vadd.f32 %v15670_v31, %v9013_v47  ;;  %v9014_v33 = vadd.f32 %v19887_v19, %v19715_v9  ;;  %v9125_v51 = vmul.f32 0.0078125, %v9073_v14 }
 0xe2b   : > { %9220 = vadd.xlane.f32.xlu0 %v9183_v44  ;;  %v19922_v44 = vsub.f32 %v19759_v56, %v9122_v38  ;;  %9917 = vmatprep.subr.bf16.mxu0 %v14970_v22  ;;  %v19928_v49 = vsub.f32 %v19765_v35, %v9123_v57  ;;  %v9015_v1 = vadd.f32 %v14224_v41, %v19715_v9  ;;  %v15672_v41 = vld [vmem:[%s16193_s26 + $0xe8] sm:$0xff] }
 0xe2c   : > { %v9075_v38 = vpop.xlane.xlu1 %9074  ;;  %v19943_v27 = vsub.f32 %v19769_v55, %v9124_v12  ;;  %v19949_v47 = vsub.f32 %v19774_v13, %v9125_v51  ;;  %v9016_v22 = vadd.f32 %v19883_v20, %v19715_v9  ;;  %v9017_v36 = vadd.f32 %v19893_v5, %v19715_v9  ;;  %v15674_v9 = vld [vmem:[%s16193_s26 + $0xf8] sm:$0xff] }
 0xe2d   : > { %9098 = vadd.xlane.f32.xlu1 %v19903_v10  ;;  %9725 = vmatpush1.bf16.msra.mxu1 %v14965_v59  ;;  %v9186_v8 = vmul.f32 %v19922_v44, %v19922_v44  ;;  %v9187_v53 = vmul.f32 %v19928_v49, %v19928_v49  ;;  %v9077_v19 = vpop.xlane.xlu0 %9076  ;;  %v9126_v50 = vmul.f32 0.0078125, %v9075_v38 }
 0xe2e   : > { %9918 = vmatpush1.bf16.msra.mxu0 %v14968_v25  ;;  %v9188_v59 = vmul.f32 %v19943_v27, %v19943_v27  ;;  %v9127_v42 = vmul.f32 0.0078125, %v9077_v19  ;;  %v9189_v31 = vmul.f32 %v19949_v47, %v19949_v47  ;;  %v19975_v5 = vadd.f32 %v15674_v9, %v9017_v36 }
 0xe2f   : > { %9100 = vadd.xlane.f32.xlu0 %v19910_v24  ;;  %v19965_v12 = vsub.f32 %v19785_v54, %v9126_v50 }
 0xe30   : > { %v9079_v25 = vpop.xlane.xlu1 %9078  ;;  %v19971_v51 = vsub.f32 %v19790_v32, %v9127_v42  ;;  %21189 = vst [vmem:[#allocation109_spill] sm:$0xff] %v19975_v5 }
 0xe31   : > { %9222 = vadd.xlane.f32.xlu1 %v9184_v48  ;;  %v15671_v48 = vld [vmem:[%s16193_s26 + $0xe0] sm:$0xff]  ;;  %v9081_v14 = vpop.xlane.xlu0 %9080  ;;  %v9128_v20 = vmul.f32 0.0078125, %v9079_v25  ;;  %v9190_v38 = vmul.f32 %v19965_v12, %v19965_v12 }
 0xe32   : > { %v19946_v57 = vadd.f32 %v15671_v48, %v9014_v33  ;;  %v15673_v33 = vld [vmem:[%s16193_s26 + $0xf0] sm:$0xff]  ;;  %v9191_v19 = vmul.f32 %v19971_v51, %v19971_v51  ;;  %s10938_s26 = scalar_lea.sflag [#allocation4], %s16187_s15 }
 0xe33   : > { %9224 = vadd.xlane.f32.xlu0 %v9185_v39  ;;  %v19953_v39 = vadd.f32 %v15672_v41, %v9015_v1  ;;  %v9129_v1 = vmul.f32 0.0078125, %v9081_v14 }
 0xe35   : > { %9102 = vadd.xlane.f32.xlu1 %v19925_v18  ;;  %v19984_v48 = vsub.f32 %v19798_v23, %v9129_v1 }
 0xe37   : > { %9104 = vadd.xlane.f32.xlu0 %v19932_v29  ;;  %v9193_v50 = vmul.f32 %v19984_v48, %v19984_v48 }
 0xe39   : > { %9226 = vadd.xlane.f32.xlu1 %v9186_v8  ;;  %v19968_v8 = vadd.f32 %v15673_v33, %v9016_v22 }
 0xe3b   : > { %9228 = vadd.xlane.f32.xlu0 %v9187_v53  ;;  %v19978_v53 = vsub.f32 %v19794_v58, %v9128_v20 }
 0xe3d   : > { %9106 = vadd.xlane.f32.xlu1 %v19946_v57  ;;  %v9192_v41 = vmul.f32 %v19978_v53, %v19978_v53 }
 0xe3f   : > { %9108 = vadd.xlane.f32.xlu0 %v19953_v39 }
 0xe41   : > { %9230 = vadd.xlane.f32.xlu1 %v9188_v59 }
 0xe43   : > { %9232 = vadd.xlane.f32.xlu0 %v9189_v31 }
 0xe45   : > { %9110 = vadd.xlane.f32.xlu1 %v19968_v8 }
 0xe47   : > { %9112 = vadd.xlane.f32.xlu0 %v19975_v5 }
 0xe49   : > { %9234 = vadd.xlane.f32.xlu1 %v9190_v38 }
 0xe4b   : > { %9236 = vadd.xlane.f32.xlu0 %v9191_v19 }
 0xe4d   : > { %9238 = vadd.xlane.f32.xlu1 %v9192_v41 }
 0xe4f   : > { %9240 = vadd.xlane.f32.xlu0 %v9193_v50 }
 0xe6d   : > { %v9083_v22 = vpop.xlane.xlu1 %9082 }
 0xe6e   : > { %v9130_v59 = vmul.f32 0.0078125, %v9083_v22 }
 0xe6f   : > { %v9085_v25 = vpop.xlane.xlu0 %9084 }
 0xe70   : > { %v19993_v42 = vsub.f32 %v19809_v0, %v9130_v59  ;;  %v9131_v36 = vmul.f32 0.0078125, %v9085_v25 }
 0xe71   : > { %v9087_v31 = vpop.xlane.xlu1 %9086 }
 0xe72   : > { %v19996_v14 = vsub.f32 %v19814_v26, %v9131_v36  ;;  %v9132_v20 = vmul.f32 0.0078125, %v9087_v31  ;;  %v9194_v33 = vmul.f32 %v19993_v42, %v19993_v42 }
 0xe73   : > { %v9089_v1 = vpop.xlane.xlu0 %9088 }
 0xe74   : > { %v20001_v9 = vsub.f32 %v19818_v4, %v9132_v20  ;;  %v9133_v38 = vmul.f32 0.0078125, %v9089_v1  ;;  %9242 = vadd.xlane.f32.xlu1 %v9194_v33  ;;  %v9195_v19 = vmul.f32 %v19996_v14, %v19996_v14 }
 0xe76   : > { %v20006_v41 = vsub.f32 %v19822_v21, %v9133_v38  ;;  %9244 = vadd.xlane.f32.xlu0 %v9195_v19  ;;  %v9196_v50 = vmul.f32 %v20001_v9, %v20001_v9  ;;  %v20015_v19 = vld [vmem:[%s20513_s6] ss:$0 sm:$0xff] }
 0xe78   : > { %9246 = vadd.xlane.f32.xlu1 %v9196_v50  ;;  %v9197_v22 = vmul.f32 %v20006_v41, %v20006_v41 }
 0xe7a   : > { %9248 = vadd.xlane.f32.xlu0 %v9197_v22 }
 0xe9b   : > { %v9211_v59 = vpop.xlane.xlu1 %9210 }
 0xe9c   : > { %v9274_v25 = vmul.f32 0.0078125, %v9211_v59 }
 0xe9d   : > { %v9213_v36 = vpop.xlane.xlu0 %9212 }
 0xe9e   : > { %v9306_v31 = vadd.f32 1e-05, %v9274_v25  ;;  %v9275_v20 = vmul.f32 0.0078125, %v9213_v36 }
 0xea0   : > { %15579 = vrsqrt.f32 %v9306_v31  ;;  %v9307_v33 = vadd.f32 1e-05, %v9275_v20 }
 0xea2   : > { %15581 = vrsqrt.f32 %v9307_v33 }
 0xeaa   : > { %v9091_v1 = vpop.xlane.xlu1 %9090  ;;  %v15580_v38 = vpop.eup %15579 }
 0xeab   : > { %v9134_v50 = vmul.f32 0.0078125, %v9091_v1  ;;  %v9370_v21 = vmul.f32 %v15580_v38, %v19826_v11  ;;  %v20031_v11 = vld [vmem:[%s20514_s7] ss:$0 sm:$0xff] }
 0xeac   : > { %v9093_v4 = vpop.xlane.xlu0 %9092  ;;  %v15582_v22 = vpop.eup %15581 }
 0xead   : > { %v20019_v59 = vsub.f32 %v19845_v7, %v9134_v50  ;;  %v9135_v25 = vmul.f32 0.0078125, %v9093_v4  ;;  %v9409_v36 = vmul.f32 %v20015_v19, %v9370_v21  ;;  %v9371_v31 = vmul.f32 %v15582_v22, %v19829_v61 }
 0xeae   : > { %v9215_v20 = vpop.xlane.xlu1 %9214 }
 0xeaf   : > { %v20024_v33 = vsub.f32 %v19852_v6, %v9135_v25  ;;  %v9276_v26 = vmul.f32 0.0078125, %v9215_v20  ;;  %v9198_v1 = vmul.f32 %v20019_v59, %v20019_v59  ;;  %v9410_v38 = vmul.f32 %v20015_v19, %v9371_v31 }
 0xeb0   : > { %v9217_v4 = vpop.xlane.xlu0 %9216  ;;  %v9448_v25 = vadd.f32 %v20031_v11, %v9409_v36 }
 0xeb1   : > { %v9308_v50 = vadd.f32 1e-05, %v9276_v26  ;;  %v9277_v21 = vmul.f32 0.0078125, %v9217_v4  ;;  %9250 = vadd.xlane.f32.xlu1 %v9198_v1  ;;  %v9199_v61 = vmul.f32 %v20024_v33, %v20024_v33  ;;  %v9449_v20 = vadd.f32 %v20031_v11, %v9410_v38 }
 0xeb2   : > { %v9095_v22 = vpop.xlane.xlu1 %9094 }
 0xeb3   : > { %15583 = vrsqrt.f32 %v9308_v50  ;;  %v9309_v6 = vadd.f32 1e-05, %v9277_v21  ;;  %v9136_v7 = vmul.f32 0.0078125, %v9095_v22  ;;  %9252 = vadd.xlane.f32.xlu0 %v9199_v61  ;;  %v9480_v23 = vpack.c.bf16 %v9449_v20, %v9448_v25 }
 0xeb4   : > { %v9097_v0 = vpop.xlane.xlu0 %9096 }
 0xeb5   : > { %15585 = vrsqrt.f32 %v9309_v6  ;;  %v20039_v31 = vsub.f32 %v19873_v43, %v9136_v7  ;;  %v9137_v26 = vmul.f32 0.0078125, %v9097_v0  ;;  %9743 = vmatmul.mubr.bf16.vlgmr.msra.gmra.mrb[204].mxu1 %v9480_v23  ;;  %9936 = vmatmul.mubr.bf16.vlgmr.msra.gmra.mrb[200].mxu0 %v9480_v23 }
 0xeb6   : > { %v9219_v1 = vpop.xlane.xlu1 %9218  ;;  %9752 = vmatprep.mubr.bf16.mxu1 %v21157_v15  ;;  %9945 = vmatprep.mubr.bf16.mxu0 %v21157_v15 }
 0xeb7   : > { %v20042_v4 = vsub.f32 %v19880_v63, %v9137_v26  ;;  %v9278_v36 = vmul.f32 0.0078125, %v9219_v1  ;;  %v9200_v38 = vmul.f32 %v20039_v31, %v20039_v31 }
 0xeb8   : > { %v9221_v50 = vpop.xlane.xlu0 %9220 }
 0xeb9   : > { %v9310_v6 = vadd.f32 1e-05, %v9278_v36  ;;  %v9279_v21 = vmul.f32 0.0078125, %v9221_v50  ;;  %9254 = vadd.xlane.f32.xlu1 %v9200_v38  ;;  %v9201_v0 = vmul.f32 %v20042_v4, %v20042_v4 }
 0xeba   : > { %v9099_v7 = vpop.xlane.xlu1 %9098 }
 0xebb   : > { %15587 = vrsqrt.f32 %v9310_v6  ;;  %v9311_v23 = vadd.f32 1e-05, %v9279_v21  ;;  %v9138_v61 = vmul.f32 0.0078125, %v9099_v7  ;;  %9256 = vadd.xlane.f32.xlu0 %v9201_v0 }
 0xebc   : > { %v9101_v22 = vpop.xlane.xlu0 %9100 }
 0xebd   : > { %v15584_v25 = vpop.eup %15583  ;;  %15589 = vrsqrt.f32 %v9311_v23  ;;  %v20051_v20 = vsub.f32 %v19903_v10, %v9138_v61  ;;  %v9139_v26 = vmul.f32 0.0078125, %v9101_v22 }
 0xebe   : > { %v9223_v1 = vpop.xlane.xlu1 %9222  ;;  %v9372_v36 = vmul.f32 %v15584_v25, %v19841_v37 }
 0xebf   : > { %v15586_v50 = vpop.eup %15585  ;;  %v20055_v38 = vsub.f32 %v19910_v24, %v9139_v26  ;;  %v9280_v63 = vmul.f32 0.0078125, %v9223_v1  ;;  %v9202_v6 = vmul.f32 %v20051_v20, %v20051_v20 }
 0xec0   : > { %v9225_v21 = vpop.xlane.xlu0 %9224  ;;  %v9373_v0 = vmul.f32 %v15586_v50, %v19848_v2  ;;  %v9411_v7 = vmul.f32 %v20015_v19, %v9372_v36 }
 0xec1   : > { %v9312_v23 = vadd.f32 1e-05, %v9280_v63  ;;  %v9281_v61 = vmul.f32 0.0078125, %v9225_v21  ;;  %9258 = vadd.xlane.f32.xlu1 %v9202_v6  ;;  %v9203_v22 = vmul.f32 %v20055_v38, %v20055_v38 }
 0xec2   : > { %v9103_v37 = vpop.xlane.xlu1 %9102  ;;  %v9412_v25 = vmul.f32 %v20015_v19, %v9373_v0  ;;  %v9450_v10 = vadd.f32 %v20031_v11, %v9411_v7 }
 0xec3   : > { %15591 = vrsqrt.f32 %v9312_v23  ;;  %v9313_v26 = vadd.f32 1e-05, %v9281_v61  ;;  %v9140_v1 = vmul.f32 0.0078125, %v9103_v37  ;;  %9260 = vadd.xlane.f32.xlu0 %v9203_v22 }
 0xec4   : > { %v9105_v24 = vpop.xlane.xlu0 %9104  ;;  %v9451_v2 = vadd.f32 %v20031_v11, %v9412_v25 }
 0xec5   : > { %v15588_v50 = vpop.eup %15587  ;;  %15593 = vrsqrt.f32 %v9313_v26  ;;  %v20067_v63 = vsub.f32 %v19925_v18, %v9140_v1  ;;  %v9141_v36 = vmul.f32 0.0078125, %v9105_v24 }
 0xec6   : > { %v9227_v6 = vpop.xlane.xlu1 %9226  ;;  %v9481_v21 = vpack.c.bf16 %v9451_v2, %v9450_v10  ;;  %v9374_v43 = vmul.f32 %v15588_v50, %v19870_v28 }
 0xec7   : > { %v15590_v0 = vpop.eup %15589  ;;  %v20071_v23 = vsub.f32 %v19932_v29, %v9141_v36  ;;  %v9282_v61 = vmul.f32 0.0078125, %v9227_v6  ;;  %v9204_v7 = vmul.f32 %v20067_v63, %v20067_v63 }
 0xec8   : > { %9753 = vmatmul.mubr.bf16.gmra.mrb[208].mxu1 %v9481_v21  ;;  %v9229_v22 = vpop.xlane.xlu0 %9228  ;;  %9946 = vmatmul.mubr.bf16.gmra.mrb[204].mxu0 %v9481_v21  ;;  %v9375_v37 = vmul.f32 %v15590_v0, %v19876_v30  ;;  %v9413_v25 = vmul.f32 %v20015_v19, %v9374_v43 }
 0xec9   : > { %v9314_v24 = vadd.f32 1e-05, %v9282_v61  ;;  %v9283_v26 = vmul.f32 0.0078125, %v9229_v22  ;;  %9262 = vadd.xlane.f32.xlu1 %v9204_v7  ;;  %v9205_v28 = vmul.f32 %v20071_v23, %v20071_v23  ;;  %9762 = vmatprep.mubr.bf16.mxu1 %v21157_v15 }
 0xeca   : > { %v9107_v10 = vpop.xlane.xlu1 %9106  ;;  %9955 = vmatprep.mubr.bf16.mxu0 %v21157_v15  ;;  %v9414_v1 = vmul.f32 %v20015_v19, %v9375_v37  ;;  %v9452_v43 = vadd.f32 %v20031_v11, %v9413_v25 }
 0xecb   : > { %15595 = vrsqrt.f32 %v9314_v24  ;;  %v9315_v2 = vadd.f32 1e-05, %v9283_v26  ;;  %v9142_v50 = vmul.f32 0.0078125, %v9107_v10  ;;  %9264 = vadd.xlane.f32.xlu0 %v9205_v28 }
 0xecc   : > { %v9109_v30 = vpop.xlane.xlu0 %9108  ;;  %v9453_v36 = vadd.f32 %v20031_v11, %v9414_v1 }
 0xecd   : > { %v15592_v6 = vpop.eup %15591  ;;  %15597 = vrsqrt.f32 %v9315_v2  ;;  %v20085_v21 = vsub.f32 %v19946_v57, %v9142_v50  ;;  %v9143_v0 = vmul.f32 0.0078125, %v9109_v30 }
 0xece   : > { %v9231_v61 = vpop.xlane.xlu1 %9230  ;;  %v9482_v7 = vpack.c.bf16 %v9453_v36, %v9452_v43  ;;  %v9376_v22 = vmul.f32 %v15592_v6, %v19900_v52 }
 0xecf   : > { %v15594_v37 = vpop.eup %15593  ;;  %v20089_v24 = vsub.f32 %v19953_v39, %v9143_v0  ;;  %v9284_v26 = vmul.f32 0.0078125, %v9231_v61  ;;  %v9206_v25 = vmul.f32 %v20085_v21, %v20085_v21 }
 0xed0   : > { %9763 = vmatmul.mubr.bf16.gmra.mrb[212].mxu1 %v9482_v7  ;;  %9956 = vmatmul.mubr.bf16.gmra.mrb[208].mxu0 %v9482_v7  ;;  %v9233_v28 = vpop.xlane.xlu0 %9232  ;;  %v9377_v10 = vmul.f32 %v15594_v37, %v19906_v3  ;;  %v9415_v1 = vmul.f32 %v20015_v19, %v9376_v22 }
 0xed1   : > { %v9316_v2 = vadd.f32 1e-05, %v9284_v26  ;;  %v9285_v50 = vmul.f32 0.0078125, %v9233_v28  ;;  %9266 = vadd.xlane.f32.xlu1 %v9206_v25  ;;  %v9207_v52 = vmul.f32 %v20089_v24, %v20089_v24  ;;  %9772 = vmatprep.mubr.bf16.mxu1 %v21157_v15 }
 0xed2   : > { %v9111_v30 = vpop.xlane.xlu1 %9110  ;;  %9965 = vmatprep.mubr.bf16.mxu0 %v21157_v15  ;;  %v9416_v43 = vmul.f32 %v20015_v19, %v9377_v10  ;;  %v9454_v0 = vadd.f32 %v20031_v11, %v9415_v1 }
 0xed3   : > { %15599 = vrsqrt.f32 %v9316_v2  ;;  %v9317_v36 = vadd.f32 1e-05, %v9285_v50  ;;  %v9144_v6 = vmul.f32 0.0078125, %v9111_v30  ;;  %9268 = vadd.xlane.f32.xlu0 %v9207_v52 }
 0xed4   : > { %v9113_v3 = vpop.xlane.xlu0 %9112  ;;  %v9455_v61 = vadd.f32 %v20031_v11, %v9416_v43 }
 0xed5   : > { %v15596_v7 = vpop.eup %15595  ;;  %15601 = vrsqrt.f32 %v9317_v36  ;;  %v20103_v22 = vsub.f32 %v19968_v8, %v9144_v6  ;;  %v9145_v37 = vmul.f32 0.0078125, %v9113_v3 }
 0xed6   : > { %v9235_v26 = vpop.xlane.xlu1 %9234  ;;  %v9483_v25 = vpack.c.bf16 %v9455_v61, %v9454_v0  ;;  %v9378_v28 = vmul.f32 %v15596_v7, %v19922_v44 }
 0xed7   : > { %v15598_v10 = vpop.eup %15597  ;;  %v20107_v2 = vsub.f32 %v19975_v5, %v9145_v37  ;;  %v9286_v50 = vmul.f32 0.0078125, %v9235_v26  ;;  %v9208_v1 = vmul.f32 %v20103_v22, %v20103_v22 }
 0xed8   : > { %9773 = vmatmul.mubr.bf16.gmra.mrb[216].mxu1 %v9483_v25  ;;  %9966 = vmatmul.mubr.bf16.gmra.mrb[212].mxu0 %v9483_v25  ;;  %v9237_v52 = vpop.xlane.xlu0 %9236  ;;  %v9379_v30 = vmul.f32 %v15598_v10, %v19928_v49  ;;  %v9417_v43 = vmul.f32 %v20015_v19, %v9378_v28 }
 0xed9   : > { %v9318_v36 = vadd.f32 1e-05, %v9286_v50  ;;  %v9287_v6 = vmul.f32 0.0078125, %v9237_v52  ;;  %9270 = vadd.xlane.f32.xlu1 %v9208_v1  ;;  %v9209_v44 = vmul.f32 %v20107_v2, %v20107_v2  ;;  %9782 = vmatprep.mubr.bf16.mxu1 %v21157_v15 }
 0xeda   : > { %v9239_v3 = vpop.xlane.xlu1 %9238  ;;  %9975 = vmatprep.mubr.bf16.mxu0 %v21157_v15  ;;  %v9418_v0 = vmul.f32 %v20015_v19, %v9379_v30  ;;  %v9456_v37 = vadd.f32 %v20031_v11, %v9417_v43 }
 0xedb   : > { %15603 = vrsqrt.f32 %v9318_v36  ;;  %v9319_v61 = vadd.f32 1e-05, %v9287_v6  ;;  %v9288_v7 = vmul.f32 0.0078125, %v9239_v3  ;;  %9272 = vadd.xlane.f32.xlu0 %v9209_v44 }
 0xedc   : > { %v9241_v49 = vpop.xlane.xlu0 %9240  ;;  %v9457_v26 = vadd.f32 %v20031_v11, %v9418_v0 }
 0xedd   : > { %v15600_v25 = vpop.eup %15599  ;;  %15605 = vrsqrt.f32 %v9319_v61  ;;  %v9320_v28 = vadd.f32 1e-05, %v9288_v7  ;;  %v9289_v10 = vmul.f32 0.0078125, %v9241_v49 }
 0xede   : > { %v9484_v50 = vpack.c.bf16 %v9457_v26, %v9456_v37  ;;  %v9380_v1 = vmul.f32 %v15600_v25, %v19943_v27 }
 0xedf   : > { %v15602_v52 = vpop.eup %15601  ;;  %15607 = vrsqrt.f32 %v9320_v28  ;;  %v9321_v5 = vadd.f32 1e-05, %v9289_v10 }
 0xee0   : > { %9783 = vmatmul.mubr.bf16.gmra.mrb[220].mxu1 %v9484_v50  ;;  %9976 = vmatmul.mubr.bf16.gmra.mrb[216].mxu0 %v9484_v50  ;;  %v9381_v30 = vmul.f32 %v15602_v52, %v19949_v47  ;;  %v9419_v36 = vmul.f32 %v20015_v19, %v9380_v1  ;;  %v14971_v52 = vld [vmem:[#allocation10 + $0x40] sm:$0xff]  }
 0xee1   : > { %15609 = vrsqrt.f32 %v9321_v5  ;;  %9792 = vmatprep.mubr.bf16.mxu1 %v21157_v15  ;;  %9985 = vmatprep.mubr.bf16.mxu0 %v21157_v15 }
 0xee2   : > { %v9420_v43 = vmul.f32 %v20015_v19, %v9381_v30  ;;  %v9458_v6 = vadd.f32 %v20031_v11, %v9419_v36  ;;  %v14972_v30 = vld [vmem:[#allocation10 + $0xc0] sm:$0xff]   ;;  %12249 = vmatprep.subr.bf16.mxu1 %v14971_v52 }
 0xee3   : > { %12361 = vmatprep.subr.bf16.mxu0 %v14972_v30 }
 0xee4   : > { %v9459_v27 = vadd.f32 %v20031_v11, %v9420_v43  ;;  %v14974_v43 = vld [vmem:[#allocation10 + $0x80] sm:$0xff]  }
 0xee5   : > { %v15604_v44 = vpop.eup %15603  ;;  %12362 = vmatpush3.bf16.msra.mxu0 %v14974_v43 }
 0xee6   : > { %v9485_v3 = vpack.c.bf16 %v9459_v27, %v9458_v6  ;;  %v9382_v0 = vmul.f32 %v15604_v44, %v19965_v12  ;;  %v14975_v6 = vld [vmem:[#allocation10 + $0x48] sm:$0xff]  }
 0xee7   : > { %v15606_v61 = vpop.eup %15605  ;;  %v14976_v27 = vld [vmem:[#allocation10 + $0xc8] sm:$0xff]  }
 0xee8   : > { %9793 = vmatmul.mubr.bf16.gmra.mrb[224].mxu1 %v9485_v3  ;;  %9986 = vmatmul.mubr.bf16.gmra.mrb[220].mxu0 %v9485_v3  ;;  %v9383_v47 = vmul.f32 %v15606_v61, %v19971_v51  ;;  %v9421_v5 = vmul.f32 %v20015_v19, %v9382_v0  ;;  %v14977_v44 = vld [vmem:[#allocation10 + $0x8] sm:$0xff]   ;;  %v14979_v0 = vld [vmem:[#allocation10 + $0x50] sm:$0xff]  }
 0xee9   : > { %v15608_v7 = vpop.eup %15607  ;;  %9802 = vmatprep.mubr.bf16.mxu1 %v21157_v15  ;;  %9995 = vmatprep.mubr.bf16.mxu0 %v21157_v15  ;;  %v14978_v3 = vld [vmem:[#allocation10 + $0x88] sm:$0xff]   ;;  %v14980_v61 = vld [vmem:[#allocation10 + $0xd0] sm:$0xff]  }
 0xeea   : > { %v9422_v49 = vmul.f32 %v20015_v19, %v9383_v47  ;;  %v9460_v26 = vadd.f32 %v20031_v11, %v9421_v5  ;;  %v9384_v12 = vmul.f32 %v15608_v7, %v19978_v53  ;;  %v14973_v53 = vld [vmem:[#allocation10] sm:$0xff]   ;;  %12363 = vmatprep.subr.bf16.mxu0 %v14976_v27  ;;  %v14981_v47 = vld [vmem:[#allocation10 + $0x10] sm:$0xff]   ;;  %v14983_v7 = vld [vmem:[#allocation10 + $0x58] sm:$0xff]  }
 0xeeb   : > { %v15610_v37 = vpop.eup %15609  ;;  %12250 = vmatpush3.bf16.msra.mxu1 %v14973_v53  ;;  %12364 = vmatpush3.bf16.msra.mxu0 %v14978_v3  ;;  %v14982_v5 = vld [vmem:[#allocation10 + $0x90] sm:$0xff]   ;;  %v14992_v53 = vld [vmem:[#allocation10 + $0xe8] sm:$0xff]  }
 0xeec   : > { %v9461_v25 = vadd.f32 %v20031_v11, %v9422_v49  ;;  %v9385_v28 = vmul.f32 %v15610_v37, %v19984_v48  ;;  %v9423_v50 = vmul.f32 %v20015_v19, %v9384_v12  ;;  %12251 = vmatprep.subr.bf16.mxu1 %v14975_v6  ;;  %12365 = vmatprep.subr.bf16.mxu0 %v14980_v61  ;;  %v14984_v49 = vld [vmem:[#allocation10 + $0xd8] sm:$0xff]   ;;  %v14994_v61 = vld [vmem:[#allocation10 + $0xa8] sm:$0xff]  }
 0xeed   : > { %v14985_v37 = vld [vmem:[#allocation10 + $0x18] sm:$0xff]  }
 0xeee   : > { %v9486_v10 = vpack.c.bf16 %v9461_v25, %v9460_v26  ;;  %v9424_v51 = vmul.f32 %v20015_v19, %v9385_v28  ;;  %v9462_v36 = vadd.f32 %v20031_v11, %v9423_v50  ;;  %v14986_v26 = vld [vmem:[#allocation10 + $0x98] sm:$0xff]   ;;  %v14987_v25 = vld [vmem:[#allocation10 + $0x60] sm:$0xff]  }
 0xeef   : > { %12252 = vmatpush3.bf16.msra.mxu1 %v14977_v44  ;;  %12366 = vmatpush3.bf16.msra.mxu0 %v14982_v5  ;;  %v14988_v28 = vld [vmem:[#allocation10 + $0xe0] sm:$0xff]   ;;  %v14995_v5 = vld [vmem:[#allocation10 + $0x70] sm:$0xff]  }
 0xef0   : > { %9803 = vmatmul.mubr.bf16.gmra.mrb[228].mxu1 %v9486_v10  ;;  %9996 = vmatmul.mubr.bf16.gmra.mrb[224].mxu0 %v9486_v10  ;;  %v9463_v1 = vadd.f32 %v20031_v11, %v9424_v51  ;;  %v14989_v50 = vld [vmem:[#allocation10 + $0x20] sm:$0xff]  }
 0xef1   : > { %9812 = vmatprep.mubr.bf16.mxu1 %v21157_v15  ;;  %10005 = vmatprep.mubr.bf16.mxu0 %v21157_v15 }
 0xef2   : > { %v9487_v48 = vpack.c.bf16 %v9463_v1, %v9462_v36  ;;  %12253 = vmatprep.subr.bf16.mxu1 %v14979_v0  ;;  %12367 = vmatprep.subr.bf16.mxu0 %v14984_v49  ;;  %v14990_v1 = vld [vmem:[#allocation10 + $0xa0] sm:$0xff]   ;;  %v14991_v36 = vld [vmem:[#allocation10 + $0x68] sm:$0xff]   ;;  %v14997_v49 = vld [vmem:[#allocation10 + $0x30] sm:$0xff]  }
 0xef3   : > { %12254 = vmatpush3.bf16.msra.mxu1 %v14981_v47  ;;  %12368 = vmatpush3.bf16.msra.mxu0 %v14986_v26  ;;  %v14993_v0 = vld [vmem:[#allocation10 + $0x28] sm:$0xff]   ;;  %v14999_v26 = vld [vmem:[#allocation10 + $0x78] sm:$0xff]  }
 0xef4   : > { %12255 = vmatprep.subr.bf16.mxu1 %v14983_v7  ;;  %12369 = vmatprep.subr.bf16.mxu0 %v14988_v28  ;;  %v14996_v7 = vld [vmem:[#allocation10 + $0xf0] sm:$0xff]   ;;  %v15001_v28 = vld [vmem:[#allocation10 + $0x38] sm:$0xff]  }
 0xef7   : > { %12256 = vmatpush3.bf16.msra.mxu1 %v14985_v37  ;;  %12370 = vmatpush3.bf16.msra.mxu0 %v14990_v1  ;;  %v14998_v37 = vld [vmem:[#allocation10 + $0xb0] sm:$0xff]  }
 0xef8   : > { %9813 = vmatmul.mubr.bf16.gmra.mrb[232].mxu1 %v9487_v48  ;;  %10006 = vmatmul.mubr.bf16.gmra.mrb[228].mxu0 %v9487_v48 }
 0xef9   : > { %9822 = vmatprep.mubr.bf16.mxu1 %v21157_v15  ;;  %10015 = vmatprep.mubr.bf16.mxu0 %v21157_v15 }
 0xefa   : > { %12257 = vmatprep.subr.bf16.mxu1 %v14987_v25  ;;  %12371 = vmatprep.subr.bf16.mxu0 %v14992_v53  ;;  %v15000_v25 = vld [vmem:[#allocation10 + $0xf8] sm:$0xff]  }
 0xefb   : > { %12258 = vmatpush3.bf16.msra.mxu1 %v14989_v50  ;;  %12372 = vmatpush3.bf16.msra.mxu0 %v14994_v61 }
 0xefc   : > { %12259 = vmatprep.subr.bf16.mxu1 %v14991_v36  ;;  %12373 = vmatprep.subr.bf16.mxu0 %v14996_v7 }
 0xeff   : > { %12260 = vmatpush3.bf16.msra.mxu1 %v14993_v0  ;;  %12374 = vmatpush3.bf16.msra.mxu0 %v14998_v37 }
 0xf00   : > { %12261 = vmatprep.subr.bf16.mxu1 %v14995_v5  ;;  %12375 = vmatprep.subr.bf16.mxu0 %v15000_v25 }
 0xf01   : > { %v9243_v12 = vpop.xlane.xlu1 %9242 }
 0xf02   : > { %v9290_v10 = vmul.f32 0.0078125, %v9243_v12 }
 0xf03   : > { %v9245_v51 = vpop.xlane.xlu0 %9244  ;;  %12262 = vmatpush3.bf16.msra.mxu1 %v14997_v49 }
 0xf04   : > { %v9322_v52 = vadd.f32 1e-05, %v9290_v10  ;;  %v9291_v30 = vmul.f32 0.0078125, %v9245_v51  ;;  %v15002_v10 = vld [vmem:[#allocation10 + $0xb8] sm:$0xff]   ;;  %12263 = vmatprep.subr.bf16.mxu1 %v14999_v26 }
 0xf05   : > { %v9247_v43 = vpop.xlane.xlu1 %9246  ;;  %12376 = vmatpush3.bf16.msra.mxu0 %v15002_v10 }
 0xf06   : > { %15611 = vrsqrt.f32 %v9322_v52  ;;  %v9323_v48 = vadd.f32 1e-05, %v9291_v30  ;;  %v9292_v6 = vmul.f32 0.0078125, %v9247_v43 }
 0xf07   : > { %v9249_v27 = vpop.xlane.xlu0 %9248  ;;  %12264 = vmatpush3.bf16.msra.mxu1 %v15001_v28 }
 0xf08   : > { %15613 = vrsqrt.f32 %v9323_v48  ;;  %v9324_v44 = vadd.f32 1e-05, %v9292_v6  ;;  %v9293_v3 = vmul.f32 0.0078125, %v9249_v27 }
 0xf0a   : > { %15615 = vrsqrt.f32 %v9324_v44  ;;  %v9325_v47 = vadd.f32 1e-05, %v9293_v3 }
 0xf0c   : > { %15617 = vrsqrt.f32 %v9325_v47 }
 0xf10   : > { %v15612_v12 = vpop.eup %15611 }
 0xf11   : > { %v9386_v51 = vmul.f32 %v15612_v12, %v19993_v42 }
 0xf12   : > { %v15614_v50 = vpop.eup %15613 }
 0xf13   : > { %v9387_v1 = vmul.f32 %v15614_v50, %v19996_v14  ;;  %v9425_v52 = vmul.f32 %v20015_v19, %v9386_v51 }
 0xf14   : > { %v15616_v30 = vpop.eup %15615 }
 0xf15   : > { %v9426_v36 = vmul.f32 %v20015_v19, %v9387_v1  ;;  %v9464_v43 = vadd.f32 %v20031_v11, %v9425_v52  ;;  %v9388_v6 = vmul.f32 %v15616_v30, %v20001_v9 }
 0xf16   : > { %v15618_v53 = vpop.eup %15617 }
 0xf17   : > { %v9465_v48 = vadd.f32 %v20031_v11, %v9426_v36  ;;  %v9389_v42 = vmul.f32 %v15618_v53, %v20006_v41  ;;  %v9427_v14 = vmul.f32 %v20015_v19, %v9388_v6 }
 0xf19   : > { %v9488_v27 = vpack.c.bf16 %v9465_v48, %v9464_v43  ;;  %v9428_v44 = vmul.f32 %v20015_v19, %v9389_v42  ;;  %v9466_v0 = vadd.f32 %v20031_v11, %v9427_v14 }
 0xf1b   : > { %9823 = vmatmul.mubr.bf16.gmra.mrb[236].mxu1 %v9488_v27  ;;  %10016 = vmatmul.mubr.bf16.gmra.mrb[232].mxu0 %v9488_v27  ;;  %v9467_v3 = vadd.f32 %v20031_v11, %v9428_v44 }
 0xf1c   : > { %9832 = vmatprep.mubr.bf16.mxu1 %v21157_v15  ;;  %10025 = vmatprep.mubr.bf16.mxu0 %v21157_v15 }
 0xf1d   : > { %v9489_v61 = vpack.c.bf16 %v9467_v3, %v9466_v0 }
 0xf23   : > { %9833 = vmatmul.mubr.bf16.gmra.mrb[240].mxu1 %v9489_v61  ;;  %10026 = vmatmul.mubr.bf16.gmra.mrb[236].mxu0 %v9489_v61 }
 0xf24   : > { %9842 = vmatprep.mubr.bf16.mxu1 %v21157_v15  ;;  %10035 = vmatprep.mubr.bf16.mxu0 %v21157_v15 }
 0xf3e   : > { %v9251_v9 = vpop.xlane.xlu1 %9250 }
 0xf3f   : > { %v9294_v41 = vmul.f32 0.0078125, %v9251_v9 }
 0xf40   : > { %v9253_v47 = vpop.xlane.xlu0 %9252 }
 0xf41   : > { %v9326_v5 = vadd.f32 1e-05, %v9294_v41  ;;  %v9295_v7 = vmul.f32 0.0078125, %v9253_v47 }
 0xf43   : > { %15619 = vrsqrt.f32 %v9326_v5  ;;  %v9327_v49 = vadd.f32 1e-05, %v9295_v7 }
 0xf45   : > { %15621 = vrsqrt.f32 %v9327_v49 }
 0xf46   : > { %v9255_v37 = vpop.xlane.xlu1 %9254 }
 0xf47   : > { %v9296_v26 = vmul.f32 0.0078125, %v9255_v37 }
 0xf48   : > { %v9257_v25 = vpop.xlane.xlu0 %9256 }
 0xf49   : > { %v9328_v12 = vadd.f32 1e-05, %v9296_v26  ;;  %v9297_v28 = vmul.f32 0.0078125, %v9257_v25 }
 0xf4b   : > { %15623 = vrsqrt.f32 %v9328_v12  ;;  %v9329_v10 = vadd.f32 1e-05, %v9297_v28 }
 0xf4d   : > { %v15620_v51 = vpop.eup %15619  ;;  %15625 = vrsqrt.f32 %v9329_v10 }
 0xf4e   : > { %v9259_v50 = vpop.xlane.xlu1 %9258  ;;  %v9390_v1 = vmul.f32 %v15620_v51, %v20019_v59 }
 0xf4f   : > { %v15622_v52 = vpop.eup %15621  ;;  %v9298_v30 = vmul.f32 0.0078125, %v9259_v50 }
 0xf50   : > { %v9261_v36 = vpop.xlane.xlu0 %9260  ;;  %v9391_v53 = vmul.f32 %v15622_v52, %v20024_v33  ;;  %v9429_v43 = vmul.f32 %v20015_v19, %v9390_v1 }
 0xf51   : > { %v9330_v48 = vadd.f32 1e-05, %v9298_v30  ;;  %v9299_v6 = vmul.f32 0.0078125, %v9261_v36 }
 0xf52   : > { %v9430_v42 = vmul.f32 %v20015_v19, %v9391_v53  ;;  %v9468_v44 = vadd.f32 %v20031_v11, %v9429_v43 }
 0xf53   : > { %15627 = vrsqrt.f32 %v9330_v48  ;;  %v9331_v27 = vadd.f32 1e-05, %v9299_v6 }
 0xf54   : > { %v9469_v14 = vadd.f32 %v20031_v11, %v9430_v42 }
 0xf55   : > { %v15624_v3 = vpop.eup %15623  ;;  %15629 = vrsqrt.f32 %v9331_v27 }
 0xf56   : > { %v9263_v59 = vpop.xlane.xlu1 %9262  ;;  %v9490_v0 = vpack.c.bf16 %v9469_v14, %v9468_v44  ;;  %v9392_v61 = vmul.f32 %v15624_v3, %v20039_v31 }
 0xf57   : > { %v15626_v9 = vpop.eup %15625  ;;  %v9300_v33 = vmul.f32 0.0078125, %v9263_v59 }
 0xf58   : > { %9843 = vmatmul.mubr.bf16.gmra.mrb[244].mxu1 %v9490_v0  ;;  %10036 = vmatmul.mubr.bf16.gmra.mrb[240].mxu0 %v9490_v0  ;;  %v9265_v41 = vpop.xlane.xlu0 %9264  ;;  %v9393_v47 = vmul.f32 %v15626_v9, %v20042_v4  ;;  %v9431_v5 = vmul.f32 %v20015_v19, %v9392_v61 }
 0xf59   : > { %v9332_v7 = vadd.f32 1e-05, %v9300_v33  ;;  %v9301_v49 = vmul.f32 0.0078125, %v9265_v41  ;;  %9852 = vmatprep.mubr.bf16.mxu1 %v21157_v15  ;;  %10045 = vmatprep.mubr.bf16.mxu0 %v21157_v15 }
 0xf5a   : > { %v9432_v37 = vmul.f32 %v20015_v19, %v9393_v47  ;;  %v9470_v31 = vadd.f32 %v20031_v11, %v9431_v5 }
 0xf5b   : > { %15631 = vrsqrt.f32 %v9332_v7  ;;  %v9333_v26 = vadd.f32 1e-05, %v9301_v49 }
 0xf5c   : > { %v9471_v25 = vadd.f32 %v20031_v11, %v9432_v37 }
 0xf5d   : > { %v15628_v12 = vpop.eup %15627  ;;  %15633 = vrsqrt.f32 %v9333_v26 }
 0xf5e   : > { %v9267_v28 = vpop.xlane.xlu1 %9266  ;;  %v9491_v4 = vpack.c.bf16 %v9471_v25, %v9470_v31  ;;  %v9394_v10 = vmul.f32 %v15628_v12, %v20051_v20 }
 0xf5f   : > { %v15630_v51 = vpop.eup %15629  ;;  %v9302_v50 = vmul.f32 0.0078125, %v9267_v28 }
 0xf60   : > { %9853 = vmatmul.mubr.bf16.gmra.mrb[248].mxu1 %v9491_v4  ;;  %10046 = vmatmul.mubr.bf16.gmra.mrb[244].mxu0 %v9491_v4  ;;  %v9269_v1 = vpop.xlane.xlu0 %9268  ;;  %v9395_v52 = vmul.f32 %v15630_v51, %v20055_v38  ;;  %v9433_v30 = vmul.f32 %v20015_v19, %v9394_v10 }
 0xf61   : > { %v9334_v36 = vadd.f32 1e-05, %v9302_v50  ;;  %v9303_v53 = vmul.f32 0.0078125, %v9269_v1  ;;  %9862 = vmatprep.mubr.bf16.mxu1 %v21157_v15  ;;  %10055 = vmatprep.mubr.bf16.mxu0 %v21157_v15 }
 0xf62   : > { %v9434_v43 = vmul.f32 %v20015_v19, %v9395_v52  ;;  %v9472_v20 = vadd.f32 %v20031_v11, %v9433_v30 }
 0xf63   : > { %15635 = vrsqrt.f32 %v9334_v36  ;;  %v9335_v48 = vadd.f32 1e-05, %v9303_v53 }
 0xf64   : > { %v9473_v6 = vadd.f32 %v20031_v11, %v9434_v43 }
 0xf65   : > { %v15632_v42 = vpop.eup %15631  ;;  %15637 = vrsqrt.f32 %v9335_v48 }
 0xf66   : > { %v9396_v38 = vmul.f32 %v15632_v42, %v20067_v63  ;;  %v9271_v27 = vpop.xlane.xlu1 %9270  ;;  %v9492_v44 = vpack.c.bf16 %v9473_v6, %v9472_v20 }
 0xf67   : > { %v15634_v14 = vpop.eup %15633  ;;  %v9304_v3 = vmul.f32 0.0078125, %v9271_v27 }
 0xf68   : > { %v9435_v59 = vmul.f32 %v20015_v19, %v9396_v38  ;;  %v9397_v0 = vmul.f32 %v15634_v14, %v20071_v23  ;;  %9863 = vmatmul.mubr.bf16.gmra.mrb[252].mxu1 %v9492_v44  ;;  %10056 = vmatmul.mubr.bf16.gmra.mrb[248].mxu0 %v9492_v44  ;;  %v9273_v61 = vpop.xlane.xlu0 %9272 }
 0xf69   : > { %v9336_v9 = vadd.f32 1e-05, %v9304_v3  ;;  %v9305_v33 = vmul.f32 0.0078125, %v9273_v61  ;;  %9872 = vmatprep.mubr.bf16.mxu1 %v21157_v15  ;;  %10065 = vmatprep.mubr.bf16.mxu0 %v21157_v15 }
 0xf6a   : > { %v9436_v41 = vmul.f32 %v20015_v19, %v9397_v0  ;;  %v9474_v47 = vadd.f32 %v20031_v11, %v9435_v59 }
 0xf6b   : > { %15639 = vrsqrt.f32 %v9336_v9  ;;  %v9337_v63 = vadd.f32 1e-05, %v9305_v33 }
 0xf6c   : > { %v9475_v5 = vadd.f32 %v20031_v11, %v9436_v41 }
 0xf6d   : > { %v15636_v7 = vpop.eup %15635  ;;  %15641 = vrsqrt.f32 %v9337_v63 }
 0xf6e   : > { %v9493_v23 = vpack.c.bf16 %v9475_v5, %v9474_v47  ;;  %v9398_v49 = vmul.f32 %v15636_v7, %v20085_v21 }
 0xf6f   : > { %v15638_v37 = vpop.eup %15637 }
 0xf70   : > { %v9437_v26 = vmul.f32 %v20015_v19, %v9398_v49  ;;  %v9399_v31 = vmul.f32 %v15638_v37, %v20089_v24  ;;  %9873 = vmatmul.mubr.bf16.gmra.mrb[0].mxu1 %v9493_v23  ;;  %10066 = vmatmul.mubr.bf16.gmra.mrb[252].mxu0 %v9493_v23 }
 0xf71   : > { %9882 = vmatprep.mubr.bf16.mxu1 %v21157_v15  ;;  %10075 = vmatprep.mubr.bf16.mxu0 %v21157_v15 }
 0xf72   : > { %v9438_v25 = vmul.f32 %v20015_v19, %v9399_v31  ;;  %v9476_v12 = vadd.f32 %v20031_v11, %v9437_v26 }
 0xf74   : > { %v9477_v28 = vadd.f32 %v20031_v11, %v9438_v25 }
 0xf75   : > { %v15640_v4 = vpop.eup %15639 }
 0xf76   : > { %v9494_v10 = vpack.c.bf16 %v9477_v28, %v9476_v12  ;;  %v9400_v21 = vmul.f32 %v15640_v4, %v20103_v22  ;;  %v21190_v22 = vld [vmem:[#allocation82_spill] sm:$0xff] }
 0xf77   : > { %v15642_v51 = vpop.eup %15641  ;;  %v9532_v53 = vsub.s32 0, %v21190_v22  ;;  %v9540_v43 = vsub.s32 2, %v21190_v22  ;;  %v9536_v48 = vsub.s32 1, %v21190_v22 }
 0xf78   : > { %v9439_v50 = vmul.f32 %v20015_v19, %v9400_v21  ;;  %v9401_v24 = vmul.f32 %v15642_v51, %v20107_v2  ;;  %9883 = vmatmul.mubr.bf16.gmra.mrb[4].mxu1 %v9494_v10  ;;  %10076 = vmatmul.mubr.bf16.gmra.mrb[0].mxu0 %v9494_v10  ;;  %v9528_v2 = vld [vmem:[%s21191_s17] sm:$0xf]  ;;  %s15823_s17 = scalar_lea.vmem %s15822_s29, 8192 }
 0xf79   : > { %9892 = vmatprep.mubr.bf16.mxu1 %v21157_v15  ;;  %10085 = vmatprep.mubr.bf16.mxu0 %v21157_v15  ;;  %v9544_v15 = vsub.s32 3, %v21190_v22  ;;  %v20217_v20 = vrot.slane %v9528_v2, %v9540_v43  ;;  %p15825_p2 = scmp.lt.s32.totalorder %s15823_s17, %s15817_s25 }
 0xf7a   : > { %v9440_v1 = vmul.f32 %v20015_v19, %v9401_v24  ;;  %v9478_v52 = vadd.f32 %v20031_v11, %v9439_v50  ;;  %v20215_v19 = vrot.slane %v9528_v2, %v9532_v53 }
 0xf7b   : > { %v20221_v6 = vrot.slane %v9528_v2, %v9544_v15  ;;  %p15826_p1 = por %p15825_p2, %p15824_p12 }
 0xf7c   : > { %v9479_v30 = vadd.f32 %v20031_v11, %v9440_v1  ;;  %v20219_v11 = vrot.slane %v9528_v2, %v9536_v48 }
 0xf7d   : > { %p15827_p13 = pnand %p15826_p1, %p15820_p7 }
 0xf7e   : > { %v9495_v36 = vpack.c.bf16 %v9479_v30, %v9478_v52 }
 0xf80   : > { %9893 = vmatmul.mubr.bf16.gmra.mrb[8].mxu1 %v9495_v36  ;;  %10086 = vmatmul.mubr.bf16.gmra.mrb[4].mxu0 %v9495_v36 }
 0xf88   : > { %v9744_v42 = vpop.f32.mrb[204].mxu1  ;;  %v9937_v38 = vpop.f32.mrb[200].mxu0 }
 0xf89   : > { %v9745_v27 = vadd.f32 %v9744_v42, %v20215_v19  ;;  %v9938_v44 = vadd.f32 %v9937_v38, %v20217_v20  ;;  %v9746_v14 = vpop.f32.mrb[205].mxu1  ;;  %v9939_v3 = vpop.f32.mrb[201].mxu0 }
 0xf8a   : > { %v9747_v59 = vadd.f32 %v9746_v14, %v20219_v11  ;;  %v9940_v0 = vadd.f32 %v9939_v3, %v20221_v6  ;;  %v9748_v61 = vpop.f32.mrb[206].mxu1  ;;  %v9941_v9 = vpop.f32.mrb[202].mxu0 }
 0xf8b   : > { %v9749_v33 = vadd.f32 %v9748_v61, %v20215_v19  ;;  %v9942_v41 = vadd.f32 %v9941_v9, %v20217_v20  ;;  %v9750_v63 = vpop.f32.mrb[207].mxu1  ;;  %v9943_v47 = vpop.f32.mrb[203].mxu0  ;;  %v10096_v23 = vmax.f32 %v9745_v27, 0.0  ;;  %v10098_v49 = vmax.f32 %v9938_v44, 0.0 }
 0xf8c   : > { %v9751_v5 = vadd.f32 %v9750_v63, %v20219_v11  ;;  %v9944_v7 = vadd.f32 %v9943_v47, %v20221_v6  ;;  %v10097_v31 = vmax.f32 %v9747_v59, 0.0  ;;  %v10099_v25 = vmax.f32 %v9940_v0, 0.0 }
 0xf8d   : > { %v10100_v37 = vmax.f32 %v9749_v33, 0.0  ;;  %v10102_v26 = vmax.f32 %v9942_v41, 0.0 }
 0xf8e   : > { %v10101_v12 = vmax.f32 %v9751_v5, 0.0  ;;  %v10103_v28 = vmax.f32 %v9944_v7, 0.0 }
 0xf8f   : > { %v10224_v4 = vpack.c.bf16 %v10100_v37, %v10096_v23  ;;  %v10226_v10 = vpack.c.bf16 %v10102_v26, %v10098_v49 }
 0xf90   : > { %v10225_v21 = vpack.c.bf16 %v10101_v12, %v10097_v31  ;;  %v10227_v51 = vpack.c.bf16 %v10103_v28, %v10099_v25 }
 0xf92   : > { %10583 = vmatprep.mubr.bf16.mxu1 %v10225_v21  ;;  %10744 = vmatprep.mubr.bf16.mxu0 %v10227_v51 }
 0xf93   : > { %10584 = vmatmul.mubr.bf16.vlgmr.msra.gmra.mrb[12].mxu1 %v10224_v4  ;;  %10745 = vmatmul.mubr.bf16.vlgmr.msra.gmra.mrb[8].mxu0 %v10226_v10 }
 0xf9b   : > { %v9754_v50 = vpop.f32.mrb[208].mxu1  ;;  %v9947_v24 = vpop.f32.mrb[204].mxu0 }
 0xf9c   : > { %v9755_v1 = vadd.f32 %v9754_v50, %v20215_v19  ;;  %v9948_v52 = vadd.f32 %v9947_v24, %v20217_v20  ;;  %v9756_v30 = vpop.f32.mrb[209].mxu1  ;;  %v9949_v36 = vpop.f32.mrb[205].mxu0 }
 0xf9d   : > { %v9757_v22 = vadd.f32 %v9756_v30, %v20219_v11  ;;  %v9950_v53 = vadd.f32 %v9949_v36, %v20221_v6  ;;  %v9758_v43 = vpop.f32.mrb[210].mxu1  ;;  %v9951_v2 = vpop.f32.mrb[206].mxu0 }
 0xf9e   : > { %v9759_v48 = vadd.f32 %v9758_v43, %v20215_v19  ;;  %v9952_v15 = vadd.f32 %v9951_v2, %v20217_v20  ;;  %v9760_v42 = vpop.f32.mrb[211].mxu1  ;;  %v9953_v38 = vpop.f32.mrb[207].mxu0  ;;  %v10104_v14 = vmax.f32 %v9755_v1, 0.0  ;;  %v10106_v3 = vmax.f32 %v9948_v52, 0.0 }
 0xf9f   : > { %v9761_v27 = vadd.f32 %v9760_v42, %v20219_v11  ;;  %v9954_v44 = vadd.f32 %v9953_v38, %v20221_v6  ;;  %v10105_v61 = vmax.f32 %v9757_v22, 0.0  ;;  %v10107_v9 = vmax.f32 %v9950_v53, 0.0 }
 0xfa0   : > { %v10108_v59 = vmax.f32 %v9759_v48, 0.0  ;;  %v10110_v0 = vmax.f32 %v9952_v15, 0.0 }
 0xfa1   : > { %v10109_v33 = vmax.f32 %v9761_v27, 0.0  ;;  %v10111_v41 = vmax.f32 %v9954_v44, 0.0 }
 0xfa2   : > { %v10228_v63 = vpack.c.bf16 %v10108_v59, %v10104_v14  ;;  %v10230_v47 = vpack.c.bf16 %v10110_v0, %v10106_v3 }
 0xfa3   : > { %v10229_v5 = vpack.c.bf16 %v10109_v33, %v10105_v61  ;;  %v10231_v7 = vpack.c.bf16 %v10111_v41, %v10107_v9  ;;  %v9764_v23 = vpop.f32.mrb[212].mxu1  ;;  %v9957_v49 = vpop.f32.mrb[208].mxu0 }
 0xfa4   : > { %v9765_v37 = vadd.f32 %v9764_v23, %v20215_v19  ;;  %v9958_v26 = vadd.f32 %v9957_v49, %v20217_v20  ;;  %v9766_v31 = vpop.f32.mrb[213].mxu1  ;;  %v9959_v25 = vpop.f32.mrb[209].mxu0 }
 0xfa5   : > { %v9767_v12 = vadd.f32 %v9766_v31, %v20219_v11  ;;  %v9960_v28 = vadd.f32 %v9959_v25, %v20221_v6  ;;  %v9768_v4 = vpop.f32.mrb[214].mxu1  ;;  %v9961_v10 = vpop.f32.mrb[210].mxu0  ;;  %10591 = vmatprep.mubr.bf16.mxu1 %v10229_v5  ;;  %10752 = vmatprep.mubr.bf16.mxu0 %v10231_v7 }
 0xfa6   : > { %v9769_v21 = vadd.f32 %v9768_v4, %v20215_v19  ;;  %v9962_v51 = vadd.f32 %v9961_v10, %v20217_v20  ;;  %v9770_v50 = vpop.f32.mrb[215].mxu1  ;;  %v9963_v24 = vpop.f32.mrb[211].mxu0  ;;  %10592 = vmatmul.mubr.bf16.gmra.mrb[16].mxu1 %v10228_v63  ;;  %10753 = vmatmul.mubr.bf16.gmra.mrb[12].mxu0 %v10230_v47  ;;  %v10112_v30 = vmax.f32 %v9765_v37, 0.0  ;;  %v10114_v36 = vmax.f32 %v9958_v26, 0.0 }
 0xfa7   : > { %v9771_v1 = vadd.f32 %v9770_v50, %v20219_v11  ;;  %v9964_v52 = vadd.f32 %v9963_v24, %v20221_v6  ;;  %v10113_v43 = vmax.f32 %v9767_v12, 0.0  ;;  %v10115_v2 = vmax.f32 %v9960_v28, 0.0 }
 0xfa8   : > { %v10116_v22 = vmax.f32 %v9769_v21, 0.0  ;;  %v10118_v53 = vmax.f32 %v9962_v51, 0.0 }
 0xfa9   : > { %v10117_v48 = vmax.f32 %v9771_v1, 0.0  ;;  %v10119_v15 = vmax.f32 %v9964_v52, 0.0 }
 0xfaa   : > { %v10232_v42 = vpack.c.bf16 %v10116_v22, %v10112_v30  ;;  %v10234_v38 = vpack.c.bf16 %v10118_v53, %v10114_v36 }
 0xfab   : > { %v10233_v27 = vpack.c.bf16 %v10117_v48, %v10113_v43  ;;  %v10235_v44 = vpack.c.bf16 %v10119_v15, %v10115_v2  ;;  %v9774_v14 = vpop.f32.mrb[216].mxu1  ;;  %v9967_v3 = vpop.f32.mrb[212].mxu0 }
 0xfac   : > { %v9775_v59 = vadd.f32 %v9774_v14, %v20215_v19  ;;  %v9968_v0 = vadd.f32 %v9967_v3, %v20217_v20  ;;  %v9776_v61 = vpop.f32.mrb[217].mxu1  ;;  %v9969_v9 = vpop.f32.mrb[213].mxu0 }
 0xfad   : > { %v9777_v33 = vadd.f32 %v9776_v61, %v20219_v11  ;;  %v9970_v41 = vadd.f32 %v9969_v9, %v20221_v6  ;;  %v9778_v63 = vpop.f32.mrb[218].mxu1  ;;  %v9971_v47 = vpop.f32.mrb[214].mxu0  ;;  %10599 = vmatprep.mubr.bf16.mxu1 %v10233_v27  ;;  %10760 = vmatprep.mubr.bf16.mxu0 %v10235_v44 }
 0xfae   : > { %v9779_v5 = vadd.f32 %v9778_v63, %v20215_v19  ;;  %v9972_v7 = vadd.f32 %v9971_v47, %v20217_v20  ;;  %v9780_v23 = vpop.f32.mrb[219].mxu1  ;;  %v9973_v49 = vpop.f32.mrb[215].mxu0  ;;  %10600 = vmatmul.mubr.bf16.gmra.mrb[20].mxu1 %v10232_v42  ;;  %10761 = vmatmul.mubr.bf16.gmra.mrb[16].mxu0 %v10234_v38  ;;  %v10120_v31 = vmax.f32 %v9775_v59, 0.0  ;;  %v10122_v25 = vmax.f32 %v9968_v0, 0.0 }
 0xfaf   : > { %v9781_v37 = vadd.f32 %v9780_v23, %v20219_v11  ;;  %v9974_v26 = vadd.f32 %v9973_v49, %v20221_v6  ;;  %v10121_v4 = vmax.f32 %v9777_v33, 0.0  ;;  %v10123_v10 = vmax.f32 %v9970_v41, 0.0 }
 0xfb0   : > { %v10124_v12 = vmax.f32 %v9779_v5, 0.0  ;;  %v10126_v28 = vmax.f32 %v9972_v7, 0.0 }
 0xfb1   : > { %v10125_v21 = vmax.f32 %v9781_v37, 0.0  ;;  %v10127_v51 = vmax.f32 %v9974_v26, 0.0 }
 0xfb2   : > { %v10236_v50 = vpack.c.bf16 %v10124_v12, %v10120_v31  ;;  %v10238_v24 = vpack.c.bf16 %v10126_v28, %v10122_v25 }
 0xfb3   : > { %v10237_v1 = vpack.c.bf16 %v10125_v21, %v10121_v4  ;;  %v10239_v52 = vpack.c.bf16 %v10127_v51, %v10123_v10  ;;  %v9784_v30 = vpop.f32.mrb[220].mxu1  ;;  %v9977_v36 = vpop.f32.mrb[216].mxu0 }
 0xfb4   : > { %v9785_v22 = vadd.f32 %v9784_v30, %v20215_v19  ;;  %v9978_v53 = vadd.f32 %v9977_v36, %v20217_v20  ;;  %v9786_v43 = vpop.f32.mrb[221].mxu1  ;;  %v9979_v2 = vpop.f32.mrb[217].mxu0 }
 0xfb5   : > { %v9787_v48 = vadd.f32 %v9786_v43, %v20219_v11  ;;  %v9980_v15 = vadd.f32 %v9979_v2, %v20221_v6  ;;  %v9788_v42 = vpop.f32.mrb[222].mxu1  ;;  %v9981_v38 = vpop.f32.mrb[218].mxu0  ;;  %10607 = vmatprep.mubr.bf16.mxu1 %v10237_v1  ;;  %10768 = vmatprep.mubr.bf16.mxu0 %v10239_v52 }
 0xfb6   : > { %v9789_v27 = vadd.f32 %v9788_v42, %v20215_v19  ;;  %v9982_v44 = vadd.f32 %v9981_v38, %v20217_v20  ;;  %v9790_v14 = vpop.f32.mrb[223].mxu1  ;;  %v9983_v3 = vpop.f32.mrb[219].mxu0  ;;  %10608 = vmatmul.mubr.bf16.gmra.mrb[24].mxu1 %v10236_v50  ;;  %10769 = vmatmul.mubr.bf16.gmra.mrb[20].mxu0 %v10238_v24  ;;  %v10128_v61 = vmax.f32 %v9785_v22, 0.0  ;;  %v10130_v9 = vmax.f32 %v9978_v53, 0.0 }
 0xfb7   : > { %v9791_v59 = vadd.f32 %v9790_v14, %v20219_v11  ;;  %v9984_v0 = vadd.f32 %v9983_v3, %v20221_v6  ;;  %v10129_v63 = vmax.f32 %v9787_v48, 0.0  ;;  %v10131_v47 = vmax.f32 %v9980_v15, 0.0 }
 0xfb8   : > { %v10132_v33 = vmax.f32 %v9789_v27, 0.0  ;;  %v10134_v41 = vmax.f32 %v9982_v44, 0.0 }
 0xfb9   : > { %v10133_v5 = vmax.f32 %v9791_v59, 0.0  ;;  %v10135_v7 = vmax.f32 %v9984_v0, 0.0 }
 0xfba   : > { %v10240_v23 = vpack.c.bf16 %v10132_v33, %v10128_v61  ;;  %v10242_v49 = vpack.c.bf16 %v10134_v41, %v10130_v9 }
 0xfbb   : > { %v10241_v37 = vpack.c.bf16 %v10133_v5, %v10129_v63  ;;  %v10243_v26 = vpack.c.bf16 %v10135_v7, %v10131_v47  ;;  %v9794_v31 = vpop.f32.mrb[224].mxu1  ;;  %v9987_v25 = vpop.f32.mrb[220].mxu0 }
 0xfbc   : > { %v9795_v12 = vadd.f32 %v9794_v31, %v20215_v19  ;;  %v9988_v28 = vadd.f32 %v9987_v25, %v20217_v20  ;;  %v9796_v4 = vpop.f32.mrb[225].mxu1  ;;  %v9989_v10 = vpop.f32.mrb[221].mxu0 }
 0xfbd   : > { %v9797_v21 = vadd.f32 %v9796_v4, %v20219_v11  ;;  %v9990_v51 = vadd.f32 %v9989_v10, %v20221_v6  ;;  %v9798_v50 = vpop.f32.mrb[226].mxu1  ;;  %v9991_v24 = vpop.f32.mrb[222].mxu0  ;;  %10615 = vmatprep.mubr.bf16.mxu1 %v10241_v37  ;;  %10776 = vmatprep.mubr.bf16.mxu0 %v10243_v26 }
 0xfbe   : > { %v9799_v1 = vadd.f32 %v9798_v50, %v20215_v19  ;;  %v9992_v52 = vadd.f32 %v9991_v24, %v20217_v20  ;;  %v9800_v30 = vpop.f32.mrb[227].mxu1  ;;  %v9993_v36 = vpop.f32.mrb[223].mxu0  ;;  %10616 = vmatmul.mubr.bf16.gmra.mrb[28].mxu1 %v10240_v23  ;;  %10777 = vmatmul.mubr.bf16.gmra.mrb[24].mxu0 %v10242_v49  ;;  %v10136_v43 = vmax.f32 %v9795_v12, 0.0  ;;  %v10138_v2 = vmax.f32 %v9988_v28, 0.0 }
 0xfbf   : > { %v9801_v22 = vadd.f32 %v9800_v30, %v20219_v11  ;;  %v9994_v53 = vadd.f32 %v9993_v36, %v20221_v6  ;;  %v10137_v42 = vmax.f32 %v9797_v21, 0.0  ;;  %v10139_v38 = vmax.f32 %v9990_v51, 0.0 }
 0xfc0   : > { %v10140_v48 = vmax.f32 %v9799_v1, 0.0  ;;  %v10142_v15 = vmax.f32 %v9992_v52, 0.0 }
 0xfc1   : > { %v10141_v27 = vmax.f32 %v9801_v22, 0.0  ;;  %v10143_v44 = vmax.f32 %v9994_v53, 0.0 }
 0xfc2   : > { %v10244_v14 = vpack.c.bf16 %v10140_v48, %v10136_v43  ;;  %v10246_v3 = vpack.c.bf16 %v10142_v15, %v10138_v2 }
 0xfc3   : > { %v10245_v59 = vpack.c.bf16 %v10141_v27, %v10137_v42  ;;  %v10247_v0 = vpack.c.bf16 %v10143_v44, %v10139_v38  ;;  %v9804_v61 = vpop.f32.mrb[228].mxu1  ;;  %v9997_v9 = vpop.f32.mrb[224].mxu0 }
 0xfc4   : > { %v9805_v33 = vadd.f32 %v9804_v61, %v20215_v19  ;;  %v9998_v41 = vadd.f32 %v9997_v9, %v20217_v20  ;;  %v9806_v63 = vpop.f32.mrb[229].mxu1  ;;  %v9999_v47 = vpop.f32.mrb[225].mxu0 }
 0xfc5   : > { %v9807_v5 = vadd.f32 %v9806_v63, %v20219_v11  ;;  %v10000_v7 = vadd.f32 %v9999_v47, %v20221_v6  ;;  %v9808_v23 = vpop.f32.mrb[230].mxu1  ;;  %v10001_v49 = vpop.f32.mrb[226].mxu0  ;;  %10623 = vmatprep.mubr.bf16.mxu1 %v10245_v59  ;;  %10784 = vmatprep.mubr.bf16.mxu0 %v10247_v0 }
 0xfc6   : > { %v9809_v37 = vadd.f32 %v9808_v23, %v20215_v19  ;;  %v10002_v26 = vadd.f32 %v10001_v49, %v20217_v20  ;;  %v9810_v31 = vpop.f32.mrb[231].mxu1  ;;  %v10003_v25 = vpop.f32.mrb[227].mxu0  ;;  %10624 = vmatmul.mubr.bf16.gmra.mrb[32].mxu1 %v10244_v14  ;;  %10785 = vmatmul.mubr.bf16.gmra.mrb[28].mxu0 %v10246_v3  ;;  %v10144_v4 = vmax.f32 %v9805_v33, 0.0  ;;  %v10146_v10 = vmax.f32 %v9998_v41, 0.0 }
 0xfc7   : > { %v9811_v12 = vadd.f32 %v9810_v31, %v20219_v11  ;;  %v10004_v28 = vadd.f32 %v10003_v25, %v20221_v6  ;;  %v10145_v50 = vmax.f32 %v9807_v5, 0.0  ;;  %v10147_v24 = vmax.f32 %v10000_v7, 0.0 }
 0xfc8   : > { %v10148_v21 = vmax.f32 %v9809_v37, 0.0  ;;  %v10150_v51 = vmax.f32 %v10002_v26, 0.0 }
 0xfc9   : > { %v10149_v1 = vmax.f32 %v9811_v12, 0.0  ;;  %v10151_v52 = vmax.f32 %v10004_v28, 0.0 }
 0xfca   : > { %v10248_v30 = vpack.c.bf16 %v10148_v21, %v10144_v4  ;;  %v10250_v36 = vpack.c.bf16 %v10150_v51, %v10146_v10 }
 0xfcb   : > { %v10249_v22 = vpack.c.bf16 %v10149_v1, %v10145_v50  ;;  %v10251_v53 = vpack.c.bf16 %v10151_v52, %v10147_v24  ;;  %v9814_v43 = vpop.f32.mrb[232].mxu1  ;;  %v10007_v2 = vpop.f32.mrb[228].mxu0 }
 0xfcc   : > { %v9815_v48 = vadd.f32 %v9814_v43, %v20215_v19  ;;  %v10008_v15 = vadd.f32 %v10007_v2, %v20217_v20  ;;  %v9816_v42 = vpop.f32.mrb[233].mxu1  ;;  %v10009_v38 = vpop.f32.mrb[229].mxu0 }
 0xfcd   : > { %v9817_v27 = vadd.f32 %v9816_v42, %v20219_v11  ;;  %v10010_v44 = vadd.f32 %v10009_v38, %v20221_v6  ;;  %v9818_v14 = vpop.f32.mrb[234].mxu1  ;;  %v10011_v3 = vpop.f32.mrb[230].mxu0  ;;  %10631 = vmatprep.mubr.bf16.mxu1 %v10249_v22  ;;  %10792 = vmatprep.mubr.bf16.mxu0 %v10251_v53 }
 0xfce   : > { %v9819_v59 = vadd.f32 %v9818_v14, %v20215_v19  ;;  %v10012_v0 = vadd.f32 %v10011_v3, %v20217_v20  ;;  %v9820_v61 = vpop.f32.mrb[235].mxu1  ;;  %v10013_v9 = vpop.f32.mrb[231].mxu0  ;;  %10632 = vmatmul.mubr.bf16.gmra.mrb[36].mxu1 %v10248_v30  ;;  %10793 = vmatmul.mubr.bf16.gmra.mrb[32].mxu0 %v10250_v36  ;;  %v10152_v63 = vmax.f32 %v9815_v48, 0.0  ;;  %v10154_v47 = vmax.f32 %v10008_v15, 0.0 }
 0xfcf   : > { %v9821_v33 = vadd.f32 %v9820_v61, %v20219_v11  ;;  %v10014_v41 = vadd.f32 %v10013_v9, %v20221_v6  ;;  %v10153_v23 = vmax.f32 %v9817_v27, 0.0  ;;  %v10155_v49 = vmax.f32 %v10010_v44, 0.0 }
 0xfd0   : > { %v10156_v5 = vmax.f32 %v9819_v59, 0.0  ;;  %v10158_v7 = vmax.f32 %v10012_v0, 0.0 }
 0xfd1   : > { %v10157_v37 = vmax.f32 %v9821_v33, 0.0  ;;  %v10159_v26 = vmax.f32 %v10014_v41, 0.0 }
 0xfd2   : > { %v10252_v31 = vpack.c.bf16 %v10156_v5, %v10152_v63  ;;  %v10254_v25 = vpack.c.bf16 %v10158_v7, %v10154_v47 }
 0xfd3   : > { %v10253_v12 = vpack.c.bf16 %v10157_v37, %v10153_v23  ;;  %v10255_v28 = vpack.c.bf16 %v10159_v26, %v10155_v49 }
 0xfd5   : > { %10639 = vmatprep.mubr.bf16.mxu1 %v10253_v12  ;;  %10800 = vmatprep.mubr.bf16.mxu0 %v10255_v28 }
 0xfd6   : > { %10640 = vmatmul.mubr.bf16.gmra.mrb[40].mxu1 %v10252_v31  ;;  %10801 = vmatmul.mubr.bf16.gmra.mrb[36].mxu0 %v10254_v25 }
 0xfee   : > { %v9824_v4 = vpop.f32.mrb[236].mxu1  ;;  %v10017_v10 = vpop.f32.mrb[232].mxu0 }
 0xfef   : > { %v9825_v21 = vadd.f32 %v9824_v4, %v20215_v19  ;;  %v10018_v51 = vadd.f32 %v10017_v10, %v20217_v20  ;;  %v9826_v50 = vpop.f32.mrb[237].mxu1  ;;  %v10019_v24 = vpop.f32.mrb[233].mxu0 }
 0xff0   : > { %v9827_v1 = vadd.f32 %v9826_v50, %v20219_v11  ;;  %v10020_v52 = vadd.f32 %v10019_v24, %v20221_v6  ;;  %v9828_v30 = vpop.f32.mrb[238].mxu1  ;;  %v10021_v36 = vpop.f32.mrb[234].mxu0 }
 0xff1   : > { %v9829_v22 = vadd.f32 %v9828_v30, %v20215_v19  ;;  %v10022_v53 = vadd.f32 %v10021_v36, %v20217_v20  ;;  %v9830_v43 = vpop.f32.mrb[239].mxu1  ;;  %v10023_v2 = vpop.f32.mrb[235].mxu0  ;;  %v10160_v42 = vmax.f32 %v9825_v21, 0.0  ;;  %v10162_v38 = vmax.f32 %v10018_v51, 0.0 }
 0xff2   : > { %v9831_v48 = vadd.f32 %v9830_v43, %v20219_v11  ;;  %v10024_v15 = vadd.f32 %v10023_v2, %v20221_v6  ;;  %v10161_v14 = vmax.f32 %v9827_v1, 0.0  ;;  %v10163_v3 = vmax.f32 %v10020_v52, 0.0 }
 0xff3   : > { %v10164_v27 = vmax.f32 %v9829_v22, 0.0  ;;  %v10166_v44 = vmax.f32 %v10022_v53, 0.0 }
 0xff4   : > { %v10165_v59 = vmax.f32 %v9831_v48, 0.0  ;;  %v10167_v0 = vmax.f32 %v10024_v15, 0.0 }
 0xff5   : > { %v10256_v61 = vpack.c.bf16 %v10164_v27, %v10160_v42  ;;  %v10258_v9 = vpack.c.bf16 %v10166_v44, %v10162_v38 }
 0xff6   : > { %v10257_v33 = vpack.c.bf16 %v10165_v59, %v10161_v14  ;;  %v10259_v41 = vpack.c.bf16 %v10167_v0, %v10163_v3  ;;  %v9834_v63 = vpop.f32.mrb[240].mxu1  ;;  %v10027_v47 = vpop.f32.mrb[236].mxu0 }
 0xff7   : > { %v9835_v5 = vadd.f32 %v9834_v63, %v20215_v19  ;;  %v10028_v7 = vadd.f32 %v10027_v47, %v20217_v20  ;;  %v9836_v23 = vpop.f32.mrb[241].mxu1  ;;  %v10029_v49 = vpop.f32.mrb[237].mxu0 }
 0xff8   : > { %v9837_v37 = vadd.f32 %v9836_v23, %v20219_v11  ;;  %v10030_v26 = vadd.f32 %v10029_v49, %v20221_v6  ;;  %v9838_v31 = vpop.f32.mrb[242].mxu1  ;;  %v10031_v25 = vpop.f32.mrb[238].mxu0  ;;  %10647 = vmatprep.mubr.bf16.mxu1 %v10257_v33  ;;  %10808 = vmatprep.mubr.bf16.mxu0 %v10259_v41 }
 0xff9   : > { %v9839_v12 = vadd.f32 %v9838_v31, %v20215_v19  ;;  %v10032_v28 = vadd.f32 %v10031_v25, %v20217_v20  ;;  %v9840_v4 = vpop.f32.mrb[243].mxu1  ;;  %v10033_v10 = vpop.f32.mrb[239].mxu0  ;;  %10648 = vmatmul.mubr.bf16.gmra.mrb[44].mxu1 %v10256_v61  ;;  %10809 = vmatmul.mubr.bf16.gmra.mrb[40].mxu0 %v10258_v9  ;;  %v10168_v50 = vmax.f32 %v9835_v5, 0.0  ;;  %v10170_v24 = vmax.f32 %v10028_v7, 0.0 }
 0xffa   : > { %v9841_v21 = vadd.f32 %v9840_v4, %v20219_v11  ;;  %v10034_v51 = vadd.f32 %v10033_v10, %v20221_v6  ;;  %v10169_v30 = vmax.f32 %v9837_v37, 0.0  ;;  %v10171_v36 = vmax.f32 %v10030_v26, 0.0 }
 0xffb   : > { %v10172_v1 = vmax.f32 %v9839_v12, 0.0  ;;  %v10174_v52 = vmax.f32 %v10032_v28, 0.0 }
 0xffc   : > { %v10173_v22 = vmax.f32 %v9841_v21, 0.0  ;;  %v10175_v53 = vmax.f32 %v10034_v51, 0.0 }
 0xffd   : > { %v10260_v43 = vpack.c.bf16 %v10172_v1, %v10168_v50  ;;  %v10262_v2 = vpack.c.bf16 %v10174_v52, %v10170_v24 }
 0xffe   : > { %v10261_v48 = vpack.c.bf16 %v10173_v22, %v10169_v30  ;;  %v10263_v15 = vpack.c.bf16 %v10175_v53, %v10171_v36 }
0x1000   : > { %10655 = vmatprep.mubr.bf16.mxu1 %v10261_v48  ;;  %10816 = vmatprep.mubr.bf16.mxu0 %v10263_v15 }
0x1001   : > { %10656 = vmatmul.mubr.bf16.gmra.mrb[48].mxu1 %v10260_v43  ;;  %10817 = vmatmul.mubr.bf16.gmra.mrb[44].mxu0 %v10262_v2 }
0x102b   : > { %v9844_v42 = vpop.f32.mrb[244].mxu1  ;;  %v10037_v38 = vpop.f32.mrb[240].mxu0 }
0x102c   : > { %v9845_v27 = vadd.f32 %v9844_v42, %v20215_v19  ;;  %v10038_v44 = vadd.f32 %v10037_v38, %v20217_v20  ;;  %v9846_v14 = vpop.f32.mrb[245].mxu1  ;;  %v10039_v3 = vpop.f32.mrb[241].mxu0 }
0x102d   : > { %v9847_v59 = vadd.f32 %v9846_v14, %v20219_v11  ;;  %v10040_v0 = vadd.f32 %v10039_v3, %v20221_v6  ;;  %v9848_v61 = vpop.f32.mrb[246].mxu1  ;;  %v10041_v9 = vpop.f32.mrb[242].mxu0 }
0x102e   : > { %v9849_v33 = vadd.f32 %v9848_v61, %v20215_v19  ;;  %v10042_v41 = vadd.f32 %v10041_v9, %v20217_v20  ;;  %v9850_v63 = vpop.f32.mrb[247].mxu1  ;;  %v10043_v47 = vpop.f32.mrb[243].mxu0  ;;  %v10176_v23 = vmax.f32 %v9845_v27, 0.0  ;;  %v10178_v49 = vmax.f32 %v10038_v44, 0.0 }
0x102f   : > { %v9851_v5 = vadd.f32 %v9850_v63, %v20219_v11  ;;  %v10044_v7 = vadd.f32 %v10043_v47, %v20221_v6  ;;  %v10177_v31 = vmax.f32 %v9847_v59, 0.0  ;;  %v10179_v25 = vmax.f32 %v10040_v0, 0.0 }
0x1030   : > { %v10180_v37 = vmax.f32 %v9849_v33, 0.0  ;;  %v10182_v26 = vmax.f32 %v10042_v41, 0.0 }
0x1031   : > { %v10181_v12 = vmax.f32 %v9851_v5, 0.0  ;;  %v10183_v28 = vmax.f32 %v10044_v7, 0.0 }
0x1032   : > { %v10264_v4 = vpack.c.bf16 %v10180_v37, %v10176_v23  ;;  %v10266_v10 = vpack.c.bf16 %v10182_v26, %v10178_v49 }
0x1033   : > { %v10265_v21 = vpack.c.bf16 %v10181_v12, %v10177_v31  ;;  %v10267_v51 = vpack.c.bf16 %v10183_v28, %v10179_v25  ;;  %v9854_v50 = vpop.f32.mrb[248].mxu1  ;;  %v10047_v24 = vpop.f32.mrb[244].mxu0 }
0x1034   : > { %v9855_v1 = vadd.f32 %v9854_v50, %v20215_v19  ;;  %v10048_v52 = vadd.f32 %v10047_v24, %v20217_v20  ;;  %v9856_v30 = vpop.f32.mrb[249].mxu1  ;;  %v10049_v36 = vpop.f32.mrb[245].mxu0 }
0x1035   : > { %v9857_v22 = vadd.f32 %v9856_v30, %v20219_v11  ;;  %v10050_v53 = vadd.f32 %v10049_v36, %v20221_v6  ;;  %v9858_v43 = vpop.f32.mrb[250].mxu1  ;;  %v10051_v2 = vpop.f32.mrb[246].mxu0  ;;  %10663 = vmatprep.mubr.bf16.mxu1 %v10265_v21  ;;  %10824 = vmatprep.mubr.bf16.mxu0 %v10267_v51 }
0x1036   : > { %v9859_v48 = vadd.f32 %v9858_v43, %v20215_v19  ;;  %v10052_v15 = vadd.f32 %v10051_v2, %v20217_v20  ;;  %v9860_v42 = vpop.f32.mrb[251].mxu1  ;;  %v10053_v38 = vpop.f32.mrb[247].mxu0  ;;  %10664 = vmatmul.mubr.bf16.gmra.mrb[52].mxu1 %v10264_v4  ;;  %10825 = vmatmul.mubr.bf16.gmra.mrb[48].mxu0 %v10266_v10  ;;  %v10184_v14 = vmax.f32 %v9855_v1, 0.0  ;;  %v10186_v3 = vmax.f32 %v10048_v52, 0.0 }
0x1037   : > { %v9861_v27 = vadd.f32 %v9860_v42, %v20219_v11  ;;  %v10054_v44 = vadd.f32 %v10053_v38, %v20221_v6  ;;  %v10185_v61 = vmax.f32 %v9857_v22, 0.0  ;;  %v10187_v9 = vmax.f32 %v10050_v53, 0.0 }
0x1038   : > { %v10188_v59 = vmax.f32 %v9859_v48, 0.0  ;;  %v10190_v0 = vmax.f32 %v10052_v15, 0.0 }
0x1039   : > { %v10189_v33 = vmax.f32 %v9861_v27, 0.0  ;;  %v10191_v41 = vmax.f32 %v10054_v44, 0.0 }
0x103a   : > { %v10268_v63 = vpack.c.bf16 %v10188_v59, %v10184_v14  ;;  %v10270_v47 = vpack.c.bf16 %v10190_v0, %v10186_v3 }
0x103b   : > { %v10269_v5 = vpack.c.bf16 %v10189_v33, %v10185_v61  ;;  %v10271_v7 = vpack.c.bf16 %v10191_v41, %v10187_v9  ;;  %v9864_v23 = vpop.f32.mrb[252].mxu1  ;;  %v10057_v49 = vpop.f32.mrb[248].mxu0 }
0x103c   : > { %v9865_v37 = vadd.f32 %v9864_v23, %v20215_v19  ;;  %v10058_v26 = vadd.f32 %v10057_v49, %v20217_v20  ;;  %v9866_v31 = vpop.f32.mrb[253].mxu1  ;;  %v10059_v25 = vpop.f32.mrb[249].mxu0 }
0x103d   : > { %v9867_v12 = vadd.f32 %v9866_v31, %v20219_v11  ;;  %v10060_v28 = vadd.f32 %v10059_v25, %v20221_v6  ;;  %v9868_v4 = vpop.f32.mrb[254].mxu1  ;;  %v10061_v10 = vpop.f32.mrb[250].mxu0  ;;  %10671 = vmatprep.mubr.bf16.mxu1 %v10269_v5  ;;  %10832 = vmatprep.mubr.bf16.mxu0 %v10271_v7 }
0x103e   : > { %v9869_v21 = vadd.f32 %v9868_v4, %v20215_v19  ;;  %v10062_v51 = vadd.f32 %v10061_v10, %v20217_v20  ;;  %v9870_v50 = vpop.f32.mrb[255].mxu1  ;;  %v10063_v24 = vpop.f32.mrb[251].mxu0  ;;  %10672 = vmatmul.mubr.bf16.gmra.mrb[56].mxu1 %v10268_v63  ;;  %10833 = vmatmul.mubr.bf16.gmra.mrb[52].mxu0 %v10270_v47  ;;  %v10192_v30 = vmax.f32 %v9865_v37, 0.0  ;;  %v10194_v36 = vmax.f32 %v10058_v26, 0.0 }
0x103f   : > { %v9871_v1 = vadd.f32 %v9870_v50, %v20219_v11  ;;  %v10064_v52 = vadd.f32 %v10063_v24, %v20221_v6  ;;  %v10193_v43 = vmax.f32 %v9867_v12, 0.0  ;;  %v10195_v2 = vmax.f32 %v10060_v28, 0.0 }
0x1040   : > { %v10196_v22 = vmax.f32 %v9869_v21, 0.0  ;;  %v10198_v53 = vmax.f32 %v10062_v51, 0.0 }
0x1041   : > { %v10197_v48 = vmax.f32 %v9871_v1, 0.0  ;;  %v10199_v15 = vmax.f32 %v10064_v52, 0.0 }
0x1042   : > { %v10272_v42 = vpack.c.bf16 %v10196_v22, %v10192_v30  ;;  %v10274_v38 = vpack.c.bf16 %v10198_v53, %v10194_v36 }
0x1043   : > { %v10273_v27 = vpack.c.bf16 %v10197_v48, %v10193_v43  ;;  %v10275_v44 = vpack.c.bf16 %v10199_v15, %v10195_v2  ;;  %v9874_v14 = vpop.f32.mrb[0].mxu1  ;;  %v10067_v3 = vpop.f32.mrb[252].mxu0 }
0x1044   : > { %v9875_v59 = vadd.f32 %v9874_v14, %v20215_v19  ;;  %v10068_v0 = vadd.f32 %v10067_v3, %v20217_v20  ;;  %v9876_v61 = vpop.f32.mrb[1].mxu1  ;;  %v10069_v9 = vpop.f32.mrb[253].mxu0 }
0x1045   : > { %v9877_v33 = vadd.f32 %v9876_v61, %v20219_v11  ;;  %v10070_v41 = vadd.f32 %v10069_v9, %v20221_v6  ;;  %v9878_v63 = vpop.f32.mrb[2].mxu1  ;;  %v10071_v47 = vpop.f32.mrb[254].mxu0  ;;  %10679 = vmatprep.mubr.bf16.mxu1 %v10273_v27  ;;  %10840 = vmatprep.mubr.bf16.mxu0 %v10275_v44 }
0x1046   : > { %v9879_v5 = vadd.f32 %v9878_v63, %v20215_v19  ;;  %v10072_v7 = vadd.f32 %v10071_v47, %v20217_v20  ;;  %v9880_v23 = vpop.f32.mrb[3].mxu1  ;;  %v10073_v49 = vpop.f32.mrb[255].mxu0  ;;  %10680 = vmatmul.mubr.bf16.gmra.mrb[60].mxu1 %v10272_v42  ;;  %10841 = vmatmul.mubr.bf16.gmra.mrb[56].mxu0 %v10274_v38  ;;  %v10200_v31 = vmax.f32 %v9875_v59, 0.0  ;;  %v10202_v25 = vmax.f32 %v10068_v0, 0.0 }
0x1047   : > { %v9881_v37 = vadd.f32 %v9880_v23, %v20219_v11  ;;  %v10074_v26 = vadd.f32 %v10073_v49, %v20221_v6  ;;  %v10201_v4 = vmax.f32 %v9877_v33, 0.0  ;;  %v10203_v10 = vmax.f32 %v10070_v41, 0.0 }
0x1048   : > { %v10204_v12 = vmax.f32 %v9879_v5, 0.0  ;;  %v10206_v28 = vmax.f32 %v10072_v7, 0.0 }
0x1049   : > { %v10205_v21 = vmax.f32 %v9881_v37, 0.0  ;;  %v10207_v51 = vmax.f32 %v10074_v26, 0.0 }
0x104a   : > { %v10276_v50 = vpack.c.bf16 %v10204_v12, %v10200_v31  ;;  %v10278_v24 = vpack.c.bf16 %v10206_v28, %v10202_v25 }
0x104b   : > { %v10277_v1 = vpack.c.bf16 %v10205_v21, %v10201_v4  ;;  %v10279_v52 = vpack.c.bf16 %v10207_v51, %v10203_v10  ;;  %v9884_v30 = vpop.f32.mrb[4].mxu1  ;;  %v10077_v36 = vpop.f32.mrb[0].mxu0 }
0x104c   : > { %v9885_v22 = vadd.f32 %v9884_v30, %v20215_v19  ;;  %v10078_v53 = vadd.f32 %v10077_v36, %v20217_v20  ;;  %v9886_v43 = vpop.f32.mrb[5].mxu1  ;;  %v10079_v2 = vpop.f32.mrb[1].mxu0 }
0x104d   : > { %v9887_v48 = vadd.f32 %v9886_v43, %v20219_v11  ;;  %v10080_v15 = vadd.f32 %v10079_v2, %v20221_v6  ;;  %v9888_v42 = vpop.f32.mrb[6].mxu1  ;;  %v10081_v38 = vpop.f32.mrb[2].mxu0  ;;  %10687 = vmatprep.mubr.bf16.mxu1 %v10277_v1  ;;  %10848 = vmatprep.mubr.bf16.mxu0 %v10279_v52 }
0x104e   : > { %v9889_v27 = vadd.f32 %v9888_v42, %v20215_v19  ;;  %v10082_v44 = vadd.f32 %v10081_v38, %v20217_v20  ;;  %v9890_v14 = vpop.f32.mrb[7].mxu1  ;;  %v10083_v3 = vpop.f32.mrb[3].mxu0  ;;  %10688 = vmatmul.mubr.bf16.gmra.mrb[64].mxu1 %v10276_v50  ;;  %10849 = vmatmul.mubr.bf16.gmra.mrb[60].mxu0 %v10278_v24  ;;  %v10208_v61 = vmax.f32 %v9885_v22, 0.0  ;;  %v10210_v9 = vmax.f32 %v10078_v53, 0.0 }
0x104f   : > { %v9891_v59 = vadd.f32 %v9890_v14, %v20219_v11  ;;  %v10084_v0 = vadd.f32 %v10083_v3, %v20221_v6  ;;  %v10209_v63 = vmax.f32 %v9887_v48, 0.0  ;;  %v10211_v47 = vmax.f32 %v10080_v15, 0.0 }
0x1050   : > { %v10212_v33 = vmax.f32 %v9889_v27, 0.0  ;;  %v10214_v41 = vmax.f32 %v10082_v44, 0.0 }
0x1051   : > { %v10213_v5 = vmax.f32 %v9891_v59, 0.0  ;;  %v10215_v7 = vmax.f32 %v10084_v0, 0.0 }
0x1052   : > { %v10280_v23 = vpack.c.bf16 %v10212_v33, %v10208_v61  ;;  %v10282_v49 = vpack.c.bf16 %v10214_v41, %v10210_v9 }
0x1053   : > { %v10281_v37 = vpack.c.bf16 %v10213_v5, %v10209_v63  ;;  %v10283_v26 = vpack.c.bf16 %v10215_v7, %v10211_v47  ;;  %v9894_v31 = vpop.f32.mrb[8].mxu1  ;;  %v10087_v25 = vpop.f32.mrb[4].mxu0 }
0x1054   : > { %v9895_v12 = vadd.f32 %v9894_v31, %v20215_v19  ;;  %v10088_v28 = vadd.f32 %v10087_v25, %v20217_v20  ;;  %v9896_v4 = vpop.f32.mrb[9].mxu1  ;;  %v10089_v10 = vpop.f32.mrb[5].mxu0 }
0x1055   : > { %v9897_v21 = vadd.f32 %v9896_v4, %v20219_v11  ;;  %v10090_v51 = vadd.f32 %v10089_v10, %v20221_v6  ;;  %v9898_v50 = vpop.f32.mrb[10].mxu1  ;;  %v10091_v24 = vpop.f32.mrb[6].mxu0  ;;  %10695 = vmatprep.mubr.bf16.mxu1 %v10281_v37  ;;  %10856 = vmatprep.mubr.bf16.mxu0 %v10283_v26 }
0x1056   : > { %v9899_v1 = vadd.f32 %v9898_v50, %v20215_v19  ;;  %v10092_v52 = vadd.f32 %v10091_v24, %v20217_v20  ;;  %v9900_v30 = vpop.f32.mrb[11].mxu1  ;;  %v10093_v36 = vpop.f32.mrb[7].mxu0  ;;  %10696 = vmatmul.mubr.bf16.gmra.mrb[68].mxu1 %v10280_v23  ;;  %10857 = vmatmul.mubr.bf16.gmra.mrb[64].mxu0 %v10282_v49  ;;  %v10216_v43 = vmax.f32 %v9895_v12, 0.0  ;;  %v10218_v2 = vmax.f32 %v10088_v28, 0.0 }
0x1057   : > { %v9901_v22 = vadd.f32 %v9900_v30, %v20219_v11  ;;  %v10094_v53 = vadd.f32 %v10093_v36, %v20221_v6  ;;  %v10217_v42 = vmax.f32 %v9897_v21, 0.0  ;;  %v10219_v38 = vmax.f32 %v10090_v51, 0.0  ;;  %v20354_v6 = vld [vmem:[%s21192_s3] ss:$0 sm:$0xff] }
0x1058   : > { %v10220_v48 = vmax.f32 %v9899_v1, 0.0  ;;  %v10222_v15 = vmax.f32 %v10092_v52, 0.0 }
0x1059   : > { %v10221_v27 = vmax.f32 %v9901_v22, 0.0  ;;  %v10223_v44 = vmax.f32 %v10094_v53, 0.0 }
0x105a   : > { %v10284_v14 = vpack.c.bf16 %v10220_v48, %v10216_v43  ;;  %v10286_v19 = vpack.c.bf16 %v10222_v15, %v10218_v2 }
0x105b   : > { %v10285_v3 = vpack.c.bf16 %v10221_v27, %v10217_v42  ;;  %v10287_v20 = vpack.c.bf16 %v10223_v44, %v10219_v38 }
0x105d   : > { %10703 = vmatprep.mubr.bf16.mxu1 %v10285_v3  ;;  %10864 = vmatprep.mubr.bf16.mxu0 %v10287_v20 }
0x105e   : > { %10704 = vmatmul.mubr.bf16.gmra.mrb[72].mxu1 %v10284_v14  ;;  %10865 = vmatmul.mubr.bf16.gmra.mrb[68].mxu0 %v10286_v19 }
0x1066   : > { %v12265_v59 = vpop.f32.mrb[12].mxu1  ;;  %v12377_v11 = vpop.f32.mrb[8].mxu0 }
0x1067   : > { %v12266_v0 = vpop.f32.mrb[13].mxu1  ;;  %v12378_v61 = vpop.f32.mrb[9].mxu0 }
0x1068   : > { %v12267_v9 = vadd.f32 %v12266_v0, %v12265_v59  ;;  %v12379_v33 = vadd.f32 %v12378_v61, %v12377_v11  ;;  %v12268_v41 = vpop.f32.mrb[14].mxu1  ;;  %v12380_v63 = vpop.f32.mrb[10].mxu0 }
0x1069   : > { %v12269_v47 = vpop.f32.mrb[15].mxu1  ;;  %v12381_v5 = vpop.f32.mrb[11].mxu0 }
0x106a   : > { %v10586_v7 = vadd.f32 %v12267_v9, %v20354_v6  ;;  %v12270_v23 = vadd.f32 %v12269_v47, %v12268_v41  ;;  %v12382_v49 = vadd.f32 %v12381_v5, %v12380_v63 }
0x106c   : > { %v10747_v37 = vadd.f32 %v12379_v33, %v10586_v7  ;;  %v10589_v26 = vadd.f32 %v12270_v23, %v20354_v6 }
0x106e   : > { %v10873_v31 = vadd.f32 %v10747_v37, %v19720_v40  ;;  %v10750_v25 = vadd.f32 %v12382_v49, %v10589_v26 }
0x1070   : > { %10905 = vst [vmem:[%s20361_s18] sm:$0xff] %v10873_v31  ;;  %v10874_v12 = vadd.f32 %v10750_v25, %v19725_v16 }
0x1072   : > { %10906 = vst [vmem:[%s20361_s18 + $0x8] sm:$0xff] %v10874_v12 }
0x1079   : > { %v12271_v28 = vpop.f32.mrb[16].mxu1  ;;  %v12383_v4 = vpop.f32.mrb[12].mxu0 }
0x107a   : > { %v12272_v10 = vpop.f32.mrb[17].mxu1  ;;  %v12384_v21 = vpop.f32.mrb[13].mxu0 }
0x107b   : > { %v12273_v51 = vadd.f32 %v12272_v10, %v12271_v28  ;;  %v12385_v50 = vadd.f32 %v12384_v21, %v12383_v4  ;;  %v12274_v24 = vpop.f32.mrb[18].mxu1  ;;  %v12386_v1 = vpop.f32.mrb[14].mxu0 }
0x107c   : > { %v12275_v40 = vpop.f32.mrb[19].mxu1  ;;  %v12387_v52 = vpop.f32.mrb[15].mxu0 }
0x107d   : > { %v10594_v30 = vadd.f32 %v12273_v51, %v20354_v6  ;;  %v12276_v36 = vadd.f32 %v12275_v40, %v12274_v24  ;;  %v12388_v22 = vadd.f32 %v12387_v52, %v12386_v1 }
0x107f   : > { %v10755_v53 = vadd.f32 %v12385_v50, %v10594_v30  ;;  %v10597_v16 = vadd.f32 %v12276_v36, %v20354_v6 }
0x1081   : > { %v10875_v43 = vadd.f32 %v10755_v53, %v19729_v34  ;;  %v10758_v2 = vadd.f32 %v12388_v22, %v10597_v16  ;;  %v12277_v48 = vpop.f32.mrb[20].mxu1  ;;  %v12389_v15 = vpop.f32.mrb[16].mxu0 }
0x1082   : > { %v12278_v42 = vpop.f32.mrb[21].mxu1  ;;  %v12390_v38 = vpop.f32.mrb[17].mxu0 }
0x1083   : > { %10907 = vst [vmem:[%s20361_s18 + $0x10] sm:$0xff] %v10875_v43  ;;  %v10876_v27 = vadd.f32 %v10758_v2, %v19733_v62  ;;  %v12279_v44 = vadd.f32 %v12278_v42, %v12277_v48  ;;  %v12391_v14 = vadd.f32 %v12390_v38, %v12389_v15  ;;  %v12280_v19 = vpop.f32.mrb[22].mxu1  ;;  %v12392_v3 = vpop.f32.mrb[18].mxu0 }
0x1084   : > { %v12281_v20 = vpop.f32.mrb[23].mxu1  ;;  %v12393_v59 = vpop.f32.mrb[19].mxu0 }
0x1085   : > { %10908 = vst [vmem:[%s20361_s18 + $0x18] sm:$0xff] %v10876_v27  ;;  %v10602_v11 = vadd.f32 %v12279_v44, %v20354_v6  ;;  %v12282_v0 = vadd.f32 %v12281_v20, %v12280_v19  ;;  %v12394_v34 = vadd.f32 %v12393_v59, %v12392_v3 }
0x1087   : > { %v10763_v61 = vadd.f32 %v12391_v14, %v10602_v11  ;;  %v10605_v9 = vadd.f32 %v12282_v0, %v20354_v6 }
0x1089   : > { %v10877_v33 = vadd.f32 %v10763_v61, %v19739_v46  ;;  %v10766_v41 = vadd.f32 %v12394_v34, %v10605_v9  ;;  %v12283_v62 = vpop.f32.mrb[24].mxu1  ;;  %v12395_v63 = vpop.f32.mrb[20].mxu0 }
0x108a   : > { %v12284_v47 = vpop.f32.mrb[25].mxu1  ;;  %v12396_v5 = vpop.f32.mrb[21].mxu0 }
0x108b   : > { %10909 = vst [vmem:[%s20361_s18 + $0x20] sm:$0xff] %v10877_v33  ;;  %v10878_v7 = vadd.f32 %v10766_v41, %v19745_v17  ;;  %v12285_v23 = vadd.f32 %v12284_v47, %v12283_v62  ;;  %v12397_v49 = vadd.f32 %v12396_v5, %v12395_v63  ;;  %v12286_v37 = vpop.f32.mrb[26].mxu1  ;;  %v12398_v26 = vpop.f32.mrb[22].mxu0 }
0x108c   : > { %v12287_v31 = vpop.f32.mrb[27].mxu1  ;;  %v12399_v25 = vpop.f32.mrb[23].mxu0 }
0x108d   : > { %10910 = vst [vmem:[%s20361_s18 + $0x28] sm:$0xff] %v10878_v7  ;;  %v10610_v12 = vadd.f32 %v12285_v23, %v20354_v6  ;;  %v12288_v28 = vadd.f32 %v12287_v31, %v12286_v37  ;;  %v12400_v46 = vadd.f32 %v12399_v25, %v12398_v26 }
0x108f   : > { %v10771_v4 = vadd.f32 %v12397_v49, %v10610_v12  ;;  %v10613_v10 = vadd.f32 %v12288_v28, %v20354_v6 }
0x1091   : > { %v10879_v21 = vadd.f32 %v10771_v4, %v19749_v60  ;;  %v10774_v51 = vadd.f32 %v12400_v46, %v10613_v10  ;;  %v12289_v17 = vpop.f32.mrb[28].mxu1  ;;  %v12401_v50 = vpop.f32.mrb[24].mxu0 }
0x1092   : > { %v12290_v24 = vpop.f32.mrb[29].mxu1  ;;  %v12402_v1 = vpop.f32.mrb[25].mxu0 }
0x1093   : > { %10911 = vst [vmem:[%s20361_s18 + $0x30] sm:$0xff] %v10879_v21  ;;  %v10880_v40 = vadd.f32 %v10774_v51, %v19753_v45  ;;  %v12291_v52 = vadd.f32 %v12290_v24, %v12289_v17  ;;  %v12403_v30 = vadd.f32 %v12402_v1, %v12401_v50  ;;  %v12292_v36 = vpop.f32.mrb[30].mxu1  ;;  %v12404_v22 = vpop.f32.mrb[26].mxu0 }
0x1094   : > { %v12293_v53 = vpop.f32.mrb[31].mxu1  ;;  %v12405_v16 = vpop.f32.mrb[27].mxu0 }
0x1095   : > { %10912 = vst [vmem:[%s20361_s18 + $0x38] sm:$0xff] %v10880_v40  ;;  %v10618_v43 = vadd.f32 %v12291_v52, %v20354_v6  ;;  %v12294_v2 = vadd.f32 %v12293_v53, %v12292_v36  ;;  %v12406_v60 = vadd.f32 %v12405_v16, %v12404_v22 }
0x1097   : > { %v10779_v48 = vadd.f32 %v12403_v30, %v10618_v43  ;;  %v10621_v15 = vadd.f32 %v12294_v2, %v20354_v6 }
0x1099   : > { %v10881_v42 = vadd.f32 %v10779_v48, %v19759_v56  ;;  %v10782_v38 = vadd.f32 %v12406_v60, %v10621_v15  ;;  %v12295_v45 = vpop.f32.mrb[32].mxu1  ;;  %v12407_v27 = vpop.f32.mrb[28].mxu0 }
0x109a   : > { %v12296_v44 = vpop.f32.mrb[33].mxu1  ;;  %v12408_v14 = vpop.f32.mrb[29].mxu0 }
0x109b   : > { %10913 = vst [vmem:[%s20361_s18 + $0x40] sm:$0xff] %v10881_v42  ;;  %v10882_v19 = vadd.f32 %v10782_v38, %v19765_v35  ;;  %v12297_v3 = vadd.f32 %v12296_v44, %v12295_v45  ;;  %v12409_v20 = vadd.f32 %v12408_v14, %v12407_v27  ;;  %v12298_v59 = vpop.f32.mrb[34].mxu1  ;;  %v12410_v11 = vpop.f32.mrb[30].mxu0 }
0x109c   : > { %v12299_v0 = vpop.f32.mrb[35].mxu1  ;;  %v12411_v34 = vpop.f32.mrb[31].mxu0 }
0x109d   : > { %10914 = vst [vmem:[%s20361_s18 + $0x48] sm:$0xff] %v10882_v19  ;;  %v10626_v61 = vadd.f32 %v12297_v3, %v20354_v6  ;;  %v12300_v9 = vadd.f32 %v12299_v0, %v12298_v59  ;;  %v12412_v56 = vadd.f32 %v12411_v34, %v12410_v11 }
0x109f   : > { %v10787_v33 = vadd.f32 %v12409_v20, %v10626_v61  ;;  %v10629_v41 = vadd.f32 %v12300_v9, %v20354_v6 }
0x10a1   : > { %v10883_v62 = vadd.f32 %v10787_v33, %v19769_v55  ;;  %v10790_v63 = vadd.f32 %v12412_v56, %v10629_v41  ;;  %v12301_v35 = vpop.f32.mrb[36].mxu1  ;;  %v12413_v47 = vpop.f32.mrb[32].mxu0  ;;  %v21194_v56 = vld [vmem:[#allocation119_spill] sm:$0xff] }
0x10a2   : > { %v12302_v5 = vpop.f32.mrb[37].mxu1  ;;  %v12414_v7 = vpop.f32.mrb[33].mxu0 }
0x10a3   : > { %10915 = vst [vmem:[%s20361_s18 + $0x50] sm:$0xff] %v10883_v62  ;;  %v10884_v23 = vadd.f32 %v10790_v63, %v19774_v13  ;;  %v12303_v49 = vadd.f32 %v12302_v5, %v12301_v35  ;;  %v12415_v37 = vadd.f32 %v12414_v7, %v12413_v47  ;;  %v12304_v26 = vpop.f32.mrb[38].mxu1  ;;  %v12416_v31 = vpop.f32.mrb[34].mxu0  ;;  %v21195_v5 = vld [vmem:[#allocation94_spill] sm:$0xff] }
0x10a4   : > { %v12305_v25 = vpop.f32.mrb[39].mxu1  ;;  %v12417_v12 = vpop.f32.mrb[35].mxu0 }
0x10a5   : > { %10916 = vst [vmem:[%s20361_s18 + $0x58] sm:$0xff] %v10884_v23  ;;  %v10634_v28 = vadd.f32 %v12303_v49, %v20354_v6  ;;  %v12306_v46 = vadd.f32 %v12305_v25, %v12304_v26  ;;  %v12418_v55 = vadd.f32 %v12417_v12, %v12416_v31 }
0x10a7   : > { %v10795_v4 = vadd.f32 %v12415_v37, %v10634_v28  ;;  %v10637_v10 = vadd.f32 %v12306_v46, %v20354_v6 }
0x10a9   : > { %v10885_v21 = vadd.f32 %v10795_v4, %v19785_v54  ;;  %v10798_v51 = vadd.f32 %v12418_v55, %v10637_v10  ;;  %v12307_v13 = vpop.f32.mrb[40].mxu1  ;;  %v12419_v17 = vpop.f32.mrb[36].mxu0  ;;  %v21196_v10 = vld [vmem:[#allocation121_spill] sm:$0xff] }
0x10aa   : > { %v12308_v50 = vpop.f32.mrb[41].mxu1  ;;  %v12420_v24 = vpop.f32.mrb[37].mxu0 }
0x10ab   : > { %10917 = vst [vmem:[%s20361_s18 + $0x60] sm:$0xff] %v10885_v21  ;;  %v10886_v1 = vadd.f32 %v10798_v51, %v19790_v32  ;;  %v12309_v40 = vadd.f32 %v12308_v50, %v12307_v13  ;;  %v12421_v52 = vadd.f32 %v12420_v24, %v12419_v17  ;;  %v12310_v30 = vpop.f32.mrb[42].mxu1  ;;  %v12422_v36 = vpop.f32.mrb[38].mxu0  ;;  %v21193_v32 = vld [vmem:[#allocation91_spill] sm:$0xff]  ;;  %v21197_v13 = vld [vmem:[#allocation110_spill] sm:$0xff] }
0x10ac   : > { %v12311_v22 = vpop.f32.mrb[43].mxu1  ;;  %v12423_v53 = vpop.f32.mrb[39].mxu0 }
0x10ad   : > { %10918 = vst [vmem:[%s20361_s18 + $0x68] sm:$0xff] %v10886_v1  ;;  %v10642_v16 = vadd.f32 %v12309_v40, %v20354_v6  ;;  %v12312_v54 = vadd.f32 %v12311_v22, %v12310_v30  ;;  %v12424_v43 = vadd.f32 %v12423_v53, %v12422_v36 }
0x10af   : > { %v10803_v2 = vadd.f32 %v12421_v52, %v10642_v16  ;;  %v10645_v60 = vadd.f32 %v12312_v54, %v20354_v6 }
0x10b1   : > { %v10887_v48 = vadd.f32 %v10803_v2, %v19794_v58  ;;  %v10806_v15 = vadd.f32 %v12424_v43, %v10645_v60 }
0x10b3   : > { %10919 = vst [vmem:[%s20361_s18 + $0x70] sm:$0xff] %v10887_v48  ;;  %v10888_v42 = vadd.f32 %v10806_v15, %v21193_v32  ;;  %v21198_v15 = vld [vmem:[#allocation123_spill] sm:$0xff] }
0x10b5   : > { %10920 = vst [vmem:[%s20361_s18 + $0x78] sm:$0xff] %v10888_v42 }
0x10cc   : > { %v12313_v38 = vpop.f32.mrb[44].mxu1  ;;  %v12425_v45 = vpop.f32.mrb[40].mxu0 }
0x10cd   : > { %v12314_v27 = vpop.f32.mrb[45].mxu1  ;;  %v12426_v44 = vpop.f32.mrb[41].mxu0 }
0x10ce   : > { %v12315_v14 = vadd.f32 %v12314_v27, %v12313_v38  ;;  %v12427_v19 = vadd.f32 %v12426_v44, %v12425_v45  ;;  %v12316_v3 = vpop.f32.mrb[46].mxu1  ;;  %v12428_v20 = vpop.f32.mrb[42].mxu0 }
0x10cf   : > { %v12317_v59 = vpop.f32.mrb[47].mxu1  ;;  %v12429_v11 = vpop.f32.mrb[43].mxu0 }
0x10d0   : > { %v10650_v0 = vadd.f32 %v12315_v14, %v20354_v6  ;;  %v12318_v34 = vadd.f32 %v12317_v59, %v12316_v3  ;;  %v12430_v58 = vadd.f32 %v12429_v11, %v12428_v20  ;;  %v21199_v14 = vld [vmem:[#allocation134_spill] sm:$0xff] }
0x10d2   : > { %v10811_v61 = vadd.f32 %v12427_v19, %v10650_v0  ;;  %v10653_v9 = vadd.f32 %v12318_v34, %v20354_v6 }
0x10d4   : > { %v10889_v33 = vadd.f32 %v10811_v61, %v21194_v56  ;;  %v10814_v41 = vadd.f32 %v12430_v58, %v10653_v9  ;;  %v12319_v62 = vpop.f32.mrb[48].mxu1  ;;  %v12431_v63 = vpop.f32.mrb[44].mxu0 }
0x10d5   : > { %v12320_v35 = vpop.f32.mrb[49].mxu1  ;;  %v12432_v47 = vpop.f32.mrb[45].mxu0 }
0x10d6   : > { %10921 = vst [vmem:[%s20361_s18 + $0x80] sm:$0xff] %v10889_v33  ;;  %v10890_v7 = vadd.f32 %v10814_v41, %v21195_v5  ;;  %v12321_v23 = vadd.f32 %v12320_v35, %v12319_v62  ;;  %v12433_v49 = vadd.f32 %v12432_v47, %v12431_v63  ;;  %v12322_v37 = vpop.f32.mrb[50].mxu1  ;;  %v12434_v26 = vpop.f32.mrb[46].mxu0  ;;  %v21200_v41 = vld [vmem:[#allocation125_spill] sm:$0xff] }
0x10d7   : > { %v12323_v31 = vpop.f32.mrb[51].mxu1  ;;  %v12435_v25 = vpop.f32.mrb[47].mxu0 }
0x10d8   : > { %10922 = vst [vmem:[%s20361_s18 + $0x88] sm:$0xff] %v10890_v7  ;;  %v10658_v12 = vadd.f32 %v12321_v23, %v20354_v6  ;;  %v12324_v28 = vadd.f32 %v12323_v31, %v12322_v37  ;;  %v12436_v46 = vadd.f32 %v12435_v25, %v12434_v26  ;;  %v21201_v23 = vld [vmem:[#allocation127_spill] sm:$0xff] }
0x10da   : > { %v10819_v55 = vadd.f32 %v12433_v49, %v10658_v12  ;;  %v10661_v4 = vadd.f32 %v12324_v28, %v20354_v6 }
0x10dc   : > { %v10891_v21 = vadd.f32 %v10819_v55, %v21196_v10  ;;  %v10822_v51 = vadd.f32 %v12436_v46, %v10661_v4 }
0x10de   : > { %10923 = vst [vmem:[%s20361_s18 + $0x90] sm:$0xff] %v10891_v21  ;;  %v10892_v17 = vadd.f32 %v10822_v51, %v21197_v13  ;;  %v21202_v51 = vld [vmem:[#allocation129_spill] sm:$0xff] }
0x10e0   : > { %10924 = vst [vmem:[%s20361_s18 + $0x98] sm:$0xff] %v10892_v17 }
0x1109   : > { %v12325_v50 = vpop.f32.mrb[52].mxu1  ;;  %v12437_v24 = vpop.f32.mrb[48].mxu0 }
0x110a   : > { %v12326_v1 = vpop.f32.mrb[53].mxu1  ;;  %v12438_v40 = vpop.f32.mrb[49].mxu0 }
0x110b   : > { %v12327_v52 = vadd.f32 %v12326_v1, %v12325_v50  ;;  %v12439_v30 = vadd.f32 %v12438_v40, %v12437_v24  ;;  %v12328_v36 = vpop.f32.mrb[54].mxu1  ;;  %v12440_v22 = vpop.f32.mrb[50].mxu0 }
0x110c   : > { %v12329_v53 = vpop.f32.mrb[55].mxu1  ;;  %v12441_v16 = vpop.f32.mrb[51].mxu0 }
0x110d   : > { %v10666_v54 = vadd.f32 %v12327_v52, %v20354_v6  ;;  %v12330_v43 = vadd.f32 %v12329_v53, %v12328_v36  ;;  %v12442_v2 = vadd.f32 %v12441_v16, %v12440_v22  ;;  %v21203_v52 = vld [vmem:[#allocation105_spill] sm:$0xff] }
0x110f   : > { %v10827_v60 = vadd.f32 %v12439_v30, %v10666_v54  ;;  %v10669_v48 = vadd.f32 %v12330_v43, %v20354_v6 }
0x1111   : > { %v10893_v32 = vadd.f32 %v10827_v60, %v21198_v15  ;;  %v10830_v42 = vadd.f32 %v12442_v2, %v10669_v48  ;;  %v12331_v38 = vpop.f32.mrb[56].mxu1  ;;  %v12443_v45 = vpop.f32.mrb[52].mxu0 }
0x1112   : > { %v12332_v27 = vpop.f32.mrb[57].mxu1  ;;  %v12444_v44 = vpop.f32.mrb[53].mxu0 }
0x1113   : > { %10925 = vst [vmem:[%s20361_s18 + $0xa0] sm:$0xff] %v10893_v32  ;;  %v10894_v19 = vadd.f32 %v10830_v42, %v21199_v14  ;;  %v12333_v3 = vadd.f32 %v12332_v27, %v12331_v38  ;;  %v12445_v20 = vadd.f32 %v12444_v44, %v12443_v45  ;;  %v12334_v59 = vpop.f32.mrb[58].mxu1  ;;  %v12446_v11 = vpop.f32.mrb[54].mxu0 }
0x1114   : > { %v12335_v0 = vpop.f32.mrb[59].mxu1  ;;  %v12447_v34 = vpop.f32.mrb[55].mxu0 }
0x1115   : > { %10926 = vst [vmem:[%s20361_s18 + $0xa8] sm:$0xff] %v10894_v19  ;;  %v10674_v58 = vadd.f32 %v12333_v3, %v20354_v6  ;;  %v12336_v61 = vadd.f32 %v12335_v0, %v12334_v59  ;;  %v12448_v9 = vadd.f32 %v12447_v34, %v12446_v11 }
0x1117   : > { %v10835_v56 = vadd.f32 %v12445_v20, %v10674_v58  ;;  %v10677_v33 = vadd.f32 %v12336_v61, %v20354_v6 }
0x1119   : > { %v10895_v62 = vadd.f32 %v10835_v56, %v21200_v41  ;;  %v10838_v63 = vadd.f32 %v12448_v9, %v10677_v33  ;;  %v12337_v35 = vpop.f32.mrb[60].mxu1  ;;  %v12449_v47 = vpop.f32.mrb[56].mxu0 }
0x111a   : > { %v12338_v5 = vpop.f32.mrb[61].mxu1  ;;  %v12450_v7 = vpop.f32.mrb[57].mxu0 }
0x111b   : > { %10927 = vst [vmem:[%s20361_s18 + $0xb0] sm:$0xff] %v10895_v62  ;;  %v10896_v49 = vadd.f32 %v10838_v63, %v21201_v23  ;;  %v12339_v37 = vadd.f32 %v12338_v5, %v12337_v35  ;;  %v12451_v26 = vadd.f32 %v12450_v7, %v12449_v47  ;;  %v12340_v31 = vpop.f32.mrb[62].mxu1  ;;  %v12452_v25 = vpop.f32.mrb[58].mxu0 }
0x111c   : > { %v12341_v12 = vpop.f32.mrb[63].mxu1  ;;  %v12453_v28 = vpop.f32.mrb[59].mxu0 }
0x111d   : > { %10928 = vst [vmem:[%s20361_s18 + $0xb8] sm:$0xff] %v10896_v49  ;;  %v10682_v46 = vadd.f32 %v12339_v37, %v20354_v6  ;;  %v12342_v55 = vadd.f32 %v12341_v12, %v12340_v31  ;;  %v12454_v4 = vadd.f32 %v12453_v28, %v12452_v25 }
0x111f   : > { %v10843_v10 = vadd.f32 %v12451_v26, %v10682_v46  ;;  %v10685_v21 = vadd.f32 %v12342_v55, %v20354_v6  ;;  %v21205_v55 = vld [vmem:[#allocation109_spill] sm:$0xff] }
0x1121   : > { %v10897_v13 = vadd.f32 %v10843_v10, %v21202_v51  ;;  %v10846_v17 = vadd.f32 %v12454_v4, %v10685_v21  ;;  %v12343_v50 = vpop.f32.mrb[64].mxu1  ;;  %v12455_v24 = vpop.f32.mrb[60].mxu0 }
0x1122   : > { %v12344_v1 = vpop.f32.mrb[65].mxu1  ;;  %v12456_v40 = vpop.f32.mrb[61].mxu0 }
0x1123   : > { %10929 = vst [vmem:[%s20361_s18 + $0xc0] sm:$0xff] %v10897_v13  ;;  %v10898_v30 = vadd.f32 %v10846_v17, %v21203_v52  ;;  %v12345_v36 = vadd.f32 %v12344_v1, %v12343_v50  ;;  %v12457_v22 = vadd.f32 %v12456_v40, %v12455_v24  ;;  %v12346_v53 = vpop.f32.mrb[66].mxu1  ;;  %v12458_v16 = vpop.f32.mrb[62].mxu0 }
0x1124   : > { %v12347_v54 = vpop.f32.mrb[67].mxu1  ;;  %v12459_v43 = vpop.f32.mrb[63].mxu0 }
0x1125   : > { %10930 = vst [vmem:[%s20361_s18 + $0xc8] sm:$0xff] %v10898_v30  ;;  %v10690_v2 = vadd.f32 %v12345_v36, %v20354_v6  ;;  %v12348_v60 = vadd.f32 %v12347_v54, %v12346_v53  ;;  %v12460_v48 = vadd.f32 %v12459_v43, %v12458_v16 }
0x1127   : > { %v10851_v15 = vadd.f32 %v12457_v22, %v10690_v2  ;;  %v10693_v32 = vadd.f32 %v12348_v60, %v20354_v6 }
0x1129   : > { %v10899_v42 = vadd.f32 %v10851_v15, %v19925_v18  ;;  %v10854_v38 = vadd.f32 %v12460_v48, %v10693_v32  ;;  %v12349_v45 = vpop.f32.mrb[68].mxu1  ;;  %v12461_v27 = vpop.f32.mrb[64].mxu0 }
0x112a   : > { %v12350_v44 = vpop.f32.mrb[69].mxu1  ;;  %v12462_v14 = vpop.f32.mrb[65].mxu0 }
0x112b   : > { %10931 = vst [vmem:[%s20361_s18 + $0xd0] sm:$0xff] %v10899_v42  ;;  %v10900_v19 = vadd.f32 %v10854_v38, %v19932_v29  ;;  %v12351_v3 = vadd.f32 %v12350_v44, %v12349_v45  ;;  %v12463_v20 = vadd.f32 %v12462_v14, %v12461_v27  ;;  %v12352_v59 = vpop.f32.mrb[70].mxu1  ;;  %v12464_v11 = vpop.f32.mrb[66].mxu0 }
0x112c   : > { %v12353_v0 = vpop.f32.mrb[71].mxu1  ;;  %v12465_v34 = vpop.f32.mrb[67].mxu0 }
0x112d   : > { %10932 = vst [vmem:[%s20361_s18 + $0xd8] sm:$0xff] %v10900_v19  ;;  %v10698_v58 = vadd.f32 %v12351_v3, %v20354_v6  ;;  %v12354_v61 = vadd.f32 %v12353_v0, %v12352_v59  ;;  %v12466_v18 = vadd.f32 %v12465_v34, %v12464_v11 }
0x112f   : > { %v10859_v9 = vadd.f32 %v12463_v20, %v10698_v58  ;;  %v10701_v56 = vadd.f32 %v12354_v61, %v20354_v6 }
0x1131   : > { %v10901_v33 = vadd.f32 %v10859_v9, %v19946_v57  ;;  %v10862_v41 = vadd.f32 %v12466_v18, %v10701_v56  ;;  %v12355_v29 = vpop.f32.mrb[72].mxu1  ;;  %v12467_v62 = vpop.f32.mrb[68].mxu0 }
0x1132   : > { %v12356_v63 = vpop.f32.mrb[73].mxu1  ;;  %v12468_v35 = vpop.f32.mrb[69].mxu0 }
0x1133   : > { %10933 = vst [vmem:[%s20361_s18 + $0xe0] sm:$0xff] %v10901_v33  ;;  %v10902_v47 = vadd.f32 %v10862_v41, %v19953_v39  ;;  %v12357_v5 = vadd.f32 %v12356_v63, %v12355_v29  ;;  %v12469_v7 = vadd.f32 %v12468_v35, %v12467_v62  ;;  %v12358_v23 = vpop.f32.mrb[74].mxu1  ;;  %v12470_v49 = vpop.f32.mrb[70].mxu0 }
0x1134   : > { %v12359_v37 = vpop.f32.mrb[75].mxu1  ;;  %v12471_v26 = vpop.f32.mrb[71].mxu0 }
0x1135   : > { %10934 = vst [vmem:[%s20361_s18 + $0xe8] sm:$0xff] %v10902_v47  ;;  %v10706_v57 = vadd.f32 %v12357_v5, %v20354_v6  ;;  %v12360_v31 = vadd.f32 %v12359_v37, %v12358_v23  ;;  %v12472_v25 = vadd.f32 %v12471_v26, %v12470_v49 }
0x1137   : > { %v10867_v12 = vadd.f32 %v12469_v7, %v10706_v57  ;;  %v10709_v28 = vadd.f32 %v12360_v31, %v20354_v6 }
0x1139   : > { %v10903_v39 = vadd.f32 %v10867_v12, %v19968_v8  ;;  %v10870_v46 = vadd.f32 %v12472_v25, %v10709_v28 }
0x113b   : > { %10935 = vst [vmem:[%s20361_s18 + $0xf0] sm:$0xff] %v10903_v39  ;;  %v10904_v4 = vadd.f32 %v10870_v46, %v21205_v55 }
0x113d   : > { %10936 = vst [vmem:[%s20361_s18 + $0xf8] sm:$0xff] %v10904_v4 }
0x113e   : > { %15830 = shalt.err (!%p15827_p13)
}
0x113f   : > { %s15831_s16 = scalar_lea.hbm %s20458_s9, 4096  ;;  %s15835_s18 = scalar_lea.hbm %s21204_s14, 8192 }
0x1140   : > { %p15832_p9 = scmp.ne.s32.totalorder %s20458_s9, %s15831_s16  ;;  %p15836_p4 = scmp.lt.u32.totalorder %s20458_s9, %s21204_s14 }
0x1141   : > { %p15837_p8 = scmp.lt.u32.totalorder %s15835_s18, %s15831_s16  ;;  %p15839_p3 = scmp.lt.u32.totalorder %s15831_s16, %s20458_s9 }
0x1142   : > { %p15833_p0 = pnand %p15832_p9, %p16135_p10 }
0x1143   : > { %p15838_p6 = por %p15837_p8, %p15836_p4 }
0x1144   : > { %p15834_p11 = pneg %p15833_p0 }
0x1145   : > { %p15840_p5 = por %p15839_p3, %p15838_p6 }
0x1147   : > { %p15841_p7 = pnand %p15840_p5, %p15834_p11 }
0x1149   : > { %15844 = shalt.err (!%p15841_p7)
}
0x114a   : > { %s15912_s12 = smov 128   ;;  %s15913_s25 = smov 8  }
0x114b   : > { %14319 = dma.vmem_to_hbm [thread:$0]  (%p16135_p10), %s20460_s13, 4096, %s20458_s9, %s10938_s26, %s15912_s12, %s15912_s12, %s15913_s25  }
0x114c PF: > { %s21206_s27 = sld [smem:[#allocation16_spill]]  ;;  %s21207_s29 = sld [smem:[#allocation17_spill]] }
0x114d   : > { %p21209_p2 = scmp.ge.s32.totalorder %s15891_s24, 2 }
0x1152   : > { %s10967_s17 = sand.u32 1, %s21206_s27   ;;  %p21208_p12 = scmp.ne.s32.totalorder %s21207_s29, 0 }
0x1153   : > { %s10968_s16 = scalar_lea.sflag [#allocation4], %s10967_s17 }
0x1154   : > { %p14339_p1 = pnand %p21209_p2, %p21208_p12 }
0x1156   : > { %15874 = dma.done.wait (!%p14339_p1), %s10968_s16, 4096  }
0x1157   : > { %15876 = vsyncadd (!%p14339_p1), %s10968_s16, 4294963200  ;;  %p27_p13 = scmp.ge.s32.totalorder %s16125_s30, 4   ;;  %s21210_s21 = smov %s15883_s22 }
0x1158   : > { %s21211_s22 = smov %s15887_s23  ;;  %s21212_s23 = smov %s16141_s20 }
0x1159   : > { %s21213_s24 = smov %s16125_s30  ;;  %29 = sbr.rel (!%p27_p13) target bundleno = 12 (0xc), region = 132 }
0x1160   :  { %10973 = vsyncpa [#allocation3], 1 }
0x1161   :  { %10975 = vsyncpa [#allocation3 + $0x1], 1 }
0x1162   :  { %10976 = vsyncpa [#allocation6], 1 }
0x1163   :  { %10977 = vsyncpa [#allocation9], 1 }
0x1164   :  { %10978 = vsyncpa [#allocation4], 1 }
0x1165   :  { %10980 = vsyncpa [#allocation4 + $0x1], 1 }

</bundles_post_ra>
